<compile_context>
chip_gen: v6e
topology: v6e:2x2x1
jax: 0.10.0
libtpu: 0.0.40
codegen_flags: <defaults>
</compile_context>

<pallas_src>
import numpy as np
import jax
import jax.numpy as jnp
from jax import lax
from jax.experimental import pallas as pl
from jax.experimental.pallas import tpu as pltpu

# --- module hyper-parameters (in_channels reduced 256 -> 16 for a small run) ---
SIZE_OF_CAPSULE = 8
IN_CHANNELS = 16
OUT_CHANNELS = 32
KERNEL_SIZE = 9
STRIDE = 2
H = W = 20                                     # (20 - 9)//2 + 1 = 6 -> 6x6 output
HO = WO = (H - KERNEL_SIZE) // STRIDE + 1      # 6
S_OUT = HO * WO                                # 36 spatial positions
NUM_CAPSULES = OUT_CHANNELS * HO * WO          # 1152 (hardcoded in the torch module)
MERGED_C = SIZE_OF_CAPSULE * OUT_CHANNELS      # 256 merged conv output channels
FLAT = MERGED_C * S_OUT                        # 9216 torch-flat elements per batch elem
LANES = 1024                                   # kernel lane width (multiple of 128 and 8)
ROWS_PER_B = FLAT // LANES                     # 9 kernel rows per batch element


# Constant group-sum operator: G[i, j] = 1 iff lanes i and j belong to the same capsule
# (8 consecutive torch-flat indices).  Exact 0/1 values -> lossless in bf16.
_GROUP_SUM_OP = np.kron(np.eye(LANES // SIZE_OF_CAPSULE, dtype=np.float32),
                        np.ones((SIZE_OF_CAPSULE, SIZE_OF_CAPSULE), dtype=np.float32))


# --------------------------------- kernel ------------------------------------
def _bias_squash_kernel(u_ref, bias_ref, g_ref, o_ref):
    # u_ref   : (tb*9, 1024) f32  merged-conv output (pre-bias), torch-flat order
    # bias_ref: (tb*9, 1024) f32  per-channel bias, pre-tiled to the block layout
    # g_ref   : (1024, 1024) bf16 capsule group-sum operator (grid-invariant)
    # o_ref   : (tb*9, 1024) f32  squashed output, same layout
    acc = u_ref[...] + bias_ref[...]
    v = acc * acc
    # broadcast squared norm of each capsule (8 consecutive lanes): one bf16 MXU matmul,
    # f32 accumulation; cost linear in the batch tile.
    sq = jnp.dot(v.astype(jnp.bfloat16), g_ref[...],
                 preferred_element_type=jnp.float32)
    # squash scale: sq / ((1+sq)*sqrt(sq)) == sqrt(sq)/(1+sq); NaN at sq==0 matches torch.
    scale = sq * lax.rsqrt(sq) * pl.reciprocal(1.0 + sq, approx=True)
    o_ref[...] = (acc * scale).astype(o_ref.dtype)


# ------------------------------ forward wrapper -------------------------------
def _pick_tb(B):
    """Batch elements per grid step.  tb*9 rows must be divisible by 8 (Mosaic (8,128)
    rule) unless the block covers the full array, and we want >= 2 grid steps so both
    v7x TensorCores get work."""
    for tb in (64, 56, 48, 40, 32, 24, 16, 8):
        if B % tb == 0 and B // tb >= 2:
            return tb
    return B   # single full-extent block: always a legal BlockSpec, works for any B


def primary_caps_forward(x, w_all, b_all):
    """x: (B, C, 20, 20) f32, w_all: (8, 32, C, 9, 9) f32, b_all: (8, 32) f32
       -> (B, 1152, 8) f32, identical to the PyTorch module (bf16-matmul tolerance)."""
    B = x.shape[0]
    tb = _pick_tb(B)

    # All 8 capsule convs as ONE merged XLA conv (bf16 MXU, f32 accumulation).
    # Merged output channel m = capsule*32 + out_channel, so NCHW row-major flattening of
    # (256, 6, 6) is exactly torch's flat order f = m*36 + h*6 + w.
    w_merged = w_all.reshape(MERGED_C, IN_CHANNELS, KERNEL_SIZE, KERNEL_SIZE)
    u = lax.conv_general_dilated(
        x.astype(jnp.bfloat16), w_merged.astype(jnp.bfloat16),
        window_strides=(STRIDE, STRIDE), padding="VALID",
        dimension_numbers=("NCHW", "OIHW", "NCHW"),
        preferred_element_type=jnp.float32)                      # (B, 256, 6, 6) f32
    u2d = u.reshape(B * ROWS_PER_B, LANES)                       # pure reshape, no copy

    # Bias in torch-flat order, tiled to one batch-tile block (grid-invariant input).
    bias_flat = jnp.repeat(b_all.reshape(-1).astype(jnp.float32), S_OUT)      # (9216,)
    bias_blk = jnp.tile(bias_flat.reshape(ROWS_PER_B, LANES), (tb, 1))        # (tb*9, 1024)

    g = jnp.asarray(_GROUP_SUM_OP, dtype=jnp.bfloat16)                        # (1024, 1024)

    out2d = pl.pallas_call(
        _bias_squash_kernel,
        out_shape=jax.ShapeDtypeStruct((B * ROWS_PER_B, LANES), jnp.float32),
        grid_spec=pltpu.PrefetchScalarGridSpec(
            num_scalar_prefetch=0,
            grid=(B // tb,),
            in_specs=[
                pl.BlockSpec((tb * ROWS_PER_B, LANES), lambda i: (i, 0)),   # u tile
                pl.BlockSpec((tb * ROWS_PER_B, LANES), lambda i: (0, 0)),   # bias (const)
                pl.BlockSpec((LANES, LANES), lambda i: (0, 0)),             # G (const)
            ],
            out_specs=pl.BlockSpec((tb * ROWS_PER_B, LANES), lambda i: (i, 0)),
        ),
        compiler_params=pltpu.CompilerParams(
            dimension_semantics=("parallel",),
            vmem_limit_bytes=32 * 1024 * 1024),
    )(u2d, bias_blk, g)

    # torch-flat -> (B, 1152, 8): pure contiguous reshape, no transpose needed.
    return out2d.reshape(B, NUM_CAPSULES, SIZE_OF_CAPSULE)


# --------------------------- pure-JAX reference ------------------------------
def primary_caps_reference(x, w_all, b_all):
    B = x.shape[0]
    outs = []
    for i in range(SIZE_OF_CAPSULE):
        o = lax.conv_general_dilated(
            x, w_all[i], window_strides=(STRIDE, STRIDE), padding="VALID",
            dimension_numbers=("NCHW", "OIHW", "NCHW"),
            precision=lax.Precision.HIGHEST)
        outs.append(o + b_all[i][None, :, None, None])
    u = jnp.stack(outs, axis=1)                                  # (B, 8, 32, 6, 6)
    u = u.reshape(B, NUM_CAPSULES, SIZE_OF_CAPSULE)
    sq = jnp.sum(u ** 2, axis=-1, keepdims=True)
    return sq * u / ((1.0 + sq) * jnp.sqrt(sq))


if __name__ == "__main__":
    key = jax.random.PRNGKey(0)
    kx, kw, kb = jax.random.split(key, 3)
    B = 32   # -> tb = 16 (144-row blocks), 2 parallel grid steps

    x = jax.random.normal(kx, (B, IN_CHANNELS, H, W), dtype=jnp.float32)
    fan_in = IN_CHANNELS * KERNEL_SIZE * KERNEL_SIZE
    bound = 1.0 / (fan_in ** 0.5)   # PyTorch Conv2d default-style uniform init
    w_all = jax.random.uniform(
        kw, (SIZE_OF_CAPSULE, OUT_CHANNELS, IN_CHANNELS, KERNEL_SIZE, KERNEL_SIZE),
        minval=-bound, maxval=bound, dtype=jnp.float32)
    b_all = jax.random.uniform(
        kb, (SIZE_OF_CAPSULE, OUT_CHANNELS),
        minval=-bound, maxval=bound, dtype=jnp.float32)

    out = jax.jit(primary_caps_forward)(x, w_all, b_all)
    out = jax.block_until_ready(out)
    assert out.shape == (B, NUM_CAPSULES, SIZE_OF_CAPSULE), out.shape

    ref = primary_caps_reference(x, w_all, b_all)
    err = float(jnp.max(jnp.abs(out - ref)))
    assert err < 2e-2, f"max abs err {err}"

    print("KERNEL_OK")
</pallas_src>

<mosaic_0001>
module attributes {stable_mosaic.version = 11 : i64} {
  func.func @_bias_squash_kernel(%arg0: i32, %arg1: memref<144x1024xf32, #tpu.memory_space<vmem>>, %arg2: memref<144x1024xf32, #tpu.memory_space<vmem>>, %arg3: memref<1024x1024xbf16, #tpu.memory_space<vmem>>, %arg4: memref<144x1024xf32, #tpu.memory_space<vmem>>) attributes {dimension_semantics = [#tpu.dimension_semantics<parallel>], iteration_bounds = array<i64: 2>, scalar_prefetch = 0 : i64, scratch_operands = 0 : i64, tpu.core_type = #tpu.core_type<tc>, window_params = [{transform_indices = @transform_0, window_bounds = array<i64: 144, 1024>}, {pipeline_mode = #tpu.pipeline_mode<synchronous>, transform_indices = @transform_1, window_bounds = array<i64: 144, 1024>}, {pipeline_mode = #tpu.pipeline_mode<synchronous>, transform_indices = @transform_2, window_bounds = array<i64: 1024, 1024>}, {transform_indices = @transform_3, window_bounds = array<i64: 144, 1024>}]} {
    %c0 = arith.constant 0 : index
    %c0_0 = arith.constant 0 : index
    %0 = vector.load %arg1[%c0, %c0_0] : memref<144x1024xf32, #tpu.memory_space<vmem>>, vector<144x1024xf32>
    %c0_1 = arith.constant 0 : index
    %c0_2 = arith.constant 0 : index
    %1 = vector.load %arg2[%c0_1, %c0_2] : memref<144x1024xf32, #tpu.memory_space<vmem>>, vector<144x1024xf32>
    %2 = arith.addf %0, %1 : vector<144x1024xf32>
    %3 = arith.mulf %2, %2 : vector<144x1024xf32>
    %4 = arith.truncf %3 : vector<144x1024xf32> to vector<144x1024xbf16>
    %c0_3 = arith.constant 0 : index
    %c0_4 = arith.constant 0 : index
    %5 = vector.load %arg3[%c0_3, %c0_4] : memref<1024x1024xbf16, #tpu.memory_space<vmem>>, vector<1024x1024xbf16>
    %cst = arith.constant dense<0.000000e+00> : vector<144x1024xf32>
    %6 = tpu.matmul %4, %5, %cst {dimension_numbers = #tpu.dot_dimension_numbers<[1], [0], [0], [1], [0, 0, 1, 1], [], []>} : vector<144x1024xbf16>, vector<1024x1024xbf16>, vector<144x1024xf32> -> vector<144x1024xf32>
    %7 = math.rsqrt %6 : vector<144x1024xf32>
    %8 = arith.mulf %6, %7 : vector<144x1024xf32>
    %cst_5 = arith.constant 1.000000e+00 : f32
    %9 = vector.broadcast %cst_5 : f32 to vector<144x1024xf32>
    %10 = arith.addf %9, %6 : vector<144x1024xf32>
    %11 = tpu.reciprocal %10 {approx = true} : vector<144x1024xf32> -> vector<144x1024xf32>
    %12 = arith.mulf %8, %11 : vector<144x1024xf32>
    %13 = arith.mulf %2, %12 : vector<144x1024xf32>
    %c0_6 = arith.constant 0 : index
    %c0_7 = arith.constant 0 : index
    %14 = vector.load %arg4[%c0_6, %c0_7] : memref<144x1024xf32, #tpu.memory_space<vmem>>, vector<144x1024xf32>
    tpu.vector_store %arg4[%c0_6, %c0_7], %13 {strides = array<i32>} : memref<144x1024xf32, #tpu.memory_space<vmem>>, vector<144x1024xf32>,
    return
  }
  func.func @transform_0(%arg0: i32) -> (i32, i32) {
    %c0_i32 = arith.constant 0 : i32
    %c0_i32_0 = arith.constant 0 : i32
    return %arg0, %c0_i32 : i32, i32
  }
  func.func @transform_1(%arg0: i32) -> (i32, i32) {
    %c0_i32 = arith.constant 0 : i32
    %c0_i32_0 = arith.constant 0 : i32
    %c0_i32_1 = arith.constant 0 : i32
    return %c0_i32, %c0_i32_0 : i32, i32
  }
  func.func @transform_2(%arg0: i32) -> (i32, i32) {
    %c0_i32 = arith.constant 0 : i32
    %c0_i32_0 = arith.constant 0 : i32
    %c0_i32_1 = arith.constant 0 : i32
    return %c0_i32, %c0_i32_0 : i32, i32
  }
  func.func @transform_3(%arg0: i32) -> (i32, i32) {
    %c0_i32 = arith.constant 0 : i32
    %c0_i32_0 = arith.constant 0 : i32
    return %arg0, %c0_i32 : i32, i32
  }
}

</mosaic_0001>

<bundles_post_ra>
// kernel: tile.7
= control target key start
LH: loop header
LB: loop body
LE: loop exit
PB: predicated region body
PF: predicated region fallthrough
CT: control target
= control target key end

     0   :  { %vm36_vm0 = vcmask 1047556   ;;  %s2648_s0 = inlined_call_operand.vmem [shape: f32[16,9,1024], index: 0, kind: input, shape index: {}]   ;;  %s2649_s1 = inlined_call_operand.vmem [shape: f32[144,1024], index: 1, kind: output, shape index: {}]  }
   0x1   :  { %v2_v0 = vld [vmem:[%s2648_s0] sm:$0xff]   ;;  %v896_v1 = vld [vmem:[%s2648_s0 + $0x8] sm:$0xff]   ;;  %v898_v2 = vld [vmem:[%s2648_s0 + $0x10] sm:$0xff]  }
   0x2   :  { %3 = vst [vmem:[%s2649_s1] sm:$0xff] %v2_v0   ;;  %897 = vst [vmem:[%s2649_s1 + $0x8] sm:$0xff] %v896_v1   ;;  %v900_v3 = vld [vmem:[%s2648_s0 + $0x18] sm:$0xff]   ;;  %v902_v4 = vld [vmem:[%s2648_s0 + $0x20] sm:$0xff]  }
   0x3   :  { %899 = vst [vmem:[%s2649_s1 + $0x10] sm:$0xff] %v898_v2   ;;  %v904_v5 = vld [vmem:[%s2648_s0 + $0x28] sm:$0xff]   ;;  %901 = vst [vmem:[%s2649_s1 + $0x18] sm:$0xff] %v900_v3   ;;  %v906_v6 = vld [vmem:[%s2648_s0 + $0x30] sm:$0xff]  }
   0x4   :  { %903 = vst [vmem:[%s2649_s1 + $0x20] sm:$0xff] %v902_v4   ;;  %905 = vst [vmem:[%s2649_s1 + $0x28] sm:$0xff] %v904_v5   ;;  %v908_v7 = vld [vmem:[%s2648_s0 + $0x38] sm:$0xff]   ;;  %v914_v10 = vld [vmem:[%s2648_s0 + $0x80] sm:$0xff]  }
   0x5   :  { %v910_v8 = vld [vmem:[%s2648_s0 + $0x40] ss:$8 sm:$0xf]   ;;  %907 = vst [vmem:[%s2649_s1 + $0x30] sm:$0xff] %v906_v6   ;;  %909 = vst [vmem:[%s2649_s1 + $0x38] sm:$0xff] %v908_v7  }
   0x6   :  { %v911_v9 = vld [vmem:[%s2648_s0 + $0x40] ss:$8 sm:$0xf0]   ;;  %915 = vst [vmem:[%s2649_s1 + $0x41] sm:$0x7f] %v914_v10  }
   0x7   :  { %v917_v11 = vld [vmem:[%s2648_s0 + $0x88] sm:$0xff]   ;;  %v37_v12 = vsel %vm36_vm0, %v911_v9, %v910_v8  ;;  %916 = vst [vmem:[%s2649_s1 + $0x79] sm:$0x80] %v914_v10   ;;  %v920_v13 = vld [vmem:[%s2648_s0 + $0x90] sm:$0xff]   ;;  %v923_v14 = vld [vmem:[%s2648_s0 + $0x98] sm:$0xff]  }
   0x8   :  { %918 = vst [vmem:[%s2649_s1 + $0x49] sm:$0x7f] %v917_v11   ;;  %919 = vst [vmem:[%s2649_s1 + $0x81] sm:$0x80] %v917_v11   ;;  %v926_v15 = vld [vmem:[%s2648_s0 + $0xa0] sm:$0xff]   ;;  %v929_v16 = vld [vmem:[%s2648_s0 + $0xa8] sm:$0xff]  }
   0x9   :  { %912 = vst [vmem:[%s2649_s1 + $0x40] ss:$8 sm:$0xf] %v37_v12   ;;  %913 = vst [vmem:[%s2649_s1 + $0x40] ss:$8 sm:$0xf0] %v37_v12  }
   0xa   :  { %921 = vst [vmem:[%s2649_s1 + $0x51] sm:$0x7f] %v920_v13   ;;  %922 = vst [vmem:[%s2649_s1 + $0x89] sm:$0x80] %v920_v13   ;;  %v932_v17 = vld [vmem:[%s2648_s0 + $0xb0] sm:$0xff]   ;;  %v935_v18 = vld [vmem:[%s2648_s0 + $0xb8] sm:$0xff]  }
   0xb   :  { %924 = vst [vmem:[%s2649_s1 + $0x59] sm:$0x7f] %v923_v14   ;;  %925 = vst [vmem:[%s2649_s1 + $0x91] sm:$0x80] %v923_v14   ;;  %v942_v22 = vld [vmem:[%s2648_s0 + $0x100] sm:$0xff]   ;;  %v945_v23 = vld [vmem:[%s2648_s0 + $0x108] sm:$0xff]  }
   0xc   :  { %927 = vst [vmem:[%s2649_s1 + $0x61] sm:$0x7f] %v926_v15   ;;  %928 = vst [vmem:[%s2649_s1 + $0x99] sm:$0x80] %v926_v15   ;;  %v948_v24 = vld [vmem:[%s2648_s0 + $0x110] sm:$0xff]   ;;  %v951_v25 = vld [vmem:[%s2648_s0 + $0x118] sm:$0xff]  }
   0xd   :  { %930 = vst [vmem:[%s2649_s1 + $0x69] sm:$0x7f] %v929_v16   ;;  %931 = vst [vmem:[%s2649_s1 + $0xa1] sm:$0x80] %v929_v16   ;;  %v954_v26 = vld [vmem:[%s2648_s0 + $0x120] sm:$0xff]   ;;  %v957_v27 = vld [vmem:[%s2648_s0 + $0x128] sm:$0xff]  }
   0xe   :  { %933 = vst [vmem:[%s2649_s1 + $0x71] sm:$0x7f] %v932_v17   ;;  %934 = vst [vmem:[%s2649_s1 + $0xa9] sm:$0x80] %v932_v17   ;;  %v960_v28 = vld [vmem:[%s2648_s0 + $0x130] sm:$0xff]   ;;  %v963_v29 = vld [vmem:[%s2648_s0 + $0x138] sm:$0xff]  }
   0xf   :  { %936 = vst [vmem:[%s2649_s1 + $0x79] sm:$0x7f] %v935_v18   ;;  %937 = vst [vmem:[%s2649_s1 + $0xb1] sm:$0x80] %v935_v18   ;;  %v970_v32 = vld [vmem:[%s2648_s0 + $0x180] sm:$0xff]   ;;  %v973_v33 = vld [vmem:[%s2648_s0 + $0x188] sm:$0xff]  }
  0x10   :  { %v938_v19 = vld [vmem:[%s2648_s0 + $0xc0] ss:$8 sm:$0xf]   ;;  %943 = vst [vmem:[%s2649_s1 + $0x82] sm:$0x3f] %v942_v22  }
  0x11   :  { %v939_v20 = vld [vmem:[%s2648_s0 + $0xc0] ss:$8 sm:$0xf0]   ;;  %944 = vst [vmem:[%s2649_s1 + $0xba] sm:$0xc0] %v942_v22  }
  0x12   :  { %v95_v21 = vsel %vm36_vm0, %v939_v20, %v938_v19  ;;  %946 = vst [vmem:[%s2649_s1 + $0x8a] sm:$0x3f] %v945_v23   ;;  %947 = vst [vmem:[%s2649_s1 + $0xc2] sm:$0xc0] %v945_v23   ;;  %v976_v35 = vld [vmem:[%s2648_s0 + $0x190] sm:$0xff]   ;;  %v979_v36 = vld [vmem:[%s2648_s0 + $0x198] sm:$0xff]  }
  0x13   :  { %940 = vst [vmem:[%s2649_s1 + $0x81] ss:$8 sm:$0xf] %v95_v21   ;;  %941 = vst [vmem:[%s2649_s1 + $0x81] ss:$8 sm:$0xf0] %v95_v21  }
  0x14   :  { %949 = vst [vmem:[%s2649_s1 + $0x92] sm:$0x3f] %v948_v24   ;;  %950 = vst [vmem:[%s2649_s1 + $0xca] sm:$0xc0] %v948_v24   ;;  %v982_v37 = vld [vmem:[%s2648_s0 + $0x1a0] sm:$0xff]   ;;  %v985_v38 = vld [vmem:[%s2648_s0 + $0x1a8] sm:$0xff]  }
  0x15   :  { %952 = vst [vmem:[%s2649_s1 + $0x9a] sm:$0x3f] %v951_v25   ;;  %953 = vst [vmem:[%s2649_s1 + $0xd2] sm:$0xc0] %v951_v25   ;;  %v988_v39 = vld [vmem:[%s2648_s0 + $0x1b0] sm:$0xff]   ;;  %v991_v40 = vld [vmem:[%s2648_s0 + $0x1b8] sm:$0xff]  }
  0x16   :  { %955 = vst [vmem:[%s2649_s1 + $0xa2] sm:$0x3f] %v954_v26   ;;  %956 = vst [vmem:[%s2649_s1 + $0xda] sm:$0xc0] %v954_v26   ;;  %v998_v44 = vld [vmem:[%s2648_s0 + $0x200] sm:$0xff]   ;;  %v1001_v45 = vld [vmem:[%s2648_s0 + $0x208] sm:$0xff]  }
  0x17   :  { %958 = vst [vmem:[%s2649_s1 + $0xaa] sm:$0x3f] %v957_v27   ;;  %959 = vst [vmem:[%s2649_s1 + $0xe2] sm:$0xc0] %v957_v27   ;;  %v1004_v46 = vld [vmem:[%s2648_s0 + $0x210] sm:$0xff]   ;;  %v1007_v47 = vld [vmem:[%s2648_s0 + $0x218] sm:$0xff]  }
  0x18   :  { %v966_v30 = vld [vmem:[%s2648_s0 + $0x140] ss:$8 sm:$0xf]   ;;  %961 = vst [vmem:[%s2649_s1 + $0xb2] sm:$0x3f] %v960_v28  }
  0x19   :  { %962 = vst [vmem:[%s2649_s1 + $0xea] sm:$0xc0] %v960_v28   ;;  %964 = vst [vmem:[%s2649_s1 + $0xba] sm:$0x3f] %v963_v29   ;;  %v1010_v48 = vld [vmem:[%s2648_s0 + $0x220] sm:$0xff]   ;;  %v1013_v49 = vld [vmem:[%s2648_s0 + $0x228] sm:$0xff]  }
  0x1a   :  { %965 = vst [vmem:[%s2649_s1 + $0xf2] sm:$0xc0] %v963_v29   ;;  %v967_v31 = vld [vmem:[%s2648_s0 + $0x140] ss:$8 sm:$0xf0]  }
  0x1b   :  { %v153_v34 = vsel %vm36_vm0, %v967_v31, %v966_v30  ;;  %971 = vst [vmem:[%s2649_s1 + $0xc3] sm:$0x1f] %v970_v32   ;;  %972 = vst [vmem:[%s2649_s1 + $0xfb] sm:$0xe0] %v970_v32   ;;  %v1016_v50 = vld [vmem:[%s2648_s0 + $0x230] sm:$0xff]   ;;  %v1019_v51 = vld [vmem:[%s2648_s0 + $0x238] sm:$0xff]  }
  0x1c   :  { %974 = vst [vmem:[%s2649_s1 + $0xcb] sm:$0x1f] %v973_v33   ;;  %975 = vst [vmem:[%s2649_s1 + $0x103] sm:$0xe0] %v973_v33   ;;  %v1026_v54 = vld [vmem:[%s2648_s0 + $0x280] sm:$0xff]   ;;  %v1029_v55 = vld [vmem:[%s2648_s0 + $0x288] sm:$0xff]  }
  0x1d   :  { %968 = vst [vmem:[%s2649_s1 + $0xc2] ss:$8 sm:$0xf] %v153_v34   ;;  %969 = vst [vmem:[%s2649_s1 + $0xc2] ss:$8 sm:$0xf0] %v153_v34  }
  0x1e   :  { %977 = vst [vmem:[%s2649_s1 + $0xd3] sm:$0x1f] %v976_v35   ;;  %978 = vst [vmem:[%s2649_s1 + $0x10b] sm:$0xe0] %v976_v35   ;;  %v1032_v57 = vld [vmem:[%s2648_s0 + $0x290] sm:$0xff]   ;;  %v1035_v58 = vld [vmem:[%s2648_s0 + $0x298] sm:$0xff]  }
  0x1f   :  { %980 = vst [vmem:[%s2649_s1 + $0xdb] sm:$0x1f] %v979_v36   ;;  %981 = vst [vmem:[%s2649_s1 + $0x113] sm:$0xe0] %v979_v36   ;;  %v1038_v59 = vld [vmem:[%s2648_s0 + $0x2a0] sm:$0xff]   ;;  %v1041_v60 = vld [vmem:[%s2648_s0 + $0x2a8] sm:$0xff]  }
  0x20   :  { %983 = vst [vmem:[%s2649_s1 + $0xe3] sm:$0x1f] %v982_v37   ;;  %984 = vst [vmem:[%s2649_s1 + $0x11b] sm:$0xe0] %v982_v37   ;;  %v1044_v61 = vld [vmem:[%s2648_s0 + $0x2b0] sm:$0xff]   ;;  %v1047_v62 = vld [vmem:[%s2648_s0 + $0x2b8] sm:$0xff]  }
  0x21   :  { %986 = vst [vmem:[%s2649_s1 + $0xeb] sm:$0x1f] %v985_v38   ;;  %987 = vst [vmem:[%s2649_s1 + $0x123] sm:$0xe0] %v985_v38   ;;  %v1054_v2 = vld [vmem:[%s2648_s0 + $0x300] sm:$0xff]   ;;  %v1057_v3 = vld [vmem:[%s2648_s0 + $0x308] sm:$0xff]  }
  0x22   :  { %989 = vst [vmem:[%s2649_s1 + $0xf3] sm:$0x1f] %v988_v39   ;;  %990 = vst [vmem:[%s2649_s1 + $0x12b] sm:$0xe0] %v988_v39   ;;  %v1060_v4 = vld [vmem:[%s2648_s0 + $0x310] sm:$0xff]   ;;  %v1063_v5 = vld [vmem:[%s2648_s0 + $0x318] sm:$0xff]  }
  0x23   :  { %992 = vst [vmem:[%s2649_s1 + $0xfb] sm:$0x1f] %v991_v40   ;;  %993 = vst [vmem:[%s2649_s1 + $0x133] sm:$0xe0] %v991_v40   ;;  %v1066_v6 = vld [vmem:[%s2648_s0 + $0x320] sm:$0xff]   ;;  %v1069_v7 = vld [vmem:[%s2648_s0 + $0x328] sm:$0xff]  }
  0x24   :  { %v994_v41 = vld [vmem:[%s2648_s0 + $0x1c0] ss:$8 sm:$0xf]   ;;  %999 = vst [vmem:[%s2649_s1 + $0x104] sm:$0xf] %v998_v44  }
  0x25   :  { %v995_v42 = vld [vmem:[%s2648_s0 + $0x1c0] ss:$8 sm:$0xf0]   ;;  %1000 = vst [vmem:[%s2649_s1 + $0x13c] sm:$0xf0] %v998_v44  }
  0x26   :  { %v211_v43 = vsel %vm36_vm0, %v995_v42, %v994_v41  ;;  %1002 = vst [vmem:[%s2649_s1 + $0x10c] sm:$0xf] %v1001_v45   ;;  %1003 = vst [vmem:[%s2649_s1 + $0x144] sm:$0xf0] %v1001_v45   ;;  %v1072_v8 = vld [vmem:[%s2648_s0 + $0x330] sm:$0xff]   ;;  %v1075_v9 = vld [vmem:[%s2648_s0 + $0x338] sm:$0xff]  }
  0x27   :  { %996 = vst [vmem:[%s2649_s1 + $0x103] ss:$8 sm:$0xf] %v211_v43   ;;  %997 = vst [vmem:[%s2649_s1 + $0x103] ss:$8 sm:$0xf0] %v211_v43  }
  0x28   :  { %1005 = vst [vmem:[%s2649_s1 + $0x114] sm:$0xf] %v1004_v46   ;;  %1006 = vst [vmem:[%s2649_s1 + $0x14c] sm:$0xf0] %v1004_v46   ;;  %v1082_v12 = vld [vmem:[%s2648_s0 + $0x380] sm:$0xff]   ;;  %v1085_v13 = vld [vmem:[%s2648_s0 + $0x388] sm:$0xff]  }
  0x29   :  { %1008 = vst [vmem:[%s2649_s1 + $0x11c] sm:$0xf] %v1007_v47   ;;  %1009 = vst [vmem:[%s2649_s1 + $0x154] sm:$0xf0] %v1007_v47   ;;  %v1088_v15 = vld [vmem:[%s2648_s0 + $0x390] sm:$0xff]   ;;  %v1091_v16 = vld [vmem:[%s2648_s0 + $0x398] sm:$0xff]  }
  0x2a   :  { %1011 = vst [vmem:[%s2649_s1 + $0x124] sm:$0xf] %v1010_v48   ;;  %1012 = vst [vmem:[%s2649_s1 + $0x15c] sm:$0xf0] %v1010_v48   ;;  %v1094_v17 = vld [vmem:[%s2648_s0 + $0x3a0] sm:$0xff]   ;;  %v1097_v18 = vld [vmem:[%s2648_s0 + $0x3a8] sm:$0xff]  }
  0x2b   :  { %1014 = vst [vmem:[%s2649_s1 + $0x12c] sm:$0xf] %v1013_v49   ;;  %1015 = vst [vmem:[%s2649_s1 + $0x164] sm:$0xf0] %v1013_v49   ;;  %v1100_v19 = vld [vmem:[%s2648_s0 + $0x3b0] sm:$0xff]   ;;  %v1103_v20 = vld [vmem:[%s2648_s0 + $0x3b8] sm:$0xff]  }
  0x2c   :  { %v1022_v52 = vld [vmem:[%s2648_s0 + $0x240] ss:$8 sm:$0xf]   ;;  %1017 = vst [vmem:[%s2649_s1 + $0x134] sm:$0xf] %v1016_v50  }
  0x2d   :  { %1018 = vst [vmem:[%s2649_s1 + $0x16c] sm:$0xf0] %v1016_v50   ;;  %1020 = vst [vmem:[%s2649_s1 + $0x13c] sm:$0xf] %v1019_v51   ;;  %v1110_v24 = vld [vmem:[%s2648_s0 + $0x400] sm:$0xff]   ;;  %v1112_v25 = vld [vmem:[%s2648_s0 + $0x408] sm:$0xff]  }
  0x2e   :  { %1021 = vst [vmem:[%s2649_s1 + $0x174] sm:$0xf0] %v1019_v51   ;;  %v1023_v53 = vld [vmem:[%s2648_s0 + $0x240] ss:$8 sm:$0xf0]   ;;  %1111 = vst [vmem:[%s2649_s1 + $0x240] sm:$0xff] %v1110_v24  }
  0x2f   :  { %v269_v56 = vsel %vm36_vm0, %v1023_v53, %v1022_v52  ;;  %1027 = vst [vmem:[%s2649_s1 + $0x145] sm:$0x7] %v1026_v54   ;;  %1028 = vst [vmem:[%s2649_s1 + $0x17d] sm:$0xf8] %v1026_v54   ;;  %v1114_v26 = vld [vmem:[%s2648_s0 + $0x410] sm:$0xff]   ;;  %v1116_v27 = vld [vmem:[%s2648_s0 + $0x418] sm:$0xff]  }
  0x30   :  { %1030 = vst [vmem:[%s2649_s1 + $0x14d] sm:$0x7] %v1029_v55   ;;  %1031 = vst [vmem:[%s2649_s1 + $0x185] sm:$0xf8] %v1029_v55   ;;  %v1118_v28 = vld [vmem:[%s2648_s0 + $0x420] sm:$0xff]   ;;  %v1120_v29 = vld [vmem:[%s2648_s0 + $0x428] sm:$0xff]  }
  0x31   :  { %1024 = vst [vmem:[%s2649_s1 + $0x144] ss:$8 sm:$0xf] %v269_v56   ;;  %1025 = vst [vmem:[%s2649_s1 + $0x144] ss:$8 sm:$0xf0] %v269_v56  }
  0x32   :  { %1033 = vst [vmem:[%s2649_s1 + $0x155] sm:$0x7] %v1032_v57   ;;  %1034 = vst [vmem:[%s2649_s1 + $0x18d] sm:$0xf8] %v1032_v57   ;;  %v1122_v30 = vld [vmem:[%s2648_s0 + $0x430] sm:$0xff]   ;;  %v1124_v31 = vld [vmem:[%s2648_s0 + $0x438] sm:$0xff]  }
  0x33   :  { %1036 = vst [vmem:[%s2649_s1 + $0x15d] sm:$0x7] %v1035_v58   ;;  %1037 = vst [vmem:[%s2649_s1 + $0x195] sm:$0xf8] %v1035_v58   ;;  %v1130_v34 = vld [vmem:[%s2648_s0 + $0x480] sm:$0xff]   ;;  %v1133_v35 = vld [vmem:[%s2648_s0 + $0x488] sm:$0xff]  }
  0x34   :  { %1039 = vst [vmem:[%s2649_s1 + $0x165] sm:$0x7] %v1038_v59   ;;  %1040 = vst [vmem:[%s2649_s1 + $0x19d] sm:$0xf8] %v1038_v59   ;;  %v1136_v37 = vld [vmem:[%s2648_s0 + $0x490] sm:$0xff]   ;;  %v1139_v38 = vld [vmem:[%s2648_s0 + $0x498] sm:$0xff]  }
  0x35   :  { %1042 = vst [vmem:[%s2649_s1 + $0x16d] sm:$0x7] %v1041_v60   ;;  %1043 = vst [vmem:[%s2649_s1 + $0x1a5] sm:$0xf8] %v1041_v60   ;;  %v1142_v39 = vld [vmem:[%s2648_s0 + $0x4a0] sm:$0xff]   ;;  %v1145_v40 = vld [vmem:[%s2648_s0 + $0x4a8] sm:$0xff]  }
  0x36   :  { %1045 = vst [vmem:[%s2649_s1 + $0x175] sm:$0x7] %v1044_v61   ;;  %1046 = vst [vmem:[%s2649_s1 + $0x1ad] sm:$0xf8] %v1044_v61   ;;  %v1148_v41 = vld [vmem:[%s2648_s0 + $0x4b0] sm:$0xff]   ;;  %v1151_v42 = vld [vmem:[%s2648_s0 + $0x4b8] sm:$0xff]  }
  0x37   :  { %1048 = vst [vmem:[%s2649_s1 + $0x17d] sm:$0x7] %v1047_v62   ;;  %1049 = vst [vmem:[%s2649_s1 + $0x1b5] sm:$0xf8] %v1047_v62   ;;  %v1158_v46 = vld [vmem:[%s2648_s0 + $0x500] sm:$0xff]   ;;  %v1161_v47 = vld [vmem:[%s2648_s0 + $0x508] sm:$0xff]  }
  0x38   :  { %v1050_v63 = vld [vmem:[%s2648_s0 + $0x2c0] ss:$8 sm:$0xf]   ;;  %1055 = vst [vmem:[%s2649_s1 + $0x186] sm:$0x3] %v1054_v2   ;;  %1113 = vst [vmem:[%s2649_s1 + $0x248] sm:$0xff] %v1112_v25  }
  0x39   :  { %v1051_v0 = vld [vmem:[%s2648_s0 + $0x2c0] ss:$8 sm:$0xf0]   ;;  %1056 = vst [vmem:[%s2649_s1 + $0x1be] sm:$0xfc] %v1054_v2   ;;  %1115 = vst [vmem:[%s2649_s1 + $0x250] sm:$0xff] %v1114_v26  }
  0x3a   :  { %v327_v1 = vsel %vm36_vm0, %v1051_v0, %v1050_v63  ;;  %1058 = vst [vmem:[%s2649_s1 + $0x18e] sm:$0x3] %v1057_v3   ;;  %1059 = vst [vmem:[%s2649_s1 + $0x1c6] sm:$0xfc] %v1057_v3   ;;  %v1164_v48 = vld [vmem:[%s2648_s0 + $0x510] sm:$0xff]   ;;  %v1167_v49 = vld [vmem:[%s2648_s0 + $0x518] sm:$0xff]  }
  0x3b   :  { %1052 = vst [vmem:[%s2649_s1 + $0x185] ss:$8 sm:$0xf] %v327_v1   ;;  %1053 = vst [vmem:[%s2649_s1 + $0x185] ss:$8 sm:$0xf0] %v327_v1  }
  0x3c   :  { %1061 = vst [vmem:[%s2649_s1 + $0x196] sm:$0x3] %v1060_v4   ;;  %1062 = vst [vmem:[%s2649_s1 + $0x1ce] sm:$0xfc] %v1060_v4   ;;  %v1170_v50 = vld [vmem:[%s2648_s0 + $0x520] sm:$0xff]   ;;  %v1173_v51 = vld [vmem:[%s2648_s0 + $0x528] sm:$0xff]  }
  0x3d   :  { %1064 = vst [vmem:[%s2649_s1 + $0x19e] sm:$0x3] %v1063_v5   ;;  %1065 = vst [vmem:[%s2649_s1 + $0x1d6] sm:$0xfc] %v1063_v5   ;;  %v1176_v52 = vld [vmem:[%s2648_s0 + $0x530] sm:$0xff]   ;;  %v1179_v53 = vld [vmem:[%s2648_s0 + $0x538] sm:$0xff]  }
  0x3e   :  { %1067 = vst [vmem:[%s2649_s1 + $0x1a6] sm:$0x3] %v1066_v6   ;;  %1068 = vst [vmem:[%s2649_s1 + $0x1de] sm:$0xfc] %v1066_v6   ;;  %v1186_v56 = vld [vmem:[%s2648_s0 + $0x580] sm:$0xff]   ;;  %v1189_v57 = vld [vmem:[%s2648_s0 + $0x588] sm:$0xff]  }
  0x3f   :  { %1070 = vst [vmem:[%s2649_s1 + $0x1ae] sm:$0x3] %v1069_v7   ;;  %1071 = vst [vmem:[%s2649_s1 + $0x1e6] sm:$0xfc] %v1069_v7   ;;  %v1192_v59 = vld [vmem:[%s2648_s0 + $0x590] sm:$0xff]   ;;  %v1195_v60 = vld [vmem:[%s2648_s0 + $0x598] sm:$0xff]  }
  0x40   :  { %v1078_v10 = vld [vmem:[%s2648_s0 + $0x340] ss:$8 sm:$0xf]   ;;  %1073 = vst [vmem:[%s2649_s1 + $0x1b6] sm:$0x3] %v1072_v8   ;;  %1117 = vst [vmem:[%s2649_s1 + $0x258] sm:$0xff] %v1116_v27  }
  0x41   :  { %1074 = vst [vmem:[%s2649_s1 + $0x1ee] sm:$0xfc] %v1072_v8   ;;  %1076 = vst [vmem:[%s2649_s1 + $0x1be] sm:$0x3] %v1075_v9   ;;  %v1198_v61 = vld [vmem:[%s2648_s0 + $0x5a0] sm:$0xff]   ;;  %v1201_v62 = vld [vmem:[%s2648_s0 + $0x5a8] sm:$0xff]  }
  0x42   :  { %1077 = vst [vmem:[%s2649_s1 + $0x1f6] sm:$0xfc] %v1075_v9   ;;  %v1079_v11 = vld [vmem:[%s2648_s0 + $0x340] ss:$8 sm:$0xf0]   ;;  %1119 = vst [vmem:[%s2649_s1 + $0x260] sm:$0xff] %v1118_v28  }
  0x43   :  { %v385_v14 = vsel %vm36_vm0, %v1079_v11, %v1078_v10  ;;  %1083 = vst [vmem:[%s2649_s1 + $0x1c7] ss:$57 sm:$0x3] %v1082_v12   ;;  %1084 = vst [vmem:[%s2649_s1 + $0x1ff] sm:$0xfc] %v1082_v12   ;;  %v1204_v63 = vld [vmem:[%s2648_s0 + $0x5b0] sm:$0xff]  }
  0x44   :  { %1086 = vst [vmem:[%s2649_s1 + $0x1cf] ss:$57 sm:$0x3] %v1085_v13   ;;  %1087 = vst [vmem:[%s2649_s1 + $0x207] sm:$0xfc] %v1085_v13   ;;  %v1207_v0 = vld [vmem:[%s2648_s0 + $0x5b8] sm:$0xff]  }
  0x45   :  { %1080 = vst [vmem:[%s2649_s1 + $0x1c6] ss:$8 sm:$0xf] %v385_v14   ;;  %1081 = vst [vmem:[%s2649_s1 + $0x1c6] ss:$8 sm:$0xf0] %v385_v14  }
  0x46   :  { %1089 = vst [vmem:[%s2649_s1 + $0x1d7] ss:$57 sm:$0x3] %v1088_v15   ;;  %1090 = vst [vmem:[%s2649_s1 + $0x20f] sm:$0xfc] %v1088_v15   ;;  %v1214_v4 = vld [vmem:[%s2648_s0 + $0x600] sm:$0xff]  }
  0x47   :  { %1092 = vst [vmem:[%s2649_s1 + $0x1df] ss:$57 sm:$0x3] %v1091_v16   ;;  %1093 = vst [vmem:[%s2649_s1 + $0x217] sm:$0xfc] %v1091_v16   ;;  %v1217_v5 = vld [vmem:[%s2648_s0 + $0x608] sm:$0xff]  }
  0x48   :  { %1095 = vst [vmem:[%s2649_s1 + $0x1e7] ss:$57 sm:$0x3] %v1094_v17   ;;  %1096 = vst [vmem:[%s2649_s1 + $0x21f] sm:$0xfc] %v1094_v17   ;;  %v1220_v6 = vld [vmem:[%s2648_s0 + $0x610] sm:$0xff]  }
  0x49   :  { %1098 = vst [vmem:[%s2649_s1 + $0x1ef] ss:$57 sm:$0x3] %v1097_v18   ;;  %1099 = vst [vmem:[%s2649_s1 + $0x227] sm:$0xfc] %v1097_v18   ;;  %v1223_v7 = vld [vmem:[%s2648_s0 + $0x618] sm:$0xff]  }
  0x4a   :  { %1101 = vst [vmem:[%s2649_s1 + $0x1f7] ss:$57 sm:$0x3] %v1100_v19   ;;  %1102 = vst [vmem:[%s2649_s1 + $0x22f] sm:$0xfc] %v1100_v19   ;;  %v1226_v8 = vld [vmem:[%s2648_s0 + $0x620] sm:$0xff]  }
  0x4b   :  { %1104 = vst [vmem:[%s2649_s1 + $0x1ff] ss:$57 sm:$0x3] %v1103_v20   ;;  %1105 = vst [vmem:[%s2649_s1 + $0x237] sm:$0xfc] %v1103_v20   ;;  %v1229_v9 = vld [vmem:[%s2648_s0 + $0x628] sm:$0xff]  }
  0x4c   :  { %v1106_v21 = vld [vmem:[%s2648_s0 + $0x3c0] ss:$8 sm:$0xf]   ;;  %1121 = vst [vmem:[%s2649_s1 + $0x268] sm:$0xff] %v1120_v29   ;;  %1123 = vst [vmem:[%s2649_s1 + $0x270] sm:$0xff] %v1122_v30  }
  0x4d   :  { %v1107_v22 = vld [vmem:[%s2648_s0 + $0x3c0] ss:$8 sm:$0xf0]   ;;  %1125 = vst [vmem:[%s2649_s1 + $0x278] sm:$0xff] %v1124_v31   ;;  %1131 = vst [vmem:[%s2649_s1 + $0x281] sm:$0x7f] %v1130_v34  }
  0x4e   :  { %v443_v23 = vsel %vm36_vm0, %v1107_v22, %v1106_v21  ;;  %v1126_v32 = vld [vmem:[%s2648_s0 + $0x440] ss:$8 sm:$0xf]   ;;  %1132 = vst [vmem:[%s2649_s1 + $0x2b9] sm:$0x80] %v1130_v34  }
  0x4f   :  { %1108 = vst [vmem:[%s2649_s1 + $0x207] ss:$8 sm:$0xf] %v443_v23   ;;  %1109 = vst [vmem:[%s2649_s1 + $0x207] ss:$8 sm:$0xf0] %v443_v23  }
  0x50   :  { %v1127_v33 = vld [vmem:[%s2648_s0 + $0x440] ss:$8 sm:$0xf0]   ;;  %1134 = vst [vmem:[%s2649_s1 + $0x289] sm:$0x7f] %v1133_v35  }
  0x51   :  { %v485_v36 = vsel %vm36_vm0, %v1127_v33, %v1126_v32  ;;  %1135 = vst [vmem:[%s2649_s1 + $0x2c1] sm:$0x80] %v1133_v35   ;;  %1137 = vst [vmem:[%s2649_s1 + $0x291] sm:$0x7f] %v1136_v37   ;;  %v1232_v10 = vld [vmem:[%s2648_s0 + $0x630] sm:$0xff]   ;;  %v1235_v11 = vld [vmem:[%s2648_s0 + $0x638] sm:$0xff]  }
  0x52   :  { %1128 = vst [vmem:[%s2649_s1 + $0x280] ss:$8 sm:$0xf] %v485_v36   ;;  %1129 = vst [vmem:[%s2649_s1 + $0x280] ss:$8 sm:$0xf0] %v485_v36  }
  0x53   :  { %1138 = vst [vmem:[%s2649_s1 + $0x2c9] sm:$0x80] %v1136_v37   ;;  %1140 = vst [vmem:[%s2649_s1 + $0x299] sm:$0x7f] %v1139_v38   ;;  %v1242_v14 = vld [vmem:[%s2648_s0 + $0x680] sm:$0xff]   ;;  %v1245_v15 = vld [vmem:[%s2648_s0 + $0x688] sm:$0xff]  }
  0x54   :  { %1141 = vst [vmem:[%s2649_s1 + $0x2d1] sm:$0x80] %v1139_v38   ;;  %1143 = vst [vmem:[%s2649_s1 + $0x2a1] sm:$0x7f] %v1142_v39   ;;  %v1248_v17 = vld [vmem:[%s2648_s0 + $0x690] sm:$0xff]   ;;  %v1251_v18 = vld [vmem:[%s2648_s0 + $0x698] sm:$0xff]  }
  0x55   :  { %1144 = vst [vmem:[%s2649_s1 + $0x2d9] sm:$0x80] %v1142_v39   ;;  %1146 = vst [vmem:[%s2649_s1 + $0x2a9] sm:$0x7f] %v1145_v40   ;;  %v1254_v19 = vld [vmem:[%s2648_s0 + $0x6a0] sm:$0xff]   ;;  %v1257_v20 = vld [vmem:[%s2648_s0 + $0x6a8] sm:$0xff]  }
  0x56   :  { %1147 = vst [vmem:[%s2649_s1 + $0x2e1] sm:$0x80] %v1145_v40   ;;  %1149 = vst [vmem:[%s2649_s1 + $0x2b1] sm:$0x7f] %v1148_v41   ;;  %v1260_v21 = vld [vmem:[%s2648_s0 + $0x6b0] sm:$0xff]   ;;  %v1263_v22 = vld [vmem:[%s2648_s0 + $0x6b8] sm:$0xff]  }
  0x57   :  { %1150 = vst [vmem:[%s2649_s1 + $0x2e9] sm:$0x80] %v1148_v41   ;;  %1152 = vst [vmem:[%s2649_s1 + $0x2b9] sm:$0x7f] %v1151_v42   ;;  %v1270_v26 = vld [vmem:[%s2648_s0 + $0x700] sm:$0xff]   ;;  %v1273_v27 = vld [vmem:[%s2648_s0 + $0x708] sm:$0xff]  }
  0x58   :  { %1153 = vst [vmem:[%s2649_s1 + $0x2f1] sm:$0x80] %v1151_v42   ;;  %v1154_v43 = vld [vmem:[%s2648_s0 + $0x4c0] ss:$8 sm:$0xf]  }
  0x59   :  { %v1155_v44 = vld [vmem:[%s2648_s0 + $0x4c0] ss:$8 sm:$0xf0]   ;;  %1159 = vst [vmem:[%s2649_s1 + $0x2c2] sm:$0x3f] %v1158_v46  }
  0x5a   :  { %v543_v45 = vsel %vm36_vm0, %v1155_v44, %v1154_v43  ;;  %1160 = vst [vmem:[%s2649_s1 + $0x2fa] sm:$0xc0] %v1158_v46   ;;  %1162 = vst [vmem:[%s2649_s1 + $0x2ca] sm:$0x3f] %v1161_v47   ;;  %v1276_v28 = vld [vmem:[%s2648_s0 + $0x710] sm:$0xff]   ;;  %v1279_v29 = vld [vmem:[%s2648_s0 + $0x718] sm:$0xff]  }
  0x5b   :  { %1156 = vst [vmem:[%s2649_s1 + $0x2c1] ss:$8 sm:$0xf] %v543_v45   ;;  %1157 = vst [vmem:[%s2649_s1 + $0x2c1] ss:$8 sm:$0xf0] %v543_v45  }
  0x5c   :  { %1163 = vst [vmem:[%s2649_s1 + $0x302] sm:$0xc0] %v1161_v47   ;;  %1165 = vst [vmem:[%s2649_s1 + $0x2d2] sm:$0x3f] %v1164_v48   ;;  %v1282_v30 = vld [vmem:[%s2648_s0 + $0x720] sm:$0xff]   ;;  %v1285_v31 = vld [vmem:[%s2648_s0 + $0x728] sm:$0xff]  }
  0x5d   :  { %1166 = vst [vmem:[%s2649_s1 + $0x30a] sm:$0xc0] %v1164_v48   ;;  %1168 = vst [vmem:[%s2649_s1 + $0x2da] sm:$0x3f] %v1167_v49   ;;  %v1288_v32 = vld [vmem:[%s2648_s0 + $0x730] sm:$0xff]   ;;  %v1291_v33 = vld [vmem:[%s2648_s0 + $0x738] sm:$0xff]  }
  0x5e   :  { %1169 = vst [vmem:[%s2649_s1 + $0x312] sm:$0xc0] %v1167_v49   ;;  %1171 = vst [vmem:[%s2649_s1 + $0x2e2] sm:$0x3f] %v1170_v50   ;;  %v1298_v36 = vld [vmem:[%s2648_s0 + $0x780] sm:$0xff]   ;;  %v1301_v37 = vld [vmem:[%s2648_s0 + $0x788] sm:$0xff]  }
  0x5f   :  { %1172 = vst [vmem:[%s2649_s1 + $0x31a] sm:$0xc0] %v1170_v50   ;;  %1174 = vst [vmem:[%s2649_s1 + $0x2ea] sm:$0x3f] %v1173_v51   ;;  %v1304_v39 = vld [vmem:[%s2648_s0 + $0x790] sm:$0xff]   ;;  %v1307_v40 = vld [vmem:[%s2648_s0 + $0x798] sm:$0xff]  }
  0x60   :  { %1175 = vst [vmem:[%s2649_s1 + $0x322] sm:$0xc0] %v1173_v51   ;;  %v1182_v54 = vld [vmem:[%s2648_s0 + $0x540] ss:$8 sm:$0xf]  }
  0x61   :  { %1177 = vst [vmem:[%s2649_s1 + $0x2f2] sm:$0x3f] %v1176_v52   ;;  %1178 = vst [vmem:[%s2649_s1 + $0x32a] sm:$0xc0] %v1176_v52   ;;  %v1310_v41 = vld [vmem:[%s2648_s0 + $0x7a0] sm:$0xff]   ;;  %v1313_v42 = vld [vmem:[%s2648_s0 + $0x7a8] sm:$0xff]  }
  0x62   :  { %1180 = vst [vmem:[%s2649_s1 + $0x2fa] sm:$0x3f] %v1179_v53   ;;  %1181 = vst [vmem:[%s2649_s1 + $0x332] sm:$0xc0] %v1179_v53   ;;  %v1316_v43 = vld [vmem:[%s2648_s0 + $0x7b0] sm:$0xff]   ;;  %v1319_v44 = vld [vmem:[%s2648_s0 + $0x7b8] sm:$0xff]  }
  0x63   :  { %v1183_v55 = vld [vmem:[%s2648_s0 + $0x540] ss:$8 sm:$0xf0]   ;;  %1187 = vst [vmem:[%s2649_s1 + $0x303] sm:$0x1f] %v1186_v56  }
  0x64   :  { %v601_v58 = vsel %vm36_vm0, %v1183_v55, %v1182_v54  ;;  %1188 = vst [vmem:[%s2649_s1 + $0x33b] sm:$0xe0] %v1186_v56   ;;  %1190 = vst [vmem:[%s2649_s1 + $0x30b] sm:$0x1f] %v1189_v57  }
  0x65   :  { %1191 = vst [vmem:[%s2649_s1 + $0x343] sm:$0xe0] %v1189_v57   ;;  %1184 = vst [vmem:[%s2649_s1 + $0x302] ss:$8 sm:$0xf] %v601_v58  }
  0x66   :  { %1185 = vst [vmem:[%s2649_s1 + $0x302] ss:$8 sm:$0xf0] %v601_v58   ;;  %1193 = vst [vmem:[%s2649_s1 + $0x313] sm:$0x1f] %v1192_v59  }
  0x67   :  { %1194 = vst [vmem:[%s2649_s1 + $0x34b] sm:$0xe0] %v1192_v59   ;;  %1196 = vst [vmem:[%s2649_s1 + $0x31b] sm:$0x1f] %v1195_v60  }
  0x68   :  { %1197 = vst [vmem:[%s2649_s1 + $0x353] sm:$0xe0] %v1195_v60   ;;  %1199 = vst [vmem:[%s2649_s1 + $0x323] sm:$0x1f] %v1198_v61  }
  0x69   :  { %1200 = vst [vmem:[%s2649_s1 + $0x35b] sm:$0xe0] %v1198_v61   ;;  %1202 = vst [vmem:[%s2649_s1 + $0x32b] sm:$0x1f] %v1201_v62  }
  0x6a   :  { %1203 = vst [vmem:[%s2649_s1 + $0x363] sm:$0xe0] %v1201_v62   ;;  %1205 = vst [vmem:[%s2649_s1 + $0x333] sm:$0x1f] %v1204_v63  }
  0x6b   :  { %1206 = vst [vmem:[%s2649_s1 + $0x36b] sm:$0xe0] %v1204_v63   ;;  %1208 = vst [vmem:[%s2649_s1 + $0x33b] sm:$0x1f] %v1207_v0  }
  0x6c   :  { %1209 = vst [vmem:[%s2649_s1 + $0x373] sm:$0xe0] %v1207_v0   ;;  %v1210_v1 = vld [vmem:[%s2648_s0 + $0x5c0] ss:$8 sm:$0xf]  }
  0x6d   :  { %v1211_v2 = vld [vmem:[%s2648_s0 + $0x5c0] ss:$8 sm:$0xf0]   ;;  %1215 = vst [vmem:[%s2649_s1 + $0x344] sm:$0xf] %v1214_v4  }
  0x6e   :  { %v659_v3 = vsel %vm36_vm0, %v1211_v2, %v1210_v1  ;;  %1216 = vst [vmem:[%s2649_s1 + $0x37c] sm:$0xf0] %v1214_v4   ;;  %1218 = vst [vmem:[%s2649_s1 + $0x34c] sm:$0xf] %v1217_v5  }
  0x6f   :  { %1212 = vst [vmem:[%s2649_s1 + $0x343] ss:$8 sm:$0xf] %v659_v3   ;;  %1213 = vst [vmem:[%s2649_s1 + $0x343] ss:$8 sm:$0xf0] %v659_v3  }
  0x70   :  { %1219 = vst [vmem:[%s2649_s1 + $0x384] sm:$0xf0] %v1217_v5   ;;  %1221 = vst [vmem:[%s2649_s1 + $0x354] sm:$0xf] %v1220_v6  }
  0x71   :  { %1222 = vst [vmem:[%s2649_s1 + $0x38c] sm:$0xf0] %v1220_v6   ;;  %1224 = vst [vmem:[%s2649_s1 + $0x35c] sm:$0xf] %v1223_v7  }
  0x72   :  { %1225 = vst [vmem:[%s2649_s1 + $0x394] sm:$0xf0] %v1223_v7   ;;  %1227 = vst [vmem:[%s2649_s1 + $0x364] sm:$0xf] %v1226_v8  }
  0x73   :  { %1228 = vst [vmem:[%s2649_s1 + $0x39c] sm:$0xf0] %v1226_v8   ;;  %1230 = vst [vmem:[%s2649_s1 + $0x36c] sm:$0xf] %v1229_v9  }
  0x74   :  { %1231 = vst [vmem:[%s2649_s1 + $0x3a4] sm:$0xf0] %v1229_v9   ;;  %v1238_v12 = vld [vmem:[%s2648_s0 + $0x640] ss:$8 sm:$0xf]  }
  0x75   :  { %1233 = vst [vmem:[%s2649_s1 + $0x374] sm:$0xf] %v1232_v10   ;;  %1234 = vst [vmem:[%s2649_s1 + $0x3ac] sm:$0xf0] %v1232_v10  }
  0x76   :  { %1236 = vst [vmem:[%s2649_s1 + $0x37c] sm:$0xf] %v1235_v11   ;;  %1237 = vst [vmem:[%s2649_s1 + $0x3b4] sm:$0xf0] %v1235_v11  }
  0x77   :  { %v1239_v13 = vld [vmem:[%s2648_s0 + $0x640] ss:$8 sm:$0xf0]   ;;  %1243 = vst [vmem:[%s2649_s1 + $0x385] sm:$0x7] %v1242_v14  }
  0x78   :  { %v717_v16 = vsel %vm36_vm0, %v1239_v13, %v1238_v12  ;;  %1244 = vst [vmem:[%s2649_s1 + $0x3bd] sm:$0xf8] %v1242_v14   ;;  %1246 = vst [vmem:[%s2649_s1 + $0x38d] sm:$0x7] %v1245_v15  }
  0x79   :  { %1247 = vst [vmem:[%s2649_s1 + $0x3c5] sm:$0xf8] %v1245_v15   ;;  %1240 = vst [vmem:[%s2649_s1 + $0x384] ss:$8 sm:$0xf] %v717_v16  }
  0x7a   :  { %1241 = vst [vmem:[%s2649_s1 + $0x384] ss:$8 sm:$0xf0] %v717_v16   ;;  %1249 = vst [vmem:[%s2649_s1 + $0x395] sm:$0x7] %v1248_v17  }
  0x7b   :  { %1250 = vst [vmem:[%s2649_s1 + $0x3cd] sm:$0xf8] %v1248_v17   ;;  %1252 = vst [vmem:[%s2649_s1 + $0x39d] sm:$0x7] %v1251_v18  }
  0x7c   :  { %1253 = vst [vmem:[%s2649_s1 + $0x3d5] sm:$0xf8] %v1251_v18   ;;  %1255 = vst [vmem:[%s2649_s1 + $0x3a5] sm:$0x7] %v1254_v19  }
  0x7d   :  { %1256 = vst [vmem:[%s2649_s1 + $0x3dd] sm:$0xf8] %v1254_v19   ;;  %1258 = vst [vmem:[%s2649_s1 + $0x3ad] sm:$0x7] %v1257_v20  }
  0x7e   :  { %1259 = vst [vmem:[%s2649_s1 + $0x3e5] sm:$0xf8] %v1257_v20   ;;  %1261 = vst [vmem:[%s2649_s1 + $0x3b5] sm:$0x7] %v1260_v21  }
  0x7f   :  { %1262 = vst [vmem:[%s2649_s1 + $0x3ed] sm:$0xf8] %v1260_v21   ;;  %1264 = vst [vmem:[%s2649_s1 + $0x3bd] sm:$0x7] %v1263_v22  }
  0x80   :  { %1265 = vst [vmem:[%s2649_s1 + $0x3f5] sm:$0xf8] %v1263_v22   ;;  %v1266_v23 = vld [vmem:[%s2648_s0 + $0x6c0] ss:$8 sm:$0xf]  }
  0x81   :  { %v1267_v24 = vld [vmem:[%s2648_s0 + $0x6c0] ss:$8 sm:$0xf0]   ;;  %1271 = vst [vmem:[%s2649_s1 + $0x3c6] sm:$0x3] %v1270_v26  }
  0x82   :  { %v775_v25 = vsel %vm36_vm0, %v1267_v24, %v1266_v23  ;;  %1272 = vst [vmem:[%s2649_s1 + $0x3fe] sm:$0xfc] %v1270_v26   ;;  %1274 = vst [vmem:[%s2649_s1 + $0x3ce] sm:$0x3] %v1273_v27  }
  0x83   :  { %1268 = vst [vmem:[%s2649_s1 + $0x3c5] ss:$8 sm:$0xf] %v775_v25   ;;  %1269 = vst [vmem:[%s2649_s1 + $0x3c5] ss:$8 sm:$0xf0] %v775_v25  }
  0x84   :  { %1275 = vst [vmem:[%s2649_s1 + $0x406] sm:$0xfc] %v1273_v27   ;;  %1277 = vst [vmem:[%s2649_s1 + $0x3d6] sm:$0x3] %v1276_v28  }
  0x85   :  { %1278 = vst [vmem:[%s2649_s1 + $0x40e] sm:$0xfc] %v1276_v28   ;;  %1280 = vst [vmem:[%s2649_s1 + $0x3de] sm:$0x3] %v1279_v29  }
  0x86   :  { %1281 = vst [vmem:[%s2649_s1 + $0x416] sm:$0xfc] %v1279_v29   ;;  %1283 = vst [vmem:[%s2649_s1 + $0x3e6] sm:$0x3] %v1282_v30  }
  0x87   :  { %1284 = vst [vmem:[%s2649_s1 + $0x41e] sm:$0xfc] %v1282_v30   ;;  %1286 = vst [vmem:[%s2649_s1 + $0x3ee] sm:$0x3] %v1285_v31  }
  0x88   :  { %1287 = vst [vmem:[%s2649_s1 + $0x426] sm:$0xfc] %v1285_v31   ;;  %v1294_v34 = vld [vmem:[%s2648_s0 + $0x740] ss:$8 sm:$0xf]  }
  0x89   :  { %1289 = vst [vmem:[%s2649_s1 + $0x3f6] sm:$0x3] %v1288_v32   ;;  %1290 = vst [vmem:[%s2649_s1 + $0x42e] sm:$0xfc] %v1288_v32  }
  0x8a   :  { %1292 = vst [vmem:[%s2649_s1 + $0x3fe] sm:$0x3] %v1291_v33   ;;  %1293 = vst [vmem:[%s2649_s1 + $0x436] sm:$0xfc] %v1291_v33  }
  0x8b   :  { %v1295_v35 = vld [vmem:[%s2648_s0 + $0x740] ss:$8 sm:$0xf0]   ;;  %1299 = vst [vmem:[%s2649_s1 + $0x407] ss:$57 sm:$0x3] %v1298_v36  }
  0x8c   :  { %v833_v38 = vsel %vm36_vm0, %v1295_v35, %v1294_v34  ;;  %1300 = vst [vmem:[%s2649_s1 + $0x43f] sm:$0xfc] %v1298_v36   ;;  %1302 = vst [vmem:[%s2649_s1 + $0x40f] ss:$57 sm:$0x3] %v1301_v37  }
  0x8d   :  { %1303 = vst [vmem:[%s2649_s1 + $0x447] sm:$0xfc] %v1301_v37   ;;  %1296 = vst [vmem:[%s2649_s1 + $0x406] ss:$8 sm:$0xf] %v833_v38  }
  0x8e   :  { %1297 = vst [vmem:[%s2649_s1 + $0x406] ss:$8 sm:$0xf0] %v833_v38   ;;  %1305 = vst [vmem:[%s2649_s1 + $0x417] ss:$57 sm:$0x3] %v1304_v39  }
  0x8f   :  { %1306 = vst [vmem:[%s2649_s1 + $0x44f] sm:$0xfc] %v1304_v39   ;;  %1308 = vst [vmem:[%s2649_s1 + $0x41f] ss:$57 sm:$0x3] %v1307_v40  }
  0x90   :  { %1309 = vst [vmem:[%s2649_s1 + $0x457] sm:$0xfc] %v1307_v40   ;;  %1311 = vst [vmem:[%s2649_s1 + $0x427] ss:$57 sm:$0x3] %v1310_v41  }
  0x91   :  { %1312 = vst [vmem:[%s2649_s1 + $0x45f] sm:$0xfc] %v1310_v41   ;;  %1314 = vst [vmem:[%s2649_s1 + $0x42f] ss:$57 sm:$0x3] %v1313_v42  }
  0x92   :  { %1315 = vst [vmem:[%s2649_s1 + $0x467] sm:$0xfc] %v1313_v42   ;;  %1317 = vst [vmem:[%s2649_s1 + $0x437] ss:$57 sm:$0x3] %v1316_v43  }
  0x93   :  { %1318 = vst [vmem:[%s2649_s1 + $0x46f] sm:$0xfc] %v1316_v43   ;;  %1320 = vst [vmem:[%s2649_s1 + $0x43f] ss:$57 sm:$0x3] %v1319_v44  }
  0x94   :  { %1321 = vst [vmem:[%s2649_s1 + $0x477] sm:$0xfc] %v1319_v44   ;;  %v1322_v45 = vld [vmem:[%s2648_s0 + $0x7c0] ss:$8 sm:$0xf]  }
  0x95   :  { %v1323_v46 = vld [vmem:[%s2648_s0 + $0x7c0] ss:$8 sm:$0xf0]  }
  0x96   :  { %v891_v47 = vsel %vm36_vm0, %v1323_v46, %v1322_v45 }
  0x97   :  { %1324 = vst [vmem:[%s2649_s1 + $0x447] ss:$8 sm:$0xf] %v891_v47   ;;  %1325 = vst [vmem:[%s2649_s1 + $0x447] ss:$8 sm:$0xf0] %v891_v47  }

// kernel: primary_caps_forward.1
= control target key start
LH: loop header
LB: loop body
LE: loop exit
PB: predicated region body
PF: predicated region fallthrough
CT: control target
= control target key end

     0   :  { %s8070_s12 = smov 0   ;;  %s14408_s0 = inlined_call_operand.vmem [shape: f32[288,1024], index: 0, kind: input, shape index: {}]   ;;  %s14409_s1 = inlined_call_operand.vmem [shape: f32[144,1024], index: 1, kind: input, shape index: {}]   ;;  %s14410_s2 = inlined_call_operand.vmem [shape: bf16[1024,1024], index: 2, kind: input, shape index: {}]   ;;  %s14411_s3 = inlined_call_operand.vmem [shape: f32[288,1024], index: 3, kind: output, shape index: {}]  }
   0x1 LB: > { %s6933_s13 = sadd.s32 4294967295, %s8048_s12   ;;  %p6937_p0 = scmp.ge.s32.totalorder %s8048_s12, 1  ;;  %s8048_s12 = sphi %s8070_s12, %s13_s12  }
   0x2   : > { %p139_p1 = scmp.lt.s32.totalorder %s8048_s12, 3 }
   0x4   : > { %p140_p2 = pnand %p6937_p0, %p139_p1 }
   0x6   : > { %143 = sbr.rel (%p140_p2) target bundleno = 1019 (0x3fb), region = 32 }
   0xb   : > { %v883_v0 = vld [vmem:[%s14410_s2 + $0x1c0] sm:$0xff]  ;;  %s165_s11 = smul.u32 18, %s6933_s13  ;;  %v324_v60 = vld [vmem:[%s14409_s1 + $0x8] sm:$0xff] }
   0xc   : > { %v887_v1 = vld [vmem:[%s14410_s2 + $0x1e0] sm:$0xff]  ;;  %v332_v61 = vld [vmem:[%s14409_s1 + $0x48] sm:$0xff] }
   0xd   : > { %v1011_v2 = vld [vmem:[%s14410_s2 + $0x5c0] sm:$0xff]  ;;  %v6999_v3 = vcombine.high %v883_v0, %v887_v1  ;;  %v6998_v5 = vcombine.low %v883_v0, %v887_v1  ;;  %p166_p3 = scmp.lt.s32.totalorder %s165_s11, 35 }
   0xe   : > { %v1015_v4 = vld [vmem:[%s14410_s2 + $0x5e0] sm:$0xff] }
   0xf   : > { %v875_v6 = vld [vmem:[%s14410_s2 + $0x180] sm:$0xff]  ;;  %v7127_v8 = vcombine.high %v1011_v2, %v1015_v4  ;;  %v7126_v9 = vcombine.low %v1011_v2, %v1015_v4  ;;  %3899 = vmatprep.subr.bf16.mxu0 %v6999_v3  ;;  %s15689_s11 = smov (!%p166_p3, %s165_s11), 35  ;;  %v326_v2 = vld [vmem:[%s14409_s1 + $0x18] sm:$0xff] }
  0x10   : > { %v879_v7 = vld [vmem:[%s14410_s2 + $0x1a0] sm:$0xff]  ;;  %3900 = vmatpush1.bf16.msra.mxu0 %v6998_v5  ;;  %s7456_s10 = sshll.u32 %s15689_s11, 6  ;;  %v334_v3 = vld [vmem:[%s14409_s1 + $0x58] sm:$0xff] }
  0x11   : > { %v6991_v10 = vcombine.high %v875_v6, %v879_v7  ;;  %v1003_v11 = vld [vmem:[%s14410_s2 + $0x580] sm:$0xff]  ;;  %4022 = vmatprep.subr.bf16.mxu1 %v7127_v8  ;;  %v6990_v18 = vcombine.low %v875_v6, %v879_v7  ;;  %s8164_s13 = scalar_lea.vmem %s14408_s0, %s7456_s10  ;;  %s11732_s28 = scalar_lea.vmem %s14411_s3, %s7456_s10 }
  0x12   : > { %v1007_v12 = vld [vmem:[%s14410_s2 + $0x5a0] sm:$0xff]  ;;  %4023 = vmatpush1.bf16.msra.mxu1 %v7126_v9  ;;  %v180_v57 = vld [vmem:[%s8164_s13 + $0x8] sm:$0xff]  ;;  %v182_v62 = vld [vmem:[%s8164_s13 + $0x18] sm:$0xff] }
  0x13   : > { %v867_v13 = vld [vmem:[%s14410_s2 + $0x140] sm:$0xff]  ;;  %v7119_v14 = vcombine.high %v1003_v11, %v1007_v12  ;;  %3901 = vmatprep.subr.bf16.mxu0 %v6991_v10  ;;  %v7118_v19 = vcombine.low %v1003_v11, %v1007_v12  ;;  %v188_v58 = vld [vmem:[%s8164_s13 + $0x48] sm:$0xff]  ;;  %v8193_v63 = vadd.f32 %v324_v60, %v180_v57  ;;  %v190_v1 = vld [vmem:[%s8164_s13 + $0x58] sm:$0xff]  ;;  %v8204_v6 = vadd.f32 %v326_v2, %v182_v62 }
  0x14   : > { %v871_v15 = vld [vmem:[%s14410_s2 + $0x160] sm:$0xff]  ;;  %3902 = vmatpush1.bf16.msra.mxu0 %v6990_v18  ;;  %v8195_v0 = vadd.f32 %v332_v61, %v188_v58  ;;  %v8206_v7 = vadd.f32 %v334_v3, %v190_v1 }
  0x15   : > { %v995_v16 = vld [vmem:[%s14410_s2 + $0x540] sm:$0xff]  ;;  %v6983_v20 = vcombine.high %v867_v13, %v871_v15  ;;  %4024 = vmatprep.subr.bf16.mxu1 %v7119_v14  ;;  %v6982_v26 = vcombine.low %v867_v13, %v871_v15  ;;  %14792 = vst [vmem:[#allocation2_spill] sm:$0xff] %v8193_v63  ;;  %14794 = vst [vmem:[#allocation4_spill] sm:$0xff] %v8204_v6  ;;  %v612_v9 = vmul.f32 %v8193_v63, %v8193_v63  ;;  %v336_v63 = vld [vmem:[%s14409_s1 + $0x68] sm:$0xff] }
  0x16   : > { %v999_v17 = vld [vmem:[%s14410_s2 + $0x560] sm:$0xff]  ;;  %4025 = vmatpush1.bf16.msra.mxu1 %v7118_v19  ;;  %14793 = vst [vmem:[#allocation3_spill] sm:$0xff] %v8195_v0  ;;  %14795 = vst [vmem:[#allocation5_spill] sm:$0xff] %v8206_v7  ;;  %v620_v10 = vmul.f32 %v8195_v0, %v8195_v0  ;;  %v614_v14 = vmul.f32 %v8204_v6, %v8204_v6  ;;  %v622_v15 = vmul.f32 %v8206_v7, %v8206_v7  ;;  %v396_v7 = vld [vmem:[%s14409_s1 + $0x248] sm:$0xff] }
  0x17   : > { %v7111_v21 = vcombine.high %v995_v16, %v999_v17  ;;  %v859_v22 = vld [vmem:[%s14410_s2 + $0x100] sm:$0xff]  ;;  %3903 = vmatprep.subr.bf16.mxu0 %v6983_v20  ;;  %v7110_v27 = vcombine.low %v995_v16, %v999_v17 }
  0x18   : > { %v863_v23 = vld [vmem:[%s14410_s2 + $0x120] sm:$0xff]  ;;  %3904 = vmatpush1.bf16.msra.mxu0 %v6982_v26  ;;  %v8228_v18 = vpack.c.bf16 %v620_v10, %v612_v9  ;;  %v8230_v20 = vpack.c.bf16 %v622_v15, %v614_v14  ;;  %v181_v14 = vld [vmem:[%s8164_s13 + $0x10] sm:$0xff] }
  0x19   : > { %v987_v24 = vld [vmem:[%s14410_s2 + $0x500] sm:$0xff]  ;;  %v6975_v28 = vcombine.high %v859_v22, %v863_v23  ;;  %4026 = vmatprep.subr.bf16.mxu1 %v7111_v21  ;;  %v6974_v34 = vcombine.low %v859_v22, %v863_v23 }
  0x1a   : > { %v991_v25 = vld [vmem:[%s14410_s2 + $0x520] sm:$0xff]  ;;  %4027 = vmatpush1.bf16.msra.mxu1 %v7110_v27  ;;  %14796 = vst [vmem:[#allocation6_spill] sm:$0xff] %v8228_v18  ;;  %14797 = vst [vmem:[#allocation7_spill] sm:$0xff] %v8230_v20  ;;  %3931 = vmatprep.mubr.bf16.mxu0 %v8228_v18 }
  0x1b   : > { %v7103_v29 = vcombine.high %v987_v24, %v991_v25  ;;  %v851_v30 = vld [vmem:[%s14410_s2 + $0xc0] sm:$0xff]  ;;  %3905 = vmatprep.subr.bf16.mxu0 %v6975_v28  ;;  %v7102_v35 = vcombine.low %v987_v24, %v991_v25  ;;  %4054 = vmatprep.mubr.bf16.mxu1 %v8230_v20 }
  0x1c   : > { %v855_v31 = vld [vmem:[%s14410_s2 + $0xe0] sm:$0xff]  ;;  %3906 = vmatpush1.bf16.msra.mxu0 %v6974_v34 }
  0x1d   : > { %v979_v32 = vld [vmem:[%s14410_s2 + $0x4c0] sm:$0xff]  ;;  %v6967_v36 = vcombine.high %v851_v30, %v855_v31  ;;  %4028 = vmatprep.subr.bf16.mxu1 %v7103_v29  ;;  %v6966_v42 = vcombine.low %v851_v30, %v855_v31 }
  0x1e   : > { %v983_v33 = vld [vmem:[%s14410_s2 + $0x4e0] sm:$0xff]  ;;  %4029 = vmatpush1.bf16.msra.mxu1 %v7102_v35 }
  0x1f   : > { %v7095_v37 = vcombine.high %v979_v32, %v983_v33  ;;  %v843_v38 = vld [vmem:[%s14410_s2 + $0x80] sm:$0xff]  ;;  %3907 = vmatprep.subr.bf16.mxu0 %v6967_v36  ;;  %v7094_v43 = vcombine.low %v979_v32, %v983_v33 }
  0x20   : > { %v847_v39 = vld [vmem:[%s14410_s2 + $0xa0] sm:$0xff]  ;;  %3908 = vmatpush1.bf16.msra.mxu0 %v6966_v42 }
  0x21   : > { %v971_v40 = vld [vmem:[%s14410_s2 + $0x480] sm:$0xff]  ;;  %v6959_v44 = vcombine.high %v843_v38, %v847_v39  ;;  %4030 = vmatprep.subr.bf16.mxu1 %v7095_v37  ;;  %v6958_v50 = vcombine.low %v843_v38, %v847_v39 }
  0x22   : > { %v975_v41 = vld [vmem:[%s14410_s2 + $0x4a0] sm:$0xff]  ;;  %4031 = vmatpush1.bf16.msra.mxu1 %v7094_v43 }
  0x23   : > { %v7087_v45 = vcombine.high %v971_v40, %v975_v41  ;;  %v835_v46 = vld [vmem:[%s14410_s2 + $0x40] sm:$0xff]  ;;  %3909 = vmatprep.subr.bf16.mxu0 %v6959_v44  ;;  %v7086_v53 = vcombine.low %v971_v40, %v975_v41 }
  0x24   : > { %v839_v47 = vld [vmem:[%s14410_s2 + $0x60] sm:$0xff]  ;;  %3910 = vmatpush1.bf16.msra.mxu0 %v6958_v50 }
  0x25   : > { %v963_v48 = vld [vmem:[%s14410_s2 + $0x440] sm:$0xff]  ;;  %v6951_v54 = vcombine.high %v835_v46, %v839_v47  ;;  %4032 = vmatprep.subr.bf16.mxu1 %v7087_v45  ;;  %v6950_v4 = vcombine.low %v835_v46, %v839_v47 }
  0x26   : > { %v967_v49 = vld [vmem:[%s14410_s2 + $0x460] sm:$0xff]  ;;  %4033 = vmatpush1.bf16.msra.mxu1 %v7086_v53 }
  0x27   : > { %v827_v51 = vld [vmem:[%s14410_s2] sm:$0xff]  ;;  %v7079_v59 = vcombine.high %v963_v48, %v967_v49  ;;  %v7078_v5 = vcombine.low %v963_v48, %v967_v49  ;;  %3911 = vmatprep.subr.bf16.mxu0 %v6951_v54 }
  0x28   : > { %v831_v52 = vld [vmem:[%s14410_s2 + $0x20] sm:$0xff]  ;;  %3912 = vmatpush1.bf16.msra.mxu0 %v6950_v4 }
  0x29   : > { %v955_v55 = vld [vmem:[%s14410_s2 + $0x400] sm:$0xff]  ;;  %v6943_v8 = vcombine.high %v827_v51, %v831_v52  ;;  %4034 = vmatprep.subr.bf16.mxu1 %v7079_v59  ;;  %v6942_v19 = vcombine.low %v827_v51, %v831_v52 }
  0x2a   : > { %v959_v56 = vld [vmem:[%s14410_s2 + $0x420] sm:$0xff]  ;;  %4035 = vmatpush1.bf16.msra.mxu1 %v7078_v5 }
  0x2b   : > { %v7071_v11 = vcombine.high %v955_v55, %v959_v56  ;;  %v947_v12 = vld [vmem:[%s14410_s2 + $0x3c0] sm:$0xff]  ;;  %3913 = vmatprep.subr.bf16.mxu0 %v6943_v8  ;;  %v7070_v21 = vcombine.low %v955_v55, %v959_v56 }
  0x2c   : > { %v951_v13 = vld [vmem:[%s14410_s2 + $0x3e0] sm:$0xff]  ;;  %3914 = vmatpush1.bf16.msra.mxu0 %v6942_v19  ;;  %v325_v19 = vld [vmem:[%s14409_s1 + $0x10] sm:$0xff] }
  0x2d   : > { %v1075_v16 = vld [vmem:[%s14410_s2 + $0x7c0] sm:$0xff]  ;;  %v7063_v22 = vcombine.high %v947_v12, %v951_v13  ;;  %4036 = vmatprep.subr.bf16.mxu1 %v7071_v11  ;;  %v7062_v28 = vcombine.low %v947_v12, %v951_v13 }
  0x2e   : > { %v1079_v17 = vld [vmem:[%s14410_s2 + $0x7e0] sm:$0xff]  ;;  %4037 = vmatpush1.bf16.msra.mxu1 %v7070_v21  ;;  %v333_v21 = vld [vmem:[%s14409_s1 + $0x50] sm:$0xff] }
  0x2f   : > { %v7191_v23 = vcombine.high %v1075_v16, %v1079_v17  ;;  %v939_v24 = vld [vmem:[%s14410_s2 + $0x380] sm:$0xff]  ;;  %3915 = vmatprep.subr.bf16.mxu0 %v7063_v22  ;;  %v7190_v29 = vcombine.low %v1075_v16, %v1079_v17  ;;  %v189_v17 = vld [vmem:[%s8164_s13 + $0x50] sm:$0xff] }
  0x30   : > { %v943_v25 = vld [vmem:[%s14410_s2 + $0x3a0] sm:$0xff]  ;;  %3916 = vmatpush2.bf16.msra.mxu0 %v7062_v28 }
  0x31   : > { %v1067_v26 = vld [vmem:[%s14410_s2 + $0x780] sm:$0xff]  ;;  %v7055_v30 = vcombine.high %v939_v24, %v943_v25  ;;  %4038 = vmatprep.subr.bf16.mxu1 %v7191_v23  ;;  %v7054_v36 = vcombine.low %v939_v24, %v943_v25  ;;  %v196_v25 = vld [vmem:[%s8164_s13 + $0x88] sm:$0xff] }
  0x32   : > { %v1071_v27 = vld [vmem:[%s14410_s2 + $0x7a0] sm:$0xff]  ;;  %4039 = vmatpush2.bf16.msra.mxu1 %v7190_v29 }
  0x33   : > { %v7183_v31 = vcombine.high %v1067_v26, %v1071_v27  ;;  %v931_v32 = vld [vmem:[%s14410_s2 + $0x340] sm:$0xff]  ;;  %3917 = vmatprep.subr.bf16.mxu0 %v7055_v30  ;;  %v7182_v37 = vcombine.low %v1067_v26, %v1071_v27  ;;  %v204_v26 = vld [vmem:[%s8164_s13 + $0xc8] sm:$0xff] }
  0x34   : > { %v935_v33 = vld [vmem:[%s14410_s2 + $0x360] sm:$0xff]  ;;  %3918 = vmatpush2.bf16.msra.mxu0 %v7054_v36  ;;  %v340_v30 = vld [vmem:[%s14409_s1 + $0x88] sm:$0xff]  ;;  %v342_v36 = vld [vmem:[%s14409_s1 + $0x98] sm:$0xff] }
  0x35   : > { %v1059_v34 = vld [vmem:[%s14410_s2 + $0x740] sm:$0xff]  ;;  %v7047_v38 = vcombine.high %v931_v32, %v935_v33  ;;  %4040 = vmatprep.subr.bf16.mxu1 %v7183_v31  ;;  %v7046_v44 = vcombine.low %v931_v32, %v935_v33  ;;  %v348_v31 = vld [vmem:[%s14409_s1 + $0xc8] sm:$0xff]  ;;  %v198_v32 = vld [vmem:[%s8164_s13 + $0x98] sm:$0xff]  ;;  %v8367_v33 = vadd.f32 %v325_v19, %v181_v14 }
  0x36   : > { %v1063_v35 = vld [vmem:[%s14410_s2 + $0x760] sm:$0xff]  ;;  %4041 = vmatpush2.bf16.msra.mxu1 %v7182_v37  ;;  %v350_v37 = vld [vmem:[%s14409_s1 + $0xd8] sm:$0xff] }
  0x37   : > { %v7175_v39 = vcombine.high %v1059_v34, %v1063_v35  ;;  %v923_v40 = vld [vmem:[%s14410_s2 + $0x300] sm:$0xff]  ;;  %3919 = vmatprep.subr.bf16.mxu0 %v7047_v38  ;;  %v7174_v45 = vcombine.low %v1059_v34, %v1063_v35  ;;  %14800 = vst [vmem:[#allocation10_spill] sm:$0xff] %v8367_v33  ;;  %v8369_v34 = vadd.f32 %v333_v21, %v189_v17  ;;  %v206_v35 = vld [vmem:[%s8164_s13 + $0xd8] sm:$0xff] }
  0x38   : > { %v927_v41 = vld [vmem:[%s14410_s2 + $0x320] sm:$0xff]  ;;  %3920 = vmatpush2.bf16.msra.mxu0 %v7046_v44 }
  0x39   : > { %v1051_v42 = vld [vmem:[%s14410_s2 + $0x700] sm:$0xff]  ;;  %v7039_v46 = vcombine.high %v923_v40, %v927_v41  ;;  %4042 = vmatprep.subr.bf16.mxu1 %v7175_v39  ;;  %v7038_v52 = vcombine.low %v923_v40, %v927_v41  ;;  %14801 = vst [vmem:[#allocation11_spill] sm:$0xff] %v8369_v34 }
  0x3a   : > { %v1055_v43 = vld [vmem:[%s14410_s2 + $0x720] sm:$0xff]  ;;  %4043 = vmatpush2.bf16.msra.mxu1 %v7174_v45  ;;  %v8397_v45 = vadd.f32 %v340_v30, %v196_v25  ;;  %v356_v25 = vld [vmem:[%s14409_s1 + $0x108] sm:$0xff] }
  0x3b   : > { %v7167_v47 = vcombine.high %v1051_v42, %v1055_v43  ;;  %v915_v48 = vld [vmem:[%s14410_s2 + $0x2c0] sm:$0xff]  ;;  %3921 = vmatprep.subr.bf16.mxu0 %v7039_v46  ;;  %v7166_v53 = vcombine.low %v1051_v42, %v1055_v43  ;;  %v8399_v46 = vadd.f32 %v348_v31, %v204_v26  ;;  %v364_v26 = vld [vmem:[%s14409_s1 + $0x148] sm:$0xff] }
  0x3c   : > { %v919_v49 = vld [vmem:[%s14410_s2 + $0x2e0] sm:$0xff]  ;;  %3922 = vmatpush2.bf16.msra.mxu0 %v7038_v52  ;;  %14802 = vst [vmem:[#allocation12_spill] sm:$0xff] %v8397_v45  ;;  %v380_v31 = vld [vmem:[%s14409_s1 + $0x1c8] sm:$0xff] }
  0x3d   : > { %v1043_v50 = vld [vmem:[%s14410_s2 + $0x6c0] sm:$0xff]  ;;  %v7031_v54 = vcombine.high %v915_v48, %v919_v49  ;;  %4044 = vmatprep.subr.bf16.mxu1 %v7167_v47  ;;  %v7030_v60 = vcombine.low %v915_v48, %v919_v49  ;;  %14803 = vst [vmem:[#allocation13_spill] sm:$0xff] %v8399_v46 }
  0x3e   : > { %v1047_v51 = vld [vmem:[%s14410_s2 + $0x6e0] sm:$0xff]  ;;  %4045 = vmatpush2.bf16.msra.mxu1 %v7166_v53 }
  0x3f   : > { %v7159_v55 = vcombine.high %v1043_v50, %v1047_v51  ;;  %v907_v56 = vld [vmem:[%s14410_s2 + $0x280] sm:$0xff]  ;;  %3923 = vmatprep.subr.bf16.mxu0 %v7031_v54  ;;  %v7158_v61 = vcombine.low %v1043_v50, %v1047_v51 }
  0x40   : > { %v911_v57 = vld [vmem:[%s14410_s2 + $0x2a0] sm:$0xff]  ;;  %3924 = vmatpush2.bf16.msra.mxu0 %v7030_v60  ;;  %v621_v60 = vmul.f32 %v8369_v34, %v8369_v34  ;;  %v246_v34 = vld [vmem:[%s8164_s13 + $0x218] sm:$0xff] }
  0x41   : > { %v1035_v58 = vld [vmem:[%s14410_s2 + $0x680] sm:$0xff]  ;;  %v7023_v62 = vcombine.high %v907_v56, %v911_v57  ;;  %4046 = vmatprep.subr.bf16.mxu1 %v7159_v55  ;;  %v7022_v15 = vcombine.low %v907_v56, %v911_v57  ;;  %v8427_v55 = vadd.f32 %v342_v36, %v198_v32  ;;  %v8429_v56 = vadd.f32 %v350_v37, %v206_v35  ;;  %v222_v36 = vld [vmem:[%s8164_s13 + $0x158] sm:$0xff] }
  0x42   : > { %v1039_v59 = vld [vmem:[%s14410_s2 + $0x6a0] sm:$0xff]  ;;  %4047 = vmatpush2.bf16.msra.mxu1 %v7158_v61  ;;  %v358_v37 = vld [vmem:[%s14409_s1 + $0x118] sm:$0xff] }
  0x43   : > { %v8297_v1 = vld [vmem:[%s14410_s2 + $0x240] sm:$0xff]  ;;  %v7151_v4 = vcombine.high %v1035_v58, %v1039_v59  ;;  %3925 = vmatprep.subr.bf16.mxu0 %v7023_v62  ;;  %v7150_v22 = vcombine.low %v1035_v58, %v1039_v59  ;;  %14804 = vst [vmem:[#allocation14_spill] sm:$0xff] %v8427_v55  ;;  %14805 = vst [vmem:[#allocation15_spill] sm:$0xff] %v8429_v56  ;;  %v613_v59 = vmul.f32 %v8367_v33, %v8367_v33  ;;  %v268_v33 = vld [vmem:[%s8164_s13 + $0x2c8] sm:$0xff] }
  0x44   : > { %v8302_v2 = vld [vmem:[%s14410_s2 + $0x260] sm:$0xff]  ;;  %3926 = vmatpush2.bf16.msra.mxu0 %v7022_v15  ;;  %v212_v15 = vld [vmem:[%s8164_s13 + $0x108] sm:$0xff]  ;;  %v630_v21 = vmul.f32 %v8427_v55, %v8427_v55 }
  0x45   : > { %v8307_v3 = vld [vmem:[%s14410_s2 + $0x640] sm:$0xff]  ;;  %v7015_v23 = vcombine.high %v8297_v1, %v8302_v2  ;;  %4048 = vmatprep.subr.bf16.mxu1 %v7151_v4  ;;  %v7014_v38 = vcombine.low %v8297_v1, %v8302_v2  ;;  %v197_v1 = vld [vmem:[%s8164_s13 + $0x90] sm:$0xff]  ;;  %v8503_v30 = vpack.c.bf16 %v621_v60, %v613_v59  ;;  %v244_v55 = vld [vmem:[%s8164_s13 + $0x208] sm:$0xff] }
  0x46   : > { %v8312_v5 = vld [vmem:[%s14410_s2 + $0x660] sm:$0xff]  ;;  %4049 = vmatpush2.bf16.msra.mxu1 %v7150_v22  ;;  %v638_v22 = vmul.f32 %v8429_v56, %v8429_v56  ;;  %v382_v56 = vld [vmem:[%s14409_s1 + $0x1d8] sm:$0xff] }
  0x47   : > { %v179_v8 = vld [vmem:[%s8164_s13] sm:$0xff]  ;;  %v7143_v27 = vcombine.high %v8307_v3, %v8312_v5  ;;  %v7142_v39 = vcombine.low %v8307_v3, %v8312_v5  ;;  %3927 = vmatprep.subr.bf16.mxu0 %v7015_v23  ;;  %14809 = vst [vmem:[#allocation19_spill] sm:$0xff] %v8503_v30 }
  0x48   : > { %v187_v9 = vld [vmem:[%s8164_s13 + $0x40] sm:$0xff]  ;;  %3928 = vmatpush2.bf16.msra.mxu0 %v7014_v38  ;;  %v366_v38 = vld [vmem:[%s14409_s1 + $0x158] sm:$0xff] }
  0x49   : > { %v8319_v10 = vld [vmem:[%s14410_s2 + $0x200] sm:$0xff]  ;;  %4050 = vmatprep.subr.bf16.mxu1 %v7143_v27  ;;  %v214_v27 = vld [vmem:[%s8164_s13 + $0x118] sm:$0xff] }
  0x4a   : > { %v8324_v11 = vld [vmem:[%s14410_s2 + $0x220] sm:$0xff]  ;;  %4051 = vmatpush2.bf16.msra.mxu1 %v7142_v39 }
  0x4b   : > { %v323_v12 = vld [vmem:[%s14409_s1] sm:$0xff]  ;;  %v7007_v40 = vcombine.high %v8319_v10, %v8324_v11  ;;  %v7006_v57 = vcombine.low %v8319_v10, %v8324_v11  ;;  %v349_v10 = vld [vmem:[%s14409_s1 + $0xd0] sm:$0xff]  ;;  %v230_v11 = vld [vmem:[%s8164_s13 + $0x198] sm:$0xff] }
  0x4c   : > { %v331_v13 = vld [vmem:[%s14409_s1 + $0x40] sm:$0xff]  ;;  %v8356_v28 = vadd.f32 %v323_v12, %v179_v8  ;;  %v205_v8 = vld [vmem:[%s8164_s13 + $0xd0] sm:$0xff]  ;;  %v628_v12 = vmul.f32 %v8397_v45, %v8397_v45  ;;  %v438_v45 = vld [vmem:[%s14409_s1 + $0x398] sm:$0xff] }
  0x4d   : > { %v8336_v16 = vld [vmem:[%s14410_s2 + $0x600] sm:$0xff]  ;;  %v8358_v29 = vadd.f32 %v331_v13, %v187_v9  ;;  %v341_v9 = vld [vmem:[%s14409_s1 + $0x90] sm:$0xff]  ;;  %3929 = vmatprep.subr.bf16.mxu0 %v7007_v40  ;;  %v636_v13 = vmul.f32 %v8399_v46, %v8399_v46  ;;  %v8509_v35 = vadd.f32 %v349_v10, %v205_v8  ;;  %v8564_v10 = vadd.f32 %v358_v37, %v214_v27  ;;  %v228_v27 = vld [vmem:[%s8164_s13 + $0x188] sm:$0xff] }
  0x4e   : > { %v8350_v24 = vld [vmem:[%s14410_s2 + $0x620] sm:$0xff]  ;;  %14798 = vst [vmem:[#allocation8_spill] sm:$0xff] %v8356_v28  ;;  %v611_v50 = vmul.f32 %v8356_v28, %v8356_v28  ;;  %v8507_v32 = vadd.f32 %v341_v9, %v197_v1  ;;  %3930 = vmatpush2.bf16.msra.mxu0 %v7006_v57  ;;  %v8541_v57 = vadd.f32 %v356_v25, %v212_v15  ;;  %v221_v15 = vld [vmem:[%s8164_s13 + $0x150] sm:$0xff]  ;;  %v372_v40 = vld [vmem:[%s14409_s1 + $0x188] sm:$0xff] }
  0x4f   : > { %14799 = vst [vmem:[#allocation9_spill] sm:$0xff] %v8358_v29  ;;  %v8387_v41 = vld [vmem:[%s14410_s2 + $0x9c0] sm:$0xff]  ;;  %v7135_v44 = vcombine.high %v8336_v16, %v8350_v24  ;;  %v619_v51 = vmul.f32 %v8358_v29, %v8358_v29  ;;  %v7134_v58 = vcombine.low %v8336_v16, %v8350_v24  ;;  %v220_v16 = vld [vmem:[%s8164_s13 + $0x148] sm:$0xff]  ;;  %14811 = vst [vmem:[#allocation21_spill] sm:$0xff] %v8509_v35 }
  0x50   : > { %v8392_v42 = vld [vmem:[%s14410_s2 + $0x9e0] sm:$0xff]  ;;  %14810 = vst [vmem:[#allocation20_spill] sm:$0xff] %v8507_v32  ;;  %14813 = vst [vmem:[#allocation23_spill] sm:$0xff] %v8541_v57  ;;  %v8562_v9 = vadd.f32 %v364_v26, %v220_v16  ;;  %v637_v16 = vmul.f32 %v8509_v35, %v8509_v35  ;;  %v365_v26 = vld [vmem:[%s14409_s1 + $0x150] sm:$0xff] }
  0x51   : > { %v195_v43 = vld [vmem:[%s8164_s13 + $0x80] sm:$0xff]  ;;  %v7254_v2 = vcombine.low %v8387_v41, %v8392_v42  ;;  %v7255_v3 = vcombine.high %v8387_v41, %v8392_v42  ;;  %4052 = vmatprep.subr.bf16.mxu1 %v7135_v44  ;;  %v8478_v17 = vpack.c.bf16 %v619_v51, %v611_v50  ;;  %v8537_v50 = vpack.c.bf16 %v636_v13, %v628_v12  ;;  %v213_v13 = vld [vmem:[%s8164_s13 + $0x110] sm:$0xff]  ;;  %v186_v28 = vld [vmem:[%s8164_s13 + $0x38] sm:$0xff] }
  0x52   : > { %v203_v47 = vld [vmem:[%s8164_s13 + $0xc0] sm:$0xff]  ;;  %4053 = vmatpush2.bf16.msra.mxu1 %v7134_v58  ;;  %v8550_v58 = vpack.c.bf16 %v638_v22, %v630_v21  ;;  %14815 = vst [vmem:[#allocation25_spill] sm:$0xff] %v8562_v9  ;;  %14816 = vst [vmem:[#allocation26_spill] sm:$0xff] %v8564_v10  ;;  %v8566_v12 = vadd.f32 %v366_v38, %v222_v36  ;;  %v629_v21 = vmul.f32 %v8507_v32, %v8507_v32  ;;  %v236_v36 = vld [vmem:[%s8164_s13 + $0x1c8] sm:$0xff] }
  0x53   : > { %v339_v48 = vld [vmem:[%s14409_s1 + $0x80] sm:$0xff]  ;;  %14808 = vst [vmem:[#allocation18_spill] sm:$0xff] %v8478_v17  ;;  %4145 = vmatprep.subr.bf16.mxu0 %v7255_v3  ;;  %14812 = vst [vmem:[#allocation22_spill] sm:$0xff] %v8537_v50  ;;  %3932 = vmatmul.mubr.bf16.vlgmr.msra.gmra.mxu0 %v8478_v17  ;;  %v644_v42 = vmul.f32 %v8541_v57, %v8541_v57  ;;  %v374_v38 = vld [vmem:[%s14409_s1 + $0x198] sm:$0xff] }
  0x54   : > { %v347_v49 = vld [vmem:[%s14409_s1 + $0xc0] sm:$0xff]  ;;  %v8454_v4 = vadd.f32 %v339_v48, %v195_v43  ;;  %14814 = vst [vmem:[#allocation24_spill] sm:$0xff] %v8550_v58  ;;  %14817 = vst [vmem:[#allocation27_spill] sm:$0xff] %v8566_v12  ;;  %4146 = vmatpush1.bf16.msra.mxu0 %v7254_v2  ;;  %3941 = vmatprep.mubr.bf16.mxu0 %v8537_v50  ;;  %v381_v35 = vld [vmem:[%s14409_s1 + $0x1d0] sm:$0xff] }
  0x55   : > { %v8415_v52 = vld [vmem:[%s14410_s2 + $0xdc0] sm:$0xff]  ;;  %v8456_v5 = vadd.f32 %v347_v49, %v203_v47  ;;  %4055 = vmatmul.mubr.bf16.vlgmr.msra.gmra.mxu1 %v8503_v30  ;;  %v252_v32 = vld [vmem:[%s8164_s13 + $0x248] sm:$0xff] }
  0x56   : > { %v8420_v53 = vld [vmem:[%s14410_s2 + $0xde0] sm:$0xff]  ;;  %14806 = vst [vmem:[#allocation16_spill] sm:$0xff] %v8454_v4  ;;  %v627_v43 = vmul.f32 %v8454_v4, %v8454_v4  ;;  %4064 = vmatprep.mubr.bf16.mxu1 %v8550_v58  ;;  %v446_v4 = vld [vmem:[%s14409_s1 + $0x3d8] sm:$0xff] }
  0x57   : > { %v8425_v54 = vld [vmem:[%s14410_s2 + $0x980] sm:$0xff]  ;;  %14807 = vst [vmem:[#allocation17_spill] sm:$0xff] %v8456_v5  ;;  %v7383_v19 = vcombine.high %v8415_v52, %v8420_v53  ;;  %v635_v44 = vmul.f32 %v8456_v5, %v8456_v5  ;;  %v14819_v41 = vcombine.low %v8415_v52, %v8420_v53  ;;  %v652_v52 = vmul.f32 %v8562_v9, %v8562_v9 }
  0x58   : > { %v8442_v61 = vld [vmem:[%s14410_s2 + $0x9a0] sm:$0xff]  ;;  %v646_v53 = vmul.f32 %v8564_v10, %v8564_v10 }
  0x59   : > { %v8447_v62 = vld [vmem:[%s14410_s2 + $0xd80] sm:$0xff]  ;;  %v7247_v39 = vcombine.high %v8425_v54, %v8442_v61  ;;  %4268 = vmatprep.subr.bf16.mxu1 %v7383_v19  ;;  %v357_v19 = vld [vmem:[%s14409_s1 + $0x110] sm:$0xff]  ;;  %v8591_v37 = vpack.c.bf16 %v635_v44, %v627_v43  ;;  %v238_v44 = vld [vmem:[%s8164_s13 + $0x1d8] sm:$0xff] }
  0x5a   : > { %v8474_v14 = vld [vmem:[%s14410_s2 + $0xda0] sm:$0xff]  ;;  %4269 = vmatpush1.bf16.msra.mxu1 %v14819_v41 }
  0x5b   : > { %v8489_v23 = vld [vmem:[%s14410_s2 + $0x940] sm:$0xff]  ;;  %v7375_v51 = vcombine.high %v8447_v62, %v8474_v14  ;;  %14818 = vst [vmem:[#allocation28_spill] sm:$0xff] %v8591_v37  ;;  %4147 = vmatprep.subr.bf16.mxu0 %v7247_v39  ;;  %v654_v39 = vmul.f32 %v8566_v12, %v8566_v12  ;;  %v8644_v12 = vadd.f32 %v372_v40, %v228_v27 }
  0x5c   : > { %v8494_v24 = vld [vmem:[%s14410_s2 + $0x960] sm:$0xff]  ;;  %v8663_v40 = vadd.f32 %v374_v38, %v230_v11  ;;  %v8665_v27 = vadd.f32 %v382_v56, %v238_v44  ;;  %3942 = vmatmul.mubr.bf16.gmra.mxu0 %v8591_v37 }
  0x5d   : > { %v8529_v47 = vld [vmem:[%s14410_s2 + $0xd40] sm:$0xff]  ;;  %v7239_v25 = vcombine.high %v8489_v23, %v8494_v24  ;;  %4270 = vmatprep.subr.bf16.mxu1 %v7375_v51  ;;  %14824 = vst [vmem:[#allocation33_spill] sm:$0xff] %v8644_v12  ;;  %v14825_v51 = vcombine.low %v8425_v54, %v8442_v61  ;;  %v14830_v54 = vcombine.low %v8447_v62, %v8474_v14 }
  0x5e   : > { %v8534_v48 = vld [vmem:[%s14410_s2 + $0xd60] sm:$0xff]  ;;  %14828 = vst [vmem:[#allocation36_spill] sm:$0xff] %v8663_v40  ;;  %14829 = vst [vmem:[#allocation37_spill] sm:$0xff] %v8665_v27  ;;  %v8687_v14 = vpack.c.bf16 %v652_v52, %v644_v42  ;;  %v14833_v10 = vcombine.low %v8489_v23, %v8494_v24 }
  0x5f   : > { %v211_v49 = vld [vmem:[%s8164_s13 + $0x100] sm:$0xff]  ;;  %v7367_v22 = vcombine.high %v8529_v47, %v8534_v48  ;;  %4148 = vmatpush1.bf16.msra.mxu0 %v14825_v51  ;;  %4271 = vmatpush1.bf16.msra.mxu1 %v14830_v54  ;;  %v229_v51 = vld [vmem:[%s8164_s13 + $0x190] sm:$0xff]  ;;  %v14834_v23 = vcombine.low %v8529_v47, %v8534_v48 }
  0x60   : > { %v219_v59 = vld [vmem:[%s8164_s13 + $0x140] sm:$0xff]  ;;  %4149 = vmatprep.subr.bf16.mxu0 %v7239_v25  ;;  %14831 = vst [vmem:[#allocation38_spill] sm:$0xff] %v8687_v14  ;;  %v237_v54 = vld [vmem:[%s8164_s13 + $0x1d0] sm:$0xff]  ;;  %3951 = vmatprep.mubr.bf16.mxu0 %v8687_v14 }
  0x61   : > { %v355_v60 = vld [vmem:[%s14409_s1 + $0x100] sm:$0xff]  ;;  %4272 = vmatprep.subr.bf16.mxu1 %v7367_v22 }
  0x62   : > { %v363_v1 = vld [vmem:[%s14409_s1 + $0x140] sm:$0xff]  ;;  %v8609_v2 = vadd.f32 %v355_v60, %v211_v49  ;;  %v8632_v60 = vadd.f32 %v365_v26, %v221_v15  ;;  %v8661_v26 = vadd.f32 %v380_v31, %v236_v36  ;;  %v373_v49 = vld [vmem:[%s14409_s1 + $0x190] sm:$0xff] }
  0x63   : > { %v8555_v3 = vld [vmem:[%s14410_s2 + $0x900] sm:$0xff]  ;;  %v8611_v43 = vadd.f32 %v363_v1, %v219_v59  ;;  %v8630_v59 = vadd.f32 %v357_v19, %v213_v13  ;;  %v8649_v13 = vpack.c.bf16 %v637_v16, %v629_v21  ;;  %v8689_v16 = vpack.c.bf16 %v654_v39, %v646_v53  ;;  %4150 = vmatpush1.bf16.msra.mxu0 %v14833_v10 }
  0x64   : > { %v8560_v8 = vld [vmem:[%s14410_s2 + $0x920] sm:$0xff]  ;;  %14820 = vst [vmem:[#allocation29_spill] sm:$0xff] %v8609_v2  ;;  %14823 = vst [vmem:[#allocation32_spill] sm:$0xff] %v8632_v60  ;;  %v643_v21 = vmul.f32 %v8609_v2, %v8609_v2  ;;  %v653_v39 = vmul.f32 %v8632_v60, %v8632_v60  ;;  %v668_v60 = vmul.f32 %v8661_v26, %v8661_v26  ;;  %4273 = vmatpush1.bf16.msra.mxu1 %v14834_v23  ;;  %v398_v23 = vld [vmem:[%s14409_s1 + $0x258] sm:$0xff] }
  0x65   : > { %14821 = vst [vmem:[#allocation30_spill] sm:$0xff] %v8611_v43  ;;  %14822 = vst [vmem:[#allocation31_spill] sm:$0xff] %v8630_v59  ;;  %v8637_v1 = vld [vmem:[%s14410_s2 + $0xd00] sm:$0xff]  ;;  %v7231_v61 = vcombine.high %v8555_v3, %v8560_v8  ;;  %v651_v31 = vmul.f32 %v8611_v43, %v8611_v43  ;;  %v645_v53 = vmul.f32 %v8630_v59, %v8630_v59  ;;  %4065 = vmatmul.mubr.bf16.gmra.mxu1 %v8649_v13  ;;  %v436_v43 = vld [vmem:[%s14409_s1 + $0x388] sm:$0xff] }
  0x66   : > { %v8642_v41 = vld [vmem:[%s14410_s2 + $0xd20] sm:$0xff]  ;;  %14826 = vst [vmem:[#allocation34_spill] sm:$0xff] %v8649_v13  ;;  %14827 = vst [vmem:[#allocation35_spill] sm:$0xff] %v8661_v26  ;;  %v670_v59 = vmul.f32 %v8665_v27, %v8665_v27  ;;  %4074 = vmatprep.mubr.bf16.mxu1 %v8689_v16  ;;  %v294_v2 = vld [vmem:[%s8164_s13 + $0x398] sm:$0xff] }
  0x67   : > { %v8654_v15 = vld [vmem:[%s14410_s2 + $0x8c0] sm:$0xff]  ;;  %14832 = vst [vmem:[#allocation39_spill] sm:$0xff] %v8689_v16  ;;  %v7358_v25 = vcombine.low %v8637_v1, %v8642_v41  ;;  %v7359_v36 = vcombine.high %v8637_v1, %v8642_v41  ;;  %v660_v41 = vmul.f32 %v8644_v12, %v8644_v12  ;;  %v662_v1 = vmul.f32 %v8663_v40, %v8663_v40  ;;  %v388_v40 = vld [vmem:[%s14409_s1 + $0x208] sm:$0xff] }
  0x68   : > { %v8659_v19 = vld [vmem:[%s14410_s2 + $0x8e0] sm:$0xff]  ;;  %4151 = vmatprep.subr.bf16.mxu0 %v7231_v61  ;;  %v8744_v24 = vpack.c.bf16 %v651_v31, %v643_v21  ;;  %v254_v21 = vld [vmem:[%s8164_s13 + $0x258] sm:$0xff]  ;;  %v8772_v6 = vpack.c.bf16 %v653_v39, %v645_v53  ;;  %v412_v12 = vld [vmem:[%s14409_s1 + $0x2c8] sm:$0xff] }
  0x69   : > { %v8679_v56 = vld [vmem:[%s14410_s2 + $0xcc0] sm:$0xff]  ;;  %v7223_v10 = vcombine.high %v8654_v15, %v8659_v19  ;;  %v390_v31 = vld [vmem:[%s14409_s1 + $0x218] sm:$0xff]  ;;  %4274 = vmatprep.subr.bf16.mxu1 %v7359_v36  ;;  %v14841_v36 = vcombine.low %v8555_v3, %v8560_v8  ;;  %v8809_v3 = vadd.f32 %v388_v40, %v244_v55  ;;  %v8826_v55 = vadd.f32 %v398_v23, %v254_v21  ;;  %v253_v21 = vld [vmem:[%s8164_s13 + $0x250] sm:$0xff] }
  0x6a   : > { %v8684_v62 = vld [vmem:[%s14410_s2 + $0xce0] sm:$0xff]  ;;  %14835 = vst [vmem:[#allocation40_spill] sm:$0xff] %v8744_v24  ;;  %14838 = vst [vmem:[#allocation43_spill] sm:$0xff] %v8772_v6  ;;  %4275 = vmatpush1.bf16.msra.mxu1 %v7358_v25  ;;  %3952 = vmatmul.mubr.bf16.gmra.mxu0 %v8744_v24 }
  0x6b   : > { %v227_v11 = vld [vmem:[%s8164_s13 + $0x180] sm:$0xff]  ;;  %v7350_v27 = vcombine.low %v8679_v56, %v8684_v62  ;;  %v7351_v47 = vcombine.high %v8679_v56, %v8684_v62  ;;  %v8776_v62 = vadd.f32 %v373_v49, %v229_v51  ;;  %4152 = vmatpush1.bf16.msra.mxu0 %v14841_v36  ;;  %v8795_v49 = vpack.c.bf16 %v670_v59, %v662_v1  ;;  %v260_v56 = vld [vmem:[%s8164_s13 + $0x288] sm:$0xff] }
  0x6c   : > { %v8698_v38 = vld [vmem:[%s14410_s2 + $0x880] sm:$0xff]  ;;  %14844 = vst [vmem:[#allocation48_spill] sm:$0xff] %v8809_v3  ;;  %4153 = vmatprep.subr.bf16.mxu0 %v7223_v10  ;;  %v8822_v1 = vadd.f32 %v396_v7, %v252_v32  ;;  %14847 = vst [vmem:[#allocation51_spill] sm:$0xff] %v8826_v55  ;;  %v245_v10 = vld [vmem:[%s8164_s13 + $0x210] sm:$0xff] }
  0x6d   : > { %v8703_v22 = vld [vmem:[%s14410_s2 + $0x8a0] sm:$0xff]  ;;  %14839 = vst [vmem:[#allocation44_spill] sm:$0xff] %v8776_v62  ;;  %14843 = vst [vmem:[#allocation47_spill] sm:$0xff] %v8795_v49  ;;  %4276 = vmatprep.subr.bf16.mxu1 %v7351_v47  ;;  %v661_v47 = vmul.f32 %v8776_v62, %v8776_v62  ;;  %4075 = vmatmul.mubr.bf16.gmra.mxu1 %v8772_v6  ;;  %v14848_v62 = vcombine.low %v8654_v15, %v8659_v19 }
  0x6e   : > { %v235_v42 = vld [vmem:[%s8164_s13 + $0x1c0] sm:$0xff]  ;;  %14845 = vst [vmem:[#allocation49_spill] sm:$0xff] %v8822_v1  ;;  %4277 = vmatpush1.bf16.msra.mxu1 %v7350_v27  ;;  %v684_v15 = vmul.f32 %v8822_v1, %v8822_v1  ;;  %v414_v27 = vld [vmem:[%s14409_s1 + $0x2d8] sm:$0xff]  ;;  %4084 = vmatprep.mubr.bf16.mxu1 %v8795_v49 }
  0x6f   : > { %v371_v44 = vld [vmem:[%s14409_s1 + $0x180] sm:$0xff]  ;;  %4154 = vmatpush1.bf16.msra.mxu0 %v14848_v62  ;;  %v686_v62 = vmul.f32 %v8826_v55, %v8826_v55 }
  0x70   : > { %v379_v52 = vld [vmem:[%s14409_s1 + $0x1c0] sm:$0xff]  ;;  %v8761_v48 = vadd.f32 %v371_v44, %v227_v11  ;;  %v8778_v11 = vadd.f32 %v381_v35, %v237_v54  ;;  %v7215_v35 = vcombine.high %v8698_v38, %v8703_v22 }
  0x71   : > { %v8763_v61 = vadd.f32 %v379_v52, %v235_v42  ;;  %v8783_v42 = vld [vmem:[%s14410_s2 + $0xc80] sm:$0xff]  ;;  %v8793_v52 = vpack.c.bf16 %v668_v60, %v660_v41  ;;  %v8824_v41 = vadd.f32 %v390_v31, %v246_v34  ;;  %v389_v31 = vld [vmem:[%s14409_s1 + $0x210] sm:$0xff] }
  0x72   : > { %14836 = vst [vmem:[#allocation41_spill] sm:$0xff] %v8761_v48  ;;  %14840 = vst [vmem:[#allocation45_spill] sm:$0xff] %v8778_v11  ;;  %v8788_v44 = vld [vmem:[%s14410_s2 + $0xca0] sm:$0xff]  ;;  %v659_v7 = vmul.f32 %v8761_v48, %v8761_v48  ;;  %v669_v23 = vmul.f32 %v8778_v11, %v8778_v11  ;;  %v676_v11 = vmul.f32 %v8809_v3, %v8809_v3  ;;  %v262_v48 = vld [vmem:[%s8164_s13 + $0x298] sm:$0xff]  ;;  %4155 = vmatprep.subr.bf16.mxu0 %v7215_v35 }
  0x73   : > { %14837 = vst [vmem:[#allocation42_spill] sm:$0xff] %v8763_v61  ;;  %14842 = vst [vmem:[#allocation46_spill] sm:$0xff] %v8793_v52  ;;  %v8802_v53 = vld [vmem:[%s14410_s2 + $0x840] sm:$0xff]  ;;  %v667_v34 = vmul.f32 %v8763_v61, %v8763_v61  ;;  %v7342_v32 = vcombine.low %v8783_v42, %v8788_v44  ;;  %v7343_v54 = vcombine.high %v8783_v42, %v8788_v44  ;;  %v397_v44 = vld [vmem:[%s14409_s1 + $0x250] sm:$0xff]  ;;  %3961 = vmatprep.mubr.bf16.mxu0 %v8793_v52 }
  0x74   : > { %v8807_v39 = vld [vmem:[%s14410_s2 + $0x860] sm:$0xff]  ;;  %14846 = vst [vmem:[#allocation50_spill] sm:$0xff] %v8824_v41  ;;  %v404_v61 = vld [vmem:[%s14409_s1 + $0x288] sm:$0xff]  ;;  %v678_v19 = vmul.f32 %v8824_v41, %v8824_v41  ;;  %v8898_v41 = vadd.f32 %v397_v44, %v253_v21  ;;  %v8912_v35 = vpack.c.bf16 %v669_v23, %v661_v47 }
  0x75   : > { %v243_v8 = vld [vmem:[%s8164_s13 + $0x200] sm:$0xff]  ;;  %v7207_v42 = vcombine.high %v8802_v53, %v8807_v39  ;;  %v8910_v3 = vpack.c.bf16 %v667_v34, %v659_v7  ;;  %4278 = vmatprep.subr.bf16.mxu1 %v7343_v54  ;;  %v8926_v44 = vadd.f32 %v404_v61, %v260_v56  ;;  %v14856_v34 = vcombine.low %v8698_v38, %v8703_v22 }
  0x76   : > { %v8815_v59 = vld [vmem:[%s14410_s2 + $0xc40] sm:$0xff]  ;;  %14852 = vst [vmem:[#allocation55_spill] sm:$0xff] %v8898_v41  ;;  %14854 = vst [vmem:[#allocation57_spill] sm:$0xff] %v8912_v35  ;;  %4279 = vmatpush1.bf16.msra.mxu1 %v7342_v32  ;;  %v8947_v38 = vpack.c.bf16 %v684_v15, %v676_v11  ;;  %v8949_v22 = vpack.c.bf16 %v686_v62, %v678_v19  ;;  %v685_v11 = vmul.f32 %v8898_v41, %v8898_v41 }
  0x77   : > { %v8820_v60 = vld [vmem:[%s14410_s2 + $0xc60] sm:$0xff]  ;;  %14853 = vst [vmem:[#allocation56_spill] sm:$0xff] %v8910_v3  ;;  %14855 = vst [vmem:[#allocation58_spill] sm:$0xff] %v8926_v44  ;;  %4156 = vmatpush1.bf16.msra.mxu0 %v14856_v34  ;;  %v405_v34 = vld [vmem:[%s14409_s1 + $0x290] sm:$0xff]  ;;  %4085 = vmatmul.mubr.bf16.gmra.mxu1 %v8912_v35  ;;  %v14864_v41 = vcombine.low %v8802_v53, %v8807_v39 }
  0x78   : > { %v251_v40 = vld [vmem:[%s8164_s13 + $0x240] sm:$0xff]  ;;  %4157 = vmatprep.subr.bf16.mxu0 %v7207_v42  ;;  %14860 = vst [vmem:[#allocation62_spill] sm:$0xff] %v8947_v38  ;;  %14861 = vst [vmem:[#allocation63_spill] sm:$0xff] %v8949_v22  ;;  %3962 = vmatmul.mubr.bf16.gmra.mxu0 %v8910_v3 }
  0x79   : > { %v387_v25 = vld [vmem:[%s14409_s1 + $0x200] sm:$0xff]  ;;  %3971 = vmatprep.mubr.bf16.mxu0 %v8947_v38  ;;  %4094 = vmatprep.mubr.bf16.mxu1 %v8949_v22 }
  0x7a   : > { %v395_v51 = vld [vmem:[%s14409_s1 + $0x240] sm:$0xff]  ;;  %v8868_v36 = vadd.f32 %v387_v25, %v243_v8  ;;  %v270_v8 = vld [vmem:[%s8164_s13 + $0x2d8] sm:$0xff]  ;;  %v7335_v25 = vcombine.high %v8815_v59, %v8820_v60 }
  0x7b   : > { %v8870_v26 = vadd.f32 %v395_v51, %v251_v40  ;;  %v406_v40 = vld [vmem:[%s14409_s1 + $0x298] sm:$0xff]  ;;  %v8896_v51 = vadd.f32 %v389_v31, %v245_v10  ;;  %v8903_v55 = vld [vmem:[%s14410_s2 + $0x800] sm:$0xff]  ;;  %v7334_v10 = vcombine.low %v8815_v59, %v8820_v60  ;;  %v8934_v60 = vadd.f32 %v412_v12, %v268_v33  ;;  %4158 = vmatpush1.bf16.msra.mxu0 %v14864_v41  ;;  %v420_v41 = vld [vmem:[%s14409_s1 + $0x308] sm:$0xff] }
  0x7c   : > { %14849 = vst [vmem:[#allocation52_spill] sm:$0xff] %v8868_v36  ;;  %v8908_v1 = vld [vmem:[%s14410_s2 + $0x820] sm:$0xff]  ;;  %v675_v59 = vmul.f32 %v8868_v36, %v8868_v36  ;;  %v8936_v54 = vadd.f32 %v406_v40, %v262_v48  ;;  %v8938_v47 = vadd.f32 %v414_v27, %v270_v8  ;;  %4280 = vmatprep.subr.bf16.mxu1 %v7335_v25  ;;  %v261_v27 = vld [vmem:[%s8164_s13 + $0x290] sm:$0xff]  ;;  %v430_v36 = vld [vmem:[%s14409_s1 + $0x358] sm:$0xff] }
  0x7d   : > { %14850 = vst [vmem:[#allocation53_spill] sm:$0xff] %v8870_v26  ;;  %14851 = vst [vmem:[#allocation54_spill] sm:$0xff] %v8896_v51  ;;  %v8919_v21 = vld [vmem:[%s14410_s2 + $0xc00] sm:$0xff]  ;;  %v683_v33 = vmul.f32 %v8870_v26, %v8870_v26  ;;  %v677_v48 = vmul.f32 %v8896_v51, %v8896_v51  ;;  %v7198_v32 = vcombine.low %v8903_v55, %v8908_v1  ;;  %v269_v25 = vld [vmem:[%s8164_s13 + $0x2d0] sm:$0xff]  ;;  %4281 = vmatpush1.bf16.msra.mxu1 %v7334_v10 }
  0x7e   : > { %v8924_v31 = vld [vmem:[%s14410_s2 + $0xc20] sm:$0xff]  ;;  %14857 = vst [vmem:[#allocation59_spill] sm:$0xff] %v8934_v60  ;;  %14858 = vst [vmem:[#allocation60_spill] sm:$0xff] %v8936_v54  ;;  %v7199_v42 = vcombine.high %v8903_v55, %v8908_v1  ;;  %v692_v55 = vmul.f32 %v8926_v44, %v8926_v44  ;;  %v700_v51 = vmul.f32 %v8934_v60, %v8934_v60  ;;  %v284_v44 = vld [vmem:[%s8164_s13 + $0x348] sm:$0xff] }
  0x7f   : > { %v259_v7 = vld [vmem:[%s8164_s13 + $0x280] sm:$0xff]  ;;  %14859 = vst [vmem:[#allocation61_spill] sm:$0xff] %v8938_v47  ;;  %v7327_v1 = vcombine.high %v8919_v21, %v8924_v31  ;;  %v7326_v53 = vcombine.low %v8919_v21, %v8924_v31  ;;  %v9023_v10 = vpack.c.bf16 %v683_v33, %v675_v59  ;;  %v286_v60 = vld [vmem:[%s8164_s13 + $0x358] sm:$0xff]  ;;  %v9054_v9 = vpack.c.bf16 %v685_v11, %v677_v48 }
  0x80   : > { %v267_v23 = vld [vmem:[%s8164_s13 + $0x2c0] sm:$0xff]  ;;  %4159 = vmatprep.subr.bf16.mxu0 %v7199_v42  ;;  %v422_v26 = vld [vmem:[%s14409_s1 + $0x318] sm:$0xff] }
  0x81   : > { %v403_v61 = vld [vmem:[%s14409_s1 + $0x280] sm:$0xff]  ;;  %14865 = vst [vmem:[#allocation66_spill] sm:$0xff] %v9023_v10  ;;  %4282 = vmatprep.subr.bf16.mxu1 %v7327_v1  ;;  %14868 = vst [vmem:[#allocation69_spill] sm:$0xff] %v9054_v9  ;;  %4160 = vmatpush1.bf16.msra.mxu0 %v7198_v32 }
  0x82   : > { %v411_v56 = vld [vmem:[%s14409_s1 + $0x2c0] sm:$0xff]  ;;  %v8986_v8 = vadd.f32 %v403_v61, %v259_v7  ;;  %v694_v7 = vmul.f32 %v8936_v54, %v8936_v54  ;;  %v413_v61 = vld [vmem:[%s14409_s1 + $0x2d0] sm:$0xff]  ;;  %v278_v54 = vld [vmem:[%s8164_s13 + $0x318] sm:$0xff]  ;;  %4283 = vmatpush1.bf16.msra.mxu1 %v7326_v53  ;;  %3972 = vmatmul.mubr.bf16.gmra.mxu0 %v9023_v10 }
  0x83   : > { %v8956_v12 = vld [vmem:[%s14410_s2 + $0xbc0] sm:$0xff]  ;;  %v8988_v40 = vadd.f32 %v411_v56, %v267_v23  ;;  %v702_v23 = vmul.f32 %v8938_v47, %v8938_v47  ;;  %v276_v56 = vld [vmem:[%s8164_s13 + $0x308] sm:$0xff]  ;;  %v9042_v42 = vadd.f32 %v413_v61, %v269_v25  ;;  %4095 = vmatmul.mubr.bf16.gmra.mxu1 %v9054_v9 }
  0x84   : > { %v8969_v15 = vld [vmem:[%s14410_s2 + $0xbe0] sm:$0xff]  ;;  %14862 = vst [vmem:[#allocation64_spill] sm:$0xff] %v8986_v8  ;;  %v428_v47 = vld [vmem:[%s14409_s1 + $0x348] sm:$0xff]  ;;  %v691_v59 = vmul.f32 %v8986_v8, %v8986_v8  ;;  %v9056_v8 = vpack.c.bf16 %v700_v51, %v692_v55  ;;  %v9075_v51 = vadd.f32 %v420_v41, %v276_v56  ;;  %v9084_v55 = vadd.f32 %v422_v26, %v278_v54 }
  0x85   : > { %v8974_v19 = vld [vmem:[%s14410_s2 + $0xfc0] sm:$0xff]  ;;  %14863 = vst [vmem:[#allocation65_spill] sm:$0xff] %v8988_v40  ;;  %v7319_v39 = vcombine.high %v8956_v12, %v8969_v15  ;;  %v7318_v21 = vcombine.low %v8956_v12, %v8969_v15  ;;  %v699_v33 = vmul.f32 %v8988_v40, %v8988_v40  ;;  %v9040_v12 = vadd.f32 %v405_v34, %v261_v27  ;;  %v300_v40 = vld [vmem:[%s8164_s13 + $0x3c8] sm:$0xff] }
  0x86   : > { %v8979_v62 = vld [vmem:[%s14410_s2 + $0xfe0] sm:$0xff]  ;;  %14867 = vst [vmem:[#allocation68_spill] sm:$0xff] %v9042_v42  ;;  %14869 = vst [vmem:[#allocation70_spill] sm:$0xff] %v9056_v8  ;;  %v9058_v27 = vpack.c.bf16 %v702_v23, %v694_v7  ;;  %v9082_v32 = vadd.f32 %v428_v47, %v284_v44  ;;  %v9086_v7 = vadd.f32 %v430_v36, %v286_v60  ;;  %v277_v47 = vld [vmem:[%s8164_s13 + $0x310] sm:$0xff]  ;;  %3981 = vmatprep.mubr.bf16.mxu0 %v9056_v8 }
  0x87   : > { %v7447_v31 = vcombine.high %v8974_v19, %v8979_v62  ;;  %14866 = vst [vmem:[#allocation67_spill] sm:$0xff] %v9040_v12  ;;  %v9047_v15 = vld [vmem:[%s14410_s2 + $0xb80] sm:$0xff]  ;;  %14871 = vst [vmem:[#allocation72_spill] sm:$0xff] %v9075_v51  ;;  %4161 = vmatprep.subr.bf16.mxu0 %v7319_v39  ;;  %v7446_v56 = vcombine.low %v8974_v19, %v8979_v62  ;;  %v9114_v19 = vpack.c.bf16 %v699_v33, %v691_v59 }
  0x88   : > { %v9052_v1 = vld [vmem:[%s14410_s2 + $0xba0] sm:$0xff]  ;;  %14870 = vst [vmem:[#allocation71_spill] sm:$0xff] %v9058_v27  ;;  %14872 = vst [vmem:[#allocation73_spill] sm:$0xff] %v9082_v32  ;;  %v693_v62 = vmul.f32 %v9040_v12, %v9040_v12  ;;  %v701_v39 = vmul.f32 %v9042_v42, %v9042_v42  ;;  %4162 = vmatpush2.bf16.msra.mxu0 %v7318_v21  ;;  %v708_v33 = vmul.f32 %v9075_v51, %v9075_v51  ;;  %v292_v12 = vld [vmem:[%s8164_s13 + $0x388] sm:$0xff] }
  0x89   : > { %v9063_v25 = vld [vmem:[%s14410_s2 + $0xf80] sm:$0xff]  ;;  %14873 = vst [vmem:[#allocation74_spill] sm:$0xff] %v9084_v55  ;;  %14874 = vst [vmem:[#allocation75_spill] sm:$0xff] %v9086_v7  ;;  %4284 = vmatprep.subr.bf16.mxu1 %v7447_v31  ;;  %v7310_v53 = vcombine.low %v9047_v15, %v9052_v1  ;;  %v7311_v44 = vcombine.high %v9047_v15, %v9052_v1  ;;  %v285_v31 = vld [vmem:[%s8164_s13 + $0x350] sm:$0xff]  ;;  %4104 = vmatprep.mubr.bf16.mxu1 %v9058_v27 }
  0x8a   : > { %v9068_v34 = vld [vmem:[%s14410_s2 + $0xfa0] sm:$0xff]  ;;  %14875 = vst [vmem:[#allocation76_spill] sm:$0xff] %v9114_v19  ;;  %v421_v15 = vld [vmem:[%s14409_s1 + $0x310] sm:$0xff]  ;;  %v716_v21 = vmul.f32 %v9082_v32, %v9082_v32  ;;  %v710_v57 = vmul.f32 %v9084_v55, %v9084_v55  ;;  %v444_v32 = vld [vmem:[%s14409_s1 + $0x3c8] sm:$0xff]  ;;  %4285 = vmatpush2.bf16.msra.mxu1 %v7446_v56  ;;  %v9177_v29 = vpack.c.bf16 %v701_v39, %v693_v62 }
  0x8b   : > { %v9073_v48 = vld [vmem:[%s14410_s2 + $0xb40] sm:$0xff]  ;;  %v7439_v41 = vcombine.high %v9063_v25, %v9068_v34  ;;  %v429_v1 = vld [vmem:[%s14409_s1 + $0x350] sm:$0xff]  ;;  %v302_v55 = vld [vmem:[%s8164_s13 + $0x3d8] sm:$0xff]  ;;  %4163 = vmatprep.subr.bf16.mxu0 %v7311_v44  ;;  %3982 = vmatmul.mubr.bf16.gmra.mxu0 %v9114_v19 }
  0x8c   : > { %v9080_v11 = vld [vmem:[%s14410_s2 + $0xb60] sm:$0xff]  ;;  %14878 = vst [vmem:[#allocation79_spill] sm:$0xff] %v9177_v29  ;;  %4164 = vmatpush2.bf16.msra.mxu0 %v7310_v53  ;;  %v9208_v53 = vadd.f32 %v444_v32, %v300_v40  ;;  %v9210_v62 = vpack.c.bf16 %v716_v21, %v708_v33  ;;  %4105 = vmatmul.mubr.bf16.gmra.mxu1 %v9177_v29 }
  0x8d   : > { %v275_v23 = vld [vmem:[%s8164_s13 + $0x300] sm:$0xff]  ;;  %v7303_v59 = vcombine.high %v9073_v48, %v9080_v11  ;;  %v7302_v46 = vcombine.low %v9073_v48, %v9080_v11  ;;  %4286 = vmatprep.subr.bf16.mxu1 %v7439_v41  ;;  %v9183_v48 = vadd.f32 %v421_v15, %v277_v47  ;;  %v9206_v47 = vadd.f32 %v436_v43, %v292_v12 }
  0x8e   : > { %v419_v61 = vld [vmem:[%s14409_s1 + $0x300] sm:$0xff]  ;;  %14882 = vst [vmem:[#allocation83_spill] sm:$0xff] %v9208_v53  ;;  %14883 = vst [vmem:[#allocation84_spill] sm:$0xff] %v9210_v62  ;;  %v9221_v15 = vadd.f32 %v446_v4, %v302_v55  ;;  %v301_v4 = vld [vmem:[%s8164_s13 + $0x3d0] sm:$0xff]  ;;  %v732_v21 = vmul.f32 %v9208_v53, %v9208_v53  ;;  %3991 = vmatprep.mubr.bf16.mxu0 %v9210_v62 }
  0x8f   : > { %v9101_v26 = vld [vmem:[%s14410_s2 + $0xf40] sm:$0xff]  ;;  %v9134_v42 = vadd.f32 %v419_v61, %v275_v23  ;;  %v718_v23 = vmul.f32 %v9086_v7, %v9086_v7  ;;  %v7438_v7 = vcombine.low %v9063_v25, %v9068_v34  ;;  %14879 = vst [vmem:[#allocation80_spill] sm:$0xff] %v9183_v48  ;;  %14881 = vst [vmem:[#allocation82_spill] sm:$0xff] %v9206_v47  ;;  %4165 = vmatprep.subr.bf16.mxu0 %v7303_v59  ;;  %v418_v62 = vld [vmem:[%s14409_s1 + $0x2f8] sm:$0xff] }
  0x90   : > { %v9106_v36 = vld [vmem:[%s14410_s2 + $0xf60] sm:$0xff]  ;;  %14886 = vst [vmem:[#allocation87_spill] sm:$0xff] %v9221_v15  ;;  %4166 = vmatpush2.bf16.msra.mxu0 %v7302_v46  ;;  %v724_v33 = vmul.f32 %v9206_v47, %v9206_v47  ;;  %v318_v47 = vld [vmem:[%s8164_s13 + $0x458] sm:$0xff] }
  0x91   : > { %v283_v60 = vld [vmem:[%s8164_s13 + $0x340] sm:$0xff]  ;;  %14876 = vst [vmem:[#allocation77_spill] sm:$0xff] %v9134_v42  ;;  %v7430_v25 = vcombine.low %v9101_v26, %v9106_v36  ;;  %v7431_v34 = vcombine.high %v9101_v26, %v9106_v36  ;;  %v9212_v39 = vpack.c.bf16 %v718_v23, %v710_v57  ;;  %4287 = vmatpush2.bf16.msra.mxu1 %v7438_v7 }
  0x92   : > { %v427_v54 = vld [vmem:[%s14409_s1 + $0x340] sm:$0xff] }
  0x93   : > { %v9152_v61 = vld [vmem:[%s14410_s2 + $0xb00] sm:$0xff]  ;;  %v9168_v5 = vadd.f32 %v427_v54, %v283_v60  ;;  %v707_v60 = vmul.f32 %v9134_v42, %v9134_v42  ;;  %v9194_v54 = vadd.f32 %v429_v1, %v285_v31  ;;  %14884 = vst [vmem:[#allocation85_spill] sm:$0xff] %v9212_v39  ;;  %v9219_v31 = vadd.f32 %v438_v45, %v294_v2  ;;  %v293_v45 = vld [vmem:[%s8164_s13 + $0x390] sm:$0xff]  ;;  %v462_v42 = vld [vmem:[%s14409_s1 + $0x458] sm:$0xff] }
  0x94   : > { %v9157_v51 = vld [vmem:[%s14410_s2 + $0xb20] sm:$0xff]  ;;  %4288 = vmatprep.subr.bf16.mxu1 %v7431_v34  ;;  %v709_v2 = vmul.f32 %v9183_v48, %v9183_v48  ;;  %v445_v1 = vld [vmem:[%s14409_s1 + $0x3d0] sm:$0xff]  ;;  %v316_v34 = vld [vmem:[%s8164_s13 + $0x448] sm:$0xff]  ;;  %4114 = vmatprep.mubr.bf16.mxu1 %v9212_v39 }
  0x95   : > { %14877 = vst [vmem:[#allocation78_spill] sm:$0xff] %v9168_v5  ;;  %v291_v0 = vld [vmem:[%s8164_s13 + $0x380] sm:$0xff]  ;;  %14880 = vst [vmem:[#allocation81_spill] sm:$0xff] %v9194_v54  ;;  %v715_v43 = vmul.f32 %v9168_v5, %v9168_v5  ;;  %v7295_v40 = vcombine.high %v9152_v61, %v9157_v51  ;;  %v7294_v55 = vcombine.low %v9152_v61, %v9157_v51  ;;  %v308_v61 = vld [vmem:[%s8164_s13 + $0x408] sm:$0xff]  ;;  %4289 = vmatpush2.bf16.msra.mxu1 %v7430_v25 }
  0x96   : > { %v299_v11 = vld [vmem:[%s8164_s13 + $0x3c0] sm:$0xff]  ;;  %14885 = vst [vmem:[#allocation86_spill] sm:$0xff] %v9219_v31  ;;  %v717_v51 = vmul.f32 %v9194_v54, %v9194_v54  ;;  %v460_v54 = vld [vmem:[%s14409_s1 + $0x448] sm:$0xff]  ;;  %v310_v48 = vld [vmem:[%s8164_s13 + $0x418] sm:$0xff] }
  0x97   : > { %v435_v56 = vld [vmem:[%s14409_s1 + $0x380] sm:$0xff]  ;;  %4167 = vmatprep.subr.bf16.mxu0 %v7295_v40  ;;  %v454_v5 = vld [vmem:[%s14409_s1 + $0x418] sm:$0xff]  ;;  %v9298_v25 = vpack.c.bf16 %v715_v43, %v707_v60  ;;  %v9318_v43 = vpack.c.bf16 %v732_v21, %v724_v33 }
  0x98   : > { %v443_v44 = vld [vmem:[%s14409_s1 + $0x3c0] sm:$0xff]  ;;  %v9232_v12 = vadd.f32 %v435_v56, %v291_v0  ;;  %v437_v0 = vld [vmem:[%s14409_s1 + $0x390] sm:$0xff]  ;;  %v734_v56 = vmul.f32 %v9221_v15, %v9221_v15  ;;  %v9316_v60 = vpack.c.bf16 %v717_v51, %v709_v2  ;;  %4168 = vmatpush2.bf16.msra.mxu0 %v7294_v55  ;;  %v9340_v51 = vadd.f32 %v462_v42, %v318_v47 }
  0x99   : > { %v9199_v26 = vld [vmem:[%s14410_s2 + $0xf00] sm:$0xff]  ;;  %v9234_v32 = vadd.f32 %v443_v44, %v299_v11  ;;  %v726_v11 = vmul.f32 %v9219_v31, %v9219_v31  ;;  %v452_v44 = vld [vmem:[%s14409_s1 + $0x408] sm:$0xff]  ;;  %14889 = vst [vmem:[#allocation90_spill] sm:$0xff] %v9298_v25  ;;  %v9300_v40 = vadd.f32 %v437_v0, %v293_v45  ;;  %14893 = vst [vmem:[#allocation94_spill] sm:$0xff] %v9318_v43  ;;  %3992 = vmatmul.mubr.bf16.gmra.mxu0 %v9298_v25 }
  0x9a   : > { %v9204_v36 = vld [vmem:[%s14410_s2 + $0xf20] sm:$0xff]  ;;  %14887 = vst [vmem:[#allocation88_spill] sm:$0xff] %v9232_v12  ;;  %v723_v31 = vmul.f32 %v9232_v12, %v9232_v12  ;;  %14892 = vst [vmem:[#allocation93_spill] sm:$0xff] %v9316_v60  ;;  %v9332_v0 = vadd.f32 %v460_v54, %v316_v34  ;;  %v317_v34 = vld [vmem:[%s8164_s13 + $0x450] sm:$0xff]  ;;  %4115 = vmatmul.mubr.bf16.gmra.mxu1 %v9316_v60  ;;  %4001 = vmatprep.mubr.bf16.mxu0 %v9318_v43 }
  0x9b   : > { %v9217_v41 = vld [vmem:[%s14410_s2 + $0xac0] sm:$0xff]  ;;  %14888 = vst [vmem:[#allocation89_spill] sm:$0xff] %v9234_v32  ;;  %v7423_v7 = vcombine.high %v9199_v26, %v9204_v36  ;;  %v7422_v53 = vcombine.low %v9199_v26, %v9204_v36  ;;  %v731_v15 = vmul.f32 %v9234_v32, %v9234_v32  ;;  %14890 = vst [vmem:[#allocation91_spill] sm:$0xff] %v9300_v40  ;;  %v386_v60 = vld [vmem:[%s14409_s1 + $0x1f8] sm:$0xff] }
  0x9c   : > { %v9230_v57 = vld [vmem:[%s14410_s2 + $0xae0] sm:$0xff]  ;;  %v9302_v26 = vadd.f32 %v445_v1, %v301_v4  ;;  %14895 = vst [vmem:[#allocation96_spill] sm:$0xff] %v9332_v0  ;;  %v9336_v55 = vpack.c.bf16 %v734_v56, %v726_v11  ;;  %v9338_v1 = vadd.f32 %v454_v5, %v310_v48  ;;  %14898 = vst [vmem:[#allocation99_spill] sm:$0xff] %v9340_v51 }
  0x9d   : > { %v9254_v59 = vld [vmem:[%s14410_s2 + $0xec0] sm:$0xff]  ;;  %v7287_v46 = vcombine.high %v9217_v41, %v9230_v57  ;;  %4290 = vmatprep.subr.bf16.mxu1 %v7423_v7  ;;  %v9330_v7 = vadd.f32 %v452_v44, %v308_v61  ;;  %v7286_v2 = vcombine.low %v9217_v41, %v9230_v57  ;;  %v9357_v5 = vpack.c.bf16 %v731_v15, %v723_v31  ;;  %v309_v61 = vld [vmem:[%s8164_s13 + $0x410] sm:$0xff] }
  0x9e   : > { %v9266_v23 = vld [vmem:[%s14410_s2 + $0xee0] sm:$0xff]  ;;  %14891 = vst [vmem:[#allocation92_spill] sm:$0xff] %v9302_v26  ;;  %14896 = vst [vmem:[#allocation97_spill] sm:$0xff] %v9336_v55  ;;  %4291 = vmatpush2.bf16.msra.mxu1 %v7422_v53  ;;  %v725_v53 = vmul.f32 %v9300_v40, %v9300_v40  ;;  %v733_v31 = vmul.f32 %v9302_v26, %v9302_v26  ;;  %v748_v44 = vmul.f32 %v9332_v0, %v9332_v0  ;;  %v184_v26 = vld [vmem:[%s8164_s13 + $0x28] sm:$0xff] }
  0x9f   : > { %v7415_v36 = vcombine.high %v9254_v59, %v9266_v23  ;;  %v9309_v32 = vld [vmem:[%s14410_s2 + $0xa80] sm:$0xff]  ;;  %14894 = vst [vmem:[#allocation95_spill] sm:$0xff] %v9330_v7  ;;  %4169 = vmatprep.subr.bf16.mxu0 %v7287_v46  ;;  %14897 = vst [vmem:[#allocation98_spill] sm:$0xff] %v9338_v1  ;;  %v7414_v42 = vcombine.low %v9254_v59, %v9266_v23  ;;  %v453_v59 = vld [vmem:[%s14409_s1 + $0x410] sm:$0xff]  ;;  %v740_v56 = vmul.f32 %v9330_v7, %v9330_v7 }
  0xa0   : > { %v9314_v12 = vld [vmem:[%s14410_s2 + $0xaa0] sm:$0xff]  ;;  %14899 = vst [vmem:[#allocation100_spill] sm:$0xff] %v9357_v5  ;;  %v461_v23 = vld [vmem:[%s14409_s1 + $0x450] sm:$0xff]  ;;  %v192_v40 = vld [vmem:[%s8164_s13 + $0x68] sm:$0xff]  ;;  %4124 = vmatprep.mubr.bf16.mxu1 %v9336_v55  ;;  %4170 = vmatpush2.bf16.msra.mxu0 %v7286_v2  ;;  %v9428_v43 = vpack.c.bf16 %v733_v31, %v725_v53 }
  0xa1   : > { %v9323_v45 = vld [vmem:[%s14410_s2 + $0xe80] sm:$0xff]  ;;  %v7279_v48 = vcombine.high %v9309_v32, %v9314_v12  ;;  %4292 = vmatprep.subr.bf16.mxu1 %v7415_v36  ;;  %v7278_v11 = vcombine.low %v9309_v32, %v9314_v12  ;;  %v742_v12 = vmul.f32 %v9338_v1, %v9338_v1  ;;  %v750_v32 = vmul.f32 %v9340_v51, %v9340_v51  ;;  %v328_v0 = vld [vmem:[%s14409_s1 + $0x28] sm:$0xff]  ;;  %v338_v55 = vld [vmem:[%s14409_s1 + $0x78] sm:$0xff] }
  0xa2   : > { %v9328_v4 = vld [vmem:[%s14410_s2 + $0xea0] sm:$0xff]  ;;  %4293 = vmatpush2.bf16.msra.mxu1 %v7414_v42  ;;  %14902 = vst [vmem:[#allocation103_spill] sm:$0xff] %v9428_v43  ;;  %v9430_v42 = vadd.f32 %v453_v59, %v309_v61  ;;  %v9460_v31 = vadd.f32 %v328_v0, %v184_v26  ;;  %4002 = vmatmul.mubr.bf16.gmra.mxu0 %v9357_v5  ;;  %v361_v5 = vld [vmem:[%s14409_s1 + $0x130] sm:$0xff] }
  0xa3   : > { %v9345_v33 = vld [vmem:[%s14410_s2 + $0xa40] sm:$0xff]  ;;  %v7407_v15 = vcombine.high %v9323_v45, %v9328_v4  ;;  %4171 = vmatprep.subr.bf16.mxu0 %v7279_v48  ;;  %v7406_v2 = vcombine.low %v9323_v45, %v9328_v4  ;;  %v9432_v45 = vadd.f32 %v461_v23, %v317_v34  ;;  %v9464_v59 = vpack.c.bf16 %v750_v32, %v742_v12  ;;  %v9501_v32 = vld [vmem:[%s14410_s2 + $0x1c8] sm:$0xff] }
  0xa4   : > { %v9350_v54 = vld [vmem:[%s14410_s2 + $0xa60] sm:$0xff]  ;;  %14903 = vst [vmem:[#allocation104_spill] sm:$0xff] %v9430_v42  ;;  %14906 = vst [vmem:[#allocation107_spill] sm:$0xff] %v9460_v31  ;;  %4172 = vmatpush2.bf16.msra.mxu0 %v7278_v11  ;;  %v193_v11 = vld [vmem:[%s8164_s13 + $0x70] sm:$0xff]  ;;  %4125 = vmatmul.mubr.bf16.gmra.mxu1 %v9428_v43 }
  0xa5   : > { %v307_v21 = vld [vmem:[%s8164_s13 + $0x400] sm:$0xff]  ;;  %v7271_v1 = vcombine.high %v9345_v33, %v9350_v54  ;;  %4294 = vmatprep.subr.bf16.mxu1 %v7407_v15  ;;  %14904 = vst [vmem:[#allocation105_spill] sm:$0xff] %v9432_v45  ;;  %v7270_v61 = vcombine.low %v9345_v33, %v9350_v54  ;;  %v9462_v15 = vadd.f32 %v336_v63, %v192_v40  ;;  %14908 = vst [vmem:[#allocation109_spill] sm:$0xff] %v9464_v59 }
  0xa6   : > { %v315_v41 = vld [vmem:[%s8164_s13 + $0x440] sm:$0xff]  ;;  %4295 = vmatpush2.bf16.msra.mxu1 %v7406_v2  ;;  %v749_v12 = vmul.f32 %v9432_v45, %v9432_v45  ;;  %v9506_v2 = vld [vmem:[%s14410_s2 + $0x1e8] sm:$0xff]  ;;  %v337_v45 = vld [vmem:[%s14409_s1 + $0x70] sm:$0xff]  ;;  %4134 = vmatprep.mubr.bf16.mxu1 %v9464_v59 }
  0xa7   : > { %v451_v57 = vld [vmem:[%s14409_s1 + $0x400] sm:$0xff]  ;;  %14907 = vst [vmem:[#allocation108_spill] sm:$0xff] %v9462_v15  ;;  %4173 = vmatprep.subr.bf16.mxu0 %v7271_v1  ;;  %v741_v1 = vmul.f32 %v9430_v42, %v9430_v42  ;;  %v9522_v42 = vld [vmem:[%s14410_s2 + $0x5c8] sm:$0xff] }
  0xa8   : > { %v459_v47 = vld [vmem:[%s14409_s1 + $0x440] sm:$0xff]  ;;  %v9406_v7 = vadd.f32 %v451_v57, %v307_v21  ;;  %v194_v21 = vld [vmem:[%s8164_s13 + $0x78] sm:$0xff]  ;;  %4174 = vmatpush2.bf16.msra.mxu0 %v7270_v61  ;;  %v7001_v61 = vcombine.high %v9501_v32, %v9506_v2 }
  0xa9   : > { %v9384_v46 = vld [vmem:[%s14410_s2 + $0xe40] sm:$0xff]  ;;  %v9419_v51 = vadd.f32 %v459_v47, %v315_v41  ;;  %v330_v57 = vld [vmem:[%s14409_s1 + $0x38] sm:$0xff]  ;;  %v9446_v47 = vpack.c.bf16 %v748_v44, %v740_v56  ;;  %v9470_v23 = vadd.f32 %v338_v55, %v194_v21  ;;  %v185_v55 = vld [vmem:[%s8164_s13 + $0x30] sm:$0xff] }
  0xaa   : > { %v9397_v36 = vld [vmem:[%s14410_s2 + $0xe60] sm:$0xff]  ;;  %14900 = vst [vmem:[#allocation101_spill] sm:$0xff] %v9406_v7  ;;  %v739_v33 = vmul.f32 %v9406_v7, %v9406_v7  ;;  %v9468_v54 = vadd.f32 %v330_v57, %v186_v28  ;;  %v616_v57 = vmul.f32 %v9460_v31, %v9460_v31  ;;  %v208_v7 = vld [vmem:[%s8164_s13 + $0xe8] sm:$0xff] }
  0xab   : > { %14901 = vst [vmem:[#allocation102_spill] sm:$0xff] %v9419_v51  ;;  %v7399_v4 = vcombine.high %v9384_v46, %v9397_v36  ;;  %v9439_v41 = vld [vmem:[%s14410_s2 + $0xa00] sm:$0xff]  ;;  %14905 = vst [vmem:[#allocation106_spill] sm:$0xff] %v9446_v47  ;;  %v747_v63 = vmul.f32 %v9419_v51, %v9419_v51  ;;  %v7398_v40 = vcombine.low %v9384_v46, %v9397_v36  ;;  %v329_v36 = vld [vmem:[%s14409_s1 + $0x30] sm:$0xff]  ;;  %4011 = vmatprep.mubr.bf16.mxu0 %v9446_v47 }
  0xac   : > { %v9444_v48 = vld [vmem:[%s14410_s2 + $0xa20] sm:$0xff]  ;;  %14909 = vst [vmem:[#allocation110_spill] sm:$0xff] %v9468_v54  ;;  %14910 = vst [vmem:[#allocation111_spill] sm:$0xff] %v9470_v23  ;;  %v200_v51 = vld [vmem:[%s8164_s13 + $0xa8] sm:$0xff] }
  0xad   : > { %v9453_v34 = vld [vmem:[%s14410_s2 + $0xe00] sm:$0xff]  ;;  %v7263_v28 = vcombine.high %v9439_v41, %v9444_v48  ;;  %4296 = vmatprep.subr.bf16.mxu1 %v7399_v4  ;;  %v7262_v21 = vcombine.low %v9439_v41, %v9444_v48  ;;  %v624_v4 = vmul.f32 %v9462_v15, %v9462_v15  ;;  %v9527_v41 = vld [vmem:[%s14410_s2 + $0x5e8] sm:$0xff]  ;;  %v618_v48 = vmul.f32 %v9468_v54, %v9468_v54 }
  0xae   : > { %v9458_v53 = vld [vmem:[%s14410_s2 + $0xe20] sm:$0xff]  ;;  %v626_v15 = vmul.f32 %v9470_v23, %v9470_v23  ;;  %4297 = vmatpush2.bf16.msra.mxu1 %v7398_v40  ;;  %v344_v54 = vld [vmem:[%s14409_s1 + $0xa8] sm:$0xff]  ;;  %v9551_v23 = vpack.c.bf16 %v747_v63, %v739_v33  ;;  %v9553_v40 = vadd.f32 %v329_v36, %v185_v55  ;;  %v9566_v33 = vpack.c.bf16 %v749_v12, %v741_v1 }
  0xaf   : > { %v183_v56 = vld [vmem:[%s8164_s13 + $0x20] sm:$0xff]  ;;  %v7391_v46 = vcombine.high %v9453_v34, %v9458_v53  ;;  %4175 = vmatprep.subr.bf16.mxu0 %v7263_v28  ;;  %v7390_v47 = vcombine.low %v9453_v34, %v9458_v53  ;;  %v9555_v34 = vadd.f32 %v337_v45, %v193_v11  ;;  %v7129_v53 = vcombine.high %v9522_v42, %v9527_v41  ;;  %v346_v28 = vld [vmem:[%s14409_s1 + $0xb8] sm:$0xff] }
  0xb0   : > { %v191_v44 = vld [vmem:[%s8164_s13 + $0x60] sm:$0xff]  ;;  %14913 = vst [vmem:[#allocation114_spill] sm:$0xff] %v9551_v23  ;;  %14914 = vst [vmem:[#allocation115_spill] sm:$0xff] %v9553_v40  ;;  %v9568_v63 = vpack.c.bf16 %v624_v4, %v616_v57  ;;  %4176 = vmatpush2.bf16.msra.mxu0 %v7262_v21  ;;  %v9570_v45 = vpack.c.bf16 %v626_v15, %v618_v48  ;;  %v9574_v11 = vadd.f32 %v344_v54, %v200_v51  ;;  %v9598_v54 = vld [vmem:[%s14410_s2 + $0x1a8] sm:$0xff] }
  0xb1   : > { %v327_v26 = vld [vmem:[%s14409_s1 + $0x20] sm:$0xff]  ;;  %4298 = vmatprep.subr.bf16.mxu1 %v7391_v46  ;;  %14915 = vst [vmem:[#allocation116_spill] sm:$0xff] %v9555_v34  ;;  %14916 = vst [vmem:[#allocation117_spill] sm:$0xff] %v9566_v33  ;;  %4391 = vmatprep.subr.bf16.mxu0 %v7001_v61  ;;  %v617_v51 = vmul.f32 %v9553_v40, %v9553_v40  ;;  %v9612_v48 = vld [vmem:[%s14410_s2 + $0x588] sm:$0xff] }
  0xb2   : > { %v335_v0 = vld [vmem:[%s14409_s1 + $0x60] sm:$0xff]  ;;  %v9534_v31 = vadd.f32 %v327_v26, %v183_v56  ;;  %v352_v56 = vld [vmem:[%s14409_s1 + $0xe8] sm:$0xff]  ;;  %v202_v26 = vld [vmem:[%s8164_s13 + $0xb8] sm:$0xff]  ;;  %14917 = vst [vmem:[#allocation118_spill] sm:$0xff] %v9568_v63  ;;  %4299 = vmatpush2.bf16.msra.mxu1 %v7390_v47  ;;  %4012 = vmatmul.mubr.bf16.gmra.mxu0 %v9551_v23 }
  0xb3   : > { %v9540_v43 = vadd.f32 %v335_v0, %v191_v44  ;;  %v210_v44 = vld [vmem:[%s8164_s13 + $0xf8] sm:$0xff]  ;;  %14918 = vst [vmem:[#allocation119_spill] sm:$0xff] %v9570_v45  ;;  %14919 = vst [vmem:[#allocation120_spill] sm:$0xff] %v9574_v11  ;;  %v9576_v46 = vadd.f32 %v352_v56, %v208_v7  ;;  %v9580_v1 = vadd.f32 %v346_v28, %v202_v26  ;;  %v199_v15 = vld [vmem:[%s8164_s13 + $0xa0] sm:$0xff]  ;;  %4514 = vmatprep.subr.bf16.mxu1 %v7129_v53 }
  0xb4   : > { %14911 = vst [vmem:[#allocation112_spill] sm:$0xff] %v9534_v31  ;;  %v354_v0 = vld [vmem:[%s14409_s1 + $0xf8] sm:$0xff]  ;;  %v615_v55 = vmul.f32 %v9534_v31, %v9534_v31  ;;  %v625_v7 = vmul.f32 %v9555_v34, %v9555_v34  ;;  %v9593_v47 = vld [vmem:[%s14410_s2 + $0x188] sm:$0xff]  ;;  %v207_v21 = vld [vmem:[%s8164_s13 + $0xe0] sm:$0xff]  ;;  %4135 = vmatmul.mubr.bf16.gmra.mxu1 %v9566_v33  ;;  %4177 = vmatprep.mubr.bf16.mxu0 %v9568_v63 }
  0xb5   : > { %14912 = vst [vmem:[#allocation113_spill] sm:$0xff] %v9540_v43  ;;  %14920 = vst [vmem:[#allocation121_spill] sm:$0xff] %v9576_v46  ;;  %v623_v36 = vmul.f32 %v9540_v43, %v9540_v43  ;;  %v9582_v12 = vadd.f32 %v354_v0, %v210_v44  ;;  %v343_v57 = vld [vmem:[%s14409_s1 + $0xa0] sm:$0xff]  ;;  %v9617_v61 = vld [vmem:[%s14410_s2 + $0x5a8] sm:$0xff]  ;;  %4300 = vmatprep.mubr.bf16.mxu1 %v9570_v45  ;;  %v632_v44 = vmul.f32 %v9574_v11, %v9574_v11 }
  0xb6   : > { %14921 = vst [vmem:[#allocation122_spill] sm:$0xff] %v9580_v1  ;;  %v351_v4 = vld [vmem:[%s14409_s1 + $0xe0] sm:$0xff]  ;;  %v201_v56 = vld [vmem:[%s8164_s13 + $0xb0] sm:$0xff]  ;;  %v640_v28 = vmul.f32 %v9576_v46, %v9576_v46  ;;  %v216_v34 = vld [vmem:[%s8164_s13 + $0x128] sm:$0xff]  ;;  %v7000_v31 = vcombine.low %v9501_v32, %v9506_v2  ;;  %v634_v45 = vmul.f32 %v9580_v1, %v9580_v1  ;;  %v9651_v33 = vadd.f32 %v343_v57, %v199_v15 }
  0xb7   : > { %14922 = vst [vmem:[#allocation123_spill] sm:$0xff] %v9582_v12  ;;  %v209_v26 = vld [vmem:[%s8164_s13 + $0xf0] sm:$0xff]  ;;  %v224_v40 = vld [vmem:[%s8164_s13 + $0x168] sm:$0xff]  ;;  %v9634_v43 = vpack.c.bf16 %v623_v36, %v615_v55  ;;  %v642_v11 = vmul.f32 %v9582_v12, %v9582_v12  ;;  %v218_v55 = vld [vmem:[%s8164_s13 + $0x138] sm:$0xff]  ;;  %v9649_v36 = vpack.c.bf16 %v625_v7, %v617_v51  ;;  %v9653_v32 = vadd.f32 %v351_v4, %v207_v21 }
  0xb8   : > { %v345_v53 = vld [vmem:[%s14409_s1 + $0xb0] sm:$0xff]  ;;  %v360_v46 = vld [vmem:[%s14409_s1 + $0x128] sm:$0xff]  ;;  %14925 = vst [vmem:[#allocation126_spill] sm:$0xff] %v9651_v33  ;;  %v226_v12 = vld [vmem:[%s8164_s13 + $0x178] sm:$0xff]  ;;  %v7128_v51 = vcombine.low %v9522_v42, %v9527_v41  ;;  %v6992_v15 = vcombine.low %v9593_v47, %v9598_v54  ;;  %v6993_v7 = vcombine.high %v9593_v47, %v9598_v54  ;;  %v9683_v42 = vpack.c.bf16 %v640_v28, %v632_v44 }
  0xb9   : > { %v353_v0 = vld [vmem:[%s14409_s1 + $0xf0] sm:$0xff]  ;;  %14923 = vst [vmem:[#allocation124_spill] sm:$0xff] %v9634_v43  ;;  %v368_v63 = vld [vmem:[%s14409_s1 + $0x168] sm:$0xff]  ;;  %14924 = vst [vmem:[#allocation125_spill] sm:$0xff] %v9649_v36  ;;  %v9655_v2 = vadd.f32 %v345_v53, %v201_v56  ;;  %v7120_v41 = vcombine.low %v9612_v48, %v9617_v61  ;;  %v7121_v47 = vcombine.high %v9612_v48, %v9617_v61 }
  0xba   : > { %14926 = vst [vmem:[#allocation127_spill] sm:$0xff] %v9653_v32  ;;  %v362_v1 = vld [vmem:[%s14409_s1 + $0x138] sm:$0xff]  ;;  %v9670_v21 = vadd.f32 %v353_v0, %v209_v26  ;;  %v9675_v57 = vld [vmem:[%s14410_s2 + $0x148] sm:$0xff]  ;;  %v215_v56 = vld [vmem:[%s8164_s13 + $0x120] sm:$0xff]  ;;  %v9689_v54 = vadd.f32 %v360_v46, %v216_v34  ;;  %v9698_v44 = vpack.c.bf16 %v642_v11, %v634_v45  ;;  %v9710_v46 = vadd.f32 %v368_v63, %v224_v40 }
  0xbb   : > { %14927 = vst [vmem:[#allocation128_spill] sm:$0xff] %v9655_v2  ;;  %v370_v23 = vld [vmem:[%s14409_s1 + $0x178] sm:$0xff]  ;;  %v9680_v4 = vld [vmem:[%s14410_s2 + $0x168] sm:$0xff]  ;;  %14929 = vst [vmem:[#allocation130_spill] sm:$0xff] %v9683_v42  ;;  %v9712_v48 = vadd.f32 %v362_v1, %v218_v55  ;;  %4178 = vmatmul.mubr.bf16.vlgmr.msra.gmra.mxu0 %v9634_v43  ;;  %v631_v45 = vmul.f32 %v9651_v33, %v9651_v33  ;;  %v639_v11 = vmul.f32 %v9653_v32, %v9653_v32 }
  0xbc   : > { %14928 = vst [vmem:[#allocation129_spill] sm:$0xff] %v9670_v21  ;;  %14930 = vst [vmem:[#allocation131_spill] sm:$0xff] %v9689_v54  ;;  %v223_v26 = vld [vmem:[%s8164_s13 + $0x160] sm:$0xff]  ;;  %v9703_v28 = vld [vmem:[%s14410_s2 + $0x548] sm:$0xff]  ;;  %v9714_v61 = vadd.f32 %v370_v23, %v226_v12  ;;  %v633_v59 = vmul.f32 %v9655_v2, %v9655_v2  ;;  %4301 = vmatmul.mubr.bf16.vlgmr.msra.gmra.mxu1 %v9649_v36  ;;  %4392 = vmatpush1.bf16.msra.mxu0 %v7000_v31 }
  0xbd   : > { %v359_v53 = vld [vmem:[%s14409_s1 + $0x120] sm:$0xff]  ;;  %14931 = vst [vmem:[#allocation132_spill] sm:$0xff] %v9698_v44  ;;  %v9708_v34 = vld [vmem:[%s14410_s2 + $0x568] sm:$0xff]  ;;  %14932 = vst [vmem:[#allocation133_spill] sm:$0xff] %v9710_v46  ;;  %v641_v63 = vmul.f32 %v9670_v21, %v9670_v21  ;;  %4515 = vmatpush1.bf16.msra.mxu1 %v7128_v51  ;;  %4393 = vmatprep.subr.bf16.mxu0 %v6993_v7  ;;  %v6985_v31 = vcombine.high %v9675_v57, %v9680_v4 }
  0xbe   : > { %v367_v0 = vld [vmem:[%s14409_s1 + $0x160] sm:$0xff]  ;;  %14933 = vst [vmem:[#allocation134_spill] sm:$0xff] %v9712_v48  ;;  %14934 = vst [vmem:[#allocation135_spill] sm:$0xff] %v9714_v61  ;;  %v9728_v40 = vld [vmem:[%s14410_s2 + $0x108] sm:$0xff]  ;;  %v9734_v1 = vadd.f32 %v359_v53, %v215_v56  ;;  %v7113_v56 = vcombine.high %v9703_v28, %v9708_v34  ;;  %v648_v53 = vmul.f32 %v9689_v54, %v9689_v54  ;;  %4187 = vmatprep.mubr.bf16.mxu0 %v9683_v42 }
  0xbf   : > { %v217_v23 = vld [vmem:[%s8164_s13 + $0x130] sm:$0xff]  ;;  %v9736_v12 = vadd.f32 %v367_v0, %v223_v26  ;;  %v9752_v26 = vld [vmem:[%s14410_s2 + $0x128] sm:$0xff]  ;;  %4310 = vmatprep.mubr.bf16.mxu1 %v9698_v44  ;;  %v656_v51 = vmul.f32 %v9710_v46, %v9710_v46  ;;  %v650_v7 = vmul.f32 %v9712_v48, %v9712_v48  ;;  %v658_v32 = vmul.f32 %v9714_v61, %v9714_v61  ;;  %v234_v42 = vld [vmem:[%s8164_s13 + $0x1b8] sm:$0xff] }
  0xc0   : > { %14935 = vst [vmem:[#allocation136_spill] sm:$0xff] %v9734_v1  ;;  %v225_v55 = vld [vmem:[%s8164_s13 + $0x170] sm:$0xff]  ;;  %v232_v0 = vld [vmem:[%s8164_s13 + $0x1a8] sm:$0xff]  ;;  %4516 = vmatprep.subr.bf16.mxu1 %v7121_v47  ;;  %v9773_v44 = vpack.c.bf16 %v639_v11, %v631_v45  ;;  %v7112_v46 = vcombine.low %v9703_v28, %v9708_v34  ;;  %v9777_v36 = vadd.f32 %v361_v5, %v217_v23  ;;  %v242_v61 = vld [vmem:[%s8164_s13 + $0x1f8] sm:$0xff] }
  0xc1   : > { %14936 = vst [vmem:[#allocation137_spill] sm:$0xff] %v9736_v12  ;;  %v369_v2 = vld [vmem:[%s14409_s1 + $0x170] sm:$0xff]  ;;  %v240_v21 = vld [vmem:[%s8164_s13 + $0x1e8] sm:$0xff]  ;;  %v378_v43 = vld [vmem:[%s14409_s1 + $0x1b8] sm:$0xff]  ;;  %4394 = vmatpush1.bf16.msra.mxu0 %v6992_v15  ;;  %v9788_v47 = vpack.c.bf16 %v641_v63, %v633_v59  ;;  %v647_v5 = vmul.f32 %v9734_v1, %v9734_v1  ;;  %4517 = vmatpush1.bf16.msra.mxu1 %v7120_v41 }
  0xc2   : > { %v376_v54 = vld [vmem:[%s14409_s1 + $0x1a8] sm:$0xff]  ;;  %14937 = vst [vmem:[#allocation138_spill] sm:$0xff] %v9773_v44  ;;  %14938 = vst [vmem:[#allocation139_spill] sm:$0xff] %v9777_v36  ;;  %v9779_v48 = vadd.f32 %v369_v2, %v225_v55  ;;  %v655_v2 = vmul.f32 %v9736_v12, %v9736_v12  ;;  %4395 = vmatprep.subr.bf16.mxu0 %v6985_v31  ;;  %v6977_v15 = vcombine.high %v9728_v40, %v9752_v26 }
  0xc3   : > { %v384_v33 = vld [vmem:[%s14409_s1 + $0x1e8] sm:$0xff]  ;;  %14940 = vst [vmem:[#allocation141_spill] sm:$0xff] %v9788_v47  ;;  %v9823_v41 = vadd.f32 %v376_v54, %v232_v0  ;;  %4518 = vmatprep.subr.bf16.mxu1 %v7113_v56  ;;  %v9827_v55 = vpack.c.bf16 %v656_v51, %v648_v53  ;;  %v9829_v31 = vpack.c.bf16 %v658_v32, %v650_v7  ;;  %v231_v54 = vld [vmem:[%s8164_s13 + $0x1a0] sm:$0xff]  ;;  %v233_v0 = vld [vmem:[%s8164_s13 + $0x1b0] sm:$0xff] }
  0xc4   : > { %14939 = vst [vmem:[#allocation140_spill] sm:$0xff] %v9779_v48  ;;  %v9799_v28 = vld [vmem:[%s14410_s2 + $0x508] sm:$0xff]  ;;  %v9825_v63 = vadd.f32 %v384_v33, %v240_v21  ;;  %v9836_v12 = vadd.f32 %v378_v43, %v234_v42  ;;  %v9838_v1 = vadd.f32 %v386_v60, %v242_v61  ;;  %v375_v33 = vld [vmem:[%s14409_s1 + $0x1a0] sm:$0xff]  ;;  %4188 = vmatmul.mubr.bf16.gmra.mxu0 %v9773_v44  ;;  %v250_v44 = vld [vmem:[%s8164_s13 + $0x238] sm:$0xff] }
  0xc5   : > { %v9804_v59 = vld [vmem:[%s14410_s2 + $0x528] sm:$0xff]  ;;  %14941 = vst [vmem:[#allocation142_spill] sm:$0xff] %v9823_v41  ;;  %14943 = vst [vmem:[#allocation144_spill] sm:$0xff] %v9827_v55  ;;  %v649_v32 = vmul.f32 %v9777_v36, %v9777_v36  ;;  %v657_v21 = vmul.f32 %v9779_v48, %v9779_v48  ;;  %v239_v56 = vld [vmem:[%s8164_s13 + $0x1e0] sm:$0xff]  ;;  %4311 = vmatmul.mubr.bf16.gmra.mxu1 %v9788_v47  ;;  %v14947_v51 = vcombine.low %v9675_v57, %v9680_v4 }
  0xc6   : > { %v9811_v34 = vld [vmem:[%s14410_s2 + $0xc8] sm:$0xff]  ;;  %14942 = vst [vmem:[#allocation143_spill] sm:$0xff] %v9825_v63  ;;  %14944 = vst [vmem:[#allocation145_spill] sm:$0xff] %v9829_v31  ;;  %v7104_v43 = vcombine.low %v9799_v28, %v9804_v59  ;;  %v7105_v60 = vcombine.high %v9799_v28, %v9804_v59  ;;  %v383_v53 = vld [vmem:[%s14409_s1 + $0x1e0] sm:$0xff]  ;;  %v9872_v7 = vpack.c.bf16 %v655_v2, %v647_v5  ;;  %4519 = vmatpush1.bf16.msra.mxu1 %v7112_v46 }
  0xc7   : > { %v9816_v11 = vld [vmem:[%s14410_s2 + $0xe8] sm:$0xff]  ;;  %14945 = vst [vmem:[#allocation146_spill] sm:$0xff] %v9836_v12  ;;  %14946 = vst [vmem:[#allocation147_spill] sm:$0xff] %v9838_v1  ;;  %4396 = vmatpush1.bf16.msra.mxu0 %v14947_v51  ;;  %v241_v48 = vld [vmem:[%s8164_s13 + $0x1f0] sm:$0xff]  ;;  %v664_v57 = vmul.f32 %v9823_v41, %v9823_v41  ;;  %v672_v4 = vmul.f32 %v9825_v63, %v9825_v63  ;;  %v9889_v5 = vadd.f32 %v375_v33, %v231_v54 }
  0xc8   : > { %v9821_v23 = vld [vmem:[%s14410_s2 + $0x4c8] sm:$0xff]  ;;  %14948 = vst [vmem:[#allocation148_spill] sm:$0xff] %v9872_v7  ;;  %v6969_v59 = vcombine.high %v9811_v34, %v9816_v11  ;;  %v377_v36 = vld [vmem:[%s14409_s1 + $0x1b0] sm:$0xff]  ;;  %4397 = vmatprep.subr.bf16.mxu0 %v6977_v15  ;;  %4197 = vmatprep.mubr.bf16.mxu0 %v9827_v55  ;;  %v666_v33 = vmul.f32 %v9836_v12, %v9836_v12 }
  0xc9   : > { %v9834_v45 = vld [vmem:[%s14410_s2 + $0x4e8] sm:$0xff]  ;;  %v385_v47 = vld [vmem:[%s14409_s1 + $0x1f0] sm:$0xff]  ;;  %14949 = vst [vmem:[#allocation149_spill] sm:$0xff] %v9889_v5  ;;  %4320 = vmatprep.mubr.bf16.mxu1 %v9829_v31  ;;  %v674_v28 = vmul.f32 %v9838_v1, %v9838_v1  ;;  %v9918_v25 = vpack.c.bf16 %v657_v21, %v649_v32  ;;  %4520 = vmatprep.subr.bf16.mxu1 %v7105_v60  ;;  %v258_v32 = vld [vmem:[%s8164_s13 + $0x278] sm:$0xff] }
  0xca   : > { %v9856_v42 = vld [vmem:[%s14410_s2 + $0x88] sm:$0xff]  ;;  %v7097_v54 = vcombine.high %v9821_v23, %v9834_v45  ;;  %v9920_v31 = vadd.f32 %v383_v53, %v239_v56  ;;  %v9922_v55 = vadd.f32 %v377_v36, %v233_v0  ;;  %v9924_v39 = vadd.f32 %v385_v47, %v241_v48  ;;  %v394_v21 = vld [vmem:[%s14409_s1 + $0x238] sm:$0xff]  ;;  %4521 = vmatpush1.bf16.msra.mxu1 %v7104_v43 }
  0xcb   : > { %v9861_v61 = vld [vmem:[%s14410_s2 + $0xa8] sm:$0xff]  ;;  %14950 = vst [vmem:[#allocation150_spill] sm:$0xff] %v9918_v25  ;;  %v402_v36 = vld [vmem:[%s14409_s1 + $0x278] sm:$0xff]  ;;  %v14954_v48 = vcombine.low %v9728_v40, %v9752_v26  ;;  %v7096_v47 = vcombine.low %v9821_v23, %v9834_v45  ;;  %v247_v26 = vld [vmem:[%s8164_s13 + $0x220] sm:$0xff]  ;;  %v9965_v45 = vpack.c.bf16 %v672_v4, %v664_v57  ;;  %v663_v23 = vmul.f32 %v9889_v5, %v9889_v5 }
  0xcc   : > { %v9894_v2 = vld [vmem:[%s14410_s2 + $0x488] sm:$0xff]  ;;  %14951 = vst [vmem:[#allocation151_spill] sm:$0xff] %v9920_v31  ;;  %14952 = vst [vmem:[#allocation152_spill] sm:$0xff] %v9922_v55  ;;  %v6960_v60 = vcombine.low %v9856_v42, %v9861_v61  ;;  %v6961_v56 = vcombine.high %v9856_v42, %v9861_v61  ;;  %v255_v61 = vld [vmem:[%s8164_s13 + $0x260] sm:$0xff]  ;;  %4522 = vmatprep.subr.bf16.mxu1 %v7097_v54  ;;  %v9978_v43 = vpack.c.bf16 %v674_v28, %v666_v33 }
  0xcd   : > { %v9899_v51 = vld [vmem:[%s14410_s2 + $0x4a8] sm:$0xff]  ;;  %14953 = vst [vmem:[#allocation153_spill] sm:$0xff] %v9924_v39  ;;  %4398 = vmatpush1.bf16.msra.mxu0 %v14954_v48  ;;  %14956 = vst [vmem:[#allocation155_spill] sm:$0xff] %v9965_v45  ;;  %v391_v48 = vld [vmem:[%s14409_s1 + $0x220] sm:$0xff]  ;;  %v9982_v57 = vadd.f32 %v394_v21, %v250_v44  ;;  %v671_v28 = vmul.f32 %v9920_v31, %v9920_v31  ;;  %v665_v54 = vmul.f32 %v9922_v55, %v9922_v55 }
  0xce   : > { %v248_v46 = vld [vmem:[%s8164_s13 + $0x228] sm:$0xff]  ;;  %4399 = vmatprep.subr.bf16.mxu0 %v6969_v59  ;;  %14958 = vst [vmem:[#allocation157_spill] sm:$0xff] %v9978_v43  ;;  %v7088_v59 = vcombine.low %v9894_v2, %v9899_v51  ;;  %v257_v4 = vld [vmem:[%s8164_s13 + $0x270] sm:$0xff]  ;;  %4198 = vmatmul.mubr.bf16.gmra.mxu0 %v9872_v7  ;;  %v673_v44 = vmul.f32 %v9924_v39, %v9924_v39  ;;  %v410_v7 = vld [vmem:[%s14409_s1 + $0x2b8] sm:$0xff] }
  0xcf   : > { %v392_v15 = vld [vmem:[%s14409_s1 + $0x228] sm:$0xff]  ;;  %14959 = vst [vmem:[#allocation158_spill] sm:$0xff] %v9982_v57  ;;  %v7089_v33 = vcombine.high %v9894_v2, %v9899_v51  ;;  %4321 = vmatmul.mubr.bf16.gmra.mxu1 %v9918_v25  ;;  %v14961_v31 = vcombine.low %v9811_v34, %v9816_v11  ;;  %v266_v25 = vld [vmem:[%s8164_s13 + $0x2b8] sm:$0xff]  ;;  %4207 = vmatprep.mubr.bf16.mxu0 %v9965_v45 }
  0xd0   : > { %v256_v63 = vld [vmem:[%s8164_s13 + $0x268] sm:$0xff]  ;;  %v9962_v40 = vadd.f32 %v392_v15, %v248_v46  ;;  %v399_v46 = vld [vmem:[%s14409_s1 + $0x260] sm:$0xff]  ;;  %v393_v15 = vld [vmem:[%s14409_s1 + $0x230] sm:$0xff]  ;;  %4523 = vmatpush1.bf16.msra.mxu1 %v7096_v47  ;;  %v10025_v11 = vadd.f32 %v391_v48, %v247_v26  ;;  %4330 = vmatprep.mubr.bf16.mxu1 %v9978_v43  ;;  %v682_v47 = vmul.f32 %v9982_v57, %v9982_v57 }
  0xd1   : > { %v400_v41 = vld [vmem:[%s14409_s1 + $0x268] sm:$0xff]  ;;  %4400 = vmatpush1.bf16.msra.mxu0 %v14961_v31  ;;  %v10027_v31 = vadd.f32 %v399_v46, %v255_v61  ;;  %v10043_v48 = vpack.c.bf16 %v671_v28, %v663_v23  ;;  %4524 = vmatprep.subr.bf16.mxu1 %v7089_v33 }
  0xd2   : > { %v9929_v1 = vld [vmem:[%s14410_s2 + $0x48] sm:$0xff]  ;;  %14955 = vst [vmem:[#allocation154_spill] sm:$0xff] %v9962_v40  ;;  %v9969_v42 = vadd.f32 %v400_v41, %v256_v63  ;;  %v9984_v41 = vadd.f32 %v402_v36, %v258_v32  ;;  %v249_v63 = vld [vmem:[%s8164_s13 + $0x230] sm:$0xff]  ;;  %v680_v2 = vmul.f32 %v9962_v40, %v9962_v40  ;;  %14962 = vst [vmem:[#allocation160_spill] sm:$0xff] %v10025_v11  ;;  %4401 = vmatprep.subr.bf16.mxu0 %v6961_v56 }
  0xd3   : > { %v9934_v12 = vld [vmem:[%s14410_s2 + $0x68] sm:$0xff]  ;;  %v401_v32 = vld [vmem:[%s14409_s1 + $0x270] sm:$0xff]  ;;  %14963 = vst [vmem:[#allocation161_spill] sm:$0xff] %v10027_v31  ;;  %v274_v40 = vld [vmem:[%s8164_s13 + $0x2f8] sm:$0xff]  ;;  %v10041_v61 = vadd.f32 %v393_v15, %v249_v63 }
  0xd4   : > { %v9955_v53 = vld [vmem:[%s14410_s2 + $0x448] sm:$0xff]  ;;  %14957 = vst [vmem:[#allocation156_spill] sm:$0xff] %v9969_v42  ;;  %14960 = vst [vmem:[#allocation159_spill] sm:$0xff] %v9984_v41  ;;  %v6953_v55 = vcombine.high %v9929_v1, %v9934_v12  ;;  %v688_v34 = vmul.f32 %v9969_v42, %v9969_v42  ;;  %v690_v26 = vmul.f32 %v9984_v41, %v9984_v41  ;;  %4525 = vmatpush1.bf16.msra.mxu1 %v7088_v59  ;;  %v407_v59 = vld [vmem:[%s14409_s1 + $0x2a0] sm:$0xff] }
  0xd5   : > { %v9960_v0 = vld [vmem:[%s14410_s2 + $0x468] sm:$0xff]  ;;  %14964 = vst [vmem:[#allocation162_spill] sm:$0xff] %v10041_v61  ;;  %14965 = vst [vmem:[#allocation163_spill] sm:$0xff] %v10043_v48  ;;  %v6952_v46 = vcombine.low %v9929_v1, %v9934_v12  ;;  %v10047_v42 = vadd.f32 %v401_v32, %v257_v4  ;;  %v10066_v1 = vpack.c.bf16 %v673_v44, %v665_v54  ;;  %4402 = vmatpush1.bf16.msra.mxu0 %v6960_v60 }
  0xd6   : > { %v264_v21 = vld [vmem:[%s8164_s13 + $0x2a8] sm:$0xff]  ;;  %v7081_v39 = vcombine.high %v9955_v53, %v9960_v0  ;;  %v10085_v54 = vadd.f32 %v410_v7, %v266_v25  ;;  %v10087_v60 = vadd.f32 %v418_v62, %v274_v40  ;;  %4403 = vmatprep.subr.bf16.mxu0 %v6953_v55  ;;  %v7080_v44 = vcombine.low %v9955_v53, %v9960_v0  ;;  %v263_v25 = vld [vmem:[%s8164_s13 + $0x2a0] sm:$0xff] }
  0xd7   : > { %v272_v36 = vld [vmem:[%s8164_s13 + $0x2e8] sm:$0xff]  ;;  %14966 = vst [vmem:[#allocation164_spill] sm:$0xff] %v10047_v42  ;;  %14968 = vst [vmem:[#allocation166_spill] sm:$0xff] %v10066_v1  ;;  %v10091_v33 = vpack.c.bf16 %v688_v34, %v680_v2  ;;  %v679_v32 = vmul.f32 %v10025_v11, %v10025_v11  ;;  %v10106_v55 = vpack.c.bf16 %v690_v26, %v682_v47  ;;  %v271_v40 = vld [vmem:[%s8164_s13 + $0x2e0] sm:$0xff]  ;;  %4208 = vmatmul.mubr.bf16.gmra.mxu0 %v10043_v48 }
  0xd8   : > { %v408_v51 = vld [vmem:[%s14409_s1 + $0x2a8] sm:$0xff]  ;;  %14970 = vst [vmem:[#allocation168_spill] sm:$0xff] %v10085_v54  ;;  %14971 = vst [vmem:[#allocation169_spill] sm:$0xff] %v10087_v60  ;;  %4526 = vmatprep.subr.bf16.mxu1 %v7081_v39  ;;  %v687_v7 = vmul.f32 %v10027_v31, %v10027_v31  ;;  %v681_v53 = vmul.f32 %v10041_v61, %v10041_v61  ;;  %v415_v39 = vld [vmem:[%s14409_s1 + $0x2e0] sm:$0xff]  ;;  %4331 = vmatmul.mubr.bf16.gmra.mxu1 %v10066_v1 }
  0xd9   : > { %v416_v5 = vld [vmem:[%s14409_s1 + $0x2e8] sm:$0xff]  ;;  %v10064_v63 = vadd.f32 %v408_v51, %v264_v21  ;;  %14972 = vst [vmem:[#allocation170_spill] sm:$0xff] %v10091_v33  ;;  %14973 = vst [vmem:[#allocation171_spill] sm:$0xff] %v10106_v55  ;;  %v689_v21 = vmul.f32 %v10047_v42, %v10047_v42  ;;  %v265_v34 = vld [vmem:[%s8164_s13 + $0x2b0] sm:$0xff]  ;;  %4404 = vmatpush1.bf16.msra.mxu0 %v6952_v46  ;;  %4527 = vmatpush1.bf16.msra.mxu1 %v7080_v44 }
  0xda   : > { %v10052_v56 = vld [vmem:[%s14410_s2 + $0x8] sm:$0xff]  ;;  %v10083_v28 = vadd.f32 %v416_v5, %v272_v36  ;;  %v273_v47 = vld [vmem:[%s8164_s13 + $0x2f0] sm:$0xff]  ;;  %4217 = vmatprep.mubr.bf16.mxu0 %v10091_v33  ;;  %v282_v31 = vld [vmem:[%s8164_s13 + $0x338] sm:$0xff]  ;;  %4340 = vmatprep.mubr.bf16.mxu1 %v10106_v55  ;;  %v10160_v44 = vpack.c.bf16 %v687_v7, %v679_v32  ;;  %v10175_v32 = vadd.f32 %v415_v39, %v271_v40 }
  0xdb   : > { %v10057_v57 = vld [vmem:[%s14410_s2 + $0x28] sm:$0xff]  ;;  %14967 = vst [vmem:[#allocation165_spill] sm:$0xff] %v10064_v63  ;;  %v696_v51 = vmul.f32 %v10064_v63, %v10064_v63  ;;  %v409_v26 = vld [vmem:[%s14409_s1 + $0x2b0] sm:$0xff]  ;;  %v290_v11 = vld [vmem:[%s8164_s13 + $0x378] sm:$0xff]  ;;  %v10173_v48 = vpack.c.bf16 %v689_v21, %v681_v53 }
  0xdc   : > { %v10062_v23 = vld [vmem:[%s14410_s2 + $0x408] sm:$0xff]  ;;  %14969 = vst [vmem:[#allocation167_spill] sm:$0xff] %v10083_v28  ;;  %v6945_v0 = vcombine.high %v10052_v56, %v10057_v57  ;;  %v6944_v36 = vcombine.low %v10052_v56, %v10057_v57  ;;  %v704_v41 = vmul.f32 %v10083_v28, %v10083_v28  ;;  %v698_v57 = vmul.f32 %v10085_v54, %v10085_v54  ;;  %v417_v42 = vld [vmem:[%s14409_s1 + $0x2f0] sm:$0xff]  ;;  %v426_v33 = vld [vmem:[%s14409_s1 + $0x338] sm:$0xff] }
  0xdd   : > { %v10071_v12 = vld [vmem:[%s14410_s2 + $0x428] sm:$0xff]  ;;  %v706_v56 = vmul.f32 %v10087_v60, %v10087_v60  ;;  %14974 = vst [vmem:[#allocation172_spill] sm:$0xff] %v10160_v44  ;;  %v434_v1 = vld [vmem:[%s14409_s1 + $0x378] sm:$0xff]  ;;  %14976 = vst [vmem:[#allocation174_spill] sm:$0xff] %v10173_v48  ;;  %v10177_v7 = vadd.f32 %v409_v26, %v265_v34 }
  0xde   : > { %v10076_v4 = vld [vmem:[%s14410_s2 + $0x3c8] sm:$0xff]  ;;  %v7073_v2 = vcombine.high %v10062_v23, %v10071_v12  ;;  %v7072_v46 = vcombine.low %v10062_v23, %v10071_v12  ;;  %4405 = vmatprep.subr.bf16.mxu0 %v6945_v0  ;;  %v10164_v12 = vadd.f32 %v407_v59, %v263_v25  ;;  %14977 = vst [vmem:[#allocation175_spill] sm:$0xff] %v10175_v32  ;;  %v281_v26 = vld [vmem:[%s8164_s13 + $0x330] sm:$0xff]  ;;  %v450_v55 = vld [vmem:[%s14409_s1 + $0x3f8] sm:$0xff] }
  0xdf   : > { %v10081_v15 = vld [vmem:[%s14410_s2 + $0x3e8] sm:$0xff]  ;;  %14978 = vst [vmem:[#allocation176_spill] sm:$0xff] %v10177_v7  ;;  %v10179_v0 = vadd.f32 %v417_v42, %v273_v47  ;;  %4406 = vmatpush1.bf16.msra.mxu0 %v6944_v36  ;;  %v10193_v40 = vpack.c.bf16 %v704_v41, %v696_v51  ;;  %v10195_v39 = vpack.c.bf16 %v706_v56, %v698_v57  ;;  %v289_v57 = vld [vmem:[%s8164_s13 + $0x370] sm:$0xff] }
  0xe0   : > { %v10098_v5 = vld [vmem:[%s14410_s2 + $0x7c8] sm:$0xff]  ;;  %v7065_v28 = vcombine.high %v10076_v4, %v10081_v15  ;;  %14975 = vst [vmem:[#allocation173_spill] sm:$0xff] %v10164_v12  ;;  %4528 = vmatprep.subr.bf16.mxu1 %v7073_v2  ;;  %v7064_v53 = vcombine.low %v10076_v4, %v10081_v15  ;;  %v10221_v36 = vadd.f32 %v426_v33, %v282_v31  ;;  %v425_v56 = vld [vmem:[%s14409_s1 + $0x330] sm:$0xff] }
  0xe1   : > { %v10103_v62 = vld [vmem:[%s14410_s2 + $0x7e8] sm:$0xff]  ;;  %14979 = vst [vmem:[#allocation177_spill] sm:$0xff] %v10179_v0  ;;  %14980 = vst [vmem:[#allocation178_spill] sm:$0xff] %v10193_v40  ;;  %4529 = vmatpush1.bf16.msra.mxu1 %v7072_v46  ;;  %v10223_v51 = vadd.f32 %v434_v1, %v290_v11  ;;  %v423_v1 = vld [vmem:[%s14409_s1 + $0x320] sm:$0xff]  ;;  %4218 = vmatmul.mubr.bf16.gmra.mxu0 %v10160_v44  ;;  %v703_v33 = vmul.f32 %v10175_v32, %v10175_v32 }
  0xe2   : > { %v280_v61 = vld [vmem:[%s8164_s13 + $0x328] sm:$0xff]  ;;  %v7193_v23 = vcombine.high %v10098_v5, %v10103_v62  ;;  %14981 = vst [vmem:[#allocation179_spill] sm:$0xff] %v10195_v39  ;;  %4407 = vmatprep.subr.bf16.mxu0 %v7065_v28  ;;  %14984 = vst [vmem:[#allocation182_spill] sm:$0xff] %v10221_v36  ;;  %v7192_v28 = vcombine.low %v10098_v5, %v10103_v62  ;;  %v697_v5 = vmul.f32 %v10177_v7, %v10177_v7  ;;  %v433_v7 = vld [vmem:[%s14409_s1 + $0x370] sm:$0xff] }
  0xe3   : > { %v288_v63 = vld [vmem:[%s8164_s13 + $0x368] sm:$0xff]  ;;  %14985 = vst [vmem:[#allocation183_spill] sm:$0xff] %v10223_v51  ;;  %v705_v62 = vmul.f32 %v10179_v0, %v10179_v0  ;;  %4341 = vmatmul.mubr.bf16.gmra.mxu1 %v10173_v48  ;;  %4408 = vmatpush2.bf16.msra.mxu0 %v7064_v53  ;;  %v722_v53 = vmul.f32 %v10223_v51, %v10223_v51  ;;  %v306_v44 = vld [vmem:[%s8164_s13 + $0x3f8] sm:$0xff] }
  0xe4   : > { %v424_v60 = vld [vmem:[%s14409_s1 + $0x328] sm:$0xff]  ;;  %4530 = vmatprep.subr.bf16.mxu1 %v7193_v23  ;;  %4227 = vmatprep.mubr.bf16.mxu0 %v10193_v40  ;;  %v298_v40 = vld [vmem:[%s8164_s13 + $0x3b8] sm:$0xff] }
  0xe5   : > { %v432_v54 = vld [vmem:[%s14409_s1 + $0x368] sm:$0xff]  ;;  %v10207_v2 = vadd.f32 %v424_v60, %v280_v61  ;;  %v279_v61 = vld [vmem:[%s8164_s13 + $0x320] sm:$0xff]  ;;  %v695_v60 = vmul.f32 %v10164_v12, %v10164_v12  ;;  %4350 = vmatprep.mubr.bf16.mxu1 %v10195_v39  ;;  %4531 = vmatpush2.bf16.msra.mxu1 %v7192_v28  ;;  %v442_v51 = vld [vmem:[%s14409_s1 + $0x3b8] sm:$0xff] }
  0xe6   : > { %v10184_v25 = vld [vmem:[%s14410_s2 + $0x388] sm:$0xff]  ;;  %v10219_v15 = vadd.f32 %v432_v54, %v288_v63  ;;  %v287_v63 = vld [vmem:[%s8164_s13 + $0x360] sm:$0xff]  ;;  %v10292_v39 = vadd.f32 %v423_v1, %v279_v61 }
  0xe7   : > { %v10189_v59 = vld [vmem:[%s14410_s2 + $0x3a8] sm:$0xff]  ;;  %14982 = vst [vmem:[#allocation180_spill] sm:$0xff] %v10207_v2  ;;  %v431_v54 = vld [vmem:[%s14409_s1 + $0x360] sm:$0xff]  ;;  %v712_v0 = vmul.f32 %v10207_v2, %v10207_v2  ;;  %v10303_v43 = vpack.c.bf16 %v703_v33, %v695_v60  ;;  %v10321_v60 = vpack.c.bf16 %v705_v62, %v697_v5 }
  0xe8   : > { %v10200_v42 = vld [vmem:[%s14410_s2 + $0x788] sm:$0xff]  ;;  %14983 = vst [vmem:[#allocation181_spill] sm:$0xff] %v10219_v15  ;;  %v7057_v34 = vcombine.high %v10184_v25, %v10189_v59  ;;  %v7056_v46 = vcombine.low %v10184_v25, %v10189_v59  ;;  %v720_v25 = vmul.f32 %v10219_v15, %v10219_v15  ;;  %v714_v59 = vmul.f32 %v10221_v36, %v10221_v36 }
  0xe9   : > { %v10205_v21 = vld [vmem:[%s14410_s2 + $0x7a8] sm:$0xff]  ;;  %14986 = vst [vmem:[#allocation184_spill] sm:$0xff] %v10292_v39  ;;  %v10294_v36 = vadd.f32 %v431_v54, %v287_v63  ;;  %14988 = vst [vmem:[#allocation186_spill] sm:$0xff] %v10303_v43  ;;  %4228 = vmatmul.mubr.bf16.gmra.mxu0 %v10303_v43 }
  0xea   : > { %v10212_v41 = vld [vmem:[%s14410_s2 + $0x348] sm:$0xff]  ;;  %v7185_v47 = vcombine.high %v10200_v42, %v10205_v21  ;;  %4409 = vmatprep.subr.bf16.mxu0 %v7057_v34  ;;  %v7184_v15 = vcombine.low %v10200_v42, %v10205_v21  ;;  %v10307_v42 = vadd.f32 %v425_v56, %v281_v26  ;;  %v10309_v21 = vadd.f32 %v433_v7, %v289_v57  ;;  %v303_v57 = vld [vmem:[%s8164_s13 + $0x3e0] sm:$0xff]  ;;  %v441_v56 = vld [vmem:[%s14409_s1 + $0x3b0] sm:$0xff] }
  0xeb   : > { %v10217_v4 = vld [vmem:[%s14410_s2 + $0x368] sm:$0xff]  ;;  %14987 = vst [vmem:[#allocation185_spill] sm:$0xff] %v10294_v36  ;;  %14991 = vst [vmem:[#allocation189_spill] sm:$0xff] %v10321_v60  ;;  %4410 = vmatpush2.bf16.msra.mxu0 %v7056_v46  ;;  %v10339_v5 = vpack.c.bf16 %v720_v25, %v712_v0  ;;  %v449_v46 = vld [vmem:[%s14409_s1 + $0x3f0] sm:$0xff]  ;;  %4351 = vmatmul.mubr.bf16.gmra.mxu1 %v10321_v60 }
  0xec   : > { %v10235_v31 = vld [vmem:[%s14410_s2 + $0x748] sm:$0xff]  ;;  %v7049_v23 = vcombine.high %v10212_v41, %v10217_v4  ;;  %4532 = vmatprep.subr.bf16.mxu1 %v7185_v47  ;;  %14989 = vst [vmem:[#allocation187_spill] sm:$0xff] %v10307_v42  ;;  %14990 = vst [vmem:[#allocation188_spill] sm:$0xff] %v10309_v21  ;;  %v7048_v63 = vcombine.low %v10212_v41, %v10217_v4  ;;  %v10341_v41 = vpack.c.bf16 %v722_v53, %v714_v59  ;;  %v466_v60 = vld [vmem:[%s14409_s1 + $0x478] sm:$0xff] }
  0xed   : > { %v10240_v11 = vld [vmem:[%s14410_s2 + $0x768] sm:$0xff]  ;;  %14994 = vst [vmem:[#allocation192_spill] sm:$0xff] %v10339_v5  ;;  %4533 = vmatpush2.bf16.msra.mxu1 %v7184_v15  ;;  %v719_v47 = vmul.f32 %v10294_v36, %v10294_v36  ;;  %v713_v15 = vmul.f32 %v10307_v42, %v10307_v42  ;;  %4237 = vmatprep.mubr.bf16.mxu0 %v10339_v5  ;;  %v314_v36 = vld [vmem:[%s8164_s13 + $0x438] sm:$0xff] }
  0xee   : > { %v296_v32 = vld [vmem:[%s8164_s13 + $0x3a8] sm:$0xff]  ;;  %v7177_v28 = vcombine.high %v10235_v31, %v10240_v11  ;;  %4411 = vmatprep.subr.bf16.mxu0 %v7049_v23  ;;  %14995 = vst [vmem:[#allocation193_spill] sm:$0xff] %v10341_v41  ;;  %v7176_v0 = vcombine.low %v10235_v31, %v10240_v11  ;;  %v305_v11 = vld [vmem:[%s8164_s13 + $0x3f0] sm:$0xff]  ;;  %4360 = vmatprep.mubr.bf16.mxu1 %v10341_v41  ;;  %v322_v5 = vld [vmem:[%s8164_s13 + $0x478] sm:$0xff] }
  0xef   : > { %v304_v12 = vld [vmem:[%s8164_s13 + $0x3e8] sm:$0xff]  ;;  %4412 = vmatpush2.bf16.msra.mxu0 %v7048_v63 }
  0xf0   : > { %v440_v2 = vld [vmem:[%s14409_s1 + $0x3a8] sm:$0xff]  ;;  %4534 = vmatprep.subr.bf16.mxu1 %v7177_v28 }
  0xf1   : > { %v448_v48 = vld [vmem:[%s14409_s1 + $0x3e8] sm:$0xff]  ;;  %v10335_v54 = vadd.f32 %v440_v2, %v296_v32  ;;  %v10353_v32 = vadd.f32 %v442_v51, %v298_v40  ;;  %v711_v2 = vmul.f32 %v10292_v39, %v10292_v39  ;;  %v297_v40 = vld [vmem:[%s8164_s13 + $0x3b0] sm:$0xff]  ;;  %v721_v51 = vmul.f32 %v10309_v21, %v10309_v21  ;;  %4535 = vmatpush2.bf16.msra.mxu1 %v7176_v0 }
  0xf2   : > { %v10314_v61 = vld [vmem:[%s14410_s2 + $0x308] sm:$0xff]  ;;  %v10337_v33 = vadd.f32 %v448_v48, %v304_v12  ;;  %v10355_v48 = vadd.f32 %v450_v55, %v306_v44  ;;  %v295_v12 = vld [vmem:[%s8164_s13 + $0x3a0] sm:$0xff]  ;;  %v10439_v0 = vadd.f32 %v441_v56, %v297_v40 }
  0xf3   : > { %v10319_v34 = vld [vmem:[%s14410_s2 + $0x328] sm:$0xff]  ;;  %14992 = vst [vmem:[#allocation190_spill] sm:$0xff] %v10335_v54  ;;  %14996 = vst [vmem:[#allocation194_spill] sm:$0xff] %v10353_v32  ;;  %v439_v55 = vld [vmem:[%s14409_s1 + $0x3a0] sm:$0xff]  ;;  %v728_v59 = vmul.f32 %v10335_v54, %v10335_v54  ;;  %v10422_v39 = vpack.c.bf16 %v719_v47, %v711_v2  ;;  %v10435_v43 = vpack.c.bf16 %v721_v51, %v713_v15 }
  0xf4   : > { %v10328_v7 = vld [vmem:[%s14410_s2 + $0x708] sm:$0xff]  ;;  %14993 = vst [vmem:[#allocation191_spill] sm:$0xff] %v10337_v33  ;;  %14997 = vst [vmem:[#allocation195_spill] sm:$0xff] %v10355_v48  ;;  %v7041_v26 = vcombine.high %v10314_v61, %v10319_v34  ;;  %v447_v44 = vld [vmem:[%s14409_s1 + $0x3e0] sm:$0xff]  ;;  %v7040_v25 = vcombine.low %v10314_v61, %v10319_v34  ;;  %v736_v53 = vmul.f32 %v10337_v33, %v10337_v33 }
  0xf5   : > { %v10333_v1 = vld [vmem:[%s14410_s2 + $0x728] sm:$0xff]  ;;  %v730_v34 = vmul.f32 %v10353_v32, %v10353_v32  ;;  %v738_v63 = vmul.f32 %v10355_v48, %v10355_v48  ;;  %14998 = vst [vmem:[#allocation196_spill] sm:$0xff] %v10422_v39  ;;  %v10426_v32 = vadd.f32 %v439_v55, %v295_v12  ;;  %v458_v48 = vld [vmem:[%s14409_s1 + $0x438] sm:$0xff]  ;;  %15000 = vst [vmem:[#allocation198_spill] sm:$0xff] %v10435_v43  ;;  %4238 = vmatmul.mubr.bf16.gmra.mxu0 %v10422_v39 }
  0xf6   : > { %v10346_v4 = vld [vmem:[%s14410_s2 + $0x2c8] sm:$0xff]  ;;  %v7169_v31 = vcombine.high %v10328_v7, %v10333_v1  ;;  %4413 = vmatprep.subr.bf16.mxu0 %v7041_v26  ;;  %v7168_v41 = vcombine.low %v10328_v7, %v10333_v1  ;;  %v10437_v2 = vadd.f32 %v447_v44, %v303_v57  ;;  %15002 = vst [vmem:[#allocation200_spill] sm:$0xff] %v10439_v0 }
  0xf7   : > { %v10351_v62 = vld [vmem:[%s14410_s2 + $0x2e8] sm:$0xff]  ;;  %14999 = vst [vmem:[#allocation197_spill] sm:$0xff] %v10426_v32  ;;  %4414 = vmatpush2.bf16.msra.mxu0 %v7040_v25  ;;  %v10449_v47 = vpack.c.bf16 %v736_v53, %v728_v59  ;;  %v10451_v26 = vadd.f32 %v449_v46, %v305_v11  ;;  %v10465_v51 = vpack.c.bf16 %v738_v63, %v730_v34  ;;  %v313_v59 = vld [vmem:[%s8164_s13 + $0x430] sm:$0xff] }
  0xf8   : > { %v10391_v23 = vld [vmem:[%s14410_s2 + $0x6c8] sm:$0xff]  ;;  %v7033_v61 = vcombine.high %v10346_v4, %v10351_v62  ;;  %4536 = vmatprep.subr.bf16.mxu1 %v7169_v31  ;;  %15001 = vst [vmem:[#allocation199_spill] sm:$0xff] %v10437_v2  ;;  %v7032_v15 = vcombine.low %v10346_v4, %v10351_v62  ;;  %v10467_v31 = vadd.f32 %v458_v48, %v314_v36  ;;  %v319_v4 = vld [vmem:[%s8164_s13 + $0x460] sm:$0xff] }
  0xf9   : > { %v10403_v28 = vld [vmem:[%s14410_s2 + $0x6e8] sm:$0xff]  ;;  %15003 = vst [vmem:[#allocation201_spill] sm:$0xff] %v10449_v47  ;;  %15004 = vst [vmem:[#allocation202_spill] sm:$0xff] %v10451_v26  ;;  %v10469_v11 = vadd.f32 %v466_v60, %v322_v5  ;;  %4537 = vmatpush2.bf16.msra.mxu1 %v7168_v41  ;;  %v727_v56 = vmul.f32 %v10426_v32, %v10426_v32  ;;  %v311_v60 = vld [vmem:[%s8164_s13 + $0x420] sm:$0xff]  ;;  %v729_v5 = vmul.f32 %v10439_v0, %v10439_v0 }
  0xfa   : > { %v312_v21 = vld [vmem:[%s8164_s13 + $0x428] sm:$0xff]  ;;  %v7161_v7 = vcombine.high %v10391_v23, %v10403_v28  ;;  %4415 = vmatprep.subr.bf16.mxu0 %v7033_v61  ;;  %15007 = vst [vmem:[#allocation205_spill] sm:$0xff] %v10465_v51  ;;  %15008 = vst [vmem:[#allocation206_spill] sm:$0xff] %v10467_v31  ;;  %v455_v62 = vld [vmem:[%s14409_s1 + $0x420] sm:$0xff]  ;;  %4361 = vmatmul.mubr.bf16.gmra.mxu1 %v10435_v43  ;;  %v737_v46 = vmul.f32 %v10451_v26, %v10451_v26 }
  0xfb   : > { %v320_v42 = vld [vmem:[%s8164_s13 + $0x468] sm:$0xff]  ;;  %15009 = vst [vmem:[#allocation207_spill] sm:$0xff] %v10469_v11  ;;  %v463_v48 = vld [vmem:[%s14409_s1 + $0x460] sm:$0xff]  ;;  %4247 = vmatprep.mubr.bf16.mxu0 %v10449_v47  ;;  %4370 = vmatprep.mubr.bf16.mxu1 %v10465_v51  ;;  %v746_v34 = vmul.f32 %v10467_v31, %v10467_v31  ;;  %v754_v63 = vmul.f32 %v10469_v11, %v10469_v11  ;;  %v457_v26 = vld [vmem:[%s14409_s1 + $0x430] sm:$0xff] }
  0xfc   : > { %v456_v33 = vld [vmem:[%s14409_s1 + $0x428] sm:$0xff]  ;;  %4538 = vmatprep.subr.bf16.mxu1 %v7161_v7  ;;  %4416 = vmatpush2.bf16.msra.mxu0 %v7032_v15  ;;  %v321_v7 = vld [vmem:[%s8164_s13 + $0x470] sm:$0xff]  ;;  %v10529_v15 = vadd.f32 %v455_v62, %v311_v60  ;;  %v10531_v11 = vadd.f32 %v463_v48, %v319_v4 }
  0xfd   : > { %v464_v54 = vld [vmem:[%s14409_s1 + $0x468] sm:$0xff]  ;;  %v10459_v44 = vadd.f32 %v456_v33, %v312_v21  ;;  %v7160_v21 = vcombine.low %v10391_v23, %v10403_v28  ;;  %v735_v33 = vmul.f32 %v10437_v2, %v10437_v2  ;;  %v465_v0 = vld [vmem:[%s14409_s1 + $0x470] sm:$0xff] }
  0xfe   : > { %v908_v1 = vld [vmem:[%s14410_s2 + $0x288] sm:$0xff]  ;;  %v10461_v40 = vadd.f32 %v464_v54, %v320_v42  ;;  %15011 = vst [vmem:[#allocation209_spill] sm:$0xff] %v10529_v15  ;;  %15012 = vst [vmem:[#allocation210_spill] sm:$0xff] %v10531_v11  ;;  %v751_v62 = vmul.f32 %v10531_v11, %v10531_v11 }
  0xff   : > { %v912_v12 = vld [vmem:[%s14410_s2 + $0x2a8] sm:$0xff]  ;;  %15005 = vst [vmem:[#allocation203_spill] sm:$0xff] %v10459_v44  ;;  %v744_v23 = vmul.f32 %v10459_v44, %v10459_v44  ;;  %4539 = vmatpush2.bf16.msra.mxu1 %v7160_v21 }
 0x100   : > { %v1036_v57 = vld [vmem:[%s14410_s2 + $0x688] sm:$0xff]  ;;  %15006 = vst [vmem:[#allocation204_spill] sm:$0xff] %v10461_v40  ;;  %v7025_v42 = vcombine.high %v908_v1, %v912_v12  ;;  %v752_v25 = vmul.f32 %v10461_v40, %v10461_v40  ;;  %v7024_v61 = vcombine.low %v908_v1, %v912_v12  ;;  %v10527_v12 = vpack.c.bf16 %v735_v33, %v727_v56 }
 0x101   : > { %v1040_v55 = vld [vmem:[%s14410_s2 + $0x6a8] sm:$0xff]  ;;  %v10543_v56 = vadd.f32 %v457_v26, %v313_v59 }
 0x102   : > { %v10478_v54 = vld [vmem:[%s14410_s2 + $0x248] sm:$0xff]  ;;  %v7153_v41 = vcombine.high %v1036_v57, %v1040_v55  ;;  %4417 = vmatprep.subr.bf16.mxu0 %v7025_v42  ;;  %v7152_v40 = vcombine.low %v1036_v57, %v1040_v55  ;;  %15010 = vst [vmem:[#allocation208_spill] sm:$0xff] %v10527_v12  ;;  %v10539_v57 = vpack.c.bf16 %v737_v46, %v729_v5 }
 0x103   : > { %v10483_v36 = vld [vmem:[%s14410_s2 + $0x268] sm:$0xff]  ;;  %v10541_v55 = vpack.c.bf16 %v752_v25, %v744_v23  ;;  %15015 = vst [vmem:[#allocation213_spill] sm:$0xff] %v10543_v56  ;;  %v10545_v42 = vadd.f32 %v465_v0, %v321_v7  ;;  %4418 = vmatpush2.bf16.msra.mxu0 %v7024_v61  ;;  %v743_v0 = vmul.f32 %v10529_v15, %v10529_v15 }
 0x104   : > { %v1028_v53 = vld [vmem:[%s14410_s2 + $0x648] sm:$0xff]  ;;  %v7017_v1 = vcombine.high %v10478_v54, %v10483_v36  ;;  %4540 = vmatprep.subr.bf16.mxu1 %v7153_v41  ;;  %15013 = vst [vmem:[#allocation211_spill] sm:$0xff] %v10539_v57  ;;  %v10553_v41 = vpack.c.bf16 %v754_v63, %v746_v34  ;;  %v7016_v5 = vcombine.low %v10478_v54, %v10483_v36 }
 0x105   : > { %v1032_v28 = vld [vmem:[%s14410_s2 + $0x668] sm:$0xff]  ;;  %15014 = vst [vmem:[#allocation212_spill] sm:$0xff] %v10541_v55  ;;  %15016 = vst [vmem:[#allocation214_spill] sm:$0xff] %v10545_v42  ;;  %4541 = vmatpush2.bf16.msra.mxu1 %v7152_v40  ;;  %4248 = vmatmul.mubr.bf16.gmra.mxu0 %v10527_v12  ;;  %v745_v54 = vmul.f32 %v10543_v56, %v10543_v56  ;;  %v753_v36 = vmul.f32 %v10545_v42, %v10545_v42 }
 0x106   : > { %v7145_v31 = vcombine.high %v1028_v53, %v1032_v28  ;;  %v892_v44 = vld [vmem:[%s14410_s2 + $0x208] sm:$0xff]  ;;  %15017 = vst [vmem:[#allocation215_spill] sm:$0xff] %v10553_v41  ;;  %4419 = vmatprep.subr.bf16.mxu0 %v7017_v1  ;;  %v7144_v26 = vcombine.low %v1028_v53, %v1032_v28  ;;  %4371 = vmatmul.mubr.bf16.gmra.mxu1 %v10539_v57 }
 0x107   : > { %v896_v21 = vld [vmem:[%s14410_s2 + $0x228] sm:$0xff]  ;;  %4257 = vmatprep.mubr.bf16.mxu0 %v10541_v55  ;;  %4380 = vmatprep.mubr.bf16.mxu1 %v10553_v41  ;;  %v10581_v28 = vpack.c.bf16 %v751_v62, %v743_v0  ;;  %v10583_v34 = vpack.c.bf16 %v753_v36, %v745_v54 }
 0x108   : > { %v1020_v60 = vld [vmem:[%s14410_s2 + $0x608] sm:$0xff]  ;;  %v7009_v4 = vcombine.high %v892_v44, %v896_v21  ;;  %4542 = vmatprep.subr.bf16.mxu1 %v7145_v31  ;;  %4420 = vmatpush2.bf16.msra.mxu0 %v7016_v5  ;;  %v7008_v25 = vcombine.low %v892_v44, %v896_v21 }
 0x109   : > { %v1024_v33 = vld [vmem:[%s14410_s2 + $0x628] sm:$0xff]  ;;  %4543 = vmatpush2.bf16.msra.mxu1 %v7144_v26  ;;  %15018 = vst [vmem:[#allocation216_spill] sm:$0xff] %v10581_v28  ;;  %15019 = vst [vmem:[#allocation217_spill] sm:$0xff] %v10583_v34 }
 0x10a   : > { %v7137_v48 = vcombine.high %v1020_v60, %v1024_v33  ;;  %v1140_v46 = vld [vmem:[%s14410_s2 + $0x9c8] sm:$0xff]  ;;  %4421 = vmatprep.subr.bf16.mxu0 %v7009_v4  ;;  %v7136_v59 = vcombine.low %v1020_v60, %v1024_v33 }
 0x10b   : > { %v1144_v40 = vld [vmem:[%s14410_s2 + $0x9e8] sm:$0xff] }
 0x10c   : > { %v1268_v31 = vld [vmem:[%s14410_s2 + $0xdc8] sm:$0xff]  ;;  %v7257_v53 = vcombine.high %v1140_v46, %v1144_v40  ;;  %4544 = vmatprep.subr.bf16.mxu1 %v7137_v48  ;;  %4422 = vmatpush2.bf16.msra.mxu0 %v7008_v25  ;;  %v7256_v7 = vcombine.low %v1140_v46, %v1144_v40 }
 0x10d   : > { %v1272_v23 = vld [vmem:[%s14410_s2 + $0xde8] sm:$0xff]  ;;  %4545 = vmatpush2.bf16.msra.mxu1 %v7136_v59  ;;  %4258 = vmatmul.mubr.bf16.gmra.mxu0 %v10581_v28 }
 0x10e   : > { %v7385_v61 = vcombine.high %v1268_v31, %v1272_v23  ;;  %4637 = vmatprep.subr.bf16.mxu0 %v7257_v53  ;;  %4381 = vmatmul.mubr.bf16.gmra.mxu1 %v10583_v34  ;;  %v1132_v44 = vld [vmem:[%s14410_s2 + $0x988] sm:$0xff]  ;;  %v7384_v60 = vcombine.low %v1268_v31, %v1272_v23  ;;  %v11318_v34 = vld [vmem:[%s14410_s2 + $0x8f0] sm:$0xff] }
 0x10f   : > { %4423 = vmatprep.mubr.bf16.mxu0 %v8228_v18  ;;  %4546 = vmatprep.mubr.bf16.mxu1 %v8230_v20  ;;  %v1136_v63 = vld [vmem:[%s14410_s2 + $0x9a8] sm:$0xff]  ;;  %v11292_v20 = vld [vmem:[%s14410_s2 + $0xd10] sm:$0xff] }
 0x110   : > { %4760 = vmatprep.subr.bf16.mxu1 %v7385_v61  ;;  %v1260_v1 = vld [vmem:[%s14410_s2 + $0xd88] sm:$0xff]  ;;  %v7249_v33 = vcombine.high %v1132_v44, %v1136_v63  ;;  %v7248_v48 = vcombine.low %v1132_v44, %v1136_v63 }
 0x111   : > { %v1264_v21 = vld [vmem:[%s14410_s2 + $0xda8] sm:$0xff] }
 0x112   : > { %v1124_v5 = vld [vmem:[%s14410_s2 + $0x948] sm:$0xff]  ;;  %v7377_v4 = vcombine.high %v1260_v1, %v1264_v21  ;;  %v7376_v46 = vcombine.low %v1260_v1, %v1264_v21 }
 0x113   : > { %v1128_v26 = vld [vmem:[%s14410_s2 + $0x968] sm:$0xff] }
 0x114   : > { %v1252_v0 = vld [vmem:[%s14410_s2 + $0xd48] sm:$0xff]  ;;  %v7241_v40 = vcombine.high %v1124_v5, %v1128_v26  ;;  %v7240_v23 = vcombine.low %v1124_v5, %v1128_v26 }
 0x115   : > { %4424 = vmatmul.mubr.bf16.vlgmr.msra.gmra.mxu0 %v8478_v17  ;;  %v1256_v62 = vld [vmem:[%s14410_s2 + $0xd68] sm:$0xff] }
 0x116   : > { %4547 = vmatmul.mubr.bf16.vlgmr.msra.gmra.mxu1 %v8503_v30  ;;  %4638 = vmatpush1.bf16.msra.mxu0 %v7256_v7  ;;  %v7369_v54 = vcombine.high %v1252_v0, %v1256_v62  ;;  %v1116_v36 = vld [vmem:[%s14410_s2 + $0x908] sm:$0xff]  ;;  %v7368_v53 = vcombine.low %v1252_v0, %v1256_v62  ;;  %v11242_v30 = vld [vmem:[%s14410_s2 + $0x950] sm:$0xff] }
 0x117   : > { %4761 = vmatpush1.bf16.msra.mxu1 %v7384_v60  ;;  %4639 = vmatprep.subr.bf16.mxu0 %v7249_v33  ;;  %v1120_v31 = vld [vmem:[%s14410_s2 + $0x928] sm:$0xff] }
 0x118   : > { %4433 = vmatprep.mubr.bf16.mxu0 %v8537_v50  ;;  %4556 = vmatprep.mubr.bf16.mxu1 %v8550_v58  ;;  %v1244_v25 = vld [vmem:[%s14410_s2 + $0xd08] sm:$0xff]  ;;  %v7233_v61 = vcombine.high %v1116_v36, %v1120_v31  ;;  %v7232_v60 = vcombine.low %v1116_v36, %v1120_v31  ;;  %v15076_v58 = vld [vmem:[#allocation186_spill] sm:$0xff] }
 0x119   : > { %4762 = vmatprep.subr.bf16.mxu1 %v7377_v4  ;;  %v1248_v59 = vld [vmem:[%s14410_s2 + $0xd28] sm:$0xff] }
 0x11a   : > { %4640 = vmatpush1.bf16.msra.mxu0 %v7248_v48  ;;  %v1108_v44 = vld [vmem:[%s14410_s2 + $0x8c8] sm:$0xff]  ;;  %v7361_v7 = vcombine.high %v1244_v25, %v1248_v59  ;;  %v7360_v33 = vcombine.low %v1244_v25, %v1248_v59 }
 0x11b   : > { %4763 = vmatpush1.bf16.msra.mxu1 %v7376_v46  ;;  %4641 = vmatprep.subr.bf16.mxu0 %v7241_v40  ;;  %v1112_v63 = vld [vmem:[%s14410_s2 + $0x8e8] sm:$0xff] }
 0x11c   : > { %4764 = vmatprep.subr.bf16.mxu1 %v7369_v54  ;;  %v1236_v1 = vld [vmem:[%s14410_s2 + $0xcc8] sm:$0xff]  ;;  %v7225_v5 = vcombine.high %v1108_v44, %v1112_v63  ;;  %v7224_v62 = vcombine.low %v1108_v44, %v1112_v63 }
 0x11d   : > { %4434 = vmatmul.mubr.bf16.gmra.mxu0 %v8591_v37  ;;  %v1240_v21 = vld [vmem:[%s14410_s2 + $0xce8] sm:$0xff] }
 0x11e   : > { %4557 = vmatmul.mubr.bf16.gmra.mxu1 %v8649_v13  ;;  %4642 = vmatpush1.bf16.msra.mxu0 %v7240_v23  ;;  %v7353_v26 = vcombine.high %v1236_v1, %v1240_v21  ;;  %v1100_v4 = vld [vmem:[%s14410_s2 + $0x888] sm:$0xff]  ;;  %v7352_v40 = vcombine.low %v1236_v1, %v1240_v21  ;;  %v11152_v13 = vld [vmem:[%s14410_s2 + $0x210] sm:$0xff] }
 0x11f   : > { %4765 = vmatpush1.bf16.msra.mxu1 %v7368_v53  ;;  %4643 = vmatprep.subr.bf16.mxu0 %v7233_v61  ;;  %v1104_v0 = vld [vmem:[%s14410_s2 + $0x8a8] sm:$0xff] }
 0x120   : > { %4443 = vmatprep.mubr.bf16.mxu0 %v8687_v14  ;;  %4566 = vmatprep.mubr.bf16.mxu1 %v8689_v16  ;;  %v1228_v48 = vld [vmem:[%s14410_s2 + $0xc88] sm:$0xff]  ;;  %v7217_v54 = vcombine.high %v1100_v4, %v1104_v0  ;;  %v7216_v53 = vcombine.low %v1100_v4, %v1104_v0  ;;  %v11162_v16 = vld [vmem:[%s14410_s2 + $0x610] sm:$0xff] }
 0x121   : > { %4766 = vmatprep.subr.bf16.mxu1 %v7361_v7  ;;  %v1232_v46 = vld [vmem:[%s14410_s2 + $0xca8] sm:$0xff] }
 0x122   : > { %4644 = vmatpush1.bf16.msra.mxu0 %v7232_v60  ;;  %v1092_v36 = vld [vmem:[%s14410_s2 + $0x848] sm:$0xff]  ;;  %v7345_v23 = vcombine.high %v1228_v48, %v1232_v46  ;;  %v7344_v61 = vcombine.low %v1228_v48, %v1232_v46 }
 0x123   : > { %4767 = vmatpush1.bf16.msra.mxu1 %v7360_v33  ;;  %4645 = vmatprep.subr.bf16.mxu0 %v7225_v5  ;;  %v1096_v31 = vld [vmem:[%s14410_s2 + $0x868] sm:$0xff] }
 0x124   : > { %4768 = vmatprep.subr.bf16.mxu1 %v7353_v26  ;;  %v1220_v25 = vld [vmem:[%s14410_s2 + $0xc48] sm:$0xff]  ;;  %v7209_v44 = vcombine.high %v1092_v36, %v1096_v31  ;;  %v7208_v21 = vcombine.low %v1092_v36, %v1096_v31 }
 0x125   : > { %4444 = vmatmul.mubr.bf16.gmra.mxu0 %v8744_v24  ;;  %v1224_v59 = vld [vmem:[%s14410_s2 + $0xc68] sm:$0xff] }
 0x126   : > { %4567 = vmatmul.mubr.bf16.gmra.mxu1 %v8772_v6  ;;  %4646 = vmatpush1.bf16.msra.mxu0 %v7224_v62  ;;  %v7337_v63 = vcombine.high %v1220_v25, %v1224_v59  ;;  %v1084_v7 = vld [vmem:[%s14410_s2 + $0x808] sm:$0xff]  ;;  %v7336_v5 = vcombine.low %v1220_v25, %v1224_v59 }
 0x127   : > { %4769 = vmatpush1.bf16.msra.mxu1 %v7352_v40  ;;  %4453 = vmatprep.mubr.bf16.mxu0 %v8793_v52  ;;  %v1088_v1 = vld [vmem:[%s14410_s2 + $0x828] sm:$0xff] }
 0x128   : > { %4576 = vmatprep.mubr.bf16.mxu1 %v8795_v49  ;;  %4647 = vmatprep.subr.bf16.mxu0 %v7217_v54  ;;  %v1212_v60 = vld [vmem:[%s14410_s2 + $0xc08] sm:$0xff]  ;;  %v7201_v26 = vcombine.high %v1084_v7, %v1088_v1  ;;  %v7200_v40 = vcombine.low %v1084_v7, %v1088_v1 }
 0x129   : > { %4770 = vmatprep.subr.bf16.mxu1 %v7345_v23  ;;  %v1216_v33 = vld [vmem:[%s14410_s2 + $0xc28] sm:$0xff] }
 0x12a   : > { %4648 = vmatpush1.bf16.msra.mxu0 %v7216_v53  ;;  %v1204_v4 = vld [vmem:[%s14410_s2 + $0xbc8] sm:$0xff]  ;;  %v7329_v62 = vcombine.high %v1212_v60, %v1216_v33  ;;  %v7328_v54 = vcombine.low %v1212_v60, %v1216_v33 }
 0x12b   : > { %4771 = vmatpush1.bf16.msra.mxu1 %v7344_v61  ;;  %4649 = vmatprep.subr.bf16.mxu0 %v7209_v44  ;;  %v1208_v0 = vld [vmem:[%s14410_s2 + $0xbe8] sm:$0xff] }
 0x12c   : > { %4772 = vmatprep.subr.bf16.mxu1 %v7337_v63  ;;  %v1332_v48 = vld [vmem:[%s14410_s2 + $0xfc8] sm:$0xff]  ;;  %v7321_v36 = vcombine.high %v1204_v4, %v1208_v0  ;;  %v7320_v59 = vcombine.low %v1204_v4, %v1208_v0 }
 0x12d   : > { %4454 = vmatmul.mubr.bf16.gmra.mxu0 %v8910_v3  ;;  %v1336_v46 = vld [vmem:[%s14410_s2 + $0xfe8] sm:$0xff]  ;;  %v15049_v3 = vld [vmem:[#allocation145_spill] sm:$0xff] }
 0x12e   : > { %4577 = vmatmul.mubr.bf16.gmra.mxu1 %v8912_v35  ;;  %4650 = vmatpush1.bf16.msra.mxu0 %v7208_v21  ;;  %v7449_v31 = vcombine.high %v1332_v48, %v1336_v46  ;;  %v1196_v23 = vld [vmem:[%s14410_s2 + $0xb88] sm:$0xff]  ;;  %v7448_v44 = vcombine.low %v1332_v48, %v1336_v46  ;;  %v15048_v35 = vld [vmem:[#allocation144_spill] sm:$0xff] }
 0x12f   : > { %4773 = vmatpush1.bf16.msra.mxu1 %v7336_v5  ;;  %4463 = vmatprep.mubr.bf16.mxu0 %v8947_v38  ;;  %v1200_v25 = vld [vmem:[%s14410_s2 + $0xba8] sm:$0xff]  ;;  %v861_v38 = vld [vmem:[%s14410_s2 + $0x110] sm:$0xff] }
 0x130   : > { %4586 = vmatprep.mubr.bf16.mxu1 %v8949_v22  ;;  %4651 = vmatprep.subr.bf16.mxu0 %v7201_v26  ;;  %v1324_v53 = vld [vmem:[%s14410_s2 + $0xf88] sm:$0xff]  ;;  %v7313_v63 = vcombine.high %v1196_v23, %v1200_v25  ;;  %v7312_v60 = vcombine.low %v1196_v23, %v1200_v25 }
 0x131   : > { %4774 = vmatprep.subr.bf16.mxu1 %v7329_v62  ;;  %v1328_v61 = vld [vmem:[%s14410_s2 + $0xfa8] sm:$0xff] }
 0x132   : > { %4652 = vmatpush1.bf16.msra.mxu0 %v7200_v40  ;;  %v1188_v7 = vld [vmem:[%s14410_s2 + $0xb48] sm:$0xff]  ;;  %v7441_v21 = vcombine.high %v1324_v53, %v1328_v61  ;;  %v7440_v4 = vcombine.low %v1324_v53, %v1328_v61 }
 0x133   : > { %4775 = vmatpush1.bf16.msra.mxu1 %v7328_v54  ;;  %4653 = vmatprep.subr.bf16.mxu0 %v7321_v36  ;;  %v1192_v1 = vld [vmem:[%s14410_s2 + $0xb68] sm:$0xff] }
 0x134   : > { %4776 = vmatprep.subr.bf16.mxu1 %v7449_v31  ;;  %v1316_v33 = vld [vmem:[%s14410_s2 + $0xf48] sm:$0xff]  ;;  %v7305_v26 = vcombine.high %v1188_v7, %v1192_v1  ;;  %v7304_v46 = vcombine.low %v1188_v7, %v1192_v1  ;;  %v15021_v7 = vld [vmem:[#allocation85_spill] sm:$0xff] }
 0x135   : > { %4464 = vmatmul.mubr.bf16.gmra.mxu0 %v9023_v10  ;;  %v1320_v5 = vld [vmem:[%s14410_s2 + $0xf68] sm:$0xff]  ;;  %v15041_v10 = vld [vmem:[#allocation132_spill] sm:$0xff] }
 0x136   : > { %4587 = vmatmul.mubr.bf16.gmra.mxu1 %v9054_v9  ;;  %4654 = vmatpush2.bf16.msra.mxu0 %v7320_v59  ;;  %v7433_v0 = vcombine.high %v1316_v33, %v1320_v5  ;;  %v1180_v62 = vld [vmem:[%s14410_s2 + $0xb08] sm:$0xff]  ;;  %v7432_v36 = vcombine.low %v1316_v33, %v1320_v5  ;;  %v15040_v9 = vld [vmem:[#allocation130_spill] sm:$0xff] }
 0x137   : > { %4473 = vmatprep.mubr.bf16.mxu0 %v9056_v8  ;;  %4596 = vmatprep.mubr.bf16.mxu1 %v9058_v27  ;;  %v1184_v48 = vld [vmem:[%s14410_s2 + $0xb28] sm:$0xff] }
 0x138   : > { %4777 = vmatpush2.bf16.msra.mxu1 %v7448_v44  ;;  %4655 = vmatprep.subr.bf16.mxu0 %v7313_v63  ;;  %v1308_v40 = vld [vmem:[%s14410_s2 + $0xf08] sm:$0xff]  ;;  %v7297_v31 = vcombine.high %v1180_v62, %v1184_v48  ;;  %v7296_v53 = vcombine.low %v1180_v62, %v1184_v48  ;;  %v15020_v63 = vld [vmem:[#allocation84_spill] sm:$0xff] }
 0x139   : > { %4778 = vmatprep.subr.bf16.mxu1 %v7441_v21  ;;  %v1312_v54 = vld [vmem:[%s14410_s2 + $0xf28] sm:$0xff] }
 0x13a   : > { %4656 = vmatpush2.bf16.msra.mxu0 %v7312_v60  ;;  %v1172_v23 = vld [vmem:[%s14410_s2 + $0xac8] sm:$0xff]  ;;  %v7425_v59 = vcombine.high %v1308_v40, %v1312_v54  ;;  %v7424_v21 = vcombine.low %v1308_v40, %v1312_v54  ;;  %v15022_v40 = vld [vmem:[#allocation90_spill] sm:$0xff] }
 0x13b   : > { %4657 = vmatprep.subr.bf16.mxu0 %v7305_v26  ;;  %v1176_v25 = vld [vmem:[%s14410_s2 + $0xae8] sm:$0xff] }
 0x13c   : > { %4779 = vmatpush2.bf16.msra.mxu1 %v7440_v4  ;;  %v1300_v61 = vld [vmem:[%s14410_s2 + $0xec8] sm:$0xff]  ;;  %v7289_v1 = vcombine.high %v1172_v23, %v1176_v25 }
 0x13d   : > { %4474 = vmatmul.mubr.bf16.gmra.mxu0 %v9114_v19  ;;  %4780 = vmatprep.subr.bf16.mxu1 %v7433_v0  ;;  %v1304_v44 = vld [vmem:[%s14410_s2 + $0xee8] sm:$0xff]  ;;  %v7288_v0 = vcombine.low %v1172_v23, %v1176_v25  ;;  %v15024_v23 = vld [vmem:[#allocation94_spill] sm:$0xff] }
 0x13e   : > { %4597 = vmatmul.mubr.bf16.gmra.mxu1 %v9177_v29  ;;  %4658 = vmatpush2.bf16.msra.mxu0 %v7304_v46  ;;  %v7417_v60 = vcombine.high %v1300_v61, %v1304_v44  ;;  %v1164_v33 = vld [vmem:[%s14410_s2 + $0xa88] sm:$0xff]  ;;  %v7416_v62 = vcombine.low %v1300_v61, %v1304_v44  ;;  %v3933_v46 = vpop.f32.mrf.mxu0 }
 0x13f   : > { %4483 = vmatprep.mubr.bf16.mxu0 %v15020_v63  ;;  %4606 = vmatprep.mubr.bf16.mxu1 %v15021_v7  ;;  %v1168_v5 = vld [vmem:[%s14410_s2 + $0xaa8] sm:$0xff] }
 0x140   : > { %4781 = vmatpush2.bf16.msra.mxu1 %v7432_v36  ;;  %4659 = vmatprep.subr.bf16.mxu0 %v7297_v31  ;;  %v1292_v26 = vld [vmem:[%s14410_s2 + $0xe88] sm:$0xff]  ;;  %v7281_v48 = vcombine.high %v1164_v33, %v1168_v5 }
 0x141   : > { %4782 = vmatprep.subr.bf16.mxu1 %v7425_v59  ;;  %v1296_v4 = vld [vmem:[%s14410_s2 + $0xea8] sm:$0xff]  ;;  %v4056_v59 = vpop.f32.mrf.mxu1 }
 0x142   : > { %4660 = vmatpush2.bf16.msra.mxu0 %v7296_v53  ;;  %v7409_v54 = vcombine.high %v1292_v26, %v1296_v4  ;;  %v1156_v36 = vld [vmem:[%s14410_s2 + $0xa48] sm:$0xff]  ;;  %v15023_v53 = vld [vmem:[#allocation93_spill] sm:$0xff]  ;;  %v10784_v44 = vadd.f32 %v4056_v59, %v3933_v46  ;;  %v7408_v56 = vcombine.low %v1292_v26, %v1296_v4 }
 0x143   : > { %4661 = vmatprep.subr.bf16.mxu0 %v7289_v1  ;;  %v1160_v31 = vld [vmem:[%s14410_s2 + $0xa68] sm:$0xff]  ;;  %v3935_v1 = vpop.f32.mrf.mxu0  ;;  %v4058_v42 = vpop.f32.mrf.mxu1 }
 0x144   : > { %4783 = vmatpush2.bf16.msra.mxu1 %v7424_v21  ;;  %v1284_v25 = vld [vmem:[%s14410_s2 + $0xe48] sm:$0xff]  ;;  %v15025_v21 = vld [vmem:[#allocation97_spill] sm:$0xff]  ;;  %v7273_v11 = vcombine.high %v1156_v36, %v1160_v31  ;;  %v10787_v15 = vadd.f32 %v4058_v42, %v3935_v1  ;;  %v7272_v4 = vcombine.low %v1156_v36, %v1160_v31  ;;  %v889_v36 = vld [vmem:[%s14410_s2 + $0x1f0] sm:$0xff] }
 0x145   : > { %4484 = vmatmul.mubr.bf16.gmra.mxu0 %v15022_v40  ;;  %4784 = vmatprep.subr.bf16.mxu1 %v7417_v60  ;;  %v1288_v61 = vld [vmem:[%s14410_s2 + $0xe68] sm:$0xff]  ;;  %v7280_v60 = vcombine.low %v1164_v33, %v1168_v5  ;;  %v3937_v2 = vpop.f32.mrf.mxu0 }
 0x146   : > { %4607 = vmatmul.mubr.bf16.gmra.mxu1 %v15023_v53  ;;  %4493 = vmatprep.mubr.bf16.mxu0 %v15024_v23  ;;  %v7401_v32 = vcombine.high %v1284_v25, %v1288_v61  ;;  %v1148_v46 = vld [vmem:[%s14410_s2 + $0xa08] sm:$0xff]  ;;  %v15026_v23 = vld [vmem:[#allocation100_spill] sm:$0xff] }
 0x147   : > { %4616 = vmatprep.mubr.bf16.mxu1 %v15025_v21  ;;  %4662 = vmatpush2.bf16.msra.mxu0 %v7288_v0  ;;  %v1152_v59 = vld [vmem:[%s14410_s2 + $0xa28] sm:$0xff]  ;;  %v4060_v0 = vpop.f32.mrf.mxu1  ;;  %v3939_v26 = vpop.f32.mrf.mxu0 }
 0x148   : > { %4785 = vmatpush2.bf16.msra.mxu1 %v7416_v62  ;;  %4663 = vmatprep.subr.bf16.mxu0 %v7281_v48  ;;  %v1276_v33 = vld [vmem:[%s14410_s2 + $0xe08] sm:$0xff]  ;;  %v10801_v5 = vadd.f32 %v4060_v0, %v3937_v2  ;;  %v7400_v48 = vcombine.low %v1284_v25, %v1288_v61  ;;  %v885_v2 = vld [vmem:[%s14410_s2 + $0x1d0] sm:$0xff]  ;;  %v15029_v0 = vld [vmem:[#allocation109_spill] sm:$0xff] }
 0x149   : > { %4786 = vmatprep.subr.bf16.mxu1 %v7409_v54  ;;  %v1280_v42 = vld [vmem:[%s14410_s2 + $0xe28] sm:$0xff]  ;;  %v4062_v62 = vpop.f32.mrf.mxu1  ;;  %v7265_v54 = vcombine.high %v1148_v46, %v1152_v59  ;;  %v3943_v21 = vpop.f32.mrf.mxu0  ;;  %v1013_v25 = vld [vmem:[%s14410_s2 + $0x5d0] sm:$0xff] }
 0x14a   : > { %v10803_v1 = vadd.f32 %v4062_v62, %v3939_v26  ;;  %v7393_v53 = vcombine.high %v1276_v33, %v1280_v42  ;;  %v7264_v26 = vcombine.low %v1148_v46, %v1152_v59  ;;  %v15030_v59 = vld [vmem:[#allocation114_spill] sm:$0xff] }
 0x14b   : > { %4664 = vmatpush2.bf16.msra.mxu0 %v7280_v60  ;;  %v4066_v31 = vpop.f32.mrf.mxu1  ;;  %v3945_v60 = vpop.f32.mrf.mxu0 }
 0x14c   : > { %4787 = vmatpush2.bf16.msra.mxu1 %v7408_v56  ;;  %4665 = vmatprep.subr.bf16.mxu0 %v7273_v11  ;;  %v15027_v56 = vld [vmem:[#allocation103_spill] sm:$0xff]  ;;  %v15028_v11 = vld [vmem:[#allocation106_spill] sm:$0xff]  ;;  %v10820_v61 = vadd.f32 %v4066_v31, %v3943_v21 }
 0x14d   : > { %4494 = vmatmul.mubr.bf16.gmra.mxu0 %v15026_v23  ;;  %4788 = vmatprep.subr.bf16.mxu1 %v7401_v32  ;;  %v1017_v32 = vld [vmem:[%s14410_s2 + $0x5f0] sm:$0xff]  ;;  %v4068_v62 = vpop.f32.mrf.mxu1  ;;  %v3947_v40 = vpop.f32.mrf.mxu0 }
 0x14e   : > { %4617 = vmatmul.mubr.bf16.gmra.mxu1 %v15027_v56  ;;  %4503 = vmatprep.mubr.bf16.mxu0 %v15028_v11  ;;  %v7392_v56 = vcombine.low %v1276_v33, %v1280_v42  ;;  %v7003_v11 = vcombine.high %v885_v2, %v889_v36  ;;  %v10823_v23 = vadd.f32 %v4068_v62, %v3945_v60  ;;  %v15031_v42 = vld [vmem:[#allocation117_spill] sm:$0xff] }
 0x14f   : > { %4626 = vmatprep.mubr.bf16.mxu1 %v15029_v0  ;;  %4666 = vmatpush2.bf16.msra.mxu0 %v7272_v4  ;;  %v7131_v7 = vcombine.high %v1013_v25, %v1017_v32  ;;  %v4070_v63 = vpop.f32.mrf.mxu1  ;;  %v3949_v21 = vpop.f32.mrf.mxu0  ;;  %v7002_v62 = vcombine.low %v885_v2, %v889_v36  ;;  %v873_v2 = vld [vmem:[%s14410_s2 + $0x170] sm:$0xff] }
 0x150   : > { %4789 = vmatpush2.bf16.msra.mxu1 %v7400_v48  ;;  %4667 = vmatprep.subr.bf16.mxu0 %v7265_v54  ;;  %v10825_v29 = vadd.f32 %v4070_v63, %v3947_v40  ;;  %v15032_v48 = vld [vmem:[#allocation118_spill] sm:$0xff]  ;;  %v15033_v40 = vld [vmem:[#allocation119_spill] sm:$0xff] }
 0x151   : > { %4790 = vmatprep.subr.bf16.mxu1 %v7393_v53  ;;  %v4072_v31 = vpop.f32.mrf.mxu1  ;;  %v3953_v46 = vpop.f32.mrf.mxu0 }
 0x152   : > { %v10827_v4 = vadd.f32 %v4072_v31, %v3949_v21  ;;  %v1005_v21 = vld [vmem:[%s14410_s2 + $0x590] sm:$0xff] }
 0x153   : > { %4668 = vmatpush2.bf16.msra.mxu0 %v7264_v26  ;;  %v4076_v33 = vpop.f32.mrf.mxu1  ;;  %v3955_v63 = vpop.f32.mrf.mxu0  ;;  %v1009_v31 = vld [vmem:[%s14410_s2 + $0x5b0] sm:$0xff] }
 0x154   : > { %4791 = vmatpush2.bf16.msra.mxu1 %v7392_v56  ;;  %4883 = vmatprep.subr.bf16.mxu0 %v7003_v11  ;;  %v10832_v53 = vadd.f32 %v4076_v33, %v3953_v46  ;;  %v877_v56 = vld [vmem:[%s14410_s2 + $0x190] sm:$0xff]  ;;  %v7123_v0 = vcombine.high %v1005_v21, %v1009_v31 }
 0x155   : > { %4504 = vmatmul.mubr.bf16.gmra.mxu0 %v15030_v59  ;;  %5006 = vmatprep.subr.bf16.mxu1 %v7131_v7  ;;  %v4078_v54 = vpop.f32.mrf.mxu1  ;;  %v881_v11 = vld [vmem:[%s14410_s2 + $0x1b0] sm:$0xff]  ;;  %v3957_v60 = vpop.f32.mrf.mxu0 }
 0x156   : > { %4627 = vmatmul.mubr.bf16.gmra.mxu1 %v15031_v42  ;;  %4669 = vmatprep.mubr.bf16.mxu0 %v15032_v48  ;;  %v10841_v7 = vadd.f32 %v4078_v54, %v3955_v63  ;;  %v6995_v48 = vcombine.high %v877_v56, %v881_v11  ;;  %v869_v63 = vld [vmem:[%s14410_s2 + $0x150] sm:$0xff]  ;;  %v6994_v19 = vcombine.low %v877_v56, %v881_v11 }
 0x157   : > { %4792 = vmatprep.mubr.bf16.mxu1 %v15033_v40  ;;  %v4080_v26 = vpop.f32.mrf.mxu1  ;;  %v3959_v33 = vpop.f32.mrf.mxu0  ;;  %v7130_v40 = vcombine.low %v1013_v25, %v1017_v32  ;;  %v15037_v59 = vld [vmem:[#allocation124_spill] sm:$0xff] }
 0x158   : > { %15034 = vst [vmem:[#allocation218_spill] sm:$0xff] %v10841_v7  ;;  %v10849_v46 = vadd.f32 %v4080_v26, %v3957_v60  ;;  %v997_v25 = vld [vmem:[%s14410_s2 + $0x550] sm:$0xff]  ;;  %v15038_v26 = vld [vmem:[#allocation125_spill] sm:$0xff] }
 0x159   : > { %v4082_v42 = vpop.f32.mrf.mxu1  ;;  %v3963_v54 = vpop.f32.mrf.mxu0  ;;  %v1001_v32 = vld [vmem:[%s14410_s2 + $0x570] sm:$0xff] }
 0x15a   : > { %15035 = vst [vmem:[#allocation219_spill] sm:$0xff] %v10849_v46  ;;  %v10857_v36 = vadd.f32 %v4082_v42, %v3959_v33  ;;  %v7122_v33 = vcombine.low %v1005_v21, %v1009_v31  ;;  %v7115_v22 = vcombine.high %v997_v25, %v1001_v32  ;;  %v865_v56 = vld [vmem:[%s14410_s2 + $0x130] sm:$0xff] }
 0x15b   : > { %v4086_v60 = vpop.f32.mrf.mxu1  ;;  %v3965_v42 = vpop.f32.mrf.mxu0  ;;  %v989_v21 = vld [vmem:[%s14410_s2 + $0x510] sm:$0xff] }
 0x15c   : > { %15036 = vst [vmem:[#allocation220_spill] sm:$0xff] %v10857_v36  ;;  %v10867_v27 = vadd.f32 %v4086_v60, %v3963_v54  ;;  %v993_v31 = vld [vmem:[%s14410_s2 + $0x530] sm:$0xff] }
 0x15d   : > { %4670 = vmatmul.mubr.bf16.vlgmr.msra.gmra.mxu0 %v15037_v59  ;;  %v6987_v59 = vcombine.high %v869_v63, %v873_v2  ;;  %v4088_v8 = vpop.f32.mrf.mxu1  ;;  %v11265_v46 = vld [vmem:[%s14410_s2 + $0xd70] sm:$0xff] }
 0x15e   : > { %4793 = vmatmul.mubr.bf16.vlgmr.msra.gmra.mxu1 %v15038_v26  ;;  %4884 = vmatpush1.bf16.msra.mxu0 %v7002_v62  ;;  %15039 = vst [vmem:[#allocation221_spill] sm:$0xff] %v10867_v27  ;;  %v10877_v11 = vadd.f32 %v4088_v8, %v3965_v42  ;;  %v6986_v62 = vcombine.low %v869_v63, %v873_v2  ;;  %v11247_v27 = vld [vmem:[%s14410_s2 + $0x970] sm:$0xff]  ;;  %15083 = vst [vmem:[#allocation244_spill] sm:$0xff] %v11265_v46 }
 0x15f   : > { %5007 = vmatpush1.bf16.msra.mxu1 %v7130_v40  ;;  %4885 = vmatprep.subr.bf16.mxu0 %v6995_v48  ;;  %v3967_v40 = vpop.f32.mrf.mxu0  ;;  %v4090_v48 = vpop.f32.mrf.mxu1  ;;  %v7114_v8 = vcombine.low %v997_v25, %v1001_v32  ;;  %v6979_v42 = vcombine.high %v861_v38, %v865_v56  ;;  %v15046_v32 = vld [vmem:[#allocation141_spill] sm:$0xff]  ;;  %v11365_v46 = vld [vmem:[%s14410_s2 + $0xc90] sm:$0xff] }
 0x160   : > { %4679 = vmatprep.mubr.bf16.mxu0 %v15040_v9  ;;  %4802 = vmatprep.mubr.bf16.mxu1 %v15041_v10  ;;  %15042 = vst [vmem:[#allocation222_spill] sm:$0xff] %v10877_v11  ;;  %v10885_v54 = vadd.f32 %v4090_v48, %v3967_v40  ;;  %v15045_v40 = vld [vmem:[#allocation138_spill] sm:$0xff]  ;;  %v7107_v48 = vcombine.high %v989_v21, %v993_v31  ;;  %v11220_v11 = vld [vmem:[%s14410_s2 + $0x9b0] sm:$0xff] }
 0x161   : > { %5008 = vmatprep.subr.bf16.mxu1 %v7123_v0  ;;  %v3969_v60 = vpop.f32.mrf.mxu0  ;;  %v4092_v10 = vpop.f32.mrf.mxu1  ;;  %v857_v0 = vld [vmem:[%s14410_s2 + $0xf0] sm:$0xff] }
 0x162   : > { %4886 = vmatpush1.bf16.msra.mxu0 %v6994_v19  ;;  %15043 = vst [vmem:[#allocation223_spill] sm:$0xff] %v10885_v54  ;;  %v853_v19 = vld [vmem:[%s14410_s2 + $0xd0] sm:$0xff]  ;;  %v10893_v63 = vadd.f32 %v4092_v10, %v3969_v60  ;;  %v7106_v60 = vcombine.low %v989_v21, %v993_v31 }
 0x163   : > { %5009 = vmatpush1.bf16.msra.mxu1 %v7122_v33  ;;  %4887 = vmatprep.subr.bf16.mxu0 %v6987_v59  ;;  %v3973_v2 = vpop.f32.mrf.mxu0  ;;  %v981_v59 = vld [vmem:[%s14410_s2 + $0x4d0] sm:$0xff]  ;;  %v4096_v25 = vpop.f32.mrf.mxu1  ;;  %v6978_v33 = vcombine.low %v861_v38, %v865_v56  ;;  %v6970_v21 = vcombine.low %v853_v19, %v857_v0 }
 0x164   : > { %5010 = vmatprep.subr.bf16.mxu1 %v7115_v22  ;;  %15044 = vst [vmem:[#allocation224_spill] sm:$0xff] %v10893_v63  ;;  %v985_v22 = vld [vmem:[%s14410_s2 + $0x4f0] sm:$0xff]  ;;  %v10903_v9 = vadd.f32 %v4096_v25, %v3973_v2 }
 0x165   : > { %4680 = vmatmul.mubr.bf16.gmra.mxu0 %v15045_v40  ;;  %v3975_v10 = vpop.f32.mrf.mxu0  ;;  %v6971_v40 = vcombine.high %v853_v19, %v857_v0  ;;  %v4098_v26 = vpop.f32.mrf.mxu1  ;;  %v7099_v49 = vcombine.high %v981_v59, %v985_v22  ;;  %v845_v38 = vld [vmem:[%s14410_s2 + $0x90] sm:$0xff]  ;;  %v7098_v2 = vcombine.low %v981_v59, %v985_v22  ;;  %v15054_v22 = vld [vmem:[#allocation150_spill] sm:$0xff] }
 0x166   : > { %4803 = vmatmul.mubr.bf16.gmra.mxu1 %v15046_v32  ;;  %4888 = vmatpush1.bf16.msra.mxu0 %v6986_v62  ;;  %15047 = vst [vmem:[#allocation225_spill] sm:$0xff] %v10903_v9  ;;  %v10907_v52 = vadd.f32 %v4098_v26, %v3975_v10  ;;  %v849_v56 = vld [vmem:[%s14410_s2 + $0xb0] sm:$0xff]  ;;  %v15056_v32 = vld [vmem:[#allocation157_spill] sm:$0xff] }
 0x167   : > { %5011 = vmatpush1.bf16.msra.mxu1 %v7114_v8  ;;  %4889 = vmatprep.subr.bf16.mxu0 %v6979_v42  ;;  %v3977_v6 = vpop.f32.mrf.mxu0  ;;  %v4100_v62 = vpop.f32.mrf.mxu1  ;;  %v973_v31 = vld [vmem:[%s14410_s2 + $0x490] sm:$0xff]  ;;  %v6963_v25 = vcombine.high %v845_v38, %v849_v56 }
 0x168   : > { %4689 = vmatprep.mubr.bf16.mxu0 %v15048_v35  ;;  %4812 = vmatprep.mubr.bf16.mxu1 %v15049_v3  ;;  %15050 = vst [vmem:[#allocation226_spill] sm:$0xff] %v10907_v52  ;;  %v977_v26 = vld [vmem:[%s14410_s2 + $0x4b0] sm:$0xff]  ;;  %v10921_v8 = vadd.f32 %v4100_v62, %v3977_v6 }
 0x169   : > { %5012 = vmatprep.subr.bf16.mxu1 %v7107_v48  ;;  %v3979_v42 = vpop.f32.mrf.mxu0  ;;  %v4102_v48 = vpop.f32.mrf.mxu1  ;;  %v837_v19 = vld [vmem:[%s14410_s2 + $0x50] sm:$0xff]  ;;  %v7091_v62 = vcombine.high %v973_v31, %v977_v26 }
 0x16a   : > { %4890 = vmatpush1.bf16.msra.mxu0 %v6978_v33  ;;  %15051 = vst [vmem:[#allocation227_spill] sm:$0xff] %v10921_v8  ;;  %v841_v0 = vld [vmem:[%s14410_s2 + $0x70] sm:$0xff]  ;;  %v10929_v33 = vadd.f32 %v4102_v48, %v3979_v42  ;;  %v7090_v48 = vcombine.low %v973_v31, %v977_v26 }
 0x16b   : > { %5013 = vmatpush1.bf16.msra.mxu1 %v7106_v60  ;;  %4891 = vmatprep.subr.bf16.mxu0 %v6971_v40  ;;  %v3983_v10 = vpop.f32.mrf.mxu0  ;;  %v15053_v6 = vld [vmem:[#allocation148_spill] sm:$0xff]  ;;  %v4106_v59 = vpop.f32.mrf.mxu1  ;;  %v6962_v60 = vcombine.low %v845_v38, %v849_v56  ;;  %v6954_v31 = vcombine.low %v837_v19, %v841_v0 }
 0x16c   : > { %5014 = vmatprep.subr.bf16.mxu1 %v7099_v49  ;;  %15052 = vst [vmem:[#allocation228_spill] sm:$0xff] %v10929_v33  ;;  %v965_v40 = vld [vmem:[%s14410_s2 + $0x450] sm:$0xff]  ;;  %v10939_v3 = vadd.f32 %v4106_v59, %v3983_v10 }
 0x16d   : > { %4690 = vmatmul.mubr.bf16.gmra.mxu0 %v15053_v6  ;;  %v969_v49 = vld [vmem:[%s14410_s2 + $0x470] sm:$0xff]  ;;  %v3985_v42 = vpop.f32.mrf.mxu0  ;;  %v6955_v6 = vcombine.high %v837_v19, %v841_v0  ;;  %v4108_v35 = vpop.f32.mrf.mxu1 }
 0x16e   : > { %4813 = vmatmul.mubr.bf16.gmra.mxu1 %v15054_v22  ;;  %4892 = vmatpush1.bf16.msra.mxu0 %v6970_v21  ;;  %15055 = vst [vmem:[#allocation229_spill] sm:$0xff] %v10939_v3  ;;  %v7083_v24 = vcombine.high %v965_v40, %v969_v49  ;;  %v10943_v33 = vadd.f32 %v4108_v35, %v3985_v42  ;;  %v829_v38 = vld [vmem:[%s14410_s2 + $0x10] sm:$0xff] }
 0x16f   : > { %5015 = vmatpush1.bf16.msra.mxu1 %v7098_v2  ;;  %4699 = vmatprep.mubr.bf16.mxu0 %v9965_v45  ;;  %v3987_v8 = vpop.f32.mrf.mxu0  ;;  %v833_v56 = vld [vmem:[%s14410_s2 + $0x30] sm:$0xff]  ;;  %v4110_v21 = vpop.f32.mrf.mxu1  ;;  %v7082_v10 = vcombine.low %v965_v40, %v969_v49  ;;  %v15061_v49 = vld [vmem:[#allocation166_spill] sm:$0xff] }
 0x170   : > { %4822 = vmatprep.mubr.bf16.mxu1 %v15056_v32  ;;  %4893 = vmatprep.subr.bf16.mxu0 %v6963_v25  ;;  %15057 = vst [vmem:[#allocation230_spill] sm:$0xff] %v10943_v33  ;;  %v957_v26 = vld [vmem:[%s14410_s2 + $0x410] sm:$0xff]  ;;  %v10957_v2 = vadd.f32 %v4110_v21, %v3987_v8  ;;  %v6947_v59 = vcombine.high %v829_v38, %v833_v56  ;;  %v15060_v8 = vld [vmem:[#allocation163_spill] sm:$0xff] }
 0x171   : > { %5016 = vmatprep.subr.bf16.mxu1 %v7091_v62  ;;  %v961_v35 = vld [vmem:[%s14410_s2 + $0x430] sm:$0xff]  ;;  %v3989_v25 = vpop.f32.mrf.mxu0  ;;  %v4112_v62 = vpop.f32.mrf.mxu1 }
 0x172   : > { %4894 = vmatpush1.bf16.msra.mxu0 %v6962_v60  ;;  %15058 = vst [vmem:[#allocation231_spill] sm:$0xff] %v10957_v2  ;;  %v949_v19 = vld [vmem:[%s14410_s2 + $0x3d0] sm:$0xff]  ;;  %v10965_v60 = vadd.f32 %v4112_v62, %v3989_v25  ;;  %v7075_v21 = vcombine.high %v957_v26, %v961_v35  ;;  %v7074_v32 = vcombine.low %v957_v26, %v961_v35 }
 0x173   : > { %5017 = vmatpush1.bf16.msra.mxu1 %v7090_v48  ;;  %4895 = vmatprep.subr.bf16.mxu0 %v6955_v6  ;;  %v953_v0 = vld [vmem:[%s14410_s2 + $0x3f0] sm:$0xff]  ;;  %v3993_v42 = vpop.f32.mrf.mxu0  ;;  %v4116_v40 = vpop.f32.mrf.mxu1  ;;  %v6946_v48 = vcombine.low %v829_v38, %v833_v56 }
 0x174   : > { %5018 = vmatprep.subr.bf16.mxu1 %v7083_v24  ;;  %15059 = vst [vmem:[#allocation232_spill] sm:$0xff] %v10965_v60  ;;  %v10971_v6 = vld [vmem:[%s14410_s2 + $0x7d0] sm:$0xff]  ;;  %v10979_v25 = vadd.f32 %v4116_v40, %v3993_v42  ;;  %v7067_v45 = vcombine.high %v949_v19, %v953_v0  ;;  %v15064_v60 = vld [vmem:[#allocation171_spill] sm:$0xff]  ;;  %v7066_v26 = vcombine.low %v949_v19, %v953_v0 }
 0x175   : > { %4700 = vmatmul.mubr.bf16.gmra.mxu0 %v15060_v8  ;;  %v10976_v24 = vld [vmem:[%s14410_s2 + $0x7f0] sm:$0xff]  ;;  %v3995_v62 = vpop.f32.mrf.mxu0  ;;  %v15063_v8 = vld [vmem:[#allocation170_spill] sm:$0xff]  ;;  %v4118_v22 = vpop.f32.mrf.mxu1 }
 0x176   : > { %4823 = vmatmul.mubr.bf16.gmra.mxu1 %v15061_v49  ;;  %4896 = vmatpush1.bf16.msra.mxu0 %v6954_v31  ;;  %15062 = vst [vmem:[#allocation233_spill] sm:$0xff] %v10979_v25  ;;  %v7195_v2 = vcombine.high %v10971_v6, %v10976_v24  ;;  %v10985_v33 = vadd.f32 %v4118_v22, %v3995_v62  ;;  %v10990_v38 = vld [vmem:[%s14410_s2 + $0x390] sm:$0xff] }
 0x177   : > { %5019 = vmatpush1.bf16.msra.mxu1 %v7082_v10  ;;  %4709 = vmatprep.mubr.bf16.mxu0 %v15063_v8  ;;  %v3997_v49 = vpop.f32.mrf.mxu0  ;;  %v945_v56 = vld [vmem:[%s14410_s2 + $0x3b0] sm:$0xff]  ;;  %v4120_v31 = vpop.f32.mrf.mxu1 }
 0x178   : > { %4832 = vmatprep.mubr.bf16.mxu1 %v15064_v60  ;;  %4897 = vmatprep.subr.bf16.mxu0 %v6947_v59  ;;  %15065 = vst [vmem:[#allocation234_spill] sm:$0xff] %v10985_v33  ;;  %v10998_v35 = vld [vmem:[%s14410_s2 + $0x790] sm:$0xff]  ;;  %v11005_v10 = vadd.f32 %v4120_v31, %v3997_v49  ;;  %v7059_v40 = vcombine.high %v10990_v38, %v945_v56 }
 0x179   : > { %5020 = vmatprep.subr.bf16.mxu1 %v7075_v21  ;;  %v11003_v22 = vld [vmem:[%s14410_s2 + $0x7b0] sm:$0xff]  ;;  %v3999_v59 = vpop.f32.mrf.mxu0  ;;  %v4122_v0 = vpop.f32.mrf.mxu1  ;;  %v7194_v21 = vcombine.low %v10971_v6, %v10976_v24  ;;  %v7058_v60 = vcombine.low %v10990_v38, %v945_v56  ;;  %v15071_v56 = vld [vmem:[#allocation178_spill] sm:$0xff] }
 0x17a   : > { %4898 = vmatpush1.bf16.msra.mxu0 %v6946_v48  ;;  %15066 = vst [vmem:[#allocation235_spill] sm:$0xff] %v11005_v10  ;;  %v11010_v42 = vld [vmem:[%s14410_s2 + $0x350] sm:$0xff]  ;;  %v11035_v48 = vadd.f32 %v4122_v0, %v3999_v59  ;;  %v7187_v24 = vcombine.high %v10998_v35, %v11003_v22  ;;  %v7186_v8 = vcombine.low %v10998_v35, %v11003_v22  ;;  %v15072_v35 = vld [vmem:[#allocation179_spill] sm:$0xff] }
 0x17b   : > { %5021 = vmatpush1.bf16.msra.mxu1 %v7074_v32  ;;  %4899 = vmatprep.subr.bf16.mxu0 %v7067_v45  ;;  %v11015_v19 = vld [vmem:[%s14410_s2 + $0x370] sm:$0xff]  ;;  %v4126_v0 = vpop.f32.mrf.mxu1 }
 0x17c   : > { %5022 = vmatprep.subr.bf16.mxu1 %v7195_v2  ;;  %v11023_v45 = vld [vmem:[%s14410_s2 + $0x750] sm:$0xff]  ;;  %15067 = vst [vmem:[#allocation236_spill] sm:$0xff] %v11035_v48  ;;  %v4003_v2 = vpop.f32.mrf.mxu0  ;;  %v7050_v22 = vcombine.low %v11010_v42, %v11015_v19  ;;  %v7051_v33 = vcombine.high %v11010_v42, %v11015_v19 }
 0x17d   : > { %v11028_v32 = vld [vmem:[%s14410_s2 + $0x770] sm:$0xff] }
 0x17e   : > { %v11033_v49 = vld [vmem:[%s14410_s2 + $0x310] sm:$0xff]  ;;  %4900 = vmatpush2.bf16.msra.mxu0 %v7066_v26  ;;  %v11074_v26 = vadd.f32 %v4126_v0, %v4003_v2  ;;  %v4005_v38 = vpop.f32.mrf.mxu0  ;;  %v7179_v19 = vcombine.high %v11023_v45, %v11028_v32  ;;  %v15085_v17 = vcombine.low %v11023_v45, %v11028_v32 }
 0x17f   : > { %v15068_v6 = vld [vmem:[#allocation172_spill] sm:$0xff]  ;;  %5023 = vmatpush2.bf16.msra.mxu1 %v7194_v21  ;;  %4901 = vmatprep.subr.bf16.mxu0 %v7059_v40 }
 0x180   : > { %4710 = vmatmul.mubr.bf16.gmra.mxu0 %v15068_v6  ;;  %v11043_v62 = vld [vmem:[%s14410_s2 + $0x330] sm:$0xff]  ;;  %v15069_v6 = vld [vmem:[#allocation174_spill] sm:$0xff]  ;;  %15070 = vst [vmem:[#allocation237_spill] sm:$0xff] %v11074_v26  ;;  %v4007_v42 = vpop.f32.mrf.mxu0  ;;  %5024 = vmatprep.subr.bf16.mxu1 %v7187_v24 }
 0x181   : > { %v11048_v31 = vld [vmem:[%s14410_s2 + $0x710] sm:$0xff]  ;;  %4833 = vmatmul.mubr.bf16.gmra.mxu1 %v15069_v6  ;;  %4719 = vmatprep.mubr.bf16.mxu0 %v15071_v56  ;;  %v15086_v36 = vcombine.high %v11033_v49, %v11043_v62 }
 0x182   : > { %v11053_v59 = vld [vmem:[%s14410_s2 + $0x730] sm:$0xff]  ;;  %4842 = vmatprep.mubr.bf16.mxu1 %v15072_v35  ;;  %v4128_v35 = vpop.f32.mrf.mxu1  ;;  %4902 = vmatpush2.bf16.msra.mxu0 %v7058_v60  ;;  %v4009_v14 = vpop.f32.mrf.mxu0 }
 0x183   : > { %v11062_v48 = vld [vmem:[%s14410_s2 + $0x2d0] sm:$0xff]  ;;  %v11118_v40 = vadd.f32 %v4128_v35, %v4005_v38  ;;  %4903 = vmatprep.subr.bf16.mxu0 %v7051_v33  ;;  %5025 = vmatpush2.bf16.msra.mxu1 %v7186_v8  ;;  %v15088_v7 = vcombine.high %v11048_v31, %v11053_v59 }
 0x184   : > { %v11067_v10 = vld [vmem:[%s14410_s2 + $0x2f0] sm:$0xff]  ;;  %v4130_v35 = vpop.f32.mrf.mxu1  ;;  %v4013_v9 = vpop.f32.mrf.mxu0  ;;  %5026 = vmatprep.subr.bf16.mxu1 %v7179_v19 }
 0x185   : > { %v11072_v6 = vld [vmem:[%s14410_s2 + $0x6d0] sm:$0xff]  ;;  %15073 = vst [vmem:[#allocation238_spill] sm:$0xff] %v11118_v40  ;;  %v11164_v56 = vadd.f32 %v4130_v35, %v4007_v42 }
 0x186   : > { %v11085_v25 = vld [vmem:[%s14410_s2 + $0x6f0] sm:$0xff]  ;;  %v4132_v35 = vpop.f32.mrf.mxu1  ;;  %4904 = vmatpush2.bf16.msra.mxu0 %v7050_v22 }
 0x187   : > { %v11090_v2 = vld [vmem:[%s14410_s2 + $0x290] sm:$0xff]  ;;  %15074 = vst [vmem:[#allocation239_spill] sm:$0xff] %v11164_v56  ;;  %v11210_v37 = vadd.f32 %v4132_v35, %v4009_v14  ;;  %v15079_v56 = vld [vmem:[#allocation189_spill] sm:$0xff]  ;;  %5027 = vmatpush2.bf16.msra.mxu1 %v15085_v17  ;;  %4905 = vmatprep.subr.bf16.mxu0 %v15086_v36  ;;  %v15098_v18 = vcombine.high %v11072_v6, %v11085_v25 }
 0x188   : > { %v11095_v0 = vld [vmem:[%s14410_s2 + $0x2b0] sm:$0xff]  ;;  %4720 = vmatmul.mubr.bf16.gmra.mxu0 %v15076_v58  ;;  %v4136_v35 = vpop.f32.mrf.mxu1  ;;  %v4015_v58 = vpop.f32.mrf.mxu0  ;;  %5028 = vmatprep.subr.bf16.mxu1 %v15088_v7 }
 0x189   : > { %v11106_v26 = vld [vmem:[%s14410_s2 + $0x690] sm:$0xff]  ;;  %15075 = vst [vmem:[#allocation240_spill] sm:$0xff] %v11210_v37  ;;  %4843 = vmatmul.mubr.bf16.gmra.mxu1 %v15079_v56  ;;  %v11254_v50 = vadd.f32 %v4136_v35, %v4013_v9  ;;  %v15082_v37 = vld [vmem:[#allocation193_spill] sm:$0xff] }
 0x18a   : > { %v11111_v3 = vld [vmem:[%s14410_s2 + $0x6b0] sm:$0xff]  ;;  %4852 = vmatprep.mubr.bf16.mxu1 %v15082_v37  ;;  %v4138_v37 = vpop.f32.mrf.mxu1  ;;  %v4017_v32 = vpop.f32.mrf.mxu0 }
 0x18b   : > { %v11116_v21 = vld [vmem:[%s14410_s2 + $0x250] sm:$0xff]  ;;  %15080 = vst [vmem:[#allocation243_spill] sm:$0xff] %v11254_v50  ;;  %v11304_v45 = vadd.f32 %v4138_v37, %v4015_v58  ;;  %v15090_v50 = vcombine.low %v11033_v49, %v11043_v62 }
 0x18c   : > { %v11129_v52 = vld [vmem:[%s14410_s2 + $0x270] sm:$0xff]  ;;  %v4140_v7 = vpop.f32.mrf.mxu1  ;;  %v4019_v62 = vpop.f32.mrf.mxu0 }
 0x18d   : > { %v11134_v38 = vld [vmem:[%s14410_s2 + $0x650] sm:$0xff]  ;;  %15087 = vst [vmem:[#allocation246_spill] sm:$0xff] %v11304_v45  ;;  %4906 = vmatpush2.bf16.msra.mxu0 %v15090_v50  ;;  %v11351_v49 = vadd.f32 %v4140_v7, %v4017_v32  ;;  %v15095_v7 = vcombine.low %v11048_v31, %v11053_v59 }
 0x18e   : > { %v11139_v24 = vld [vmem:[%s14410_s2 + $0x670] sm:$0xff] }
 0x18f   : > { %v11157_v60 = vld [vmem:[%s14410_s2 + $0x230] sm:$0xff]  ;;  %15093 = vst [vmem:[#allocation250_spill] sm:$0xff] %v11351_v49  ;;  %5029 = vmatpush2.bf16.msra.mxu1 %v15095_v7  ;;  %v4179_v7 = vpop.f32.mrf.mxu0 }
 0x190   : > { %v11175_v63 = vld [vmem:[%s14410_s2 + $0x630] sm:$0xff]  ;;  %5030 = vmatprep.subr.bf16.mxu1 %v15098_v18 }
 0x191   : > { %v11180_v42 = vld [vmem:[%s14410_s2 + $0x9d0] sm:$0xff]  ;;  %4853 = vmatmul.mubr.bf16.gmra.mxu1 %v10435_v43 }
 0x192   : > { %v11185_v33 = vld [vmem:[%s14410_s2 + $0x9f0] sm:$0xff]  ;;  %4862 = vmatprep.mubr.bf16.mxu1 %v10465_v51 }
 0x193   : > { %v11198_v54 = vld [vmem:[%s14410_s2 + $0xdd0] sm:$0xff] }
 0x194   : > { %v11203_v8 = vld [vmem:[%s14410_s2 + $0xdf0] sm:$0xff] }
 0x195   : > { %v11208_v40 = vld [vmem:[%s14410_s2 + $0x990] sm:$0xff] }
 0x196   : > { %v11225_v14 = vld [vmem:[%s14410_s2 + $0xd90] sm:$0xff] }
 0x197   : > { %15077 = vst [vmem:[#allocation241_spill] sm:$0xff] %v11225_v14  ;;  %v11230_v19 = vld [vmem:[%s14410_s2 + $0xdb0] sm:$0xff] }
 0x198   : > { %15078 = vst [vmem:[#allocation242_spill] sm:$0xff] %v11230_v19  ;;  %v11252_v22 = vld [vmem:[%s14410_s2 + $0xd50] sm:$0xff] }
 0x199   : > { %v15081_v56 = vld [vmem:[#allocation192_spill] sm:$0xff]  ;;  %4863 = vmatmul.mubr.bf16.gmra.mxu1 %v10539_v57 }
 0x19a   : > { %4729 = vmatprep.mubr.bf16.mxu0 %v15081_v56  ;;  %v11270_v9 = vld [vmem:[%s14410_s2 + $0x910] sm:$0xff]  ;;  %v15094_v56 = vcombine.high %v11062_v48, %v11067_v10  ;;  %4872 = vmatprep.mubr.bf16.mxu1 %v10553_v41 }
 0x19b   : > { %v11275_v35 = vld [vmem:[%s14410_s2 + $0x930] sm:$0xff]  ;;  %4730 = vmatmul.mubr.bf16.gmra.mxu0 %v10422_v39  ;;  %v15100_v39 = vcombine.low %v11062_v48, %v11067_v10  ;;  %v15102_v48 = vcombine.high %v11090_v2, %v11095_v0 }
 0x19c   : > { %15084 = vst [vmem:[#allocation245_spill] sm:$0xff] %v11275_v35  ;;  %v11297_v17 = vld [vmem:[%s14410_s2 + $0xd30] sm:$0xff]  ;;  %4907 = vmatprep.subr.bf16.mxu0 %v15094_v56  ;;  %v4142_v56 = vpop.f32.mrf.mxu1  ;;  %4739 = vmatprep.mubr.bf16.mxu0 %v10449_v47  ;;  %v4181_v47 = vpop.f32.mrf.mxu0 }
 0x19d   : > { %v11302_v36 = vld [vmem:[%s14410_s2 + $0x8d0] sm:$0xff]  ;;  %v11393_v59 = vadd.f32 %v4142_v56, %v4019_v62  ;;  %v4180_v56 = vadd.f32 %v4179_v7, %v10784_v44  ;;  %4908 = vmatpush2.bf16.msra.mxu0 %v15100_v39  ;;  %v4182_v51 = vadd.f32 %v4181_v47, %v10787_v15  ;;  %v15101_v39 = vcombine.low %v11072_v6, %v11085_v25 }
 0x19e   : > { %v11323_v58 = vld [vmem:[%s14410_s2 + $0xcd0] sm:$0xff]  ;;  %v4302_v49 = vpop.f32.mrf.mxu1  ;;  %4909 = vmatprep.subr.bf16.mxu0 %v15102_v48  ;;  %v4183_v25 = vpop.f32.mrf.mxu0  ;;  %v15104_v6 = vcombine.high %v11106_v26, %v11111_v3 }
 0x19f   : > { %v11328_v37 = vld [vmem:[%s14410_s2 + $0xcf0] sm:$0xff]  ;;  %15097 = vst [vmem:[#allocation252_spill] sm:$0xff] %v11393_v59  ;;  %5031 = vmatpush2.bf16.msra.mxu1 %v15101_v39  ;;  %v15105_v39 = vcombine.low %v11090_v2, %v11095_v0 }
 0x1a0   : > { %15089 = vst [vmem:[#allocation247_spill] sm:$0xff] %v11328_v37  ;;  %v11344_v14 = vld [vmem:[%s14410_s2 + $0x890] sm:$0xff]  ;;  %v11455_v37 = vadd.f32 %v4302_v49, %v4180_v56  ;;  %v4304_v10 = vpop.f32.mrf.mxu1  ;;  %5032 = vmatprep.subr.bf16.mxu1 %v15104_v6  ;;  %v4184_v6 = vadd.f32 %v4183_v25, %v10801_v5  ;;  %v4185_v48 = vpop.f32.mrf.mxu0  ;;  %v15106_v5 = vcombine.low %v11106_v26, %v11111_v3 }
 0x1a1   : > { %15091 = vst [vmem:[#allocation248_spill] sm:$0xff] %v11344_v14  ;;  %v11349_v50 = vld [vmem:[%s14410_s2 + $0x8b0] sm:$0xff]  ;;  %v11494_v19 = vadd.f32 %v4304_v10, %v4182_v51  ;;  %4910 = vmatpush2.bf16.msra.mxu0 %v15105_v39  ;;  %v4186_v39 = vadd.f32 %v4185_v48, %v10803_v1  ;;  %v15107_v25 = vcombine.high %v11116_v21, %v11129_v52 }
 0x1a2   : > { %15092 = vst [vmem:[#allocation249_spill] sm:$0xff] %v11349_v50  ;;  %v11370_v32 = vld [vmem:[%s14410_s2 + $0xcb0] sm:$0xff]  ;;  %7466 = vrsqrt.f32 %v11455_v37  ;;  %v6155_v43 = vadd.f32 1.0, %v11455_v37  ;;  %v4189_v3 = vpop.f32.mrf.mxu0  ;;  %v15108_v26 = vcombine.high %v11134_v38, %v11139_v24 }
 0x1a3   : > { %v11386_v35 = vld [vmem:[%s14410_s2 + $0x850] sm:$0xff]  ;;  %v6156_v2 = vadd.f32 1.0, %v11494_v19  ;;  %5033 = vmatpush2.bf16.msra.mxu1 %v15106_v5  ;;  %4911 = vmatprep.subr.bf16.mxu0 %v15107_v25 }
 0x1a4   : > { %v11391_v31 = vld [vmem:[%s14410_s2 + $0x870] sm:$0xff]  ;;  %7468 = vrcp.f32 %v6155_v43  ;;  %4740 = vmatmul.mubr.bf16.gmra.mxu0 %v10527_v12  ;;  %5034 = vmatprep.subr.bf16.mxu1 %v15108_v26  ;;  %v4190_v12 = vadd.f32 %v4189_v3, %v10820_v61  ;;  %v15110_v61 = vcombine.low %v11116_v21, %v11129_v52 }
 0x1a5   : > { %15096 = vst [vmem:[#allocation251_spill] sm:$0xff] %v11391_v31  ;;  %v11406_v45 = vld [vmem:[%s14410_s2 + $0xc50] sm:$0xff]  ;;  %v4306_v31 = vpop.f32.mrf.mxu1  ;;  %7470 = vrsqrt.f32 %v11494_v19  ;;  %4749 = vmatprep.mubr.bf16.mxu0 %v10541_v55 }
 0x1a6   : > { %v11411_v62 = vld [vmem:[%s14410_s2 + $0xc70] sm:$0xff]  ;;  %v11524_v0 = vadd.f32 %v4306_v31, %v4184_v6  ;;  %7472 = vrcp.f32 %v6156_v2  ;;  %4912 = vmatpush2.bf16.msra.mxu0 %v15110_v61  ;;  %v15112_v61 = vcombine.low %v11134_v38, %v11139_v24  ;;  %v15117_v24 = vcombine.high %v11162_v16, %v11175_v63 }
 0x1a7   : > { %v11416_v18 = vld [vmem:[%s14410_s2 + $0x810] sm:$0xff]  ;;  %v4308_v51 = vpop.f32.mrf.mxu1 }
 0x1a8   : > { %v11428_v59 = vld [vmem:[%s14410_s2 + $0x830] sm:$0xff]  ;;  %v6163_v5 = vadd.f32 1.0, %v11524_v0  ;;  %v11560_v25 = vadd.f32 %v4308_v51, %v4186_v39  ;;  %7474 = vrsqrt.f32 %v11524_v0  ;;  %v4191_v51 = vpop.f32.mrf.mxu0  ;;  %5035 = vmatpush2.bf16.msra.mxu1 %v15112_v61  ;;  %v15113_v39 = vcombine.high %v11152_v13, %v11157_v60 }
 0x1a9   : > { %15099 = vst [vmem:[#allocation253_spill] sm:$0xff] %v11428_v59  ;;  %v11433_v44 = vld [vmem:[%s14410_s2 + $0xc10] sm:$0xff]  ;;  %v4192_v52 = vadd.f32 %v4191_v51, %v10823_v23  ;;  %5036 = vmatprep.subr.bf16.mxu1 %v15117_v24 }
 0x1aa   : > { %v11438_v7 = vld [vmem:[%s14410_s2 + $0xc30] sm:$0xff]  ;;  %7476 = vrcp.f32 %v6163_v5  ;;  %v6164_v31 = vadd.f32 1.0, %v11560_v25  ;;  %4913 = vmatprep.subr.bf16.mxu0 %v15113_v39  ;;  %v4193_v38 = vpop.f32.mrf.mxu0 }
 0x1ab   : > { %v11453_v14 = vld [vmem:[%s14410_s2 + $0xbd0] sm:$0xff]  ;;  %7478 = vrsqrt.f32 %v11560_v25  ;;  %v4194_v3 = vadd.f32 %v4193_v38, %v10825_v29  ;;  %v15123_v38 = vcombine.high %v11180_v42, %v11185_v33 }
 0x1ac   : > { %v11469_v50 = vld [vmem:[%s14410_s2 + $0xbf0] sm:$0xff]  ;;  %7480 = vrcp.f32 %v6164_v31  ;;  %v4195_v31 = vpop.f32.mrf.mxu0  ;;  %4750 = vmatmul.mubr.bf16.gmra.mxu0 %v10581_v28 }
 0x1ad   : > { %15103 = vst [vmem:[#allocation254_spill] sm:$0xff] %v11469_v50  ;;  %v11474_v47 = vld [vmem:[%s14410_s2 + $0xfd0] sm:$0xff]  ;;  %v4312_v50 = vpop.f32.mrf.mxu1 }
 0x1ae   : > { %v11479_v15 = vld [vmem:[%s14410_s2 + $0xff0] sm:$0xff]  ;;  %v11592_v41 = vadd.f32 %v4312_v50, %v4190_v12 }
 0x1af   : > { %v11500_v49 = vld [vmem:[%s14410_s2 + $0xb90] sm:$0xff]  ;;  %v4314_v21 = vpop.f32.mrf.mxu1 }
 0x1b0   : > { %v11505_v56 = vld [vmem:[%s14410_s2 + $0xbb0] sm:$0xff]  ;;  %v6171_v39 = vadd.f32 1.0, %v11592_v41  ;;  %v11627_v61 = vadd.f32 %v4314_v21, %v4192_v52  ;;  %7482 = vrsqrt.f32 %v11592_v41  ;;  %v15120_v52 = vcombine.low %v11152_v13, %v11157_v60 }
 0x1b1   : > { %v11521_v59 = vld [vmem:[%s14410_s2 + $0xf90] sm:$0xff]  ;;  %v4316_v55 = vpop.f32.mrf.mxu1  ;;  %v4196_v13 = vadd.f32 %v4195_v31, %v10827_v4 }
 0x1b2   : > { %v11536_v10 = vld [vmem:[%s14410_s2 + $0xfb0] sm:$0xff]  ;;  %4914 = vmatpush2.bf16.msra.mxu0 %v15120_v52  ;;  %7484 = vrcp.f32 %v6171_v39  ;;  %v6172_v51 = vadd.f32 1.0, %v11627_v61  ;;  %v11656_v57 = vadd.f32 %v4316_v55, %v4194_v3  ;;  %v15122_v52 = vcombine.low %v11162_v16, %v11175_v63  ;;  %v4199_v16 = vpop.f32.mrf.mxu0  ;;  %v7467_v39 = vpop.eup %7466 }
 0x1b3   : > { %v11541_v43 = vld [vmem:[%s14410_s2 + $0xb50] sm:$0xff]  ;;  %v4318_v60 = vpop.f32.mrf.mxu1  ;;  %5129 = vmatprep.subr.bf16.mxu0 %v15123_v38  ;;  %7486 = vrsqrt.f32 %v11627_v61  ;;  %v15127_v63 = vcombine.high %v11198_v54, %v11203_v8  ;;  %v4200_v21 = vadd.f32 %v4199_v16, %v10832_v53  ;;  %v15130_v53 = vld [vmem:[#allocation7_spill] sm:$0xff] }
 0x1b4   : > { %v11546_v1 = vld [vmem:[%s14410_s2 + $0xb70] sm:$0xff]  ;;  %5037 = vmatpush2.bf16.msra.mxu1 %v15122_v52  ;;  %7488 = vrcp.f32 %v6172_v51  ;;  %v6179_v38 = vadd.f32 1.0, %v11656_v57  ;;  %v11692_v52 = vadd.f32 %v4318_v60, %v4196_v13  ;;  %v4201_v13 = vpop.f32.mrf.mxu0 }
 0x1b5   : > { %v11568_v26 = vld [vmem:[%s14410_s2 + $0xf50] sm:$0xff]  ;;  %5252 = vmatprep.subr.bf16.mxu1 %v15127_v63  ;;  %v4322_v28 = vpop.f32.mrf.mxu1  ;;  %v15129_v63 = vld [vmem:[#allocation6_spill] sm:$0xff]  ;;  %7490 = vrsqrt.f32 %v11656_v57 }
 0x1b6   : > { %v11573_v2 = vld [vmem:[%s14410_s2 + $0xf70] sm:$0xff]  ;;  %4915 = vmatprep.mubr.bf16.mxu0 %v15129_v63  ;;  %v6011_v63 = vmul.f32 %v7467_v39, %v11455_v37  ;;  %7492 = vrcp.f32 %v6179_v38 }
 0x1b7   : > { %15109 = vst [vmem:[#allocation255_spill] sm:$0xff] %v11573_v2  ;;  %v11589_v6 = vld [vmem:[%s14410_s2 + $0xb10] sm:$0xff]  ;;  %7494 = vrsqrt.f32 %v11692_v52  ;;  %v15135_v2 = vld [vmem:[#allocation18_spill] sm:$0xff] }
 0x1b8   : > { %15111 = vst [vmem:[#allocation256_spill] sm:$0xff] %v11589_v6  ;;  %v11604_v48 = vld [vmem:[%s14410_s2 + $0xb30] sm:$0xff]  ;;  %4916 = vmatmul.mubr.bf16.vlgmr.msra.gmra.mxu0 %v15135_v2 }
 0x1b9   : > { %15114 = vst [vmem:[#allocation257_spill] sm:$0xff] %v11604_v48  ;;  %v11609_v12 = vld [vmem:[%s14410_s2 + $0xf10] sm:$0xff]  ;;  %v15128_v48 = vld [vmem:[#allocation217_spill] sm:$0xff] }
 0x1ba   : > { %15115 = vst [vmem:[#allocation258_spill] sm:$0xff] %v11609_v12  ;;  %v11614_v23 = vld [vmem:[%s14410_s2 + $0xf30] sm:$0xff]  ;;  %4873 = vmatmul.mubr.bf16.gmra.mxu1 %v15128_v48  ;;  %v6180_v48 = vadd.f32 1.0, %v11692_v52  ;;  %v4203_v12 = vpop.f32.mrf.mxu0 }
 0x1bb   : > { %15116 = vst [vmem:[#allocation259_spill] sm:$0xff] %v11614_v23  ;;  %v11633_v24 = vld [vmem:[%s14410_s2 + $0xad0] sm:$0xff]  ;;  %5038 = vmatprep.mubr.bf16.mxu1 %v15130_v53  ;;  %v7469_v23 = vpop.eup %7468  ;;  %v15131_v53 = vld [vmem:[#allocation218_spill] sm:$0xff] }
 0x1bc   : > { %15118 = vst [vmem:[#allocation260_spill] sm:$0xff] %v11633_v24  ;;  %v11638_v5 = vld [vmem:[%s14410_s2 + $0xaf0] sm:$0xff]  ;;  %v4324_v24 = vpop.f32.mrf.mxu1  ;;  %v4202_v60 = vadd.f32 %v4201_v13, %v15131_v53  ;;  %v7471_v37 = vpop.eup %7470  ;;  %v6443_v39 = vmul.f32 %v7469_v23, %v6011_v63  ;;  %7496 = vrcp.f32 %v6180_v48 }
 0x1bd   : > { %15119 = vst [vmem:[#allocation261_spill] sm:$0xff] %v11638_v5  ;;  %v11653_v50 = vld [vmem:[%s14410_s2 + $0xed0] sm:$0xff]  ;;  %v11717_v5 = vadd.f32 %v4322_v28, %v4200_v21  ;;  %v15132_v28 = vld [vmem:[#allocation219_spill] sm:$0xff]  ;;  %v6012_v13 = vmul.f32 %v7471_v37, %v11494_v19  ;;  %v4205_v23 = vpop.f32.mrf.mxu0 }
 0x1be   : > { %15121 = vst [vmem:[#allocation262_spill] sm:$0xff] %v11653_v50  ;;  %v11668_v29 = vld [vmem:[%s14410_s2 + $0xef0] sm:$0xff]  ;;  %v4204_v21 = vadd.f32 %v4203_v12, %v15132_v28  ;;  %v7473_v50 = vpop.eup %7472  ;;  %v11736_v53 = vadd.f32 %v4324_v24, %v4202_v60 }
 0x1bf   : > { %15124 = vst [vmem:[#allocation263_spill] sm:$0xff] %v11668_v29  ;;  %v11673_v55 = vld [vmem:[%s14410_s2 + $0xa90] sm:$0xff]  ;;  %v6187_v38 = vadd.f32 1.0, %v11717_v5  ;;  %v4326_v29 = vpop.f32.mrf.mxu1  ;;  %7498 = vrsqrt.f32 %v11717_v5  ;;  %v7475_v12 = vpop.eup %7474  ;;  %v6444_v19 = vmul.f32 %v7473_v50, %v6012_v13 }
 0x1c0   : > { %15125 = vst [vmem:[#allocation264_spill] sm:$0xff] %v11673_v55  ;;  %v11678_v4 = vld [vmem:[%s14410_s2 + $0xab0] sm:$0xff]  ;;  %v11741_v31 = vadd.f32 %v4326_v29, %v4204_v21  ;;  %v7477_v6 = vpop.eup %7476  ;;  %v6019_v37 = vmul.f32 %v7475_v12, %v11524_v0  ;;  %v6188_v24 = vadd.f32 1.0, %v11736_v53  ;;  %v4209_v60 = vpop.f32.mrf.mxu0  ;;  %v15137_v21 = vld [vmem:[#allocation19_spill] sm:$0xff]  ;;  %v15138_v0 = vcombine.low %v11180_v42, %v11185_v33 }
 0x1c1   : > { %15126 = vst [vmem:[#allocation265_spill] sm:$0xff] %v11678_v4  ;;  %v11700_v3 = vld [vmem:[%s14410_s2 + $0xe90] sm:$0xff]  ;;  %7500 = vrcp.f32 %v6187_v38  ;;  %v4328_v55 = vpop.f32.mrf.mxu1  ;;  %v7479_v48 = vpop.eup %7478 }
 0x1c2   : > { %v11705_v51 = vld [vmem:[%s14410_s2 + $0xeb0] sm:$0xff]  ;;  %7502 = vrsqrt.f32 %v11736_v53  ;;  %v6195_v29 = vadd.f32 1.0, %v11741_v31  ;;  %5039 = vmatmul.mubr.bf16.vlgmr.msra.gmra.mxu1 %v15137_v21  ;;  %5130 = vmatpush1.bf16.msra.mxu0 %v15138_v0  ;;  %v7481_v13 = vpop.eup %7480  ;;  %v4211_v2 = vpop.f32.mrf.mxu0 }
 0x1c3   : > { %v15133_v63 = vld [vmem:[#allocation8_spill] sm:$0xff]  ;;  %7504 = vrsqrt.f32 %v11741_v31  ;;  %v4332_v50 = vpop.f32.mrf.mxu1 }
 0x1c4   : > { %v6587_v28 = vmul.f32 %v6443_v39, %v15133_v63  ;;  %v15134_v16 = vld [vmem:[#allocation220_spill] sm:$0xff]  ;;  %v6451_v63 = vmul.f32 %v7477_v6, %v6019_v37  ;;  %7506 = vrcp.f32 %v6188_v24 }
 0x1c5   : > { %v4206_v4 = vadd.f32 %v4205_v23, %v15134_v16  ;;  %v15136_v16 = vld [vmem:[#allocation221_spill] sm:$0xff]  ;;  %v15139_v23 = vld [vmem:[#allocation2_spill] sm:$0xff]  ;;  %7508 = vrcp.f32 %v6195_v29  ;;  %v4334_v37 = vpop.f32.mrf.mxu1  ;;  %v4213_v29 = vpop.f32.mrf.mxu0 }
 0x1c6   : > { %6731 = vst [vmem:[%s11732_s28] sm:$0xff] %v6587_v28  ;;  %v4210_v38 = vadd.f32 %v4209_v60, %v15136_v16  ;;  %v6588_v12 = vmul.f32 %v6444_v19, %v15139_v23  ;;  %v6020_v28 = vmul.f32 %v7479_v48, %v11560_v25  ;;  %v7483_v60 = vpop.eup %7482  ;;  %v15142_v19 = vld [vmem:[#allocation222_spill] sm:$0xff]  ;;  %v15144_v48 = vld [vmem:[#allocation24_spill] sm:$0xff] }
 0x1c7   : > { %v11751_v39 = vadd.f32 %v4328_v55, %v4206_v4  ;;  %v15140_v55 = vcombine.low %v11198_v54, %v11203_v8  ;;  %v15141_v4 = vcombine.high %v11208_v40, %v11220_v11  ;;  %v4212_v6 = vadd.f32 %v4211_v2, %v15142_v19  ;;  %v15143_v25 = vld [vmem:[#allocation22_spill] sm:$0xff]  ;;  %5048 = vmatprep.mubr.bf16.mxu1 %v15144_v48  ;;  %v7485_v24 = vpop.eup %7484  ;;  %v15145_v54 = vld [vmem:[#allocation9_spill] sm:$0xff]  ;;  %v15149_v19 = vld [vmem:[#allocation223_spill] sm:$0xff]  ;;  %v4336_v48 = vpop.f32.mrf.mxu1 }
 0x1c8   : > { %v11767_v33 = vadd.f32 %v4332_v50, %v4210_v38  ;;  %4925 = vmatprep.mubr.bf16.mxu0 %v15143_v25  ;;  %6732 = vst [vmem:[%s11732_s28 + $0x8] sm:$0xff] %v6588_v12  ;;  %v6595_v8 = vmul.f32 %v6451_v63, %v15145_v54  ;;  %v6452_v16 = vmul.f32 %v7481_v13, %v6020_v28  ;;  %v15146_v38 = vld [vmem:[#allocation241_spill] sm:$0xff]  ;;  %v15147_v50 = vld [vmem:[#allocation242_spill] sm:$0xff]  ;;  %v7487_v2 = vpop.eup %7486  ;;  %v15151_v63 = vld [vmem:[#allocation3_spill] sm:$0xff] }
 0x1c9   : > { %5253 = vmatpush1.bf16.msra.mxu1 %v15140_v55  ;;  %5131 = vmatprep.subr.bf16.mxu0 %v15141_v4  ;;  %v6196_v42 = vadd.f32 1.0, %v11751_v39  ;;  %v6027_v0 = vmul.f32 %v7483_v60, %v11592_v41  ;;  %7510 = vrsqrt.f32 %v11751_v39  ;;  %v15148_v23 = vcombine.high %v15146_v38, %v15147_v50  ;;  %v7489_v41 = vpop.eup %7488 }
 0x1ca   : > { %v6203_v55 = vadd.f32 1.0, %v11767_v33  ;;  %v11780_v4 = vadd.f32 %v4334_v37, %v4212_v6  ;;  %v4214_v12 = vadd.f32 %v4213_v29, %v15149_v19  ;;  %v15150_v13 = vcombine.low %v11208_v40, %v11220_v11  ;;  %6739 = vst [vmem:[%s11732_s28 + $0x40] sm:$0xff] %v6595_v8  ;;  %v7491_v11 = vpop.eup %7490 }
 0x1cb   : > { %5254 = vmatprep.subr.bf16.mxu1 %v15148_v23  ;;  %7512 = vrcp.f32 %v6196_v42  ;;  %v6596_v28 = vmul.f32 %v6452_v16, %v15151_v63  ;;  %v6459_v60 = vmul.f32 %v7485_v24, %v6027_v0  ;;  %v6028_v54 = vmul.f32 %v7487_v2, %v11627_v61  ;;  %v4215_v42 = vpop.f32.mrf.mxu0  ;;  %v15154_v24 = vld [vmem:[#allocation224_spill] sm:$0xff]  ;;  %v4338_v61 = vpop.f32.mrf.mxu1 }
 0x1cc   : > { %5132 = vmatpush1.bf16.msra.mxu0 %v15150_v13  ;;  %7514 = vrsqrt.f32 %v11767_v33  ;;  %v15152_v6 = vcombine.low %v15146_v38, %v15147_v50  ;;  %v15153_v37 = vcombine.high %v11242_v30, %v11247_v27  ;;  %v6204_v40 = vadd.f32 1.0, %v11780_v4  ;;  %v15155_v0 = vld [vmem:[#allocation244_spill] sm:$0xff]  ;;  %v7493_v23 = vpop.eup %7492 }
 0x1cd   : > { %7516 = vrcp.f32 %v6203_v55  ;;  %v11797_v8 = vadd.f32 %v4336_v48, %v4214_v12  ;;  %v4216_v16 = vadd.f32 %v4215_v42, %v15154_v24  ;;  %v15156_v29 = vcombine.high %v11252_v22, %v15155_v0  ;;  %6740 = vst [vmem:[%s11732_s28 + $0x48] sm:$0xff] %v6596_v28  ;;  %v15157_v38 = vld [vmem:[#allocation16_spill] sm:$0xff]  ;;  %v4219_v55 = vpop.f32.mrf.mxu0  ;;  %v7495_v12 = vpop.eup %7494  ;;  %v15159_v42 = vld [vmem:[#allocation225_spill] sm:$0xff] }
 0x1ce   : > { %5255 = vmatpush1.bf16.msra.mxu1 %v15152_v6  ;;  %5133 = vmatprep.subr.bf16.mxu0 %v15153_v37  ;;  %v6603_v50 = vmul.f32 %v6459_v60, %v15157_v38  ;;  %v6460_v2 = vmul.f32 %v7489_v41, %v6028_v54  ;;  %v6035_v19 = vmul.f32 %v7491_v11, %v11656_v57  ;;  %7518 = vrsqrt.f32 %v11780_v4  ;;  %v15158_v48 = vld [vmem:[#allocation28_spill] sm:$0xff]  ;;  %v4342_v28 = vpop.f32.mrf.mxu1  ;;  %v15160_v37 = vld [vmem:[#allocation34_spill] sm:$0xff]  ;;  %v7497_v57 = vpop.eup %7496 }
 0x1cf   : > { %5256 = vmatprep.subr.bf16.mxu1 %v15156_v29  ;;  %4926 = vmatmul.mubr.bf16.gmra.mxu0 %v15158_v48  ;;  %7520 = vrcp.f32 %v6204_v40  ;;  %v6211_v13 = vadd.f32 1.0, %v11797_v8  ;;  %v11809_v63 = vadd.f32 %v4338_v61, %v4216_v16  ;;  %v4220_v6 = vadd.f32 %v4219_v55, %v15159_v42  ;;  %v15162_v60 = vld [vmem:[#allocation12_spill] sm:$0xff]  ;;  %v4221_v24 = vpop.f32.mrf.mxu0  ;;  %v15164_v61 = vld [vmem:[#allocation245_spill] sm:$0xff] }
 0x1d0   : > { %5049 = vmatmul.mubr.bf16.gmra.mxu1 %v15160_v37  ;;  %v15161_v41 = vcombine.low %v11242_v30, %v11247_v27  ;;  %6747 = vst [vmem:[%s11732_s28 + $0x80] sm:$0xff] %v6603_v50  ;;  %v6604_v54 = vmul.f32 %v6460_v2, %v15162_v60  ;;  %v6467_v11 = vmul.f32 %v7493_v23, %v6035_v19  ;;  %7522 = vrsqrt.f32 %v11797_v8  ;;  %v7499_v30 = vpop.eup %7498  ;;  %v15166_v23 = vld [vmem:[#allocation226_spill] sm:$0xff]  ;;  %v15168_v19 = vld [vmem:[#allocation39_spill] sm:$0xff]  ;;  %v12734_v37 = vld [vmem:[%s14410_s2 + $0xd18] sm:$0xff] }
 0x1d1   : > { %v6036_v40 = vmul.f32 %v7495_v12, %v11692_v52  ;;  %v15163_v16 = vcombine.low %v11252_v22, %v15155_v0  ;;  %v15165_v29 = vcombine.high %v11270_v9, %v15164_v61  ;;  %7524 = vrcp.f32 %v6211_v13  ;;  %v4344_v52 = vpop.f32.mrf.mxu1  ;;  %v15167_v2 = vld [vmem:[#allocation38_spill] sm:$0xff]  ;;  %5058 = vmatprep.mubr.bf16.mxu1 %v15168_v19  ;;  %v7501_v55 = vpop.eup %7500  ;;  %v15169_v22 = vld [vmem:[#allocation17_spill] sm:$0xff] }
 0x1d2   : > { %5134 = vmatpush1.bf16.msra.mxu0 %v15161_v41  ;;  %v6212_v27 = vadd.f32 1.0, %v11809_v63  ;;  %v11827_v38 = vadd.f32 %v4342_v28, %v4220_v6  ;;  %v4222_v50 = vadd.f32 %v4221_v24, %v15166_v23  ;;  %4935 = vmatprep.mubr.bf16.mxu0 %v15167_v2  ;;  %6748 = vst [vmem:[%s11732_s28 + $0x88] sm:$0xff] %v6604_v54  ;;  %7526 = vrsqrt.f32 %v11809_v63  ;;  %v4223_v13 = vpop.f32.mrf.mxu0  ;;  %v7503_v28 = vpop.eup %7502  ;;  %v15171_v24 = vld [vmem:[#allocation227_spill] sm:$0xff]  ;;  %v12707_v2 = vld [vmem:[%s14410_s2 + $0xd78] sm:$0xff] }
 0x1d3   : > { %5257 = vmatpush1.bf16.msra.mxu1 %v15163_v16  ;;  %5135 = vmatprep.subr.bf16.mxu0 %v15165_v29  ;;  %v6611_v0 = vmul.f32 %v6467_v11, %v15169_v22  ;;  %v6468_v12 = vmul.f32 %v7497_v57, %v6036_v40  ;;  %v6043_v42 = vmul.f32 %v7499_v30, %v11717_v5  ;;  %v4346_v16 = vpop.f32.mrf.mxu1  ;;  %v7505_v5 = vpop.eup %7504  ;;  %v15173_v11 = vld [vmem:[#allocation13_spill] sm:$0xff]  ;;  %v15176_v22 = vld [vmem:[#allocation247_spill] sm:$0xff] }
 0x1d4   : > { %v15170_v6 = vcombine.high %v11292_v20, %v11297_v17  ;;  %7528 = vrcp.f32 %v6212_v27  ;;  %v6219_v41 = vadd.f32 1.0, %v11827_v38  ;;  %v11840_v60 = vadd.f32 %v4344_v52, %v4222_v50  ;;  %v4225_v27 = vpop.f32.mrf.mxu0  ;;  %15348 = vst [vmem:[#allocation245_spill] sm:$0xff] %v12707_v2  ;;  %v12760_v48 = vld [vmem:[%s14410_s2 + $0x8f8] sm:$0xff] }
 0x1d5   : > { %v4224_v54 = vadd.f32 %v4223_v13, %v15171_v24  ;;  %v15172_v57 = vcombine.low %v11270_v9, %v15164_v61  ;;  %6755 = vst [vmem:[%s11732_s28 + $0xc0] sm:$0xff] %v6611_v0  ;;  %v6612_v40 = vmul.f32 %v6468_v12, %v15173_v11  ;;  %v6475_v29 = vmul.f32 %v7501_v55, %v6043_v42  ;;  %v7507_v9 = vpop.eup %7506  ;;  %v15179_v13 = vld [vmem:[#allocation228_spill] sm:$0xff]  ;;  %v15182_v11 = vld [vmem:[#allocation43_spill] sm:$0xff]  ;;  %v12807_v2 = vld [vmem:[%s14410_s2 + $0xc98] sm:$0xff] }
 0x1d6   : > { %5258 = vmatprep.subr.bf16.mxu1 %v15170_v6  ;;  %v6044_v30 = vmul.f32 %v7503_v28, %v11736_v53  ;;  %7530 = vrsqrt.f32 %v11827_v38  ;;  %v15174_v23 = vcombine.low %v11292_v20, %v11297_v17  ;;  %v15175_v50 = vcombine.high %v11302_v36, %v11318_v34  ;;  %v4348_v53 = vpop.f32.mrf.mxu1  ;;  %v7509_v12 = vpop.eup %7508  ;;  %v15178_v20 = vld [vmem:[#allocation29_spill] sm:$0xff]  ;;  %v15180_v28 = vld [vmem:[#allocation40_spill] sm:$0xff]  ;;  %15356 = vst [vmem:[#allocation247_spill] sm:$0xff] %v12760_v48 }
 0x1d7   : > { %5136 = vmatpush1.bf16.msra.mxu0 %v15172_v57  ;;  %v6051_v61 = vmul.f32 %v7505_v5, %v11741_v31  ;;  %7532 = vrcp.f32 %v6219_v41  ;;  %v6220_v52 = vadd.f32 1.0, %v11840_v60  ;;  %v11858_v55 = vadd.f32 %v4346_v16, %v4224_v54  ;;  %6756 = vst [vmem:[%s11732_s28 + $0xc8] sm:$0xff] %v6612_v40  ;;  %v4229_v6 = vpop.f32.mrf.mxu0  ;;  %v7511_v41 = vpop.eup %7510  ;;  %v15181_v16 = vld [vmem:[#allocation229_spill] sm:$0xff] }
 0x1d8   : > { %5259 = vmatpush1.bf16.msra.mxu1 %v15174_v23  ;;  %5137 = vmatprep.subr.bf16.mxu0 %v15175_v50  ;;  %v15177_v0 = vcombine.high %v11323_v58, %v15176_v22  ;;  %v6619_v17 = vmul.f32 %v6475_v29, %v15178_v20  ;;  %v6476_v42 = vmul.f32 %v7507_v9, %v6044_v30  ;;  %7534 = vrsqrt.f32 %v11840_v60  ;;  %v4352_v5 = vpop.f32.mrf.mxu1  ;;  %v7513_v29 = vpop.eup %7512  ;;  %v15184_v30 = vld [vmem:[#allocation23_spill] sm:$0xff]  ;;  %v15188_v20 = vld [vmem:[#allocation230_spill] sm:$0xff]  ;;  %v12848_v48 = vld [vmem:[%s14410_s2 + $0xc58] sm:$0xff] }
 0x1d9   : > { %v4226_v31 = vadd.f32 %v4225_v27, %v15179_v13  ;;  %4936 = vmatmul.mubr.bf16.gmra.mxu0 %v15180_v28  ;;  %v6483_v24 = vmul.f32 %v7509_v12, %v6051_v61  ;;  %7536 = vrcp.f32 %v6220_v52  ;;  %v6227_v54 = vadd.f32 1.0, %v11858_v55  ;;  %5059 = vmatmul.mubr.bf16.gmra.mxu1 %v15182_v11  ;;  %v4231_v9 = vpop.f32.mrf.mxu0  ;;  %v15186_v52 = vld [vmem:[#allocation46_spill] sm:$0xff]  ;;  %v15191_v13 = vld [vmem:[#allocation249_spill] sm:$0xff] }
 0x1da   : > { %5260 = vmatprep.subr.bf16.mxu1 %v15177_v0  ;;  %v4230_v57 = vadd.f32 %v4229_v6, %v15181_v16  ;;  %v15183_v40 = vcombine.low %v11302_v36, %v11318_v34  ;;  %6763 = vst [vmem:[%s11732_s28 + $0x100] sm:$0xff] %v6619_v17  ;;  %v6620_v27 = vmul.f32 %v6476_v42, %v15184_v30  ;;  %7538 = vrsqrt.f32 %v11858_v55  ;;  %v7515_v34 = vpop.eup %7514  ;;  %v15187_v36 = vld [vmem:[#allocation30_spill] sm:$0xff]  ;;  %v4354_v17 = vpop.f32.mrf.mxu1  ;;  %v15189_v42 = vld [vmem:[#allocation47_spill] sm:$0xff]  ;;  %v12684_v28 = vld [vmem:[%s14410_s2 + $0x958] sm:$0xff] }
 0x1db   : > { %v6052_v23 = vmul.f32 %v7511_v41, %v11751_v39  ;;  %v11878_v50 = vadd.f32 %v4348_v53, %v4226_v31  ;;  %v15185_v61 = vcombine.low %v11323_v58, %v15176_v22  ;;  %4945 = vmatprep.mubr.bf16.mxu0 %v15186_v52  ;;  %v6627_v0 = vmul.f32 %v6483_v24, %v15187_v36  ;;  %v15190_v53 = vld [vmem:[#allocation248_spill] sm:$0xff]  ;;  %v7517_v58 = vpop.eup %7516  ;;  %v4233_v24 = vpop.f32.mrf.mxu0  ;;  %v15343_v52 = vld [vmem:[#allocation186_spill] sm:$0xff] }
 0x1dc   : > { %5138 = vmatpush1.bf16.msra.mxu0 %v15183_v40  ;;  %7540 = vrcp.f32 %v6227_v54  ;;  %v11885_v12 = vadd.f32 %v4352_v5, %v4230_v57  ;;  %v4232_v39 = vadd.f32 %v4231_v9, %v15188_v20  ;;  %5068 = vmatprep.mubr.bf16.mxu1 %v15189_v42  ;;  %v15192_v31 = vcombine.high %v15190_v53, %v15191_v13  ;;  %v7519_v16 = vpop.eup %7518  ;;  %v15194_v40 = vld [vmem:[#allocation231_spill] sm:$0xff]  ;;  %v12617_v42 = vld [vmem:[%s14410_s2 + $0x638] sm:$0xff] }
 0x1dd   : > { %5261 = vmatpush1.bf16.msra.mxu1 %v15185_v61  ;;  %6764 = vst [vmem:[%s11732_s28 + $0x108] sm:$0xff] %v6620_v27  ;;  %v6484_v22 = vmul.f32 %v7513_v29, %v6052_v23  ;;  %v6059_v6 = vmul.f32 %v7515_v34, %v11767_v33  ;;  %7542 = vrsqrt.f32 %v11878_v50  ;;  %v6228_v41 = vadd.f32 1.0, %v11878_v50  ;;  %6771 = vst [vmem:[%s11732_s28 + $0x140] sm:$0xff] %v6627_v0  ;;  %v4356_v33 = vpop.f32.mrf.mxu1  ;;  %v7521_v27 = vpop.eup %7520  ;;  %v15196_v23 = vld [vmem:[#allocation25_spill] sm:$0xff]  ;;  %v15198_v20 = vld [vmem:[#allocation251_spill] sm:$0xff] }
 0x1de   : > { %5139 = vmatprep.subr.bf16.mxu0 %v15192_v31  ;;  %v15193_v54 = vcombine.high %v11365_v46, %v11370_v32  ;;  %7544 = vrsqrt.f32 %v11885_v12  ;;  %v6235_v57 = vadd.f32 1.0, %v11885_v12  ;;  %v11902_v5 = vadd.f32 %v4354_v17, %v4232_v39  ;;  %v4235_v36 = vpop.f32.mrf.mxu0  ;;  %v7523_v17 = vpop.eup %7522  ;;  %v15200_v31 = vld [vmem:[#allocation232_spill] sm:$0xff] }
 0x1df   : > { %v4234_v29 = vadd.f32 %v4233_v24, %v15194_v40  ;;  %v15195_v30 = vcombine.low %v15190_v53, %v15191_v13  ;;  %v6628_v9 = vmul.f32 %v6484_v22, %v15196_v23  ;;  %v6491_v61 = vmul.f32 %v7517_v58, %v6059_v6  ;;  %v4358_v22 = vpop.f32.mrf.mxu1  ;;  %v7525_v6 = vpop.eup %7524 }
 0x1e0   : > { %5262 = vmatprep.subr.bf16.mxu1 %v15193_v54  ;;  %v6060_v34 = vmul.f32 %v7519_v16, %v11780_v4  ;;  %7546 = vrcp.f32 %v6228_v41  ;;  %v15197_v0 = vcombine.low %v11365_v46, %v11370_v32  ;;  %v15199_v39 = vcombine.high %v11386_v35, %v15198_v20  ;;  %v15202_v46 = vld [vmem:[#allocation41_spill] sm:$0xff]  ;;  %v4239_v54 = vpop.f32.mrf.mxu0  ;;  %v15203_v16 = vld [vmem:[#allocation56_spill] sm:$0xff] }
 0x1e1   : > { %5140 = vmatpush1.bf16.msra.mxu0 %v15195_v30  ;;  %7548 = vrcp.f32 %v6235_v57  ;;  %v6236_v53 = vadd.f32 1.0, %v11902_v5  ;;  %v11917_v13 = vadd.f32 %v4356_v33, %v4234_v29  ;;  %v4236_v58 = vadd.f32 %v4235_v36, %v15200_v31  ;;  %6772 = vst [vmem:[%s11732_s28 + $0x148] sm:$0xff] %v6628_v9  ;;  %v7527_v57 = vpop.eup %7526  ;;  %v15204_v33 = vld [vmem:[#allocation233_spill] sm:$0xff]  ;;  %v4362_v23 = vpop.f32.mrf.mxu1 }
 0x1e2   : > { %5263 = vmatpush1.bf16.msra.mxu1 %v15197_v0  ;;  %5141 = vmatprep.subr.bf16.mxu0 %v15199_v39  ;;  %v15201_v4 = vcombine.high %v11406_v45, %v11411_v62  ;;  %v6635_v32 = vmul.f32 %v6491_v61, %v15202_v46  ;;  %v6492_v41 = vmul.f32 %v7521_v27, %v6060_v34  ;;  %7550 = vrsqrt.f32 %v11902_v5  ;;  %v15205_v9 = vld [vmem:[#allocation57_spill] sm:$0xff]  ;;  %v4241_v39 = vpop.f32.mrf.mxu0 }
 0x1e3   : > { %v6067_v24 = vmul.f32 %v7523_v17, %v11797_v8  ;;  %4946 = vmatmul.mubr.bf16.gmra.mxu0 %v15203_v16  ;;  %7552 = vrcp.f32 %v6236_v53  ;;  %v6243_v40 = vadd.f32 1.0, %v11917_v13  ;;  %v11929_v29 = vadd.f32 %v4358_v22, %v4236_v58  ;;  %5069 = vmatmul.mubr.bf16.gmra.mxu1 %v15205_v9  ;;  %v7529_v8 = vpop.eup %7528  ;;  %v15207_v61 = vld [vmem:[#allocation33_spill] sm:$0xff]  ;;  %v15209_v53 = vld [vmem:[#allocation62_spill] sm:$0xff] }
 0x1e4   : > { %5264 = vmatprep.subr.bf16.mxu1 %v15201_v4  ;;  %v4240_v30 = vadd.f32 %v4239_v54, %v15204_v33  ;;  %v15206_v27 = vcombine.low %v11386_v35, %v15198_v20  ;;  %6779 = vst [vmem:[%s11732_s28 + $0x180] sm:$0xff] %v6635_v32  ;;  %v6636_v34 = vmul.f32 %v6492_v41, %v15207_v61  ;;  %7554 = vrsqrt.f32 %v11917_v13  ;;  %v7531_v31 = vpop.eup %7530  ;;  %v15210_v58 = vld [vmem:[#allocation234_spill] sm:$0xff]  ;;  %v4364_v4 = vpop.f32.mrf.mxu1  ;;  %v12594_v16 = vld [vmem:[%s14410_s2 + $0x218] sm:$0xff] }
 0x1e5   : > { %v6499_v36 = vmul.f32 %v7525_v6, %v6067_v24  ;;  %v6068_v0 = vmul.f32 %v7527_v57, %v11809_v63  ;;  %v15208_v17 = vcombine.low %v11406_v45, %v11411_v62  ;;  %4955 = vmatprep.mubr.bf16.mxu0 %v15209_v53  ;;  %7556 = vrcp.f32 %v6243_v40  ;;  %v15211_v6 = vld [vmem:[#allocation63_spill] sm:$0xff]  ;;  %v15212_v63 = vld [vmem:[#allocation253_spill] sm:$0xff]  ;;  %v7533_v32 = vpop.eup %7532  ;;  %v15214_v45 = vld [vmem:[#allocation42_spill] sm:$0xff]  ;;  %v4243_v54 = vpop.f32.mrf.mxu0 }
 0x1e6   : > { %5142 = vmatpush1.bf16.msra.mxu0 %v15206_v27  ;;  %v6244_v35 = vadd.f32 1.0, %v11929_v29  ;;  %v11945_v20 = vadd.f32 %v4362_v23, %v4240_v30  ;;  %v4242_v22 = vadd.f32 %v4241_v39, %v15210_v58  ;;  %5078 = vmatprep.mubr.bf16.mxu1 %v15211_v6  ;;  %v15213_v46 = vcombine.high %v11416_v18, %v15212_v63  ;;  %v7535_v40 = vpop.eup %7534  ;;  %v15216_v23 = vld [vmem:[#allocation235_spill] sm:$0xff]  ;;  %v4366_v61 = vpop.f32.mrf.mxu1  ;;  %v12527_v6 = vld [vmem:[%s14410_s2 + $0x6f8] sm:$0xff] }
 0x1e7   : > { %5265 = vmatpush1.bf16.msra.mxu1 %v15208_v17  ;;  %6780 = vst [vmem:[%s11732_s28 + $0x188] sm:$0xff] %v6636_v34  ;;  %v6643_v62 = vmul.f32 %v6499_v36, %v15214_v45  ;;  %v6500_v41 = vmul.f32 %v7529_v8, %v6068_v0  ;;  %v6075_v24 = vmul.f32 %v7531_v31, %v11827_v38  ;;  %7558 = vrsqrt.f32 %v11929_v29  ;;  %v7537_v38 = vpop.eup %7536  ;;  %v15218_v34 = vld [vmem:[#allocation35_spill] sm:$0xff]  ;;  %v4245_v17 = vpop.f32.mrf.mxu0  ;;  %v12604_v53 = vld [vmem:[%s14410_s2 + $0x618] sm:$0xff] }
 0x1e8   : > { %5143 = vmatprep.subr.bf16.mxu0 %v15213_v46  ;;  %v15215_v57 = vcombine.high %v11433_v44, %v11438_v7  ;;  %7560 = vrcp.f32 %v6244_v35  ;;  %v6251_v33 = vadd.f32 1.0, %v11945_v20  ;;  %v11960_v30 = vadd.f32 %v4364_v4, %v4242_v22  ;;  %v15220_v35 = vld [vmem:[#allocation254_spill] sm:$0xff] }
 0x1e9   : > { %v4244_v27 = vadd.f32 %v4243_v54, %v15216_v23  ;;  %v15217_v8 = vcombine.low %v11416_v18, %v15212_v63  ;;  %6787 = vst [vmem:[%s11732_s28 + $0x1c0] sm:$0xff] %v6643_v62  ;;  %v6644_v36 = vmul.f32 %v6500_v41, %v15218_v34  ;;  %v6507_v0 = vmul.f32 %v7533_v32, %v6075_v24  ;;  %v7539_v18 = vpop.eup %7538  ;;  %v15222_v63 = vld [vmem:[#allocation236_spill] sm:$0xff]  ;;  %v4249_v24 = vpop.f32.mrf.mxu0  ;;  %v15225_v54 = vld [vmem:[#allocation66_spill] sm:$0xff]  ;;  %v15226_v23 = vld [vmem:[#allocation237_spill] sm:$0xff] }
 0x1ea   : > { %5266 = vmatprep.subr.bf16.mxu1 %v15215_v57  ;;  %v6076_v39 = vmul.f32 %v7535_v40, %v11840_v60  ;;  %7562 = vrsqrt.f32 %v11945_v20  ;;  %v15219_v31 = vcombine.low %v11433_v44, %v11438_v7  ;;  %v15221_v58 = vcombine.high %v11453_v14, %v15220_v35  ;;  %v4368_v60 = vpop.f32.mrf.mxu1  ;;  %v7541_v45 = vpop.eup %7540  ;;  %v15224_v44 = vld [vmem:[#allocation52_spill] sm:$0xff] }
 0x1eb   : > { %5144 = vmatpush1.bf16.msra.mxu0 %v15217_v8  ;;  %7564 = vrcp.f32 %v6251_v33  ;;  %v6252_v22 = vadd.f32 1.0, %v11960_v30  ;;  %v11977_v4 = vadd.f32 %v4366_v61, %v4244_v27  ;;  %v4246_v46 = vadd.f32 %v4245_v17, %v15222_v63  ;;  %6788 = vst [vmem:[%s11732_s28 + $0x1c8] sm:$0xff] %v6644_v36  ;;  %v7543_v57 = vpop.eup %7542  ;;  %v15227_v8 = vld [vmem:[#allocation69_spill] sm:$0xff]  ;;  %v15229_v34 = vld [vmem:[#allocation48_spill] sm:$0xff]  ;;  %v4251_v17 = vpop.f32.mrf.mxu0 }
 0x1ec   : > { %5267 = vmatpush1.bf16.msra.mxu1 %v15219_v31  ;;  %5145 = vmatprep.subr.bf16.mxu0 %v15221_v58  ;;  %v15223_v32 = vcombine.high %v11474_v47, %v11479_v15  ;;  %v6651_v7 = vmul.f32 %v6507_v0, %v15224_v44  ;;  %v6508_v62 = vmul.f32 %v7537_v38, %v6076_v39  ;;  %7566 = vrsqrt.f32 %v11960_v30  ;;  %v4372_v61 = vpop.f32.mrf.mxu1  ;;  %v15230_v31 = vld [vmem:[#allocation70_spill] sm:$0xff]  ;;  %v15231_v58 = vld [vmem:[#allocation71_spill] sm:$0xff] }
 0x1ed   : > { %v6083_v41 = vmul.f32 %v7539_v18, %v11858_v55  ;;  %4956 = vmatmul.mubr.bf16.gmra.mxu0 %v15225_v54  ;;  %7568 = vrcp.f32 %v6252_v22  ;;  %v6259_v40 = vadd.f32 1.0, %v11977_v4  ;;  %v11989_v33 = vadd.f32 %v4368_v60, %v4246_v46  ;;  %5079 = vmatmul.mubr.bf16.gmra.mxu1 %v15227_v8  ;;  %v7545_v55 = vpop.eup %7544  ;;  %v15235_v44 = vld [vmem:[#allocation238_spill] sm:$0xff]  ;;  %v12504_v54 = vld [vmem:[%s14410_s2 + $0x2d8] sm:$0xff] }
 0x1ee   : > { %5268 = vmatprep.subr.bf16.mxu1 %v15223_v32  ;;  %v4250_v27 = vadd.f32 %v4249_v24, %v15226_v23  ;;  %v15228_v38 = vcombine.low %v11453_v14, %v15220_v35  ;;  %6795 = vst [vmem:[%s11732_s28 + $0x200] sm:$0xff] %v6651_v7  ;;  %v6652_v36 = vmul.f32 %v6508_v62, %v15229_v34  ;;  %7570 = vrsqrt.f32 %v11977_v4  ;;  %v7547_v18 = vpop.eup %7546  ;;  %v4374_v63 = vpop.f32.mrf.mxu1  ;;  %v15234_v32 = vld [vmem:[#allocation53_spill] sm:$0xff] }
 0x1ef   : > { %v6515_v0 = vmul.f32 %v7541_v45, %v6083_v41  ;;  %v6084_v39 = vmul.f32 %v7543_v57, %v11878_v50  ;;  %4965 = vmatprep.mubr.bf16.mxu0 %v15230_v31  ;;  %5088 = vmatprep.mubr.bf16.mxu1 %v15231_v58  ;;  %v6091_v22 = vmul.f32 %v7545_v55, %v11885_v12  ;;  %7572 = vrcp.f32 %v6259_v40  ;;  %v7549_v60 = vpop.eup %7548  ;;  %v4253_v62 = vpop.f32.mrf.mxu0  ;;  %v15237_v57 = vld [vmem:[#allocation239_spill] sm:$0xff] }
 0x1f0   : > { %5146 = vmatpush2.bf16.msra.mxu0 %v15228_v38  ;;  %v6260_v14 = vadd.f32 1.0, %v11989_v33  ;;  %v12004_v35 = vadd.f32 %v4372_v61, %v4250_v27  ;;  %v15232_v46 = vcombine.low %v11474_v47, %v11479_v15  ;;  %v15233_v50 = vcombine.high %v11500_v49, %v11505_v56  ;;  %6796 = vst [vmem:[%s11732_s28 + $0x208] sm:$0xff] %v6652_v36  ;;  %v7551_v47 = vpop.eup %7550  ;;  %v4376_v23 = vpop.f32.mrf.mxu1  ;;  %v15239_v38 = vld [vmem:[#allocation49_spill] sm:$0xff]  ;;  %v15331_v58 = vld [vmem:[#allocation171_spill] sm:$0xff] }
 0x1f1   : > { %v6659_v45 = vmul.f32 %v6515_v0, %v15234_v32  ;;  %v6516_v12 = vmul.f32 %v7547_v18, %v6084_v39  ;;  %7574 = vrsqrt.f32 %v11989_v33  ;;  %v4252_v7 = vadd.f32 %v4251_v17, %v15235_v44  ;;  %v7553_v61 = vpop.eup %7552  ;;  %v4255_v0 = vpop.f32.mrf.mxu0  ;;  %v15241_v18 = vld [vmem:[#allocation64_spill] sm:$0xff]  ;;  %v15245_v44 = vld [vmem:[#allocation255_spill] sm:$0xff] }
 0x1f2   : > { %5269 = vmatpush2.bf16.msra.mxu1 %v15232_v46  ;;  %5147 = vmatprep.subr.bf16.mxu0 %v15233_v50  ;;  %v15236_v41 = vcombine.high %v11521_v59, %v11536_v10  ;;  %v6523_v15 = vmul.f32 %v7549_v60, %v6091_v22  ;;  %7576 = vrcp.f32 %v6260_v14  ;;  %v6267_v24 = vadd.f32 1.0, %v12004_v35  ;;  %v7555_v17 = vpop.eup %7554  ;;  %v15242_v22 = vld [vmem:[#allocation240_spill] sm:$0xff]  ;;  %v4378_v46 = vpop.f32.mrf.mxu1 }
 0x1f3   : > { %v4254_v40 = vadd.f32 %v4253_v62, %v15237_v57  ;;  %v15238_v27 = vcombine.low %v11500_v49, %v11505_v56  ;;  %6803 = vst [vmem:[%s11732_s28 + $0x240] sm:$0xff] %v6659_v45  ;;  %v6660_v55 = vmul.f32 %v6516_v12, %v15239_v38  ;;  %v6092_v34 = vmul.f32 %v7551_v47, %v11902_v5  ;;  %v4259_v45 = vpop.f32.mrf.mxu0  ;;  %v15244_v12 = vld [vmem:[#allocation76_spill] sm:$0xff] }
 0x1f4   : > { %5270 = vmatprep.subr.bf16.mxu1 %v15236_v41  ;;  %7578 = vrsqrt.f32 %v12004_v35  ;;  %v12028_v36 = vadd.f32 %v4374_v63, %v4252_v7  ;;  %v15240_v39 = vcombine.high %v11541_v43, %v11546_v1  ;;  %v6667_v49 = vmul.f32 %v6523_v15, %v15241_v18  ;;  %v7557_v63 = vpop.eup %7556  ;;  %v4382_v47 = vpop.f32.mrf.mxu1  ;;  %v15248_v15 = vld [vmem:[#allocation79_spill] sm:$0xff] }
 0x1f5   : > { %5148 = vmatpush2.bf16.msra.mxu0 %v15238_v27  ;;  %7580 = vrcp.f32 %v6267_v24  ;;  %v12034_v56 = vadd.f32 %v4376_v23, %v4254_v40  ;;  %v4256_v14 = vadd.f32 %v4255_v0, %v15242_v22  ;;  %v15243_v5 = vcombine.low %v11521_v59, %v11536_v10  ;;  %6804 = vst [vmem:[%s11732_s28 + $0x248] sm:$0xff] %v6660_v55  ;;  %v7559_v62 = vpop.eup %7558  ;;  %v15250_v40 = vld [vmem:[#allocation58_spill] sm:$0xff]  ;;  %v4261_v38 = vpop.f32.mrf.mxu0  ;;  %v15251_v55 = vld [vmem:[#allocation84_spill] sm:$0xff]  ;;  %v15256_v22 = vld [vmem:[#allocation257_spill] sm:$0xff] }
 0x1f6   : > { %5149 = vmatprep.subr.bf16.mxu0 %v15240_v39  ;;  %v6524_v50 = vmul.f32 %v7553_v61, %v6092_v34  ;;  %v6099_v60 = vmul.f32 %v7555_v17, %v11917_v13  ;;  %7582 = vrsqrt.f32 %v12028_v36  ;;  %v6268_v32 = vadd.f32 1.0, %v12028_v36  ;;  %4966 = vmatmul.mubr.bf16.gmra.mxu0 %v15244_v12  ;;  %6811 = vst [vmem:[%s11732_s28 + $0x280] sm:$0xff] %v6667_v49  ;;  %v15247_v13 = vld [vmem:[#allocation243_spill] sm:$0xff]  ;;  %v7561_v57 = vpop.eup %7560  ;;  %v15252_v34 = vld [vmem:[#allocation85_spill] sm:$0xff]  ;;  %v4384_v18 = vpop.f32.mrf.mxu1 }
 0x1f7   : > { %5271 = vmatpush2.bf16.msra.mxu1 %v15243_v5  ;;  %v15246_v7 = vcombine.high %v11568_v26, %v15245_v44  ;;  %7584 = vrsqrt.f32 %v12034_v56  ;;  %v6275_v59 = vadd.f32 1.0, %v12034_v56  ;;  %v12051_v10 = vadd.f32 %v4378_v46, %v4256_v14  ;;  %4975 = vmatprep.mubr.bf16.mxu0 %v15251_v55  ;;  %v7563_v0 = vpop.eup %7562  ;;  %v15258_v5 = vld [vmem:[#allocation65_spill] sm:$0xff] }
 0x1f8   : > { %v4260_v41 = vadd.f32 %v4259_v45, %v15247_v13  ;;  %5089 = vmatmul.mubr.bf16.gmra.mxu1 %v15248_v15  ;;  %v15249_v24 = vcombine.low %v11541_v43, %v11546_v1  ;;  %v6668_v23 = vmul.f32 %v6524_v50, %v15250_v40  ;;  %v6531_v27 = vmul.f32 %v7557_v63, %v6099_v60  ;;  %v15253_v43 = vld [vmem:[#allocation246_spill] sm:$0xff]  ;;  %v7565_v46 = vpop.eup %7564 }
 0x1f9   : > { %5272 = vmatprep.subr.bf16.mxu1 %v15246_v7  ;;  %v6100_v61 = vmul.f32 %v7559_v62, %v11929_v29  ;;  %7586 = vrcp.f32 %v6268_v32  ;;  %5098 = vmatprep.mubr.bf16.mxu1 %v15252_v34  ;;  %v6276_v39 = vadd.f32 1.0, %v12051_v10  ;;  %v4262_v1 = vadd.f32 %v4261_v38, %v15253_v43  ;;  %v15255_v29 = vld [vmem:[#allocation256_spill] sm:$0xff]  ;;  %v4263_v32 = vpop.f32.mrf.mxu0  ;;  %v15259_v45 = vld [vmem:[#allocation258_spill] sm:$0xff]  ;;  %v15260_v7 = vld [vmem:[#allocation259_spill] sm:$0xff] }
 0x1fa   : > { %5150 = vmatpush2.bf16.msra.mxu0 %v15249_v24  ;;  %7588 = vrcp.f32 %v6275_v59  ;;  %v12063_v17 = vadd.f32 %v4382_v47, %v4260_v41  ;;  %v15254_v49 = vcombine.low %v11568_v26, %v15245_v44  ;;  %v15257_v14 = vcombine.high %v15255_v29, %v15256_v22  ;;  %6812 = vst [vmem:[%s11732_s28 + $0x288] sm:$0xff] %v6668_v23  ;;  %v7567_v26 = vpop.eup %7566  ;;  %v15262_v13 = vld [vmem:[#allocation250_spill] sm:$0xff]  ;;  %v4386_v47 = vpop.f32.mrf.mxu1  ;;  %v15265_v38 = vld [vmem:[#allocation260_spill] sm:$0xff]  ;;  %v15323_v34 = vld [vmem:[#allocation157_spill] sm:$0xff] }
 0x1fb   : > { %v6675_v63 = vmul.f32 %v6531_v27, %v15258_v5  ;;  %v6532_v50 = vmul.f32 %v7561_v57, %v6100_v61  ;;  %v6107_v60 = vmul.f32 %v7563_v0, %v11945_v20  ;;  %7590 = vrsqrt.f32 %v12051_v10  ;;  %v7569_v20 = vpop.eup %7568  ;;  %v15264_v57 = vld [vmem:[#allocation59_spill] sm:$0xff]  ;;  %v4265_v61 = vpop.f32.mrf.mxu0  ;;  %v15266_v0 = vld [vmem:[#allocation261_spill] sm:$0xff]  ;;  %v12096_v43 = vld [vmem:[%s14410_s2 + $0xa50] sm:$0xff] }
 0x1fc   : > { %5273 = vmatpush2.bf16.msra.mxu1 %v15254_v49  ;;  %5151 = vmatprep.subr.bf16.mxu0 %v15257_v14  ;;  %v15261_v62 = vcombine.high %v15259_v45, %v15260_v7  ;;  %7592 = vrcp.f32 %v6276_v39  ;;  %v6283_v44 = vadd.f32 1.0, %v12063_v17  ;;  %v12080_v59 = vadd.f32 %v4384_v18, %v4262_v1  ;;  %v12101_v1 = vld [vmem:[%s14410_s2 + $0xa70] sm:$0xff]  ;;  %v7571_v18 = vpop.eup %7570  ;;  %v4388_v14 = vpop.f32.mrf.mxu1 }
 0x1fd   : > { %v4264_v41 = vadd.f32 %v4263_v32, %v15262_v13  ;;  %v15263_v24 = vcombine.low %v15255_v29, %v15256_v22  ;;  %6819 = vst [vmem:[%s11732_s28 + $0x2c0] sm:$0xff] %v6675_v63  ;;  %v6676_v40 = vmul.f32 %v6532_v50, %v15264_v57  ;;  %v6539_v23 = vmul.f32 %v7565_v46, %v6107_v60  ;;  %v15268_v29 = vld [vmem:[#allocation252_spill] sm:$0xff]  ;;  %v7573_v5 = vpop.eup %7572  ;;  %v15270_v63 = vld [vmem:[#allocation77_spill] sm:$0xff]  ;;  %v15273_v13 = vld [vmem:[#allocation263_spill] sm:$0xff] }
 0x1fe   : > { %5274 = vmatprep.subr.bf16.mxu1 %v15261_v62  ;;  %v6108_v27 = vmul.f32 %v7567_v26, %v11960_v30  ;;  %7594 = vrsqrt.f32 %v12063_v17  ;;  %v15267_v39 = vcombine.high %v15265_v38, %v15266_v0  ;;  %v6284_v30 = vadd.f32 1.0, %v12080_v59  ;;  %v4425_v62 = vpop.f32.mrf.mxu0  ;;  %v15271_v26 = vld [vmem:[#allocation90_spill] sm:$0xff]  ;;  %v15275_v57 = vld [vmem:[#allocation93_spill] sm:$0xff] }
 0x1ff   : > { %5152 = vmatpush2.bf16.msra.mxu0 %v15263_v24  ;;  %7596 = vrcp.f32 %v6283_v44  ;;  %v12104_v49 = vadd.f32 %v4386_v47, %v4264_v41  ;;  %v4266_v22 = vadd.f32 %v4265_v61, %v15268_v29  ;;  %v15269_v46 = vcombine.low %v15259_v45, %v15260_v7  ;;  %6820 = vst [vmem:[%s11732_s28 + $0x2c8] sm:$0xff] %v6676_v40  ;;  %v15272_v44 = vld [vmem:[#allocation262_spill] sm:$0xff]  ;;  %v12121_v45 = vld [vmem:[%s14410_s2 + $0xe50] sm:$0xff] }
 0x200   : > { %5153 = vmatprep.subr.bf16.mxu0 %v15267_v39  ;;  %v6683_v50 = vmul.f32 %v6539_v23, %v15270_v63  ;;  %v6540_v60 = vmul.f32 %v7569_v20, %v6108_v27  ;;  %v6115_v32 = vmul.f32 %v7571_v18, %v11977_v4  ;;  %7598 = vrsqrt.f32 %v12080_v59  ;;  %4976 = vmatmul.mubr.bf16.gmra.mxu0 %v15271_v26  ;;  %v12126_v7 = vld [vmem:[%s14410_s2 + $0xe70] sm:$0xff]  ;;  %v7575_v4 = vpop.eup %7574  ;;  %v4548_v20 = vpop.f32.mrf.mxu1  ;;  %v15276_v40 = vld [vmem:[#allocation94_spill] sm:$0xff] }
 0x201   : > { %5275 = vmatpush2.bf16.msra.mxu1 %v15269_v46  ;;  %v15274_v41 = vcombine.high %v15272_v44, %v15273_v13  ;;  %7600 = vrcp.f32 %v6284_v30  ;;  %v6291_v47 = vadd.f32 1.0, %v12104_v49  ;;  %v12129_v24 = vadd.f32 %v4388_v14, %v4266_v22  ;;  %4985 = vmatprep.mubr.bf16.mxu0 %v15276_v40  ;;  %v7577_v27 = vpop.eup %7576  ;;  %v15277_v61 = vld [vmem:[#allocation72_spill] sm:$0xff]  ;;  %v4427_v29 = vpop.f32.mrf.mxu0  ;;  %v15278_v22 = vld [vmem:[#allocation97_spill] sm:$0xff] }
 0x202   : > { %5099 = vmatmul.mubr.bf16.gmra.mxu1 %v15275_v57  ;;  %v7275_v23 = vcombine.high %v12096_v43, %v12101_v1  ;;  %6827 = vst [vmem:[%s11732_s28 + $0x300] sm:$0xff] %v6683_v50  ;;  %v6684_v39 = vmul.f32 %v6540_v60, %v15277_v61  ;;  %v6547_v18 = vmul.f32 %v7573_v5, %v6115_v32  ;;  %7602 = vrsqrt.f32 %v12104_v49  ;;  %v7579_v46 = vpop.eup %7578  ;;  %v4550_v60 = vpop.f32.mrf.mxu1  ;;  %v15282_v32 = vld [vmem:[#allocation265_spill] sm:$0xff] }
 0x203   : > { %5276 = vmatprep.subr.bf16.mxu1 %v15274_v41  ;;  %v6116_v30 = vmul.f32 %v7575_v4, %v11989_v33  ;;  %5108 = vmatprep.mubr.bf16.mxu1 %v15278_v22  ;;  %v15279_v14 = vcombine.low %v15265_v38, %v15266_v0  ;;  %7604 = vrcp.f32 %v6291_v47  ;;  %v6292_v63 = vadd.f32 1.0, %v12129_v24  ;;  %v15281_v33 = vld [vmem:[#allocation264_spill] sm:$0xff]  ;;  %v7581_v0 = vpop.eup %7580 }
 0x204   : > { %v12144_v50 = vadd.f32 %v4548_v20, %v4425_v62  ;;  %v15280_v5 = vcombine.low %v15272_v44, %v15273_v13  ;;  %v15283_v41 = vcombine.high %v15281_v33, %v15282_v32  ;;  %v7403_v4 = vcombine.high %v12121_v45, %v12126_v7  ;;  %v12157_v38 = vld [vmem:[%s14410_s2 + $0xa10] sm:$0xff]  ;;  %6828 = vst [vmem:[%s11732_s28 + $0x308] sm:$0xff] %v6684_v39  ;;  %v15284_v62 = vld [vmem:[#allocation78_spill] sm:$0xff]  ;;  %v4429_v13 = vpop.f32.mrf.mxu0 }
 0x205   : > { %5154 = vmatpush2.bf16.msra.mxu0 %v15279_v14  ;;  %v6691_v47 = vmul.f32 %v6547_v18, %v15284_v62  ;;  %v6548_v20 = vmul.f32 %v7577_v27, %v6116_v30  ;;  %v6123_v44 = vmul.f32 %v7579_v46, %v12004_v35  ;;  %7606 = vrsqrt.f32 %v12129_v24  ;;  %v12169_v14 = vld [vmem:[%s14410_s2 + $0xa30] sm:$0xff]  ;;  %v7583_v27 = vpop.eup %7582  ;;  %v4552_v30 = vpop.f32.mrf.mxu1  ;;  %v15286_v62 = vld [vmem:[#allocation73_spill] sm:$0xff] }
 0x206   : > { %5277 = vmatpush2.bf16.msra.mxu1 %v15280_v5  ;;  %5155 = vmatprep.subr.bf16.mxu0 %v15283_v41  ;;  %v15285_v61 = vcombine.high %v11700_v3, %v11705_v51  ;;  %v12174_v39 = vld [vmem:[%s14410_s2 + $0xe10] sm:$0xff]  ;;  %7608 = vrcp.f32 %v6292_v63  ;;  %v12181_v18 = vadd.f32 %v4550_v60, %v4427_v29  ;;  %v7274_v46 = vcombine.low %v12096_v43, %v12101_v1  ;;  %v7585_v41 = vpop.eup %7584  ;;  %v4431_v63 = vpop.f32.mrf.mxu0 }
 0x207   : > { %v12179_v35 = vld [vmem:[%s14410_s2 + $0xe30] sm:$0xff]  ;;  %v7402_v5 = vcombine.low %v12121_v45, %v12126_v7  ;;  %6835 = vst [vmem:[%s11732_s28 + $0x340] sm:$0xff] %v6691_v47  ;;  %v6555_v22 = vmul.f32 %v7581_v0, %v6123_v44  ;;  %v6124_v40 = vmul.f32 %v7583_v27, %v12028_v36  ;;  %v12190_v57 = vadd.f32 %v4552_v30, %v4429_v13  ;;  %v7587_v60 = vpop.eup %7586  ;;  %v4554_v1 = vpop.f32.mrf.mxu1  ;;  %v15292_v27 = vld [vmem:[#allocation106_spill] sm:$0xff] }
 0x208   : > { %5278 = vmatprep.subr.bf16.mxu1 %v15285_v61  ;;  %v6692_v61 = vmul.f32 %v6548_v20, %v15286_v62  ;;  %v15287_v29 = vcombine.low %v15281_v33, %v15282_v32  ;;  %v6131_v43 = vmul.f32 %v7585_v41, %v12034_v56  ;;  %v15288_v45 = vcombine.low %v11700_v3, %v11705_v51  ;;  %v7589_v0 = vpop.eup %7588  ;;  %v15289_v47 = vld [vmem:[#allocation88_spill] sm:$0xff]  ;;  %v4435_v56 = vpop.f32.mrf.mxu0  ;;  %v12211_v3 = vld [vmem:[%s14410_s2 + $0x1d8] sm:$0xff]  ;;  %v15293_v41 = vld [vmem:[#allocation82_spill] sm:$0xff] }
 0x209   : > { %v7267_v7 = vcombine.high %v12157_v38, %v12169_v14  ;;  %v7395_v36 = vcombine.high %v12174_v39, %v12179_v35  ;;  %v6699_v33 = vmul.f32 %v6555_v22, %v15289_v47  ;;  %v6556_v32 = vmul.f32 %v7587_v60, %v6124_v40  ;;  %v15290_v44 = vld [vmem:[#allocation100_spill] sm:$0xff]  ;;  %v12216_v51 = vld [vmem:[%s14410_s2 + $0x1f8] sm:$0xff]  ;;  %v4558_v22 = vpop.f32.mrf.mxu1  ;;  %v15291_v40 = vld [vmem:[#allocation103_spill] sm:$0xff] }
 0x20a   : > { %5156 = vmatpush2.bf16.msra.mxu0 %v15287_v29  ;;  %5279 = vmatpush2.bf16.msra.mxu1 %v15288_v45  ;;  %6836 = vst [vmem:[%s11732_s28 + $0x348] sm:$0xff] %v6692_v61  ;;  %v12205_v20 = vadd.f32 %v4554_v1, %v4431_v63  ;;  %v6563_v13 = vmul.f32 %v7589_v0, %v6131_v43  ;;  %v4437_v29 = vpop.f32.mrf.mxu0  ;;  %v15294_v60 = vld [vmem:[#allocation109_spill] sm:$0xff] }
 0x20b   : > { %5157 = vmatprep.subr.bf16.mxu0 %v7275_v23  ;;  %4986 = vmatmul.mubr.bf16.gmra.mxu0 %v15290_v44  ;;  %v7591_v23 = vpop.eup %7590  ;;  %6843 = vst [vmem:[%s11732_s28 + $0x380] sm:$0xff] %v6699_v33  ;;  %v6700_v62 = vmul.f32 %v6556_v32, %v15293_v41  ;;  %v12225_v63 = vadd.f32 %v4558_v22, %v4435_v56  ;;  %v15295_v1 = vld [vmem:[#allocation89_spill] sm:$0xff]  ;;  %v4560_v0 = vpop.f32.mrf.mxu1 }
 0x20c   : > { %5280 = vmatprep.subr.bf16.mxu1 %v7403_v4  ;;  %5109 = vmatmul.mubr.bf16.gmra.mxu1 %v15291_v40  ;;  %v7266_v4 = vcombine.low %v12157_v38, %v12169_v14  ;;  %v7593_v30 = vpop.eup %7592  ;;  %v6132_v61 = vmul.f32 %v7591_v23, %v12051_v10  ;;  %v6707_v45 = vmul.f32 %v6563_v13, %v15295_v1 }
 0x20d   : > { %4995 = vmatprep.mubr.bf16.mxu0 %v15292_v27  ;;  %5118 = vmatprep.mubr.bf16.mxu1 %v15294_v60  ;;  %v7595_v43 = vpop.eup %7594  ;;  %v7394_v38 = vcombine.low %v12174_v39, %v12179_v35  ;;  %v7005_v14 = vcombine.high %v12211_v3, %v12216_v51  ;;  %6844 = vst [vmem:[%s11732_s28 + $0x388] sm:$0xff] %v6700_v62  ;;  %v12245_v39 = vld [vmem:[%s14410_s2 + $0x5f8] sm:$0xff]  ;;  %v15314_v60 = vld [vmem:[#allocation144_spill] sm:$0xff] }
 0x20e   : > { %5158 = vmatpush2.bf16.msra.mxu0 %v7274_v46  ;;  %5281 = vmatpush2.bf16.msra.mxu1 %v7402_v5  ;;  %v7597_v10 = vpop.eup %7596  ;;  %v6564_v47 = vmul.f32 %v7593_v30, %v6132_v61  ;;  %v6139_v33 = vmul.f32 %v7595_v43, %v12063_v17  ;;  %v12235_v32 = vadd.f32 %v4560_v0, %v4437_v29  ;;  %v4439_v46 = vpop.f32.mrf.mxu0  ;;  %v12240_v5 = vld [vmem:[%s14410_s2 + $0x5d8] sm:$0xff]  ;;  %v15296_v17 = vld [vmem:[#allocation83_spill] sm:$0xff] }
 0x20f   : > { %5159 = vmatprep.subr.bf16.mxu0 %v7267_v7  ;;  %5282 = vmatprep.subr.bf16.mxu1 %v7395_v36  ;;  %v7599_v35 = vpop.eup %7598  ;;  %6851 = vst [vmem:[%s11732_s28 + $0x3c0] sm:$0xff] %v6707_v45  ;;  %v4562_v7 = vpop.f32.mrf.mxu1  ;;  %v7133_v61 = vcombine.high %v12240_v5, %v12245_v39  ;;  %v15297_v43 = vld [vmem:[#allocation101_spill] sm:$0xff] }
 0x210   : > { %v7601_v56 = vpop.eup %7600  ;;  %v6708_v23 = vmul.f32 %v6564_v47, %v15296_v17  ;;  %v6571_v13 = vmul.f32 %v7597_v10, %v6139_v33  ;;  %v6140_v36 = vmul.f32 %v7599_v35, %v12080_v59  ;;  %v12250_v22 = vadd.f32 %v4562_v7, %v4439_v46  ;;  %v4441_v30 = vpop.f32.mrf.mxu0  ;;  %v15298_v47 = vld [vmem:[#allocation114_spill] sm:$0xff]  ;;  %v15299_v33 = vld [vmem:[#allocation117_spill] sm:$0xff]  ;;  %v15301_v35 = vld [vmem:[#allocation95_spill] sm:$0xff] }
 0x211   : > { %v7603_v41 = vpop.eup %7602  ;;  %v4564_v62 = vpop.f32.mrf.mxu1  ;;  %v15315_v27 = vld [vmem:[#allocation145_spill] sm:$0xff] }
 0x212   : > { %5160 = vmatpush2.bf16.msra.mxu0 %v7266_v4  ;;  %5283 = vmatpush2.bf16.msra.mxu1 %v7394_v38  ;;  %v7605_v29 = vpop.eup %7604  ;;  %6852 = vst [vmem:[%s11732_s28 + $0x3c8] sm:$0xff] %v6708_v23  ;;  %v6715_v1 = vmul.f32 %v6571_v13, %v15297_v43  ;;  %v6572_v45 = vmul.f32 %v7601_v56, %v6140_v36  ;;  %v4445_v10 = vpop.f32.mrf.mxu0  ;;  %v15302_v13 = vld [vmem:[#allocation119_spill] sm:$0xff] }
 0x213   : > { %5375 = vmatprep.subr.bf16.mxu0 %v7005_v14  ;;  %v6147_v0 = vmul.f32 %v7603_v41, %v12104_v49  ;;  %v12257_v59 = vadd.f32 %v4564_v62, %v4441_v30  ;;  %4996 = vmatmul.mubr.bf16.gmra.mxu0 %v15298_v47  ;;  %v7607_v4 = vpop.eup %7606  ;;  %v4568_v38 = vpop.f32.mrf.mxu1  ;;  %v15300_v14 = vld [vmem:[#allocation118_spill] sm:$0xff]  ;;  %v878_v30 = vld [vmem:[%s14410_s2 + $0x198] sm:$0xff] }
 0x214   : > { %5119 = vmatmul.mubr.bf16.gmra.mxu1 %v15299_v33  ;;  %5161 = vmatprep.mubr.bf16.mxu0 %v15300_v14  ;;  %v7609_v46 = vpop.eup %7608  ;;  %6859 = vst [vmem:[%s11732_s28 + $0x400] sm:$0xff] %v6715_v1  ;;  %v6716_v7 = vmul.f32 %v6572_v45, %v15301_v35  ;;  %v6148_v56 = vmul.f32 %v7607_v4, %v12129_v24  ;;  %v4447_v23 = vpop.f32.mrf.mxu0  ;;  %v882_v41 = vld [vmem:[%s14410_s2 + $0x1b8] sm:$0xff]  ;;  %v15303_v62 = vld [vmem:[#allocation102_spill] sm:$0xff]  ;;  %v15304_v4 = vld [vmem:[#allocation96_spill] sm:$0xff] }
 0x215   : > { %v6579_v17 = vmul.f32 %v7605_v29, %v6147_v0  ;;  %v12265_v49 = vadd.f32 %v4568_v38, %v4445_v10  ;;  %5284 = vmatprep.mubr.bf16.mxu1 %v15302_v13  ;;  %v4570_v36 = vpop.f32.mrf.mxu1  ;;  %5498 = vmatprep.subr.bf16.mxu1 %v7133_v61  ;;  %v7004_v61 = vcombine.low %v12211_v3, %v12216_v51  ;;  %v1006_v0 = vld [vmem:[%s14410_s2 + $0x598] sm:$0xff]  ;;  %v15307_v13 = vld [vmem:[#allocation130_spill] sm:$0xff]  ;;  %v15308_v14 = vld [vmem:[#allocation132_spill] sm:$0xff] }
 0x216   : > { %6860 = vst [vmem:[%s11732_s28 + $0x408] sm:$0xff] %v6716_v7  ;;  %v6580_v24 = vmul.f32 %v7609_v46, %v6148_v56  ;;  %v12276_v43 = vadd.f32 %v4570_v36, %v4447_v23  ;;  %v4449_v1 = vpop.f32.mrf.mxu0  ;;  %v1010_v10 = vld [vmem:[%s14410_s2 + $0x5b8] sm:$0xff]  ;;  %v7132_v7 = vcombine.low %v12240_v5, %v12245_v39 }
 0x217   : > { %v6723_v29 = vmul.f32 %v6579_v17, %v15303_v62  ;;  %v4572_v45 = vpop.f32.mrf.mxu1  ;;  %v6997_v17 = vcombine.high %v878_v30, %v882_v41  ;;  %v870_v3 = vld [vmem:[%s14410_s2 + $0x158] sm:$0xff]  ;;  %v15305_v62 = vld [vmem:[#allocation124_spill] sm:$0xff] }
 0x218   : > { %v6724_v38 = vmul.f32 %v6580_v24, %v15304_v4  ;;  %v12288_v46 = vadd.f32 %v4572_v45, %v4449_v1  ;;  %v4451_v35 = vpop.f32.mrf.mxu0  ;;  %v874_v51 = vld [vmem:[%s14410_s2 + $0x178] sm:$0xff]  ;;  %v6996_v45 = vcombine.low %v878_v30, %v882_v41 }
 0x219   : > { %6867 = vst [vmem:[%s11732_s28 + $0x440] sm:$0xff] %v6723_v29  ;;  %v4574_v56 = vpop.f32.mrf.mxu1  ;;  %v7125_v29 = vcombine.high %v1006_v0, %v1010_v10  ;;  %v998_v5 = vld [vmem:[%s14410_s2 + $0x558] sm:$0xff] }
 0x21a   : > { %6868 = vst [vmem:[%s11732_s28 + $0x448] sm:$0xff] %v6724_v38  ;;  %v12299_v23 = vadd.f32 %v4574_v56, %v4451_v35  ;;  %v4455_v36 = vpop.f32.mrf.mxu0  ;;  %v1002_v39 = vld [vmem:[%s14410_s2 + $0x578] sm:$0xff]  ;;  %v7124_v35 = vcombine.low %v1006_v0, %v1010_v10  ;;  %v6989_v56 = vcombine.high %v870_v3, %v874_v51  ;;  %v6988_v10 = vcombine.low %v870_v3, %v874_v51 }
 0x21b   : > { %5162 = vmatmul.mubr.bf16.vlgmr.msra.gmra.mxu0 %v15305_v62  ;;  %v4578_v24 = vpop.f32.mrf.mxu1  ;;  %v15306_v1 = vld [vmem:[#allocation125_spill] sm:$0xff]  ;;  %v7117_v33 = vcombine.high %v998_v5, %v1002_v39 }
 0x21c   : > { %5285 = vmatmul.mubr.bf16.vlgmr.msra.gmra.mxu1 %v15306_v1  ;;  %5376 = vmatpush1.bf16.msra.mxu0 %v7004_v61  ;;  %v12309_v4 = vadd.f32 %v4578_v24, %v4455_v36  ;;  %v4457_v38 = vpop.f32.mrf.mxu0  ;;  %v862_v47 = vld [vmem:[%s14410_s2 + $0x118] sm:$0xff] }
 0x21d   : > { %5499 = vmatpush1.bf16.msra.mxu1 %v7132_v7  ;;  %5377 = vmatprep.subr.bf16.mxu0 %v6997_v17  ;;  %v4580_v62 = vpop.f32.mrf.mxu1  ;;  %v866_v30 = vld [vmem:[%s14410_s2 + $0x138] sm:$0xff] }
 0x21e   : > { %5171 = vmatprep.mubr.bf16.mxu0 %v15307_v13  ;;  %5294 = vmatprep.mubr.bf16.mxu1 %v15308_v14  ;;  %v12319_v41 = vadd.f32 %v4580_v62, %v4457_v38  ;;  %v4459_v61 = vpop.f32.mrf.mxu0  ;;  %v990_v7 = vld [vmem:[%s14410_s2 + $0x518] sm:$0xff]  ;;  %v7116_v62 = vcombine.low %v998_v5, %v1002_v39  ;;  %v6981_v38 = vcombine.high %v862_v47, %v866_v30 }
 0x21f   : > { %5500 = vmatprep.subr.bf16.mxu1 %v7125_v29  ;;  %v4582_v0 = vpop.f32.mrf.mxu1  ;;  %v994_v17 = vld [vmem:[%s14410_s2 + $0x538] sm:$0xff] }
 0x220   : > { %5378 = vmatpush1.bf16.msra.mxu0 %v6996_v45  ;;  %v12327_v36 = vadd.f32 %v4582_v0, %v4459_v61  ;;  %v4461_v24 = vpop.f32.mrf.mxu0  ;;  %v854_v3 = vld [vmem:[%s14410_s2 + $0xd8] sm:$0xff]  ;;  %v15311_v61 = vld [vmem:[#allocation138_spill] sm:$0xff]  ;;  %v7109_v0 = vcombine.high %v990_v7, %v994_v17 }
 0x221   : > { %5501 = vmatpush1.bf16.msra.mxu1 %v7124_v35  ;;  %5379 = vmatprep.subr.bf16.mxu0 %v6989_v56  ;;  %v4584_v14 = vpop.f32.mrf.mxu1  ;;  %v858_v51 = vld [vmem:[%s14410_s2 + $0xf8] sm:$0xff]  ;;  %v6980_v56 = vcombine.low %v862_v47, %v866_v30 }
 0x222   : > { %15309 = vst [vmem:[#allocation218_spill] sm:$0xff] %v12327_v36  ;;  %5502 = vmatprep.subr.bf16.mxu1 %v7117_v33  ;;  %v12335_v29 = vadd.f32 %v4584_v14, %v4461_v24  ;;  %v4465_v45 = vpop.f32.mrf.mxu0  ;;  %v982_v5 = vld [vmem:[%s14410_s2 + $0x4d8] sm:$0xff]  ;;  %v7108_v24 = vcombine.low %v990_v7, %v994_v17  ;;  %v6972_v7 = vcombine.low %v854_v3, %v858_v51 }
 0x223   : > { %5172 = vmatmul.mubr.bf16.gmra.mxu0 %v15311_v61  ;;  %v986_v33 = vld [vmem:[%s14410_s2 + $0x4f8] sm:$0xff]  ;;  %v4588_v39 = vpop.f32.mrf.mxu1  ;;  %v6973_v61 = vcombine.high %v854_v3, %v858_v51 }
 0x224   : > { %15310 = vst [vmem:[#allocation219_spill] sm:$0xff] %v12335_v29  ;;  %v15312_v35 = vld [vmem:[#allocation141_spill] sm:$0xff]  ;;  %5380 = vmatpush1.bf16.msra.mxu0 %v6988_v10  ;;  %v12345_v13 = vadd.f32 %v4588_v39, %v4465_v45  ;;  %v4467_v14 = vpop.f32.mrf.mxu0  ;;  %5181 = vmatprep.mubr.bf16.mxu0 %v15314_v60  ;;  %v7101_v40 = vcombine.high %v982_v5, %v986_v33 }
 0x225   : > { %5295 = vmatmul.mubr.bf16.gmra.mxu1 %v15312_v35  ;;  %5381 = vmatprep.subr.bf16.mxu0 %v6981_v38  ;;  %v4590_v1 = vpop.f32.mrf.mxu1  ;;  %v846_v47 = vld [vmem:[%s14410_s2 + $0x98] sm:$0xff]  ;;  %v7100_v45 = vcombine.low %v982_v5, %v986_v33  ;;  %v15320_v33 = vld [vmem:[#allocation150_spill] sm:$0xff] }
 0x226   : > { %15313 = vst [vmem:[#allocation8_spill] sm:$0xff] %v12345_v13  ;;  %5503 = vmatpush1.bf16.msra.mxu1 %v7116_v62  ;;  %5304 = vmatprep.mubr.bf16.mxu1 %v15315_v27  ;;  %v12349_v44 = vadd.f32 %v4590_v1, %v4467_v14  ;;  %v4469_v26 = vpop.f32.mrf.mxu0  ;;  %v850_v30 = vld [vmem:[%s14410_s2 + $0xb8] sm:$0xff] }
 0x227   : > { %5504 = vmatprep.subr.bf16.mxu1 %v7109_v0  ;;  %v4592_v10 = vpop.f32.mrf.mxu1  ;;  %v974_v17 = vld [vmem:[%s14410_s2 + $0x498] sm:$0xff]  ;;  %v6965_v39 = vcombine.high %v846_v47, %v850_v30 }
 0x228   : > { %15316 = vst [vmem:[#allocation220_spill] sm:$0xff] %v12349_v44  ;;  %5382 = vmatpush1.bf16.msra.mxu0 %v6980_v56  ;;  %v978_v1 = vld [vmem:[%s14410_s2 + $0x4b8] sm:$0xff]  ;;  %v12363_v62 = vadd.f32 %v4592_v10, %v4469_v26  ;;  %v4471_v38 = vpop.f32.mrf.mxu0  ;;  %v15319_v26 = vld [vmem:[#allocation148_spill] sm:$0xff] }
 0x229   : > { %5383 = vmatprep.subr.bf16.mxu0 %v6973_v61  ;;  %v4594_v0 = vpop.f32.mrf.mxu1  ;;  %v838_v3 = vld [vmem:[%s14410_s2 + $0x58] sm:$0xff]  ;;  %v7093_v10 = vcombine.high %v974_v17, %v978_v1 }
 0x22a   : > { %15317 = vst [vmem:[#allocation221_spill] sm:$0xff] %v12363_v62  ;;  %5505 = vmatpush1.bf16.msra.mxu1 %v7108_v24  ;;  %v842_v51 = vld [vmem:[%s14410_s2 + $0x78] sm:$0xff]  ;;  %v12371_v56 = vadd.f32 %v4594_v0, %v4471_v38  ;;  %v4475_v14 = vpop.f32.mrf.mxu0  ;;  %v6964_v24 = vcombine.low %v846_v47, %v850_v30  ;;  %v15322_v0 = vld [vmem:[#allocation155_spill] sm:$0xff] }
 0x22b   : > { %5506 = vmatprep.subr.bf16.mxu1 %v7101_v40  ;;  %5182 = vmatmul.mubr.bf16.gmra.mxu0 %v15319_v26  ;;  %v966_v61 = vld [vmem:[%s14410_s2 + $0x458] sm:$0xff]  ;;  %v4598_v5 = vpop.f32.mrf.mxu1  ;;  %v7092_v26 = vcombine.low %v974_v17, %v978_v1  ;;  %v6957_v60 = vcombine.high %v838_v3, %v842_v51  ;;  %v6956_v17 = vcombine.low %v838_v3, %v842_v51 }
 0x22c   : > { %15318 = vst [vmem:[#allocation19_spill] sm:$0xff] %v12371_v56  ;;  %v970_v40 = vld [vmem:[%s14410_s2 + $0x478] sm:$0xff]  ;;  %5384 = vmatpush1.bf16.msra.mxu0 %v6972_v7  ;;  %v12381_v27 = vadd.f32 %v4598_v5, %v4475_v14  ;;  %v4477_v38 = vpop.f32.mrf.mxu0  ;;  %5191 = vmatprep.mubr.bf16.mxu0 %v15322_v0 }
 0x22d   : > { %5305 = vmatmul.mubr.bf16.gmra.mxu1 %v15320_v33  ;;  %v4600_v35 = vpop.f32.mrf.mxu1  ;;  %5385 = vmatprep.subr.bf16.mxu0 %v6965_v39  ;;  %v7085_v55 = vcombine.high %v966_v61, %v970_v40  ;;  %v830_v47 = vld [vmem:[%s14410_s2 + $0x18] sm:$0xff]  ;;  %v7084_v14 = vcombine.low %v966_v61, %v970_v40  ;;  %v15328_v61 = vld [vmem:[#allocation166_spill] sm:$0xff] }
 0x22e   : > { %15321 = vst [vmem:[#allocation2_spill] sm:$0xff] %v12381_v27  ;;  %5507 = vmatpush1.bf16.msra.mxu1 %v7100_v45  ;;  %5314 = vmatprep.mubr.bf16.mxu1 %v15323_v34  ;;  %v12385_v15 = vadd.f32 %v4600_v35, %v4477_v38  ;;  %v4479_v12 = vpop.f32.mrf.mxu0  ;;  %v834_v30 = vld [vmem:[%s14410_s2 + $0x38] sm:$0xff] }
 0x22f   : > { %5508 = vmatprep.subr.bf16.mxu1 %v7093_v10  ;;  %v4602_v7 = vpop.f32.mrf.mxu1  ;;  %v958_v1 = vld [vmem:[%s14410_s2 + $0x418] sm:$0xff]  ;;  %v6949_v5 = vcombine.high %v830_v47, %v834_v30  ;;  %v6948_v40 = vcombine.low %v830_v47, %v834_v30 }
 0x230   : > { %15324 = vst [vmem:[#allocation222_spill] sm:$0xff] %v12385_v15  ;;  %5386 = vmatpush1.bf16.msra.mxu0 %v6964_v24  ;;  %v962_v35 = vld [vmem:[%s14410_s2 + $0x438] sm:$0xff]  ;;  %v12399_v45 = vadd.f32 %v4602_v7, %v4479_v12  ;;  %v4481_v39 = vpop.f32.mrf.mxu0  ;;  %v15327_v12 = vld [vmem:[#allocation163_spill] sm:$0xff] }
 0x231   : > { %5387 = vmatprep.subr.bf16.mxu0 %v6957_v60  ;;  %v4604_v10 = vpop.f32.mrf.mxu1  ;;  %v950_v3 = vld [vmem:[%s14410_s2 + $0x3d8] sm:$0xff]  ;;  %v7077_v7 = vcombine.high %v958_v1, %v962_v35  ;;  %v7076_v34 = vcombine.low %v958_v1, %v962_v35 }
 0x232   : > { %15325 = vst [vmem:[#allocation22_spill] sm:$0xff] %v12399_v45  ;;  %5509 = vmatpush1.bf16.msra.mxu1 %v7092_v26  ;;  %v954_v51 = vld [vmem:[%s14410_s2 + $0x3f8] sm:$0xff]  ;;  %v12407_v24 = vadd.f32 %v4604_v10, %v4481_v39  ;;  %v4485_v38 = vpop.f32.mrf.mxu0 }
 0x233   : > { %5510 = vmatprep.subr.bf16.mxu1 %v7085_v55  ;;  %5192 = vmatmul.mubr.bf16.gmra.mxu0 %v15327_v12  ;;  %v12413_v60 = vld [vmem:[%s14410_s2 + $0x7d8] sm:$0xff]  ;;  %v4608_v26 = vpop.f32.mrf.mxu1  ;;  %v15330_v12 = vld [vmem:[#allocation170_spill] sm:$0xff]  ;;  %v7069_v0 = vcombine.high %v950_v3, %v954_v51  ;;  %v7068_v1 = vcombine.low %v950_v3, %v954_v51 }
 0x234   : > { %15326 = vst [vmem:[#allocation9_spill] sm:$0xff] %v12407_v24  ;;  %v12418_v55 = vld [vmem:[%s14410_s2 + $0x7f8] sm:$0xff]  ;;  %5388 = vmatpush1.bf16.msra.mxu0 %v6956_v17  ;;  %v12421_v39 = vadd.f32 %v4608_v26, %v4485_v38  ;;  %v4487_v10 = vpop.f32.mrf.mxu0  ;;  %5201 = vmatprep.mubr.bf16.mxu0 %v15330_v12 }
 0x235   : > { %5315 = vmatmul.mubr.bf16.gmra.mxu1 %v15328_v61  ;;  %v4610_v33 = vpop.f32.mrf.mxu1  ;;  %5389 = vmatprep.subr.bf16.mxu0 %v6949_v5  ;;  %v7197_v31 = vcombine.high %v12413_v60, %v12418_v55  ;;  %v12432_v47 = vld [vmem:[%s14410_s2 + $0x398] sm:$0xff] }
 0x236   : > { %15329 = vst [vmem:[#allocation241_spill] sm:$0xff] %v12421_v39  ;;  %5511 = vmatpush1.bf16.msra.mxu1 %v7084_v14  ;;  %5324 = vmatprep.mubr.bf16.mxu1 %v15331_v58  ;;  %v12427_v8 = vadd.f32 %v4610_v33, %v4487_v10  ;;  %v4489_v61 = vpop.f32.mrf.mxu0  ;;  %v946_v30 = vld [vmem:[%s14410_s2 + $0x3b8] sm:$0xff] }
 0x237   : > { %5512 = vmatprep.subr.bf16.mxu1 %v7077_v7  ;;  %v4612_v17 = vpop.f32.mrf.mxu1  ;;  %v12440_v35 = vld [vmem:[%s14410_s2 + $0x798] sm:$0xff]  ;;  %v7196_v7 = vcombine.low %v12413_v60, %v12418_v55  ;;  %v7061_v26 = vcombine.high %v12432_v47, %v946_v30  ;;  %v15335_v60 = vld [vmem:[#allocation172_spill] sm:$0xff]  ;;  %v7060_v58 = vcombine.low %v12432_v47, %v946_v30  ;;  %v15338_v30 = vld [vmem:[#allocation178_spill] sm:$0xff] }
 0x238   : > { %15332 = vst [vmem:[#allocation242_spill] sm:$0xff] %v12427_v8  ;;  %5390 = vmatpush1.bf16.msra.mxu0 %v6948_v40  ;;  %v12445_v33 = vld [vmem:[%s14410_s2 + $0x7b8] sm:$0xff]  ;;  %v12447_v14 = vadd.f32 %v4612_v17, %v4489_v61  ;;  %v4491_v5 = vpop.f32.mrf.mxu0 }
 0x239   : > { %5391 = vmatprep.subr.bf16.mxu0 %v7069_v0  ;;  %v12452_v38 = vld [vmem:[%s14410_s2 + $0x358] sm:$0xff]  ;;  %v4614_v51 = vpop.f32.mrf.mxu1  ;;  %v7189_v55 = vcombine.high %v12440_v35, %v12445_v33  ;;  %v7188_v12 = vcombine.low %v12440_v35, %v12445_v33  ;;  %v15339_v35 = vld [vmem:[#allocation179_spill] sm:$0xff] }
 0x23a   : > { %15333 = vst [vmem:[#allocation223_spill] sm:$0xff] %v12447_v14  ;;  %5513 = vmatpush1.bf16.msra.mxu1 %v7076_v34  ;;  %v12457_v3 = vld [vmem:[%s14410_s2 + $0x378] sm:$0xff]  ;;  %v12477_v40 = vadd.f32 %v4614_v51, %v4491_v5 }
 0x23b   : > { %5514 = vmatprep.subr.bf16.mxu1 %v7197_v31  ;;  %v12465_v34 = vld [vmem:[%s14410_s2 + $0x758] sm:$0xff]  ;;  %v4495_v31 = vpop.f32.mrf.mxu0  ;;  %5202 = vmatmul.mubr.bf16.gmra.mxu0 %v15335_v60  ;;  %v4618_v51 = vpop.f32.mrf.mxu1  ;;  %v15336_v60 = vld [vmem:[#allocation174_spill] sm:$0xff]  ;;  %v7052_v33 = vcombine.low %v12452_v38, %v12457_v3  ;;  %v7053_v14 = vcombine.high %v12452_v38, %v12457_v3 }
 0x23c   : > { %v12470_v0 = vld [vmem:[%s14410_s2 + $0x778] sm:$0xff]  ;;  %15334 = vst [vmem:[#allocation3_spill] sm:$0xff] %v12477_v40  ;;  %5392 = vmatpush2.bf16.msra.mxu0 %v7068_v1  ;;  %v12516_v1 = vadd.f32 %v4618_v51, %v4495_v31  ;;  %5211 = vmatprep.mubr.bf16.mxu0 %v15338_v30 }
 0x23d   : > { %v12475_v61 = vld [vmem:[%s14410_s2 + $0x318] sm:$0xff]  ;;  %5325 = vmatmul.mubr.bf16.gmra.mxu1 %v15336_v60  ;;  %v4497_v47 = vpop.f32.mrf.mxu0  ;;  %5393 = vmatprep.subr.bf16.mxu0 %v7061_v26  ;;  %v7181_v3 = vcombine.high %v12465_v34, %v12470_v0  ;;  %v15350_v62 = vcombine.low %v12465_v34, %v12470_v0 }
 0x23e   : > { %v12485_v10 = vld [vmem:[%s14410_s2 + $0x338] sm:$0xff]  ;;  %15337 = vst [vmem:[#allocation224_spill] sm:$0xff] %v12516_v1  ;;  %5334 = vmatprep.mubr.bf16.mxu1 %v15339_v35  ;;  %v4620_v35 = vpop.f32.mrf.mxu1  ;;  %5515 = vmatpush2.bf16.msra.mxu1 %v7196_v7 }
 0x23f   : > { %v12490_v17 = vld [vmem:[%s14410_s2 + $0x718] sm:$0xff]  ;;  %v12560_v26 = vadd.f32 %v4620_v35, %v4497_v47  ;;  %v4499_v38 = vpop.f32.mrf.mxu0  ;;  %5516 = vmatprep.subr.bf16.mxu1 %v7189_v55  ;;  %v15351_v19 = vcombine.high %v12475_v61, %v12485_v10 }
 0x240   : > { %v12495_v5 = vld [vmem:[%s14410_s2 + $0x738] sm:$0xff]  ;;  %v4622_v35 = vpop.f32.mrf.mxu1  ;;  %5394 = vmatpush2.bf16.msra.mxu0 %v7060_v58 }
 0x241   : > { %v12509_v40 = vld [vmem:[%s14410_s2 + $0x2f8] sm:$0xff]  ;;  %15340 = vst [vmem:[#allocation244_spill] sm:$0xff] %v12560_v26  ;;  %v12606_v30 = vadd.f32 %v4622_v35, %v4499_v38  ;;  %v4501_v9 = vpop.f32.mrf.mxu0  ;;  %5395 = vmatprep.subr.bf16.mxu0 %v7053_v14  ;;  %v15355_v44 = vcombine.high %v12490_v17, %v12495_v5 }
 0x242   : > { %v12514_v60 = vld [vmem:[%s14410_s2 + $0x6d8] sm:$0xff]  ;;  %v4624_v35 = vpop.f32.mrf.mxu1  ;;  %5517 = vmatpush2.bf16.msra.mxu1 %v7188_v12  ;;  %v15363_v13 = vcombine.high %v12504_v54, %v12509_v40 }
 0x243   : > { %v12532_v31 = vld [vmem:[%s14410_s2 + $0x298] sm:$0xff]  ;;  %15341 = vst [vmem:[#allocation16_spill] sm:$0xff] %v12606_v30  ;;  %v12652_v45 = vadd.f32 %v4624_v35, %v4501_v9  ;;  %v4505_v24 = vpop.f32.mrf.mxu0  ;;  %5212 = vmatmul.mubr.bf16.gmra.mxu0 %v15343_v52  ;;  %5518 = vmatprep.subr.bf16.mxu1 %v7181_v3  ;;  %v15368_v29 = vcombine.high %v12514_v60, %v12527_v6 }
 0x244   : > { %v12537_v51 = vld [vmem:[%s14410_s2 + $0x2b8] sm:$0xff]  ;;  %v4628_v35 = vpop.f32.mrf.mxu1  ;;  %5396 = vmatpush2.bf16.msra.mxu0 %v7052_v33 }
 0x245   : > { %v12548_v1 = vld [vmem:[%s14410_s2 + $0x698] sm:$0xff]  ;;  %15342 = vst [vmem:[#allocation225_spill] sm:$0xff] %v12652_v45  ;;  %v12696_v11 = vadd.f32 %v4628_v35, %v4505_v24  ;;  %v4507_v52 = vpop.f32.mrf.mxu0  ;;  %5397 = vmatprep.subr.bf16.mxu0 %v15351_v19 }
 0x246   : > { %v12553_v8 = vld [vmem:[%s14410_s2 + $0x6b8] sm:$0xff]  ;;  %5519 = vmatpush2.bf16.msra.mxu1 %v15350_v62 }
 0x247   : > { %v12558_v7 = vld [vmem:[%s14410_s2 + $0x258] sm:$0xff]  ;;  %15345 = vst [vmem:[#allocation12_spill] sm:$0xff] %v12696_v11  ;;  %v4509_v0 = vpop.f32.mrf.mxu0  ;;  %5520 = vmatprep.subr.bf16.mxu1 %v15355_v44  ;;  %v15359_v11 = vcombine.low %v12475_v61, %v12485_v10 }
 0x248   : > { %v12571_v39 = vld [vmem:[%s14410_s2 + $0x278] sm:$0xff] }
 0x249   : > { %v12576_v47 = vld [vmem:[%s14410_s2 + $0x658] sm:$0xff]  ;;  %5398 = vmatpush2.bf16.msra.mxu0 %v15359_v11  ;;  %v4511_v10 = vpop.f32.mrf.mxu0 }
 0x24a   : > { %v12581_v55 = vld [vmem:[%s14410_s2 + $0x678] sm:$0xff]  ;;  %5399 = vmatprep.subr.bf16.mxu0 %v15363_v13 }
 0x24b   : > { %v12599_v58 = vld [vmem:[%s14410_s2 + $0x238] sm:$0xff] }
 0x24c   : > { %v12622_v38 = vld [vmem:[%s14410_s2 + $0x9d8] sm:$0xff] }
 0x24d   : > { %v12627_v14 = vld [vmem:[%s14410_s2 + $0x9f8] sm:$0xff] }
 0x24e   : > { %v12640_v15 = vld [vmem:[%s14410_s2 + $0xdd8] sm:$0xff] }
 0x24f   : > { %v12645_v12 = vld [vmem:[%s14410_s2 + $0xdf8] sm:$0xff] }
 0x250   : > { %v12650_v26 = vld [vmem:[%s14410_s2 + $0x998] sm:$0xff] }
 0x251   : > { %v12662_v27 = vld [vmem:[%s14410_s2 + $0x9b8] sm:$0xff] }
 0x252   : > { %v12667_v9 = vld [vmem:[%s14410_s2 + $0xd98] sm:$0xff] }
 0x253   : > { %v12672_v3 = vld [vmem:[%s14410_s2 + $0xdb8] sm:$0xff] }
 0x254   : > { %v15344_v30 = vld [vmem:[#allocation189_spill] sm:$0xff] }
 0x255   : > { %5335 = vmatmul.mubr.bf16.gmra.mxu1 %v15344_v30  ;;  %v12689_v56 = vld [vmem:[%s14410_s2 + $0x978] sm:$0xff]  ;;  %v15346_v30 = vld [vmem:[#allocation192_spill] sm:$0xff] }
 0x256   : > { %v12694_v33 = vld [vmem:[%s14410_s2 + $0xd58] sm:$0xff]  ;;  %5221 = vmatprep.mubr.bf16.mxu0 %v15346_v30  ;;  %v15367_v30 = vld [vmem:[#allocation196_spill] sm:$0xff] }
 0x257   : > { %v15347_v45 = vld [vmem:[#allocation193_spill] sm:$0xff]  ;;  %5222 = vmatmul.mubr.bf16.gmra.mxu0 %v15367_v30  ;;  %v15369_v30 = vld [vmem:[#allocation198_spill] sm:$0xff] }
 0x258   : > { %5344 = vmatprep.mubr.bf16.mxu1 %v15347_v45  ;;  %v12712_v24 = vld [vmem:[%s14410_s2 + $0x918] sm:$0xff]  ;;  %v4630_v45 = vpop.f32.mrf.mxu1 }
 0x259   : > { %v12717_v35 = vld [vmem:[%s14410_s2 + $0x938] sm:$0xff]  ;;  %v12746_v34 = vadd.f32 %v4630_v45, %v4507_v52 }
 0x25a   : > { %15349 = vst [vmem:[#allocation226_spill] sm:$0xff] %v12717_v35  ;;  %v12739_v62 = vld [vmem:[%s14410_s2 + $0xd38] sm:$0xff]  ;;  %v4632_v45 = vpop.f32.mrf.mxu1 }
 0x25b   : > { %15352 = vst [vmem:[#allocation17_spill] sm:$0xff] %v12739_v62  ;;  %v12744_v19 = vld [vmem:[%s14410_s2 + $0x8d8] sm:$0xff]  ;;  %15354 = vst [vmem:[#allocation13_spill] sm:$0xff] %v12746_v34  ;;  %v12793_v61 = vadd.f32 %v4632_v45, %v4509_v0  ;;  %v15364_v45 = vcombine.low %v12490_v17, %v12495_v5 }
 0x25c   : > { %15353 = vst [vmem:[#allocation227_spill] sm:$0xff] %v12744_v19  ;;  %v12765_v52 = vld [vmem:[%s14410_s2 + $0xcd8] sm:$0xff]  ;;  %v4634_v13 = vpop.f32.mrf.mxu1 }
 0x25d   : > { %15357 = vst [vmem:[#allocation29_spill] sm:$0xff] %v12765_v52  ;;  %v12770_v44 = vld [vmem:[%s14410_s2 + $0xcf8] sm:$0xff]  ;;  %15362 = vst [vmem:[#allocation30_spill] sm:$0xff] %v12793_v61  ;;  %5521 = vmatpush2.bf16.msra.mxu1 %v15364_v45  ;;  %v12835_v5 = vadd.f32 %v4634_v13, %v4511_v10  ;;  %v4671_v45 = vpop.f32.mrf.mxu0 }
 0x25e   : > { %15358 = vst [vmem:[#allocation228_spill] sm:$0xff] %v12770_v44  ;;  %v12786_v36 = vld [vmem:[%s14410_s2 + $0x898] sm:$0xff]  ;;  %5522 = vmatprep.subr.bf16.mxu1 %v15368_v29  ;;  %v4672_v13 = vadd.f32 %v4671_v45, %v12144_v50  ;;  %v4794_v61 = vpop.f32.mrf.mxu1  ;;  %5345 = vmatmul.mubr.bf16.gmra.mxu1 %v15369_v30  ;;  %v15374_v44 = vcombine.low %v12504_v54, %v12509_v40 }
 0x25f   : > { %15360 = vst [vmem:[#allocation229_spill] sm:$0xff] %v12786_v36  ;;  %v12791_v11 = vld [vmem:[%s14410_s2 + $0x8b8] sm:$0xff]  ;;  %15366 = vst [vmem:[#allocation248_spill] sm:$0xff] %v12835_v5  ;;  %v15376_v40 = vcombine.low %v12514_v60, %v12527_v6 }
 0x260   : > { %15361 = vst [vmem:[#allocation23_spill] sm:$0xff] %v12791_v11  ;;  %v12812_v0 = vld [vmem:[%s14410_s2 + $0xcb8] sm:$0xff]  ;;  %5400 = vmatpush2.bf16.msra.mxu0 %v15374_v44  ;;  %v12897_v62 = vadd.f32 %v4794_v61, %v4672_v13  ;;  %v4796_v54 = vpop.f32.mrf.mxu1  ;;  %v15377_v44 = vcombine.high %v12532_v31, %v12537_v51 }
 0x261   : > { %v12828_v35 = vld [vmem:[%s14410_s2 + $0x858] sm:$0xff]  ;;  %5523 = vmatpush2.bf16.msra.mxu1 %v15376_v40  ;;  %v15380_v40 = vcombine.low %v12532_v31, %v12537_v51 }
 0x262   : > { %v12833_v17 = vld [vmem:[%s14410_s2 + $0x878] sm:$0xff]  ;;  %5401 = vmatprep.subr.bf16.mxu0 %v15377_v44  ;;  %7610 = vrsqrt.f32 %v12897_v62  ;;  %v6157_v11 = vadd.f32 1.0, %v12897_v62 }
 0x263   : > { %15365 = vst [vmem:[#allocation230_spill] sm:$0xff] %v12833_v17  ;;  %v12853_v10 = vld [vmem:[%s14410_s2 + $0xc78] sm:$0xff]  ;;  %v4798_v17 = vpop.f32.mrf.mxu1 }
 0x264   : > { %v12858_v29 = vld [vmem:[%s14410_s2 + $0x818] sm:$0xff]  ;;  %5402 = vmatpush2.bf16.msra.mxu0 %v15380_v40  ;;  %7612 = vrcp.f32 %v6157_v11 }
 0x265   : > { %v15370_v34 = vld [vmem:[#allocation201_spill] sm:$0xff] }
 0x266   : > { %5231 = vmatprep.mubr.bf16.mxu0 %v15370_v34  ;;  %v12870_v52 = vld [vmem:[%s14410_s2 + $0x838] sm:$0xff]  ;;  %v4673_v34 = vpop.f32.mrf.mxu0 }
 0x267   : > { %15371 = vst [vmem:[#allocation249_spill] sm:$0xff] %v12870_v52  ;;  %v12875_v50 = vld [vmem:[%s14410_s2 + $0xc18] sm:$0xff] }
 0x268   : > { %v12880_v45 = vld [vmem:[%s14410_s2 + $0xc38] sm:$0xff]  ;;  %v4675_v60 = vpop.f32.mrf.mxu0 }
 0x269   : > { %15372 = vst [vmem:[#allocation231_spill] sm:$0xff] %v12880_v45  ;;  %v15373_v5 = vld [vmem:[#allocation205_spill] sm:$0xff]  ;;  %v15386_v45 = vld [vmem:[#allocation211_spill] sm:$0xff] }
 0x26a   : > { %5354 = vmatprep.mubr.bf16.mxu1 %v15373_v5  ;;  %v12895_v19 = vld [vmem:[%s14410_s2 + $0xbd8] sm:$0xff]  ;;  %v4674_v5 = vadd.f32 %v4673_v34, %v12181_v18  ;;  %v15379_v34 = vcombine.high %v12548_v1, %v12553_v8  ;;  %v4677_v44 = vpop.f32.mrf.mxu0 }
 0x26b   : > { %15375 = vst [vmem:[#allocation25_spill] sm:$0xff] %v12895_v19  ;;  %v12911_v36 = vld [vmem:[%s14410_s2 + $0xbf8] sm:$0xff]  ;;  %v4678_v40 = vadd.f32 %v4677_v44, %v12205_v20  ;;  %5355 = vmatmul.mubr.bf16.gmra.mxu1 %v15386_v45 }
 0x26c   : > { %15378 = vst [vmem:[#allocation251_spill] sm:$0xff] %v12911_v36  ;;  %v12916_v18 = vld [vmem:[%s14410_s2 + $0xfd8] sm:$0xff]  ;;  %5524 = vmatprep.subr.bf16.mxu1 %v15379_v34  ;;  %v12936_v30 = vadd.f32 %v4796_v54, %v4674_v5  ;;  %v4676_v34 = vadd.f32 %v4675_v60, %v12190_v57  ;;  %v4800_v5 = vpop.f32.mrf.mxu1  ;;  %v15381_v57 = vcombine.low %v12548_v1, %v12553_v8  ;;  %v4681_v8 = vpop.f32.mrf.mxu0  ;;  %v15384_v1 = vld [vmem:[#allocation208_spill] sm:$0xff] }
 0x26d   : > { %v12921_v6 = vld [vmem:[%s14410_s2 + $0xff8] sm:$0xff]  ;;  %v15382_v60 = vcombine.high %v12558_v7, %v12571_v39  ;;  %5232 = vmatmul.mubr.bf16.gmra.mxu0 %v15384_v1  ;;  %v13002_v36 = vadd.f32 %v4800_v5, %v4678_v40  ;;  %v4682_v1 = vadd.f32 %v4681_v8, %v12225_v63  ;;  %v15389_v40 = vld [vmem:[#allocation215_spill] sm:$0xff]  ;;  %v15390_v63 = vcombine.low %v12558_v7, %v12571_v39 }
 0x26e   : > { %v12942_v61 = vld [vmem:[%s14410_s2 + $0xb98] sm:$0xff]  ;;  %v6158_v31 = vadd.f32 1.0, %v12936_v30  ;;  %v12966_v51 = vadd.f32 %v4798_v17, %v4676_v34  ;;  %5525 = vmatpush2.bf16.msra.mxu1 %v15381_v57  ;;  %7614 = vrsqrt.f32 %v12936_v30  ;;  %v15385_v17 = vcombine.high %v12576_v47, %v12581_v55  ;;  %v4804_v19 = vpop.f32.mrf.mxu1  ;;  %v4683_v5 = vpop.f32.mrf.mxu0  ;;  %5364 = vmatprep.mubr.bf16.mxu1 %v15389_v40 }
 0x26f   : > { %v12947_v13 = vld [vmem:[%s14410_s2 + $0xbb8] sm:$0xff]  ;;  %5403 = vmatprep.subr.bf16.mxu0 %v15382_v60  ;;  %v6166_v40 = vadd.f32 1.0, %v13002_v36  ;;  %v13034_v45 = vadd.f32 %v4804_v19, %v4682_v1  ;;  %v4684_v39 = vadd.f32 %v4683_v5, %v12235_v32  ;;  %v15393_v57 = vcombine.high %v12594_v16, %v12599_v58 }
 0x270   : > { %v12963_v52 = vld [vmem:[%s14410_s2 + $0xf98] sm:$0xff]  ;;  %5526 = vmatprep.subr.bf16.mxu1 %v15385_v17  ;;  %7616 = vrcp.f32 %v6158_v31  ;;  %v6165_v60 = vadd.f32 1.0, %v12966_v51  ;;  %v15387_v17 = vld [vmem:[#allocation212_spill] sm:$0xff]  ;;  %5404 = vmatpush2.bf16.msra.mxu0 %v15390_v63  ;;  %v4806_v7 = vpop.f32.mrf.mxu1  ;;  %v15392_v63 = vcombine.low %v12576_v47, %v12581_v55  ;;  %v4685_v47 = vpop.f32.mrf.mxu0  ;;  %v15396_v55 = vcombine.high %v12604_v53, %v12617_v42 }
 0x271   : > { %v12978_v54 = vld [vmem:[%s14410_s2 + $0xfb8] sm:$0xff]  ;;  %5241 = vmatprep.mubr.bf16.mxu0 %v15387_v17  ;;  %7618 = vrsqrt.f32 %v12966_v51  ;;  %5405 = vmatprep.subr.bf16.mxu0 %v15393_v57  ;;  %v6173_v5 = vadd.f32 1.0, %v13034_v45  ;;  %v4686_v34 = vadd.f32 %v4685_v47, %v12250_v22  ;;  %v15402_v47 = vcombine.high %v12622_v38, %v12627_v14 }
 0x272   : > { %15383 = vst [vmem:[#allocation232_spill] sm:$0xff] %v12978_v54  ;;  %v12983_v11 = vld [vmem:[%s14410_s2 + $0xb58] sm:$0xff]  ;;  %7620 = vrcp.f32 %v6165_v60  ;;  %5527 = vmatpush2.bf16.msra.mxu1 %v15392_v63  ;;  %v13069_v63 = vadd.f32 %v4806_v7, %v4684_v39  ;;  %v4808_v54 = vpop.f32.mrf.mxu1  ;;  %v15399_v39 = vcombine.low %v12594_v16, %v12599_v58 }
 0x273   : > { %v12988_v20 = vld [vmem:[%s14410_s2 + $0xb78] sm:$0xff]  ;;  %7622 = vrsqrt.f32 %v13002_v36  ;;  %5528 = vmatprep.subr.bf16.mxu1 %v15396_v55 }
 0x274   : > { %v13010_v44 = vld [vmem:[%s14410_s2 + $0xf58] sm:$0xff]  ;;  %7624 = vrcp.f32 %v6166_v40  ;;  %v4687_v40 = vpop.f32.mrf.mxu0  ;;  %5406 = vmatpush2.bf16.msra.mxu0 %v15399_v39  ;;  %v6174_v1 = vadd.f32 1.0, %v13069_v63  ;;  %v4810_v58 = vpop.f32.mrf.mxu1  ;;  %v15401_v39 = vcombine.low %v12604_v53, %v12617_v42  ;;  %v15406_v53 = vld [vmem:[#allocation216_spill] sm:$0xff] }
 0x275   : > { %v13015_v31 = vld [vmem:[%s14410_s2 + $0xf78] sm:$0xff]  ;;  %7626 = vrsqrt.f32 %v13034_v45  ;;  %v4688_v16 = vadd.f32 %v4687_v40, %v12257_v59  ;;  %5621 = vmatprep.subr.bf16.mxu0 %v15402_v47  ;;  %5242 = vmatmul.mubr.bf16.gmra.mxu0 %v15406_v53  ;;  %v7611_v40 = vpop.eup %7610 }
 0x276   : > { %15388 = vst [vmem:[#allocation41_spill] sm:$0xff] %v13015_v31  ;;  %v13031_v17 = vld [vmem:[%s14410_s2 + $0xb18] sm:$0xff]  ;;  %7628 = vrcp.f32 %v6173_v5  ;;  %v13098_v31 = vadd.f32 %v4808_v54, %v4686_v34  ;;  %5529 = vmatpush2.bf16.msra.mxu1 %v15401_v39  ;;  %v4691_v42 = vpop.f32.mrf.mxu0  ;;  %v15407_v34 = vcombine.high %v12640_v15, %v12645_v12  ;;  %v6013_v47 = vmul.f32 %v7611_v40, %v12897_v62 }
 0x277   : > { %15391 = vst [vmem:[#allocation233_spill] sm:$0xff] %v13031_v17  ;;  %v13046_v8 = vld [vmem:[%s14410_s2 + $0xb38] sm:$0xff]  ;;  %7630 = vrsqrt.f32 %v13069_v63  ;;  %v13134_v7 = vadd.f32 %v4810_v58, %v4688_v16  ;;  %v4692_v53 = vadd.f32 %v4691_v42, %v12265_v49  ;;  %v15410_v49 = vld [vmem:[#allocation7_spill] sm:$0xff] }
 0x278   : > { %15394 = vst [vmem:[#allocation33_spill] sm:$0xff] %v13046_v8  ;;  %v13051_v19 = vld [vmem:[%s14410_s2 + $0xf18] sm:$0xff]  ;;  %5744 = vmatprep.subr.bf16.mxu1 %v15407_v34  ;;  %7632 = vrcp.f32 %v6174_v1  ;;  %v6181_v39 = vadd.f32 1.0, %v13098_v31  ;;  %v4814_v8 = vpop.f32.mrf.mxu1  ;;  %v15409_v34 = vld [vmem:[#allocation6_spill] sm:$0xff]  ;;  %v4693_v16 = vpop.f32.mrf.mxu0 }
 0x279   : > { %v13056_v32 = vld [vmem:[%s14410_s2 + $0xf38] sm:$0xff]  ;;  %5407 = vmatprep.mubr.bf16.mxu0 %v15409_v34  ;;  %7634 = vrsqrt.f32 %v13098_v31 }
 0x27a   : > { %15395 = vst [vmem:[#allocation234_spill] sm:$0xff] %v13056_v32  ;;  %v13075_v55 = vld [vmem:[%s14410_s2 + $0xad8] sm:$0xff]  ;;  %7636 = vrcp.f32 %v6181_v39  ;;  %v7613_v32 = vpop.eup %7612  ;;  %v4695_v58 = vpop.f32.mrf.mxu0 }
 0x27b   : > { %15397 = vst [vmem:[#allocation253_spill] sm:$0xff] %v13075_v55  ;;  %v13080_v57 = vld [vmem:[%s14410_s2 + $0xaf8] sm:$0xff]  ;;  %v4816_v55 = vpop.f32.mrf.mxu1  ;;  %7638 = vrsqrt.f32 %v13134_v7  ;;  %v6445_v62 = vmul.f32 %v7613_v32, %v6013_v47  ;;  %v15411_v32 = vld [vmem:[#allocation10_spill] sm:$0xff] }
 0x27c   : > { %15398 = vst [vmem:[#allocation42_spill] sm:$0xff] %v13080_v57  ;;  %v13095_v60 = vld [vmem:[%s14410_s2 + $0xed8] sm:$0xff]  ;;  %v13159_v57 = vadd.f32 %v4814_v8, %v4692_v53  ;;  %v4696_v8 = vadd.f32 %v4695_v58, %v12288_v46 }
 0x27d   : > { %15400 = vst [vmem:[#allocation235_spill] sm:$0xff] %v13095_v60  ;;  %v13110_v22 = vld [vmem:[%s14410_s2 + $0xef8] sm:$0xff]  ;;  %v4818_v53 = vpop.f32.mrf.mxu1 }
 0x27e   : > { %15403 = vst [vmem:[#allocation35_spill] sm:$0xff] %v13110_v22  ;;  %v13115_v54 = vld [vmem:[%s14410_s2 + $0xa98] sm:$0xff]  ;;  %v7615_v22 = vpop.eup %7614  ;;  %v6189_v40 = vadd.f32 1.0, %v13159_v57  ;;  %v13176_v47 = vadd.f32 %v4818_v53, %v4696_v8  ;;  %v15414_v8 = vld [vmem:[#allocation4_spill] sm:$0xff] }
 0x27f   : > { %15404 = vst [vmem:[#allocation254_spill] sm:$0xff] %v13115_v54  ;;  %v13120_v59 = vld [vmem:[%s14410_s2 + $0xab8] sm:$0xff]  ;;  %v7617_v39 = vpop.eup %7616  ;;  %v6014_v60 = vmul.f32 %v7615_v22, %v12936_v30  ;;  %v4820_v58 = vpop.f32.mrf.mxu1  ;;  %v15412_v54 = vld [vmem:[#allocation18_spill] sm:$0xff] }
 0x280   : > { %15405 = vst [vmem:[#allocation236_spill] sm:$0xff] %v13120_v59  ;;  %v15408_v17 = vld [vmem:[#allocation217_spill] sm:$0xff]  ;;  %v7619_v42 = vpop.eup %7618  ;;  %5408 = vmatmul.mubr.bf16.vlgmr.msra.gmra.mxu0 %v15412_v54 }
 0x281   : > { %5365 = vmatmul.mubr.bf16.gmra.mxu1 %v15408_v17  ;;  %v13142_v5 = vld [vmem:[%s14410_s2 + $0xe98] sm:$0xff]  ;;  %v6182_v17 = vadd.f32 1.0, %v13134_v7  ;;  %v7621_v59 = vpop.eup %7620  ;;  %v6446_v30 = vmul.f32 %v7617_v39, %v6014_v60  ;;  %v6021_v22 = vmul.f32 %v7619_v42, %v12966_v51  ;;  %v4824_v60 = vpop.f32.mrf.mxu1  ;;  %v15413_v51 = vcombine.low %v12622_v38, %v12627_v14  ;;  %5417 = vmatprep.mubr.bf16.mxu0 %v15143_v25 }
 0x282   : > { %v13147_v1 = vld [vmem:[%s14410_s2 + $0xeb8] sm:$0xff]  ;;  %5530 = vmatprep.mubr.bf16.mxu1 %v15410_v49  ;;  %v4694_v49 = vadd.f32 %v4693_v16, %v12276_v43  ;;  %v4697_v16 = vpop.f32.mrf.mxu0  ;;  %v7623_v34 = vpop.eup %7622 }
 0x283   : > { %7640 = vrcp.f32 %v6182_v17  ;;  %v6589_v17 = vmul.f32 %v6445_v62, %v15411_v32  ;;  %v4698_v46 = vadd.f32 %v4697_v16, %v12299_v23  ;;  %v6197_v62 = vadd.f32 1.0, %v13176_v47  ;;  %5622 = vmatpush1.bf16.msra.mxu0 %v15413_v51  ;;  %v7625_v42 = vpop.eup %7624  ;;  %v15422_v51 = vld [vmem:[#allocation5_spill] sm:$0xff] }
 0x284   : > { %7642 = vrsqrt.f32 %v13159_v57  ;;  %v13171_v43 = vadd.f32 %v4816_v55, %v4694_v49  ;;  %v4701_v49 = vpop.f32.mrf.mxu0  ;;  %v6590_v54 = vmul.f32 %v6446_v30, %v15414_v8  ;;  %v6453_v53 = vmul.f32 %v7621_v59, %v6021_v22 }
 0x285   : > { %7644 = vrcp.f32 %v6189_v40  ;;  %6733 = vst [vmem:[%s11732_s28 + $0x10] sm:$0xff] %v6589_v17  ;;  %v13186_v40 = vadd.f32 %v4820_v58, %v4698_v46  ;;  %v4702_v23 = vadd.f32 %v4701_v49, %v12309_v4  ;;  %v6022_v39 = vmul.f32 %v7623_v34, %v13002_v36  ;;  %v7627_v4 = vpop.eup %7626  ;;  %v4826_v17 = vpop.f32.mrf.mxu1  ;;  %v15417_v36 = vld [vmem:[#allocation24_spill] sm:$0xff]  ;;  %v15420_v49 = vld [vmem:[#allocation218_spill] sm:$0xff] }
 0x286   : > { %7646 = vrsqrt.f32 %v13171_v43  ;;  %v6190_v55 = vadd.f32 1.0, %v13171_v43  ;;  %v4703_v16 = vpop.f32.mrf.mxu0  ;;  %v15415_v32 = vcombine.low %v12640_v15, %v12645_v12  ;;  %v7629_v34 = vpop.eup %7628  ;;  %6734 = vst [vmem:[%s11732_s28 + $0x18] sm:$0xff] %v6590_v54  ;;  %v15418_v15 = vld [vmem:[#allocation11_spill] sm:$0xff]  ;;  %v6029_v58 = vmul.f32 %v7627_v4, %v13034_v45 }
 0x287   : > { %7648 = vrsqrt.f32 %v13176_v47  ;;  %v6198_v38 = vadd.f32 1.0, %v13186_v40  ;;  %v13202_v14 = vadd.f32 %v4824_v60, %v4702_v23  ;;  %v4704_v59 = vadd.f32 %v4703_v16, %v12319_v41  ;;  %v7631_v41 = vpop.eup %7630  ;;  %v4828_v23 = vpop.f32.mrf.mxu1 }
 0x288   : > { %7650 = vrcp.f32 %v6190_v55  ;;  %v6597_v12 = vmul.f32 %v6453_v53, %v15418_v15  ;;  %v6454_v46 = vmul.f32 %v7625_v42, %v6022_v39  ;;  %v4705_v30 = vpop.f32.mrf.mxu0  ;;  %v15419_v22 = vcombine.high %v12667_v9, %v12672_v3  ;;  %v7633_v45 = vpop.eup %7632 }
 0x289   : > { %5531 = vmatmul.mubr.bf16.vlgmr.msra.gmra.mxu1 %v15137_v21  ;;  %v15416_v21 = vcombine.high %v12650_v26, %v12662_v27  ;;  %7652 = vrcp.f32 %v6197_v62  ;;  %v6205_v25 = vadd.f32 1.0, %v13202_v14  ;;  %v13215_v55 = vadd.f32 %v4826_v17, %v4704_v59 }
 0x28a   : > { %5745 = vmatpush1.bf16.msra.mxu1 %v15415_v32  ;;  %5540 = vmatprep.mubr.bf16.mxu1 %v15417_v36  ;;  %7654 = vrsqrt.f32 %v13186_v40  ;;  %v4706_v62 = vadd.f32 %v4705_v30, %v15420_v49  ;;  %v15421_v60 = vcombine.low %v12650_v26, %v12662_v27  ;;  %6741 = vst [vmem:[%s11732_s28 + $0x50] sm:$0xff] %v6597_v12  ;;  %v4707_v53 = vpop.f32.mrf.mxu0  ;;  %v7635_v27 = vpop.eup %7634  ;;  %v15429_v12 = vld [vmem:[#allocation28_spill] sm:$0xff]  ;;  %v15431_v49 = vld [vmem:[#allocation34_spill] sm:$0xff] }
 0x28b   : > { %5623 = vmatprep.subr.bf16.mxu0 %v15416_v21  ;;  %5746 = vmatprep.subr.bf16.mxu1 %v15419_v22  ;;  %7656 = vrcp.f32 %v6198_v38  ;;  %v6598_v42 = vmul.f32 %v6454_v46, %v15422_v51  ;;  %v6461_v8 = vmul.f32 %v7629_v34, %v6029_v58  ;;  %v6030_v54 = vmul.f32 %v7631_v41, %v13069_v63  ;;  %v15425_v21 = vld [vmem:[#allocation219_spill] sm:$0xff]  ;;  %v4830_v63 = vpop.f32.mrf.mxu1  ;;  %v15426_v38 = vld [vmem:[#allocation245_spill] sm:$0xff]  ;;  %v7637_v17 = vpop.eup %7636  ;;  %v15430_v22 = vld [vmem:[#allocation8_spill] sm:$0xff] }
 0x28c   : > { %5624 = vmatpush1.bf16.msra.mxu0 %v15421_v60  ;;  %7658 = vrsqrt.f32 %v13202_v14  ;;  %v15423_v39 = vcombine.low %v12667_v9, %v12672_v3  ;;  %v15424_v16 = vcombine.high %v12684_v28, %v12689_v56  ;;  %v6206_v26 = vadd.f32 1.0, %v13215_v55  ;;  %v15428_v9 = vld [vmem:[#allocation20_spill] sm:$0xff]  ;;  %v4711_v15 = vpop.f32.mrf.mxu0  ;;  %v7639_v46 = vpop.eup %7638 }
 0x28d   : > { %7660 = vrcp.f32 %v6205_v25  ;;  %v13232_v32 = vadd.f32 %v4828_v23, %v4706_v62  ;;  %v4708_v4 = vadd.f32 %v4707_v53, %v15425_v21  ;;  %v15427_v59 = vcombine.high %v12694_v33, %v15426_v38  ;;  %6742 = vst [vmem:[%s11732_s28 + $0x58] sm:$0xff] %v6598_v42  ;;  %5418 = vmatmul.mubr.bf16.gmra.mxu0 %v15429_v12  ;;  %v4834_v25 = vpop.f32.mrf.mxu1  ;;  %v15433_v23 = vld [vmem:[#allocation14_spill] sm:$0xff]  ;;  %v15439_v21 = vld [vmem:[#allocation39_spill] sm:$0xff]  ;;  %v15443_v12 = vld [vmem:[#allocation221_spill] sm:$0xff] }
 0x28e   : > { %5747 = vmatpush1.bf16.msra.mxu1 %v15423_v39  ;;  %5625 = vmatprep.subr.bf16.mxu0 %v15424_v16  ;;  %v6605_v3 = vmul.f32 %v6461_v8, %v15428_v9  ;;  %v6462_v36 = vmul.f32 %v7633_v45, %v6030_v54  ;;  %v6037_v34 = vmul.f32 %v7635_v27, %v13098_v31  ;;  %7662 = vrsqrt.f32 %v13215_v55  ;;  %v4713_v42 = vpop.f32.mrf.mxu0  ;;  %v15435_v54 = vld [vmem:[#allocation226_spill] sm:$0xff]  ;;  %v15437_v16 = vld [vmem:[#allocation220_spill] sm:$0xff]  ;;  %v15441_v9 = vld [vmem:[#allocation17_spill] sm:$0xff] }
 0x28f   : > { %5748 = vmatprep.subr.bf16.mxu1 %v15427_v59  ;;  %7664 = vrcp.f32 %v6206_v26  ;;  %v6213_v58 = vadd.f32 1.0, %v13232_v32  ;;  %v13244_v30 = vadd.f32 %v4830_v63, %v4708_v4  ;;  %v4712_v41 = vadd.f32 %v4711_v15, %v15430_v22  ;;  %v15438_v26 = vld [vmem:[#allocation38_spill] sm:$0xff] }
 0x290   : > { %v15432_v62 = vcombine.low %v12684_v28, %v12689_v56  ;;  %v7641_v31 = vpop.eup %7640  ;;  %6749 = vst [vmem:[%s11732_s28 + $0x90] sm:$0xff] %v6605_v3  ;;  %v6606_v60 = vmul.f32 %v6462_v36, %v15433_v23  ;;  %v6469_v45 = vmul.f32 %v7637_v17, %v6037_v34  ;;  %v6038_v51 = vmul.f32 %v7639_v46, %v13134_v7  ;;  %v4836_v7 = vpop.f32.mrf.mxu1 }
 0x291   : > { %5541 = vmatmul.mubr.bf16.gmra.mxu1 %v15431_v49  ;;  %7666 = vrsqrt.f32 %v13232_v32  ;;  %v15434_v8 = vcombine.low %v12694_v33, %v15426_v38  ;;  %v15436_v53 = vcombine.high %v12712_v24, %v15435_v54  ;;  %v7643_v28 = vpop.eup %7642  ;;  %v6214_v56 = vadd.f32 1.0, %v13244_v30  ;;  %5427 = vmatprep.mubr.bf16.mxu0 %v15438_v26  ;;  %v15440_v33 = vld [vmem:[#allocation21_spill] sm:$0xff]  ;;  %v4715_v17 = vpop.f32.mrf.mxu0  ;;  %v15454_v26 = vld [vmem:[#allocation19_spill] sm:$0xff] }
 0x292   : > { %5626 = vmatpush1.bf16.msra.mxu0 %v15432_v62  ;;  %7668 = vrcp.f32 %v6213_v58  ;;  %v13262_v39 = vadd.f32 %v4834_v25, %v4712_v41  ;;  %v4714_v27 = vadd.f32 %v4713_v42, %v15437_v16  ;;  %5550 = vmatprep.mubr.bf16.mxu1 %v15439_v21  ;;  %v7645_v4 = vpop.eup %7644  ;;  %6750 = vst [vmem:[%s11732_s28 + $0x98] sm:$0xff] %v6606_v60  ;;  %v4838_v58 = vpop.f32.mrf.mxu1  ;;  %v15445_v41 = vld [vmem:[#allocation15_spill] sm:$0xff] }
 0x293   : > { %5749 = vmatpush1.bf16.msra.mxu1 %v15434_v8  ;;  %5627 = vmatprep.subr.bf16.mxu0 %v15436_v53  ;;  %v6613_v63 = vmul.f32 %v6469_v45, %v15440_v33  ;;  %v6470_v38 = vmul.f32 %v7641_v31, %v6038_v51  ;;  %v6045_v59 = vmul.f32 %v7643_v28, %v13159_v57  ;;  %7670 = vrsqrt.f32 %v13244_v30  ;;  %v7647_v36 = vpop.eup %7646  ;;  %v4717_v31 = vpop.f32.mrf.mxu0  ;;  %v15447_v60 = vld [vmem:[#allocation227_spill] sm:$0xff]  ;;  %v15450_v53 = vld [vmem:[#allocation29_spill] sm:$0xff]  ;;  %v15451_v28 = vld [vmem:[#allocation228_spill] sm:$0xff] }
 0x294   : > { %v15442_v3 = vcombine.high %v12734_v37, %v15441_v9  ;;  %7672 = vrcp.f32 %v6214_v56  ;;  %v6221_v34 = vadd.f32 1.0, %v13262_v39  ;;  %v13275_v15 = vadd.f32 %v4836_v7, %v4714_v27  ;;  %v7649_v57 = vpop.eup %7648  ;;  %v15448_v45 = vld [vmem:[#allocation247_spill] sm:$0xff] }
 0x295   : > { %v4716_v46 = vadd.f32 %v4715_v17, %v15443_v12  ;;  %v15444_v22 = vcombine.low %v12712_v24, %v15435_v54  ;;  %6757 = vst [vmem:[%s11732_s28 + $0xd0] sm:$0xff] %v6613_v63  ;;  %v6614_v25 = vmul.f32 %v6470_v38, %v15445_v41  ;;  %v6477_v49 = vmul.f32 %v7645_v4, %v6045_v59  ;;  %v7651_v24 = vpop.eup %7650  ;;  %v4721_v21 = vpop.f32.mrf.mxu0  ;;  %v15455_v4 = vld [vmem:[#allocation40_spill] sm:$0xff]  ;;  %v15456_v59 = vld [vmem:[#allocation2_spill] sm:$0xff] }
 0x296   : > { %5750 = vmatprep.subr.bf16.mxu1 %v15442_v3  ;;  %v6046_v62 = vmul.f32 %v7647_v36, %v13171_v43  ;;  %7674 = vrsqrt.f32 %v13262_v39  ;;  %v15446_v23 = vcombine.low %v12734_v37, %v15441_v9  ;;  %v15449_v51 = vcombine.high %v15447_v60, %v15448_v45  ;;  %v4840_v43 = vpop.f32.mrf.mxu1  ;;  %v7653_v16 = vpop.eup %7652  ;;  %v15453_v37 = vld [vmem:[#allocation31_spill] sm:$0xff]  ;;  %5428 = vmatmul.mubr.bf16.gmra.mxu0 %v15455_v4  ;;  %v15459_v12 = vld [vmem:[#allocation26_spill] sm:$0xff] }
 0x297   : > { %5628 = vmatpush1.bf16.msra.mxu0 %v15444_v22  ;;  %v6053_v42 = vmul.f32 %v7649_v57, %v13176_v47  ;;  %7676 = vrcp.f32 %v6221_v34  ;;  %v6222_v8 = vadd.f32 1.0, %v13275_v15  ;;  %v13293_v54 = vadd.f32 %v4838_v58, %v4716_v46  ;;  %6758 = vst [vmem:[%s11732_s28 + $0xd8] sm:$0xff] %v6614_v25  ;;  %v7655_v33 = vpop.eup %7654  ;;  %v15457_v3 = vld [vmem:[#allocation43_spill] sm:$0xff]  ;;  %v4723_v57 = vpop.f32.mrf.mxu0  ;;  %v15461_v25 = vld [vmem:[#allocation46_spill] sm:$0xff] }
 0x298   : > { %5751 = vmatpush1.bf16.msra.mxu1 %v15446_v23  ;;  %5629 = vmatprep.subr.bf16.mxu0 %v15449_v51  ;;  %v15452_v56 = vcombine.high %v15450_v53, %v15451_v28  ;;  %v6621_v27 = vmul.f32 %v6477_v49, %v15453_v37  ;;  %v6478_v7 = vmul.f32 %v7651_v24, %v6046_v62  ;;  %7678 = vrsqrt.f32 %v13275_v15  ;;  %v4844_v9 = vpop.f32.mrf.mxu1  ;;  %v7657_v34 = vpop.eup %7656  ;;  %v15462_v62 = vld [vmem:[#allocation32_spill] sm:$0xff]  ;;  %v15464_v51 = vld [vmem:[#allocation47_spill] sm:$0xff]  ;;  %v15465_v24 = vld [vmem:[#allocation229_spill] sm:$0xff] }
 0x299   : > { %v4718_v47 = vadd.f32 %v4717_v31, %v15454_v26  ;;  %v6485_v63 = vmul.f32 %v7653_v16, %v6053_v42  ;;  %7680 = vrcp.f32 %v6222_v8  ;;  %v6229_v38 = vadd.f32 1.0, %v13293_v54  ;;  %5551 = vmatmul.mubr.bf16.gmra.mxu1 %v15457_v3  ;;  %5437 = vmatprep.mubr.bf16.mxu0 %v15461_v25  ;;  %v7659_v49 = vpop.eup %7658  ;;  %v15466_v42 = vld [vmem:[#allocation23_spill] sm:$0xff]  ;;  %v4725_v16 = vpop.f32.mrf.mxu0 }
 0x29a   : > { %5752 = vmatprep.subr.bf16.mxu1 %v15452_v56  ;;  %v4722_v17 = vadd.f32 %v4721_v21, %v15456_v59  ;;  %v15458_v36 = vcombine.low %v15447_v60, %v15448_v45  ;;  %6765 = vst [vmem:[%s11732_s28 + $0x110] sm:$0xff] %v6621_v27  ;;  %v6622_v46 = vmul.f32 %v6478_v7, %v15459_v12  ;;  %7682 = vrsqrt.f32 %v13293_v54  ;;  %v15463_v60 = vld [vmem:[#allocation222_spill] sm:$0xff]  ;;  %v4846_v45 = vpop.f32.mrf.mxu1 }
 0x29b   : > { %v6054_v58 = vmul.f32 %v7655_v33, %v13186_v40  ;;  %v13313_v22 = vadd.f32 %v4840_v43, %v4718_v47  ;;  %v15460_v41 = vcombine.low %v15450_v53, %v15451_v28  ;;  %v6629_v31 = vmul.f32 %v6485_v63, %v15462_v62  ;;  %5560 = vmatprep.mubr.bf16.mxu1 %v15464_v51  ;;  %v7661_v43 = vpop.eup %7660  ;;  %v15469_v47 = vld [vmem:[#allocation22_spill] sm:$0xff]  ;;  %v15471_v63 = vld [vmem:[#allocation27_spill] sm:$0xff] }
 0x29c   : > { %5630 = vmatpush1.bf16.msra.mxu0 %v15458_v36  ;;  %7684 = vrcp.f32 %v6229_v38  ;;  %v13320_v23 = vadd.f32 %v4844_v9, %v4722_v17  ;;  %v4724_v40 = vadd.f32 %v4723_v57, %v15463_v60  ;;  %v15467_v8 = vcombine.high %v15465_v24, %v15466_v42  ;;  %6766 = vst [vmem:[%s11732_s28 + $0x118] sm:$0xff] %v6622_v46  ;;  %v7663_v27 = vpop.eup %7662  ;;  %v4727_v9 = vpop.f32.mrf.mxu0  ;;  %v15473_v36 = vld [vmem:[#allocation230_spill] sm:$0xff]  ;;  %v15475_v57 = vld [vmem:[#allocation9_spill] sm:$0xff] }
 0x29d   : > { %5753 = vmatpush1.bf16.msra.mxu1 %v15460_v41  ;;  %v6486_v53 = vmul.f32 %v7657_v34, %v6054_v58  ;;  %v6061_v28 = vmul.f32 %v7659_v49, %v13202_v14  ;;  %7686 = vrsqrt.f32 %v13313_v22  ;;  %v6230_v56 = vadd.f32 1.0, %v13313_v22  ;;  %6773 = vst [vmem:[%s11732_s28 + $0x150] sm:$0xff] %v6629_v31  ;;  %v4848_v14 = vpop.f32.mrf.mxu1  ;;  %v7665_v33 = vpop.eup %7664 }
 0x29e   : > { %5631 = vmatprep.subr.bf16.mxu0 %v15467_v8  ;;  %v15468_v37 = vcombine.high %v12807_v2, %v12812_v0  ;;  %7688 = vrsqrt.f32 %v13320_v23  ;;  %v6237_v7 = vadd.f32 1.0, %v13320_v23  ;;  %v13337_v26 = vadd.f32 %v4846_v45, %v4724_v40  ;;  %v7667_v12 = vpop.eup %7666  ;;  %v4731_v60 = vpop.f32.mrf.mxu0  ;;  %v15478_v40 = vld [vmem:[#allocation56_spill] sm:$0xff] }
 0x29f   : > { %v4726_v21 = vadd.f32 %v4725_v16, %v15469_v47  ;;  %v15470_v4 = vcombine.low %v15465_v24, %v15466_v42  ;;  %v6630_v38 = vmul.f32 %v6486_v53, %v15471_v63  ;;  %v6493_v59 = vmul.f32 %v7661_v43, %v6061_v28  ;;  %v4850_v25 = vpop.f32.mrf.mxu1  ;;  %v7669_v49 = vpop.eup %7668  ;;  %5438 = vmatmul.mubr.bf16.gmra.mxu0 %v15478_v40  ;;  %v15479_v42 = vld [vmem:[#allocation241_spill] sm:$0xff] }
 0x2a0   : > { %5754 = vmatprep.subr.bf16.mxu1 %v15468_v37  ;;  %v6062_v17 = vmul.f32 %v7663_v27, %v13215_v55  ;;  %7690 = vrcp.f32 %v6230_v56  ;;  %v15472_v3 = vcombine.low %v12807_v2, %v12812_v0  ;;  %v15474_v34 = vcombine.high %v12828_v35, %v15473_v36  ;;  %v15477_v2 = vld [vmem:[#allocation44_spill] sm:$0xff]  ;;  %v7671_v45 = vpop.eup %7670  ;;  %v15480_v53 = vld [vmem:[#allocation57_spill] sm:$0xff] }
 0x2a1   : > { %5632 = vmatpush1.bf16.msra.mxu0 %v15470_v4  ;;  %7692 = vrcp.f32 %v6237_v7  ;;  %v6238_v46 = vadd.f32 1.0, %v13337_v26  ;;  %v13352_v58 = vadd.f32 %v4848_v14, %v4726_v21  ;;  %v4728_v41 = vadd.f32 %v4727_v9, %v15475_v57  ;;  %6774 = vst [vmem:[%s11732_s28 + $0x158] sm:$0xff] %v6630_v38  ;;  %v4854_v43 = vpop.f32.mrf.mxu1  ;;  %5561 = vmatmul.mubr.bf16.gmra.mxu1 %v15480_v53  ;;  %v15482_v56 = vld [vmem:[#allocation36_spill] sm:$0xff]  ;;  %v4733_v7 = vpop.f32.mrf.mxu0  ;;  %v15484_v21 = vld [vmem:[#allocation62_spill] sm:$0xff] }
 0x2a2   : > { %5755 = vmatpush1.bf16.msra.mxu1 %v15472_v3  ;;  %5633 = vmatprep.subr.bf16.mxu0 %v15474_v34  ;;  %v15476_v55 = vcombine.high %v12848_v48, %v12853_v10  ;;  %v6637_v0 = vmul.f32 %v6493_v59, %v15477_v2  ;;  %v6494_v62 = vmul.f32 %v7665_v33, %v6062_v17  ;;  %7694 = vrsqrt.f32 %v13337_v26  ;;  %v15485_v33 = vld [vmem:[#allocation242_spill] sm:$0xff]  ;;  %v15486_v59 = vld [vmem:[#allocation63_spill] sm:$0xff] }
 0x2a3   : > { %v6069_v31 = vmul.f32 %v7667_v12, %v13232_v32  ;;  %7696 = vrcp.f32 %v6238_v46  ;;  %v6245_v51 = vadd.f32 1.0, %v13352_v58  ;;  %v13364_v24 = vadd.f32 %v4850_v25, %v4728_v41  ;;  %v7673_v32 = vpop.eup %7672  ;;  %5447 = vmatprep.mubr.bf16.mxu0 %v15484_v21  ;;  %v4856_v38 = vpop.f32.mrf.mxu1  ;;  %5570 = vmatprep.mubr.bf16.mxu1 %v15486_v59  ;;  %v15490_v12 = vld [vmem:[#allocation231_spill] sm:$0xff] }
 0x2a4   : > { %5756 = vmatprep.subr.bf16.mxu1 %v15476_v55  ;;  %v4732_v8 = vadd.f32 %v4731_v60, %v15479_v42  ;;  %v15481_v28 = vcombine.low %v12828_v35, %v15473_v36  ;;  %6781 = vst [vmem:[%s11732_s28 + $0x190] sm:$0xff] %v6637_v0  ;;  %v6638_v16 = vmul.f32 %v6494_v62, %v15482_v56  ;;  %7698 = vrsqrt.f32 %v13352_v58  ;;  %v7675_v14 = vpop.eup %7674  ;;  %v4735_v34 = vpop.f32.mrf.mxu0  ;;  %v15492_v55 = vld [vmem:[#allocation223_spill] sm:$0xff]  ;;  %v15494_v62 = vld [vmem:[#allocation37_spill] sm:$0xff] }
 0x2a5   : > { %v6501_v37 = vmul.f32 %v7669_v49, %v6069_v31  ;;  %v6070_v27 = vmul.f32 %v7671_v45, %v13244_v30  ;;  %v15483_v47 = vcombine.low %v12848_v48, %v12853_v10  ;;  %7700 = vrcp.f32 %v6245_v51  ;;  %v15487_v30 = vld [vmem:[#allocation249_spill] sm:$0xff]  ;;  %v7677_v9 = vpop.eup %7676  ;;  %v4858_v2 = vpop.f32.mrf.mxu1 }
 0x2a6   : > { %5634 = vmatpush1.bf16.msra.mxu0 %v15481_v28  ;;  %v6246_v35 = vadd.f32 1.0, %v13364_v24  ;;  %v13380_v4 = vadd.f32 %v4854_v43, %v4732_v8  ;;  %v4734_v63 = vadd.f32 %v4733_v7, %v15485_v33  ;;  %v15488_v17 = vcombine.high %v12858_v29, %v15487_v30  ;;  %6782 = vst [vmem:[%s11732_s28 + $0x198] sm:$0xff] %v6638_v16  ;;  %v15489_v48 = vld [vmem:[#allocation45_spill] sm:$0xff]  ;;  %v7679_v57 = vpop.eup %7678  ;;  %v4737_v45 = vpop.f32.mrf.mxu0  ;;  %v15497_v8 = vld [vmem:[#allocation251_spill] sm:$0xff] }
 0x2a7   : > { %5757 = vmatpush1.bf16.msra.mxu1 %v15483_v47  ;;  %v6645_v10 = vmul.f32 %v6501_v37, %v15489_v48  ;;  %v6502_v3 = vmul.f32 %v7673_v32, %v6070_v27  ;;  %v6077_v36 = vmul.f32 %v7675_v14, %v13262_v39  ;;  %7702 = vrsqrt.f32 %v13364_v24  ;;  %v7681_v39 = vpop.eup %7680  ;;  %v15496_v42 = vld [vmem:[#allocation25_spill] sm:$0xff]  ;;  %v15499_v32 = vld [vmem:[#allocation3_spill] sm:$0xff]  ;;  %v15502_v14 = vld [vmem:[#allocation66_spill] sm:$0xff] }
 0x2a8   : > { %5635 = vmatprep.subr.bf16.mxu0 %v15488_v17  ;;  %v15491_v46 = vcombine.high %v12875_v50, %v15490_v12  ;;  %7704 = vrcp.f32 %v6246_v35  ;;  %v6253_v41 = vadd.f32 1.0, %v13380_v4  ;;  %v13395_v25 = vadd.f32 %v4856_v38, %v4734_v63  ;;  %v4741_v21 = vpop.f32.mrf.mxu0  ;;  %5448 = vmatmul.mubr.bf16.gmra.mxu0 %v15502_v14  ;;  %v15503_v38 = vld [vmem:[#allocation224_spill] sm:$0xff]  ;;  %v15504_v17 = vld [vmem:[#allocation69_spill] sm:$0xff]  ;;  %v15506_v48 = vld [vmem:[#allocation50_spill] sm:$0xff] }
 0x2a9   : > { %v4736_v49 = vadd.f32 %v4735_v34, %v15492_v55  ;;  %v15493_v0 = vcombine.low %v12858_v29, %v15487_v30  ;;  %6789 = vst [vmem:[%s11732_s28 + $0x1d0] sm:$0xff] %v6645_v10  ;;  %v6646_v31 = vmul.f32 %v6502_v3, %v15494_v62  ;;  %v6509_v60 = vmul.f32 %v7677_v9, %v6077_v36  ;;  %v7683_v29 = vpop.eup %7682  ;;  %v15511_v62 = vld [vmem:[#allocation55_spill] sm:$0xff]  ;;  %v15520_v14 = vld [vmem:[#allocation225_spill] sm:$0xff] }
 0x2aa   : > { %5758 = vmatprep.subr.bf16.mxu1 %v15491_v46  ;;  %v6078_v40 = vmul.f32 %v7679_v57, %v13275_v15  ;;  %7706 = vrsqrt.f32 %v13380_v4  ;;  %v15495_v51 = vcombine.low %v12875_v50, %v15490_v12  ;;  %v15498_v43 = vcombine.high %v15496_v42, %v15497_v8  ;;  %v4860_v15 = vpop.f32.mrf.mxu1  ;;  %v7685_v37 = vpop.eup %7684  ;;  %v15501_v50 = vld [vmem:[#allocation54_spill] sm:$0xff]  ;;  %5571 = vmatmul.mubr.bf16.gmra.mxu1 %v15504_v17  ;;  %v15508_v46 = vld [vmem:[#allocation71_spill] sm:$0xff] }
 0x2ab   : > { %5636 = vmatpush1.bf16.msra.mxu0 %v15493_v0  ;;  %7708 = vrcp.f32 %v6253_v41  ;;  %v6254_v53 = vadd.f32 1.0, %v13395_v25  ;;  %v13412_v28 = vadd.f32 %v4858_v2, %v4736_v49  ;;  %v4738_v56 = vadd.f32 %v4737_v45, %v15499_v32  ;;  %6790 = vst [vmem:[%s11732_s28 + $0x1d8] sm:$0xff] %v6646_v31  ;;  %v7687_v35 = vpop.eup %7686  ;;  %v4743_v34 = vpop.f32.mrf.mxu0  ;;  %v15507_v12 = vld [vmem:[#allocation70_spill] sm:$0xff]  ;;  %5580 = vmatprep.mubr.bf16.mxu1 %v15508_v46  ;;  %v15526_v46 = vld [vmem:[#allocation79_spill] sm:$0xff] }
 0x2ac   : > { %5759 = vmatpush1.bf16.msra.mxu1 %v15495_v51  ;;  %5637 = vmatprep.subr.bf16.mxu0 %v15498_v43  ;;  %v15500_v16 = vcombine.high %v12916_v18, %v12921_v6  ;;  %v6653_v27 = vmul.f32 %v6509_v60, %v15501_v50  ;;  %v6510_v7 = vmul.f32 %v7681_v39, %v6078_v40  ;;  %7710 = vrsqrt.f32 %v13395_v25  ;;  %v4864_v30 = vpop.f32.mrf.mxu1  ;;  %v15512_v60 = vld [vmem:[#allocation244_spill] sm:$0xff] }
 0x2ad   : > { %v6085_v47 = vmul.f32 %v7683_v29, %v13293_v54  ;;  %7712 = vrcp.f32 %v6254_v53  ;;  %v6261_v33 = vadd.f32 1.0, %v13412_v28  ;;  %v13424_v63 = vadd.f32 %v4860_v15, %v4738_v56  ;;  %v7689_v54 = vpop.eup %7688  ;;  %5457 = vmatprep.mubr.bf16.mxu0 %v15507_v12  ;;  %v4745_v45 = vpop.f32.mrf.mxu0  ;;  %v15513_v51 = vld [vmem:[#allocation232_spill] sm:$0xff]  ;;  %v15517_v15 = vld [vmem:[#allocation51_spill] sm:$0xff] }
 0x2ae   : > { %5760 = vmatprep.subr.bf16.mxu1 %v15500_v16  ;;  %v4742_v59 = vadd.f32 %v4741_v21, %v15503_v38  ;;  %v15505_v9 = vcombine.low %v15496_v42, %v15497_v8  ;;  %6797 = vst [vmem:[%s11732_s28 + $0x210] sm:$0xff] %v6653_v27  ;;  %v6654_v10 = vmul.f32 %v6510_v7, %v15506_v48  ;;  %7714 = vrsqrt.f32 %v13412_v28  ;;  %v7691_v57 = vpop.eup %7690  ;;  %v4866_v2 = vpop.f32.mrf.mxu1  ;;  %v15515_v43 = vld [vmem:[#allocation16_spill] sm:$0xff]  ;;  %v15519_v21 = vld [vmem:[#allocation67_spill] sm:$0xff]  ;;  %v15523_v48 = vld [vmem:[#allocation41_spill] sm:$0xff] }
 0x2af   : > { %v6517_v3 = vmul.f32 %v7685_v37, %v6085_v47  ;;  %v6086_v36 = vmul.f32 %v7687_v35, %v13313_v22  ;;  %v6093_v41 = vmul.f32 %v7689_v54, %v13320_v23  ;;  %7716 = vrcp.f32 %v6261_v33  ;;  %v7693_v39 = vpop.eup %7692  ;;  %v4747_v27 = vpop.f32.mrf.mxu0  ;;  %v15522_v54 = vld [vmem:[#allocation76_spill] sm:$0xff] }
 0x2b0   : > { %5638 = vmatpush2.bf16.msra.mxu0 %v15505_v9  ;;  %v6262_v55 = vadd.f32 1.0, %v13424_v63  ;;  %v13439_v49 = vadd.f32 %v4864_v30, %v4742_v59  ;;  %v15509_v0 = vcombine.low %v12916_v18, %v12921_v6  ;;  %v15510_v22 = vcombine.high %v12942_v61, %v12947_v13  ;;  %6798 = vst [vmem:[%s11732_s28 + $0x218] sm:$0xff] %v6654_v10  ;;  %v7695_v18 = vpop.eup %7694  ;;  %v4868_v53 = vpop.f32.mrf.mxu1 }
 0x2b1   : > { %v6661_v31 = vmul.f32 %v6517_v3, %v15511_v62  ;;  %v6518_v23 = vmul.f32 %v7691_v57, %v6086_v36  ;;  %7718 = vrsqrt.f32 %v13424_v63  ;;  %v4744_v40 = vadd.f32 %v4743_v34, %v15512_v60  ;;  %v7697_v56 = vpop.eup %7696  ;;  %v4751_v9 = vpop.f32.mrf.mxu0  ;;  %5458 = vmatmul.mubr.bf16.gmra.mxu0 %v15522_v54  ;;  %v15529_v62 = vld [vmem:[#allocation84_spill] sm:$0xff] }
 0x2b2   : > { %5761 = vmatpush2.bf16.msra.mxu1 %v15509_v0  ;;  %5639 = vmatprep.subr.bf16.mxu0 %v15510_v22  ;;  %v15514_v42 = vcombine.high %v12963_v52, %v15513_v51  ;;  %v6525_v6 = vmul.f32 %v7693_v39, %v6093_v41  ;;  %7720 = vrcp.f32 %v6262_v55  ;;  %v6269_v8 = vadd.f32 1.0, %v13439_v49  ;;  %v7699_v47 = vpop.eup %7698  ;;  %v4870_v33 = vpop.f32.mrf.mxu1  ;;  %v15528_v55 = vld [vmem:[#allocation60_spill] sm:$0xff] }
 0x2b3   : > { %v4746_v29 = vadd.f32 %v4745_v45, %v15515_v43  ;;  %v15516_v32 = vcombine.low %v12942_v61, %v12947_v13  ;;  %6805 = vst [vmem:[%s11732_s28 + $0x250] sm:$0xff] %v6661_v31  ;;  %v6662_v16 = vmul.f32 %v6518_v23, %v15517_v15  ;;  %v6094_v37 = vmul.f32 %v7695_v18, %v13337_v26  ;;  %v7701_v38 = vpop.eup %7700  ;;  %v4753_v39 = vpop.f32.mrf.mxu0  ;;  %v15530_v31 = vld [vmem:[#allocation85_spill] sm:$0xff] }
 0x2b4   : > { %5762 = vmatprep.subr.bf16.mxu1 %v15514_v42  ;;  %7722 = vrsqrt.f32 %v13439_v49  ;;  %v13463_v50 = vadd.f32 %v4866_v2, %v4744_v40  ;;  %v15518_v7 = vcombine.high %v12983_v11, %v12988_v20  ;;  %v6669_v61 = vmul.f32 %v6525_v6, %v15519_v21  ;;  %v7703_v3 = vpop.eup %7702  ;;  %v4874_v12 = vpop.f32.mrf.mxu1  ;;  %5581 = vmatmul.mubr.bf16.gmra.mxu1 %v15526_v46  ;;  %v15534_v42 = vld [vmem:[#allocation33_spill] sm:$0xff] }
 0x2b5   : > { %5640 = vmatpush2.bf16.msra.mxu0 %v15516_v32  ;;  %7724 = vrcp.f32 %v6269_v8  ;;  %v13469_v13 = vadd.f32 %v4868_v53, %v4746_v29  ;;  %v4748_v35 = vadd.f32 %v4747_v27, %v15520_v14  ;;  %v15521_v26 = vcombine.low %v12963_v52, %v15513_v51  ;;  %6806 = vst [vmem:[%s11732_s28 + $0x258] sm:$0xff] %v6662_v16  ;;  %v7705_v41 = vpop.eup %7704  ;;  %v15536_v8 = vld [vmem:[#allocation68_spill] sm:$0xff]  ;;  %v4755_v32 = vpop.f32.mrf.mxu0  ;;  %v15539_v27 = vld [vmem:[#allocation30_spill] sm:$0xff] }
 0x2b6   : > { %5641 = vmatprep.subr.bf16.mxu0 %v15518_v7  ;;  %v6526_v59 = vmul.f32 %v7697_v56, %v6094_v37  ;;  %v6101_v30 = vmul.f32 %v7699_v47, %v13352_v58  ;;  %7726 = vrsqrt.f32 %v13463_v50  ;;  %v6270_v17 = vadd.f32 1.0, %v13463_v50  ;;  %6813 = vst [vmem:[%s11732_s28 + $0x290] sm:$0xff] %v6669_v61  ;;  %v15525_v58 = vld [vmem:[#allocation12_spill] sm:$0xff]  ;;  %5467 = vmatprep.mubr.bf16.mxu0 %v15529_v62  ;;  %v4876_v45 = vpop.f32.mrf.mxu1  ;;  %v15537_v56 = vld [vmem:[#allocation234_spill] sm:$0xff]  ;;  %v15541_v61 = vld [vmem:[#allocation61_spill] sm:$0xff] }
 0x2b7   : > { %5763 = vmatpush2.bf16.msra.mxu1 %v15521_v26  ;;  %v15524_v10 = vcombine.high %v13010_v44, %v15523_v48  ;;  %7728 = vrsqrt.f32 %v13469_v13  ;;  %v6277_v52 = vadd.f32 1.0, %v13469_v13  ;;  %v13486_v36 = vadd.f32 %v4870_v33, %v4748_v35  ;;  %5590 = vmatprep.mubr.bf16.mxu1 %v15530_v31  ;;  %v7707_v23 = vpop.eup %7706  ;;  %v4757_v26 = vpop.f32.mrf.mxu0  ;;  %v13561_v62 = vld [vmem:[%s14410_s2 + $0xe78] sm:$0xff] }
 0x2b8   : > { %v4752_v34 = vadd.f32 %v4751_v9, %v15525_v58  ;;  %v15527_v57 = vcombine.low %v12983_v11, %v12988_v20  ;;  %v6670_v2 = vmul.f32 %v6526_v59, %v15528_v55  ;;  %v6533_v0 = vmul.f32 %v7701_v38, %v6101_v30  ;;  %v15531_v11 = vld [vmem:[#allocation13_spill] sm:$0xff]  ;;  %v7709_v6 = vpop.eup %7708  ;;  %v4878_v47 = vpop.f32.mrf.mxu1  ;;  %v15543_v59 = vld [vmem:[#allocation42_spill] sm:$0xff] }
 0x2b9   : > { %5764 = vmatprep.subr.bf16.mxu1 %v15524_v10  ;;  %v6102_v22 = vmul.f32 %v7703_v3, %v13364_v24  ;;  %7730 = vrcp.f32 %v6270_v17  ;;  %v6278_v60 = vadd.f32 1.0, %v13486_v36  ;;  %v4754_v20 = vadd.f32 %v4753_v39, %v15531_v11  ;;  %v15533_v24 = vld [vmem:[#allocation233_spill] sm:$0xff]  ;;  %v15545_v10 = vld [vmem:[#allocation248_spill] sm:$0xff]  ;;  %v4917_v55 = vpop.f32.mrf.mxu0 }
 0x2ba   : > { %5642 = vmatpush2.bf16.msra.mxu0 %v15527_v57  ;;  %7732 = vrcp.f32 %v6277_v52  ;;  %v13498_v40 = vadd.f32 %v4874_v12, %v4752_v34  ;;  %v15532_v51 = vcombine.low %v13010_v44, %v15523_v48  ;;  %v15535_v18 = vcombine.high %v15533_v24, %v15534_v42  ;;  %6814 = vst [vmem:[%s11732_s28 + $0x298] sm:$0xff] %v6670_v2  ;;  %v7711_v44 = vpop.eup %7710  ;;  %v15542_v38 = vld [vmem:[#allocation253_spill] sm:$0xff]  ;;  %v4880_v52 = vpop.f32.mrf.mxu1  ;;  %v15547_v12 = vld [vmem:[#allocation80_spill] sm:$0xff]  ;;  %v15548_v2 = vld [vmem:[#allocation90_spill] sm:$0xff] }
 0x2bb   : > { %v6677_v43 = vmul.f32 %v6533_v0, %v15536_v8  ;;  %v6534_v29 = vmul.f32 %v7705_v41, %v6102_v22  ;;  %v6109_v53 = vmul.f32 %v7707_v23, %v13380_v4  ;;  %7734 = vrsqrt.f32 %v13486_v36  ;;  %v7713_v4 = vpop.eup %7712  ;;  %v13531_v17 = vld [vmem:[%s14410_s2 + $0xa58] sm:$0xff]  ;;  %5468 = vmatmul.mubr.bf16.gmra.mxu0 %v15548_v2  ;;  %v15549_v0 = vld [vmem:[#allocation235_spill] sm:$0xff]  ;;  %v4919_v8 = vpop.f32.mrf.mxu0 }
 0x2bc   : > { %5765 = vmatpush2.bf16.msra.mxu1 %v15532_v51  ;;  %5643 = vmatprep.subr.bf16.mxu0 %v15535_v18  ;;  %v15538_v15 = vcombine.high %v13051_v19, %v15537_v56  ;;  %7736 = vrcp.f32 %v6278_v60  ;;  %v6285_v16 = vadd.f32 1.0, %v13498_v40  ;;  %v13515_v37 = vadd.f32 %v4876_v45, %v4754_v20  ;;  %v13536_v9 = vld [vmem:[%s14410_s2 + $0xa78] sm:$0xff]  ;;  %v7715_v54 = vpop.eup %7714  ;;  %v15550_v22 = vld [vmem:[#allocation35_spill] sm:$0xff]  ;;  %v5040_v60 = vpop.f32.mrf.mxu1  ;;  %v15553_v20 = vld [vmem:[#allocation94_spill] sm:$0xff] }
 0x2bd   : > { %v4756_v7 = vadd.f32 %v4755_v32, %v15539_v27  ;;  %v15540_v21 = vcombine.low %v15533_v24, %v15534_v42  ;;  %6821 = vst [vmem:[%s11732_s28 + $0x2d0] sm:$0xff] %v6677_v43  ;;  %v6678_v14 = vmul.f32 %v6534_v29, %v15541_v61  ;;  %v6541_v35 = vmul.f32 %v7709_v6, %v6109_v53  ;;  %v7717_v34 = vpop.eup %7716  ;;  %v15552_v11 = vld [vmem:[#allocation93_spill] sm:$0xff]  ;;  %v15554_v24 = vld [vmem:[#allocation74_spill] sm:$0xff] }
 0x2be   : > { %5766 = vmatprep.subr.bf16.mxu1 %v15538_v15  ;;  %v6110_v33 = vmul.f32 %v7711_v44, %v13395_v25  ;;  %7738 = vrsqrt.f32 %v13498_v40  ;;  %v15544_v30 = vcombine.high %v15542_v38, %v15543_v59  ;;  %v6286_v25 = vadd.f32 1.0, %v13515_v37  ;;  %5591 = vmatmul.mubr.bf16.gmra.mxu1 %v15552_v11  ;;  %v15555_v43 = vld [vmem:[#allocation97_spill] sm:$0xff]  ;;  %v5042_v15 = vpop.f32.mrf.mxu1 }
 0x2bf   : > { %5644 = vmatpush2.bf16.msra.mxu0 %v15540_v21  ;;  %7740 = vrcp.f32 %v6285_v16  ;;  %v13539_v48 = vadd.f32 %v4878_v47, %v4756_v7  ;;  %v4758_v3 = vadd.f32 %v4757_v26, %v15545_v10  ;;  %v15546_v58 = vcombine.low %v13051_v19, %v15537_v56  ;;  %6822 = vst [vmem:[%s11732_s28 + $0x2d8] sm:$0xff] %v6678_v14  ;;  %v13556_v19 = vld [vmem:[%s14410_s2 + $0xe58] sm:$0xff]  ;;  %v15559_v16 = vld [vmem:[#allocation236_spill] sm:$0xff] }
 0x2c0   : > { %5645 = vmatprep.subr.bf16.mxu0 %v15544_v30  ;;  %v6685_v46 = vmul.f32 %v6541_v35, %v15547_v12  ;;  %v6542_v57 = vmul.f32 %v7713_v4, %v6110_v33  ;;  %v6117_v41 = vmul.f32 %v7715_v54, %v13412_v28  ;;  %7742 = vrsqrt.f32 %v13515_v37  ;;  %v7719_v28 = vpop.eup %7718  ;;  %5477 = vmatprep.mubr.bf16.mxu0 %v15553_v20  ;;  %v13592_v47 = vld [vmem:[%s14410_s2 + $0xa18] sm:$0xff]  ;;  %v4921_v33 = vpop.f32.mrf.mxu0  ;;  %v15568_v20 = vld [vmem:[#allocation103_spill] sm:$0xff] }
 0x2c1   : > { %5767 = vmatpush2.bf16.msra.mxu1 %v15546_v58  ;;  %v15551_v39 = vcombine.high %v15549_v0, %v15550_v22  ;;  %7744 = vrcp.f32 %v6286_v25  ;;  %v6293_v31 = vadd.f32 1.0, %v13539_v48  ;;  %v13564_v23 = vadd.f32 %v4880_v52, %v4758_v3  ;;  %v7721_v51 = vpop.eup %7720  ;;  %5600 = vmatprep.mubr.bf16.mxu1 %v15555_v43  ;;  %v15561_v4 = vld [vmem:[#allocation81_spill] sm:$0xff]  ;;  %v5044_v25 = vpop.f32.mrf.mxu1  ;;  %v15563_v58 = vld [vmem:[#allocation75_spill] sm:$0xff] }
 0x2c2   : > { %v7277_v45 = vcombine.high %v13531_v17, %v13536_v9  ;;  %6829 = vst [vmem:[%s11732_s28 + $0x310] sm:$0xff] %v6685_v46  ;;  %v6686_v42 = vmul.f32 %v6542_v57, %v15554_v24  ;;  %v6549_v18 = vmul.f32 %v7717_v34, %v6117_v41  ;;  %v6118_v6 = vmul.f32 %v7719_v28, %v13424_v63  ;;  %v7723_v53 = vpop.eup %7722  ;;  %v15558_v63 = vld [vmem:[#allocation254_spill] sm:$0xff]  ;;  %v4923_v41 = vpop.f32.mrf.mxu0 }
 0x2c3   : > { %5768 = vmatprep.subr.bf16.mxu1 %v15551_v39  ;;  %7746 = vrsqrt.f32 %v13539_v48  ;;  %v15556_v29 = vcombine.low %v15542_v38, %v15543_v59  ;;  %v6294_v32 = vadd.f32 1.0, %v13564_v23  ;;  %v13579_v56 = vadd.f32 %v5040_v60, %v4917_v55  ;;  %v7725_v21 = vpop.eup %7724  ;;  %v13604_v38 = vld [vmem:[%s14410_s2 + $0xa38] sm:$0xff]  ;;  %v15567_v60 = vld [vmem:[#allocation100_spill] sm:$0xff] }
 0x2c4   : > { %7748 = vrcp.f32 %v6293_v31  ;;  %v15557_v44 = vcombine.low %v15549_v0, %v15550_v22  ;;  %v15560_v27 = vcombine.high %v15558_v63, %v15559_v16  ;;  %v7405_v7 = vcombine.high %v13556_v19, %v13561_v62  ;;  %6830 = vst [vmem:[%s11732_s28 + $0x318] sm:$0xff] %v6686_v42  ;;  %v13609_v59 = vld [vmem:[%s14410_s2 + $0xe18] sm:$0xff]  ;;  %v7727_v30 = vpop.eup %7726  ;;  %5478 = vmatmul.mubr.bf16.gmra.mxu0 %v15567_v60  ;;  %v15570_v42 = vld [vmem:[#allocation86_spill] sm:$0xff] }
 0x2c5   : > { %5646 = vmatpush2.bf16.msra.mxu0 %v15556_v29  ;;  %v6693_v61 = vmul.f32 %v6549_v18, %v15561_v4  ;;  %v6550_v14 = vmul.f32 %v7721_v51, %v6118_v6  ;;  %v6125_v35 = vmul.f32 %v7723_v53, %v13439_v49  ;;  %7750 = vrsqrt.f32 %v13564_v23  ;;  %v13614_v49 = vld [vmem:[%s14410_s2 + $0xe38] sm:$0xff]  ;;  %v7729_v52 = vpop.eup %7728 }
 0x2c6   : > { %5769 = vmatpush2.bf16.msra.mxu1 %v15557_v44  ;;  %5647 = vmatprep.subr.bf16.mxu0 %v15560_v27  ;;  %v15562_v26 = vcombine.high %v13142_v5, %v13147_v1  ;;  %7752 = vrcp.f32 %v6294_v32  ;;  %v13616_v54 = vadd.f32 %v5042_v15, %v4919_v8  ;;  %v7276_v10 = vcombine.low %v13531_v17, %v13536_v9  ;;  %v7731_v2 = vpop.eup %7730  ;;  %v5046_v9 = vpop.f32.mrf.mxu1  ;;  %v15571_v29 = vld [vmem:[#allocation109_spill] sm:$0xff]  ;;  %v15572_v32 = vld [vmem:[#allocation92_spill] sm:$0xff] }
 0x2c7   : > { %v7404_v3 = vcombine.low %v13556_v19, %v13561_v62  ;;  %6837 = vst [vmem:[%s11732_s28 + $0x350] sm:$0xff] %v6693_v61  ;;  %v6694_v34 = vmul.f32 %v6550_v14, %v15563_v58  ;;  %v6557_v12 = vmul.f32 %v7725_v21, %v6125_v35  ;;  %v6126_v46 = vmul.f32 %v7727_v30, %v13463_v50  ;;  %v7733_v39 = vpop.eup %7732  ;;  %v15566_v19 = vld [vmem:[#allocation91_spill] sm:$0xff] }
 0x2c8   : > { %5770 = vmatprep.subr.bf16.mxu1 %v15562_v26  ;;  %v13625_v57 = vadd.f32 %v5044_v25, %v4921_v33  ;;  %v15564_v55 = vcombine.low %v15558_v63, %v15559_v16  ;;  %v6133_v17 = vmul.f32 %v7729_v52, %v13469_v13  ;;  %v15565_v0 = vcombine.low %v13142_v5, %v13147_v1  ;;  %v4927_v13 = vpop.f32.mrf.mxu0  ;;  %v7735_v5 = vpop.eup %7734  ;;  %v15573_v14 = vld [vmem:[#allocation87_spill] sm:$0xff]  ;;  %v15574_v25 = vld [vmem:[#allocation104_spill] sm:$0xff] }
 0x2c9   : > { %v7269_v22 = vcombine.high %v13592_v47, %v13604_v38  ;;  %v7397_v50 = vcombine.high %v13609_v59, %v13614_v49  ;;  %6838 = vst [vmem:[%s11732_s28 + $0x358] sm:$0xff] %v6694_v34  ;;  %v6701_v62 = vmul.f32 %v6557_v12, %v15566_v19  ;;  %v6558_v28 = vmul.f32 %v7731_v2, %v6126_v46  ;;  %v5050_v11 = vpop.f32.mrf.mxu1  ;;  %v7737_v24 = vpop.eup %7736 }
 0x2ca   : > { %5648 = vmatpush2.bf16.msra.mxu0 %v15564_v55  ;;  %5771 = vmatpush2.bf16.msra.mxu1 %v15565_v0  ;;  %v13640_v31 = vadd.f32 %v5046_v9, %v4923_v41  ;;  %v6565_v1 = vmul.f32 %v7733_v39, %v6133_v17  ;;  %v7268_v51 = vcombine.low %v13592_v47, %v13604_v38  ;;  %v4929_v43 = vpop.f32.mrf.mxu0  ;;  %v15576_v41 = vld [vmem:[#allocation117_spill] sm:$0xff]  ;;  %v15577_v55 = vld [vmem:[#allocation118_spill] sm:$0xff]  ;;  %v15579_v39 = vld [vmem:[#allocation119_spill] sm:$0xff] }
 0x2cb   : > { %5649 = vmatprep.subr.bf16.mxu0 %v7277_v45  ;;  %5772 = vmatprep.subr.bf16.mxu1 %v7405_v7  ;;  %v15569_v45 = vld [vmem:[#allocation106_spill] sm:$0xff]  ;;  %6845 = vst [vmem:[%s11732_s28 + $0x390] sm:$0xff] %v6701_v62  ;;  %v6702_v18 = vmul.f32 %v6558_v28, %v15570_v42  ;;  %v6134_v6 = vmul.f32 %v7735_v5, %v13486_v36  ;;  %v7739_v53 = vpop.eup %7738  ;;  %v5052_v44 = vpop.f32.mrf.mxu1  ;;  %v15580_v62 = vld [vmem:[#allocation105_spill] sm:$0xff] }
 0x2cc   : > { %5601 = vmatmul.mubr.bf16.gmra.mxu1 %v15568_v20  ;;  %5487 = vmatprep.mubr.bf16.mxu0 %v15569_v45  ;;  %v13650_v8 = vadd.f32 %v5050_v11, %v4927_v13  ;;  %v6709_v15 = vmul.f32 %v6565_v1, %v15572_v32  ;;  %v7396_v63 = vcombine.low %v13609_v59, %v13614_v49  ;;  %v7741_v16 = vpop.eup %7740  ;;  %v4931_v47 = vpop.f32.mrf.mxu0  ;;  %v15578_v17 = vld [vmem:[#allocation98_spill] sm:$0xff]  ;;  %v15581_v11 = vld [vmem:[#allocation99_spill] sm:$0xff] }
 0x2cd   : > { %5610 = vmatprep.mubr.bf16.mxu1 %v15571_v29  ;;  %6846 = vst [vmem:[%s11732_s28 + $0x398] sm:$0xff] %v6702_v18  ;;  %v6566_v27 = vmul.f32 %v7737_v24, %v6134_v6  ;;  %v6141_v36 = vmul.f32 %v7739_v53, %v13498_v40  ;;  %v13658_v7 = vadd.f32 %v5052_v44, %v4929_v43  ;;  %v7743_v21 = vpop.eup %7742  ;;  %v5054_v4 = vpop.f32.mrf.mxu1  ;;  %v15582_v18 = vld [vmem:[#allocation124_spill] sm:$0xff]  ;;  %v15583_v43 = vld [vmem:[#allocation125_spill] sm:$0xff]  ;;  %v15584_v29 = vld [vmem:[#allocation130_spill] sm:$0xff] }
 0x2ce   : > { %5650 = vmatpush2.bf16.msra.mxu0 %v7276_v10  ;;  %5773 = vmatpush2.bf16.msra.mxu1 %v7404_v3  ;;  %6853 = vst [vmem:[%s11732_s28 + $0x3d0] sm:$0xff] %v6709_v15  ;;  %v7745_v61 = vpop.eup %7744  ;;  %v6142_v26 = vmul.f32 %v7743_v21, %v13515_v37  ;;  %v13663_v38 = vadd.f32 %v5054_v4, %v4931_v47  ;;  %v4933_v59 = vpop.f32.mrf.mxu0  ;;  %v15575_v37 = vld [vmem:[#allocation114_spill] sm:$0xff]  ;;  %v15585_v15 = vld [vmem:[#allocation132_spill] sm:$0xff] }
 0x2cf   : > { %5651 = vmatprep.subr.bf16.mxu0 %v7269_v22  ;;  %5774 = vmatprep.subr.bf16.mxu1 %v7397_v50  ;;  %v6710_v35 = vmul.f32 %v6566_v27, %v15573_v14  ;;  %v6573_v33 = vmul.f32 %v7741_v16, %v6141_v36  ;;  %v5056_v40 = vpop.f32.mrf.mxu1  ;;  %v15586_v14 = vld [vmem:[#allocation138_spill] sm:$0xff] }
 0x2d0   : > { %v7747_v49 = vpop.eup %7746  ;;  %v6574_v3 = vmul.f32 %v7745_v61, %v6142_v26  ;;  %v13668_v58 = vadd.f32 %v5056_v40, %v4933_v59  ;;  %v4937_v34 = vpop.f32.mrf.mxu0  ;;  %5488 = vmatmul.mubr.bf16.gmra.mxu0 %v15575_v37  ;;  %v15588_v26 = vld [vmem:[#allocation144_spill] sm:$0xff]  ;;  %v15589_v40 = vld [vmem:[#allocation145_spill] sm:$0xff] }
 0x2d1   : > { %v7749_v30 = vpop.eup %7748  ;;  %6854 = vst [vmem:[%s11732_s28 + $0x3d8] sm:$0xff] %v6710_v35  ;;  %v6717_v10 = vmul.f32 %v6573_v33, %v15574_v25  ;;  %v6149_v52 = vmul.f32 %v7747_v49, %v13539_v48  ;;  %v5060_v46 = vpop.f32.mrf.mxu1  ;;  %5653 = vmatprep.mubr.bf16.mxu0 %v15577_v55  ;;  %v15587_v33 = vld [vmem:[#allocation141_spill] sm:$0xff] }
 0x2d2   : > { %5652 = vmatpush2.bf16.msra.mxu0 %v7268_v51  ;;  %5775 = vmatpush2.bf16.msra.mxu1 %v7396_v63  ;;  %v7751_v12 = vpop.eup %7750  ;;  %v6718_v9 = vmul.f32 %v6574_v3, %v15578_v17  ;;  %v13676_v22 = vadd.f32 %v5060_v46, %v4937_v34  ;;  %v4939_v50 = vpop.f32.mrf.mxu0  ;;  %v15592_v17 = vld [vmem:[#allocation155_spill] sm:$0xff] }
 0x2d3   : > { %v7753_v2 = vpop.eup %7752  ;;  %6861 = vst [vmem:[%s11732_s28 + $0x410] sm:$0xff] %v6717_v10  ;;  %v6581_v0 = vmul.f32 %v7749_v30, %v6149_v52  ;;  %v6150_v48 = vmul.f32 %v7751_v12, %v13564_v23  ;;  %v5062_v19 = vpop.f32.mrf.mxu1 }
 0x2d4   : > { %5611 = vmatmul.mubr.bf16.gmra.mxu1 %v15576_v41  ;;  %6862 = vst [vmem:[%s11732_s28 + $0x418] sm:$0xff] %v6718_v9  ;;  %v13681_v60 = vadd.f32 %v5062_v19, %v4939_v50  ;;  %v4941_v5 = vpop.f32.mrf.mxu0  ;;  %v15590_v41 = vld [vmem:[#allocation148_spill] sm:$0xff] }
 0x2d5   : > { %5776 = vmatprep.mubr.bf16.mxu1 %v15579_v39  ;;  %v6725_v28 = vmul.f32 %v6581_v0, %v15580_v62  ;;  %v6582_v13 = vmul.f32 %v7753_v2, %v6150_v48  ;;  %v5064_v1 = vpop.f32.mrf.mxu1  ;;  %v15591_v2 = vld [vmem:[#allocation150_spill] sm:$0xff]  ;;  %v15593_v48 = vld [vmem:[#allocation157_spill] sm:$0xff] }
 0x2d6   : > { %v13685_v45 = vadd.f32 %v5064_v1, %v4941_v5  ;;  %v4943_v23 = vpop.f32.mrf.mxu0 }
 0x2d7   : > { %6869 = vst [vmem:[%s11732_s28 + $0x450] sm:$0xff] %v6725_v28  ;;  %v6726_v20 = vmul.f32 %v6582_v13, %v15581_v11  ;;  %v5066_v51 = vpop.f32.mrf.mxu1 }
 0x2d8   : > { %v13688_v24 = vadd.f32 %v5066_v51, %v4943_v23  ;;  %v4947_v42 = vpop.f32.mrf.mxu0  ;;  %5654 = vmatmul.mubr.bf16.vlgmr.msra.gmra.mxu0 %v15582_v18  ;;  %v15595_v51 = vld [vmem:[#allocation166_spill] sm:$0xff] }
 0x2d9   : > { %6870 = vst [vmem:[%s11732_s28 + $0x458] sm:$0xff] %v6726_v20  ;;  %v5070_v6 = vpop.f32.mrf.mxu1  ;;  %5663 = vmatprep.mubr.bf16.mxu0 %v15584_v29  ;;  %v15594_v20 = vld [vmem:[#allocation163_spill] sm:$0xff] }
 0x2da   : > { %v13693_v53 = vadd.f32 %v5070_v6, %v4947_v42  ;;  %v4949_v32 = vpop.f32.mrf.mxu0  ;;  %v15596_v42 = vld [vmem:[#allocation170_spill] sm:$0xff] }
 0x2db   : > { %v5072_v44 = vpop.f32.mrf.mxu1 }
 0x2dc   : > { %5777 = vmatmul.mubr.bf16.vlgmr.msra.gmra.mxu1 %v15583_v43  ;;  %v13696_v63 = vadd.f32 %v5072_v44, %v4949_v32  ;;  %v4951_v16 = vpop.f32.mrf.mxu0  ;;  %v15597_v43 = vld [vmem:[#allocation171_spill] sm:$0xff] }
 0x2dd   : > { %5786 = vmatprep.mubr.bf16.mxu1 %v15585_v15  ;;  %v5074_v27 = vpop.f32.mrf.mxu1 }
 0x2de   : > { %v13698_v36 = vadd.f32 %v5074_v27, %v4951_v16  ;;  %v4953_v47 = vpop.f32.mrf.mxu0 }
 0x2df   : > { %v5076_v21 = vpop.f32.mrf.mxu1 }
 0x2e0   : > { %v13700_v4 = vadd.f32 %v5076_v21, %v4953_v47  ;;  %v4957_v61 = vpop.f32.mrf.mxu0  ;;  %5664 = vmatmul.mubr.bf16.gmra.mxu0 %v15586_v14  ;;  %v15598_v14 = vld [vmem:[#allocation172_spill] sm:$0xff] }
 0x2e1   : > { %v5080_v35 = vpop.f32.mrf.mxu1  ;;  %5673 = vmatprep.mubr.bf16.mxu0 %v15588_v26  ;;  %v15600_v26 = vld [vmem:[#allocation178_spill] sm:$0xff] }
 0x2e2   : > { %v13705_v59 = vadd.f32 %v5080_v35, %v4957_v61  ;;  %v4959_v49 = vpop.f32.mrf.mxu0 }
 0x2e3   : > { %v5082_v30 = vpop.f32.mrf.mxu1 }
 0x2e4   : > { %5787 = vmatmul.mubr.bf16.gmra.mxu1 %v15587_v33  ;;  %v13708_v25 = vadd.f32 %v5082_v30, %v4959_v49  ;;  %v4961_v10 = vpop.f32.mrf.mxu0  ;;  %v15599_v33 = vld [vmem:[#allocation174_spill] sm:$0xff]  ;;  %v15601_v30 = vld [vmem:[#allocation179_spill] sm:$0xff] }
 0x2e5   : > { %5796 = vmatprep.mubr.bf16.mxu1 %v15589_v40  ;;  %v5084_v3 = vpop.f32.mrf.mxu1 }
 0x2e6   : > { %v13710_v52 = vadd.f32 %v5084_v3, %v4961_v10  ;;  %v4963_v34 = vpop.f32.mrf.mxu0 }
 0x2e7   : > { %v5086_v37 = vpop.f32.mrf.mxu1 }
 0x2e8   : > { %v13712_v12 = vadd.f32 %v5086_v37, %v4963_v34  ;;  %v4967_v46 = vpop.f32.mrf.mxu0  ;;  %5674 = vmatmul.mubr.bf16.gmra.mxu0 %v15590_v41 }
 0x2e9   : > { %v5090_v55 = vpop.f32.mrf.mxu1  ;;  %5683 = vmatprep.mubr.bf16.mxu0 %v15592_v17 }
 0x2ea   : > { %v13717_v9 = vadd.f32 %v5090_v55, %v4967_v46  ;;  %v4969_v0 = vpop.f32.mrf.mxu0 }
 0x2eb   : > { %v5092_v50 = vpop.f32.mrf.mxu1 }
 0x2ec   : > { %5797 = vmatmul.mubr.bf16.gmra.mxu1 %v15591_v2  ;;  %v13720_v39 = vadd.f32 %v5092_v50, %v4969_v0  ;;  %v4971_v19 = vpop.f32.mrf.mxu0  ;;  %v15602_v0 = vld [vmem:[#allocation186_spill] sm:$0xff]  ;;  %v15603_v50 = vld [vmem:[#allocation189_spill] sm:$0xff] }
 0x2ed   : > { %5806 = vmatprep.mubr.bf16.mxu1 %v15593_v48  ;;  %v5094_v62 = vpop.f32.mrf.mxu1 }
 0x2ee   : > { %v13722_v28 = vadd.f32 %v5094_v62, %v4971_v19  ;;  %v4973_v13 = vpop.f32.mrf.mxu0  ;;  %v15604_v19 = vld [vmem:[#allocation192_spill] sm:$0xff] }
 0x2ef   : > { %v5096_v5 = vpop.f32.mrf.mxu1 }
 0x2f0   : > { %v13724_v1 = vadd.f32 %v5096_v5, %v4973_v13  ;;  %v4977_v11 = vpop.f32.mrf.mxu0  ;;  %5684 = vmatmul.mubr.bf16.gmra.mxu0 %v15594_v20  ;;  %v15605_v5 = vld [vmem:[#allocation193_spill] sm:$0xff] }
 0x2f1   : > { %v5100_v23 = vpop.f32.mrf.mxu1  ;;  %5693 = vmatprep.mubr.bf16.mxu0 %v15596_v42 }
 0x2f2   : > { %v13729_v18 = vadd.f32 %v5100_v23, %v4977_v11  ;;  %v4979_v6 = vpop.f32.mrf.mxu0 }
 0x2f3   : > { %v5102_v29 = vpop.f32.mrf.mxu1 }
 0x2f4   : > { %5807 = vmatmul.mubr.bf16.gmra.mxu1 %v15595_v51  ;;  %v13732_v32 = vadd.f32 %v5102_v29, %v4979_v6  ;;  %v4981_v15 = vpop.f32.mrf.mxu0 }
 0x2f5   : > { %5816 = vmatprep.mubr.bf16.mxu1 %v15597_v43  ;;  %v5104_v44 = vpop.f32.mrf.mxu1 }
 0x2f6   : > { %v13734_v16 = vadd.f32 %v5104_v44, %v4981_v15  ;;  %v4983_v27 = vpop.f32.mrf.mxu0  ;;  %v15606_v44 = vld [vmem:[#allocation196_spill] sm:$0xff] }
 0x2f7   : > { %v5106_v47 = vpop.f32.mrf.mxu1 }
 0x2f8   : > { %v13736_v21 = vadd.f32 %v5106_v47, %v4983_v27  ;;  %v4987_v61 = vpop.f32.mrf.mxu0  ;;  %5694 = vmatmul.mubr.bf16.gmra.mxu0 %v15598_v14  ;;  %v15608_v14 = vld [vmem:[#allocation201_spill] sm:$0xff] }
 0x2f9   : > { %v5110_v35 = vpop.f32.mrf.mxu1  ;;  %5703 = vmatprep.mubr.bf16.mxu0 %v15600_v26 }
 0x2fa   : > { %v13741_v49 = vadd.f32 %v5110_v35, %v4987_v61  ;;  %v4989_v40 = vpop.f32.mrf.mxu0  ;;  %v15607_v61 = vld [vmem:[#allocation198_spill] sm:$0xff] }
 0x2fb   : > { %v5112_v10 = vpop.f32.mrf.mxu1 }
 0x2fc   : > { %5817 = vmatmul.mubr.bf16.gmra.mxu1 %v15599_v33  ;;  %v13744_v3 = vadd.f32 %v5112_v10, %v4989_v40  ;;  %v4991_v34 = vpop.f32.mrf.mxu0  ;;  %v15609_v33 = vld [vmem:[#allocation205_spill] sm:$0xff] }
 0x2fd   : > { %5826 = vmatprep.mubr.bf16.mxu1 %v15601_v30  ;;  %v5114_v37 = vpop.f32.mrf.mxu1 }
 0x2fe   : > { %v13746_v46 = vadd.f32 %v5114_v37, %v4991_v34  ;;  %v4993_v41 = vpop.f32.mrf.mxu0 }
 0x2ff   : > { %v5116_v55 = vpop.f32.mrf.mxu1 }
 0x300   : > { %v13748_v2 = vadd.f32 %v5116_v55, %v4993_v41  ;;  %v4997_v17 = vpop.f32.mrf.mxu0  ;;  %5704 = vmatmul.mubr.bf16.gmra.mxu0 %v15602_v0 }
 0x301   : > { %v5120_v48 = vpop.f32.mrf.mxu1  ;;  %5713 = vmatprep.mubr.bf16.mxu0 %v15604_v19  ;;  %v15610_v19 = vld [vmem:[#allocation208_spill] sm:$0xff] }
 0x302   : > { %v13753_v62 = vadd.f32 %v5120_v48, %v4997_v17  ;;  %v4999_v13 = vpop.f32.mrf.mxu0 }
 0x303   : > { %v5122_v11 = vpop.f32.mrf.mxu1 }
 0x304   : > { %5827 = vmatmul.mubr.bf16.gmra.mxu1 %v15603_v50  ;;  %v13756_v20 = vadd.f32 %v5122_v11, %v4999_v13  ;;  %v5001_v23 = vpop.f32.mrf.mxu0 }
 0x305   : > { %5836 = vmatprep.mubr.bf16.mxu1 %v15605_v5  ;;  %v5124_v51 = vpop.f32.mrf.mxu1 }
 0x306   : > { %v13758_v42 = vadd.f32 %v5124_v51, %v5001_v23  ;;  %v5003_v6 = vpop.f32.mrf.mxu0  ;;  %v15611_v23 = vld [vmem:[#allocation211_spill] sm:$0xff]  ;;  %v15612_v51 = vld [vmem:[#allocation212_spill] sm:$0xff] }
 0x307   : > { %v5126_v43 = vpop.f32.mrf.mxu1 }
 0x308   : > { %v13760_v29 = vadd.f32 %v5126_v43, %v5003_v6  ;;  %v5163_v15 = vpop.f32.mrf.mxu0  ;;  %5714 = vmatmul.mubr.bf16.gmra.mxu0 %v15606_v44  ;;  %v15613_v6 = vld [vmem:[#allocation215_spill] sm:$0xff] }
 0x309   : > { %v5164_v27 = vadd.f32 %v5163_v15, %v13579_v56  ;;  %v5286_v47 = vpop.f32.mrf.mxu1  ;;  %5723 = vmatprep.mubr.bf16.mxu0 %v15608_v14 }
 0x30a   : > { %v5165_v35 = vpop.f32.mrf.mxu0 }
 0x30b   : > { %v5287_v26 = vadd.f32 %v5286_v47, %v5164_v27  ;;  %v5166_v40 = vadd.f32 %v5165_v35, %v13616_v54  ;;  %v5288_v30 = vpop.f32.mrf.mxu1 }
 0x30c   : > { %5837 = vmatmul.mubr.bf16.gmra.mxu1 %v15607_v61  ;;  %v5167_v10 = vpop.f32.mrf.mxu0 }
 0x30d   : > { %5846 = vmatprep.mubr.bf16.mxu1 %v15609_v33  ;;  %7754 = vrsqrt.f32 %v5287_v26  ;;  %v6159_v34 = vadd.f32 1.0, %v5287_v26  ;;  %v13768_v37 = vadd.f32 %v5288_v30, %v5166_v40  ;;  %v5168_v41 = vadd.f32 %v5167_v10, %v13625_v57  ;;  %v5290_v56 = vpop.f32.mrf.mxu1 }
 0x30e   : > { %v5169_v55 = vpop.f32.mrf.mxu0 }
 0x30f   : > { %7756 = vrcp.f32 %v6159_v34  ;;  %v6160_v17 = vadd.f32 1.0, %v13768_v37  ;;  %v13772_v0 = vadd.f32 %v5290_v56, %v5168_v41  ;;  %v5170_v48 = vadd.f32 %v5169_v55, %v13640_v31  ;;  %v5292_v50 = vpop.f32.mrf.mxu1  ;;  %v15614_v41 = vld [vmem:[#allocation216_spill] sm:$0xff] }
 0x310   : > { %7758 = vrsqrt.f32 %v13768_v37  ;;  %v5173_v54 = vpop.f32.mrf.mxu0  ;;  %5724 = vmatmul.mubr.bf16.gmra.mxu0 %v15610_v19 }
 0x311   : > { %7760 = vrcp.f32 %v6160_v17  ;;  %v6167_v13 = vadd.f32 1.0, %v13772_v0  ;;  %v13778_v5 = vadd.f32 %v5292_v50, %v5170_v48  ;;  %v5174_v57 = vadd.f32 %v5173_v54, %v13650_v8  ;;  %v5296_v11 = vpop.f32.mrf.mxu1  ;;  %5733 = vmatprep.mubr.bf16.mxu0 %v15612_v51  ;;  %v15615_v48 = vld [vmem:[#allocation217_spill] sm:$0xff] }
 0x312   : > { %7762 = vrsqrt.f32 %v13772_v0  ;;  %v5175_v31 = vpop.f32.mrf.mxu0 }
 0x313   : > { %7764 = vrcp.f32 %v6167_v13  ;;  %v6168_v43 = vadd.f32 1.0, %v13778_v5  ;;  %v13786_v15 = vadd.f32 %v5296_v11, %v5174_v57  ;;  %v5176_v44 = vadd.f32 %v5175_v31, %v13658_v7  ;;  %v5298_v27 = vpop.f32.mrf.mxu1 }
 0x314   : > { %5847 = vmatmul.mubr.bf16.gmra.mxu1 %v15611_v23  ;;  %7766 = vrsqrt.f32 %v13778_v5  ;;  %v5177_v8 = vpop.f32.mrf.mxu0 }
 0x315   : > { %5856 = vmatprep.mubr.bf16.mxu1 %v15613_v6  ;;  %7768 = vrcp.f32 %v6168_v43  ;;  %v6175_v47 = vadd.f32 1.0, %v13786_v15  ;;  %v13791_v61 = vadd.f32 %v5298_v27, %v5176_v44  ;;  %v5178_v14 = vadd.f32 %v5177_v8, %v13663_v38  ;;  %v5300_v35 = vpop.f32.mrf.mxu1 }
 0x316   : > { %7770 = vrsqrt.f32 %v13786_v15  ;;  %v5179_v33 = vpop.f32.mrf.mxu0 }
 0x317   : > { %7772 = vrcp.f32 %v6175_v47  ;;  %v6176_v40 = vadd.f32 1.0, %v13791_v61  ;;  %v13796_v30 = vadd.f32 %v5300_v35, %v5178_v14  ;;  %v5180_v7 = vadd.f32 %v5179_v33, %v13668_v58  ;;  %v5302_v10 = vpop.f32.mrf.mxu1 }
 0x318   : > { %7774 = vrsqrt.f32 %v13791_v61  ;;  %v5183_v34 = vpop.f32.mrf.mxu0  ;;  %5734 = vmatmul.mubr.bf16.gmra.mxu0 %v15614_v41 }
 0x319   : > { %7776 = vrcp.f32 %v6176_v40  ;;  %v6183_v38 = vadd.f32 1.0, %v13796_v30  ;;  %v13802_v56 = vadd.f32 %v5302_v10, %v5180_v7  ;;  %v5184_v55 = vadd.f32 %v5183_v34, %v13676_v22  ;;  %v5306_v17 = vpop.f32.mrf.mxu1 }
 0x31a   : > { %v7755_v50 = vpop.eup %7754  ;;  %7778 = vrsqrt.f32 %v13796_v30  ;;  %v5185_v58 = vpop.f32.mrf.mxu0 }
 0x31b   : > { %v6015_v54 = vmul.f32 %v7755_v50, %v5287_v26  ;;  %7780 = vrcp.f32 %v6183_v38  ;;  %v6184_v19 = vadd.f32 1.0, %v13802_v56  ;;  %v13808_v13 = vadd.f32 %v5306_v17, %v5184_v55  ;;  %v5308_v57 = vpop.f32.mrf.mxu1 }
 0x31c   : > { %5857 = vmatmul.mubr.bf16.gmra.mxu1 %v15615_v48  ;;  %v7757_v11 = vpop.eup %7756  ;;  %7782 = vrsqrt.f32 %v13802_v56  ;;  %v5186_v23 = vadd.f32 %v5185_v58, %v13681_v60  ;;  %v5187_v22 = vpop.f32.mrf.mxu0  ;;  %v15616_v60 = vld [vmem:[#allocation112_spill] sm:$0xff]  ;;  %v15617_v58 = vld [vmem:[#allocation107_spill] sm:$0xff] }
 0x31d   : > { %v7759_v51 = vpop.eup %7758  ;;  %v6447_v31 = vmul.f32 %v7757_v11, %v6015_v54  ;;  %7784 = vrcp.f32 %v6184_v19  ;;  %v6191_v6 = vadd.f32 1.0, %v13808_v13  ;;  %v5188_v43 = vadd.f32 %v5187_v22, %v13685_v45  ;;  %v5310_v26 = vpop.f32.mrf.mxu1 }
 0x31e   : > { %v7761_v44 = vpop.eup %7760  ;;  %v6016_v27 = vmul.f32 %v7759_v51, %v13768_v37  ;;  %7786 = vrsqrt.f32 %v13808_v13  ;;  %v13816_v8 = vadd.f32 %v5308_v57, %v5186_v23  ;;  %v5189_v47 = vpop.f32.mrf.mxu0 }
 0x31f   : > { %v7763_v14 = vpop.eup %7762  ;;  %v6591_v35 = vmul.f32 %v6447_v31, %v15616_v60  ;;  %7788 = vrcp.f32 %v6191_v6  ;;  %v13819_v33 = vadd.f32 %v5310_v26, %v5188_v43  ;;  %v5190_v40 = vadd.f32 %v5189_v47, %v13688_v24  ;;  %v5312_v7 = vpop.f32.mrf.mxu1  ;;  %v15618_v6 = vld [vmem:[#allocation113_spill] sm:$0xff] }
 0x320   : > { %v7765_v45 = vpop.eup %7764  ;;  %v6448_v10 = vmul.f32 %v7761_v44, %v6016_v27  ;;  %v6023_v34 = vmul.f32 %v7763_v14, %v13772_v0  ;;  %7790 = vrsqrt.f32 %v13816_v8  ;;  %v6192_v37 = vadd.f32 1.0, %v13816_v8  ;;  %v5193_v41 = vpop.f32.mrf.mxu0 }
 0x321   : > { %v7767_v38 = vpop.eup %7766  ;;  %6735 = vst [vmem:[%s11732_s28 + $0x20] sm:$0xff] %v6591_v35  ;;  %7792 = vrsqrt.f32 %v13819_v33  ;;  %v6199_v55 = vadd.f32 1.0, %v13819_v33  ;;  %v13828_v17 = vadd.f32 %v5312_v7, %v5190_v40  ;;  %v5194_v24 = vadd.f32 %v5193_v41, %v13693_v53  ;;  %v5316_v48 = vpop.f32.mrf.mxu1  ;;  %v15619_v40 = vld [vmem:[#allocation108_spill] sm:$0xff] }
 0x322   : > { %v7769_v50 = vpop.eup %7768  ;;  %v6592_v0 = vmul.f32 %v6448_v10, %v15617_v58  ;;  %v6455_v54 = vmul.f32 %v7765_v45, %v6023_v34  ;;  %v6024_v19 = vmul.f32 %v7767_v38, %v13778_v5  ;;  %7794 = vrcp.f32 %v6192_v37  ;;  %v5195_v57 = vpop.f32.mrf.mxu0 }
 0x323   : > { %v7771_v11 = vpop.eup %7770  ;;  %7796 = vrcp.f32 %v6199_v55  ;;  %v6200_v23 = vadd.f32 1.0, %v13828_v17  ;;  %v13834_v22 = vadd.f32 %v5316_v48, %v5194_v24  ;;  %v5196_v51 = vadd.f32 %v5195_v57, %v13696_v63  ;;  %v5318_v31 = vpop.f32.mrf.mxu1  ;;  %v15620_v24 = vld [vmem:[#allocation126_spill] sm:$0xff] }
 0x324   : > { %v7773_v53 = vpop.eup %7772  ;;  %6736 = vst [vmem:[%s11732_s28 + $0x28] sm:$0xff] %v6592_v0  ;;  %v6599_v43 = vmul.f32 %v6455_v54, %v15618_v6  ;;  %v6456_v26 = vmul.f32 %v7769_v50, %v6024_v19  ;;  %v6031_v44 = vmul.f32 %v7771_v11, %v13786_v15  ;;  %7798 = vrsqrt.f32 %v13828_v17  ;;  %v5197_v5 = vpop.f32.mrf.mxu0 }
 0x325   : > { %v7775_v27 = vpop.eup %7774  ;;  %7800 = vrcp.f32 %v6200_v23  ;;  %v6207_v47 = vadd.f32 1.0, %v13834_v22  ;;  %v13842_v14 = vadd.f32 %v5318_v31, %v5196_v51  ;;  %v5198_v63 = vadd.f32 %v5197_v5, %v13698_v36  ;;  %v5320_v60 = vpop.f32.mrf.mxu1  ;;  %v15621_v23 = vld [vmem:[#allocation120_spill] sm:$0xff] }
 0x326   : > { %v7777_v35 = vpop.eup %7776  ;;  %6743 = vst [vmem:[%s11732_s28 + $0x60] sm:$0xff] %v6599_v43  ;;  %v6600_v7 = vmul.f32 %v6456_v26, %v15619_v40  ;;  %v6463_v45 = vmul.f32 %v7773_v53, %v6031_v44  ;;  %v6032_v15 = vmul.f32 %v7775_v27, %v13791_v61  ;;  %7802 = vrsqrt.f32 %v13834_v22  ;;  %v5199_v10 = vpop.f32.mrf.mxu0  ;;  %v15622_v27 = vld [vmem:[#allocation127_spill] sm:$0xff] }
 0x327   : > { %v7779_v34 = vpop.eup %7778  ;;  %7804 = vrcp.f32 %v6207_v47  ;;  %v6208_v37 = vadd.f32 1.0, %v13842_v14  ;;  %v13850_v41 = vadd.f32 %v5320_v60, %v5198_v63  ;;  %v5200_v36 = vadd.f32 %v5199_v10, %v13700_v4  ;;  %v5322_v38 = vpop.f32.mrf.mxu1  ;;  %v15623_v10 = vld [vmem:[#allocation121_spill] sm:$0xff] }
 0x328   : > { %v7781_v55 = vpop.eup %7780  ;;  %6744 = vst [vmem:[%s11732_s28 + $0x68] sm:$0xff] %v6600_v7  ;;  %v6607_v48 = vmul.f32 %v6463_v45, %v15620_v24  ;;  %v6464_v50 = vmul.f32 %v7777_v35, %v6032_v15  ;;  %v6039_v61 = vmul.f32 %v7779_v34, %v13796_v30  ;;  %7806 = vrsqrt.f32 %v13842_v14  ;;  %v5203_v58 = vpop.f32.mrf.mxu0 }
 0x329   : > { %v7783_v0 = vpop.eup %7782  ;;  %7808 = vrcp.f32 %v6208_v37  ;;  %v6215_v54 = vadd.f32 1.0, %v13850_v41  ;;  %v13858_v19 = vadd.f32 %v5322_v38, %v5200_v36  ;;  %v5204_v4 = vadd.f32 %v5203_v58, %v13705_v59  ;;  %v5326_v57 = vpop.f32.mrf.mxu1 }
 0x32a   : > { %v7785_v11 = vpop.eup %7784  ;;  %6751 = vst [vmem:[%s11732_s28 + $0xa0] sm:$0xff] %v6607_v48  ;;  %v6608_v51 = vmul.f32 %v6464_v50, %v15621_v23  ;;  %v6471_v31 = vmul.f32 %v7781_v55, %v6039_v61  ;;  %v6040_v30 = vmul.f32 %v7783_v0, %v13802_v56  ;;  %7810 = vrsqrt.f32 %v13850_v41  ;;  %v5205_v53 = vpop.f32.mrf.mxu0  ;;  %v15624_v61 = vld [vmem:[#allocation136_spill] sm:$0xff] }
 0x32b   : > { %v7787_v6 = vpop.eup %7786  ;;  %7812 = vrcp.f32 %v6215_v54  ;;  %v6216_v43 = vadd.f32 1.0, %v13858_v19  ;;  %v13866_v26 = vadd.f32 %v5326_v57, %v5204_v4  ;;  %v5206_v59 = vadd.f32 %v5205_v53, %v13708_v25  ;;  %v5328_v44 = vpop.f32.mrf.mxu1 }
 0x32c   : > { %v7789_v5 = vpop.eup %7788  ;;  %6752 = vst [vmem:[%s11732_s28 + $0xa8] sm:$0xff] %v6608_v51  ;;  %v6615_v47 = vmul.f32 %v6471_v31, %v15622_v27  ;;  %v6472_v63 = vmul.f32 %v7785_v11, %v6040_v30  ;;  %v6047_v56 = vmul.f32 %v7787_v6, %v13808_v13  ;;  %7814 = vrsqrt.f32 %v13858_v19  ;;  %v5207_v60 = vpop.f32.mrf.mxu0  ;;  %v15625_v31 = vld [vmem:[#allocation131_spill] sm:$0xff] }
 0x32d   : > { %v7791_v35 = vpop.eup %7790  ;;  %7816 = vrcp.f32 %v6216_v43  ;;  %v6223_v40 = vadd.f32 1.0, %v13866_v26  ;;  %v13874_v7 = vadd.f32 %v5328_v44, %v5206_v59  ;;  %v5208_v25 = vadd.f32 %v5207_v60, %v13710_v52  ;;  %v5330_v45 = vpop.f32.mrf.mxu1  ;;  %v15626_v59 = vld [vmem:[#allocation137_spill] sm:$0xff] }
 0x32e   : > { %v7793_v15 = vpop.eup %7792  ;;  %6759 = vst [vmem:[%s11732_s28 + $0xe0] sm:$0xff] %v6615_v47  ;;  %v6616_v34 = vmul.f32 %v6472_v63, %v15623_v10  ;;  %v6479_v37 = vmul.f32 %v7789_v5, %v6047_v56  ;;  %v6048_v13 = vmul.f32 %v7791_v35, %v13816_v8  ;;  %7818 = vrsqrt.f32 %v13866_v26  ;;  %v5209_v36 = vpop.f32.mrf.mxu0  ;;  %v15627_v10 = vld [vmem:[#allocation133_spill] sm:$0xff] }
 0x32f   : > { %v7795_v38 = vpop.eup %7794  ;;  %v6055_v55 = vmul.f32 %v7793_v15, %v13819_v33  ;;  %7820 = vrcp.f32 %v6223_v40  ;;  %v6224_v24 = vadd.f32 1.0, %v13874_v7  ;;  %v13883_v48 = vadd.f32 %v5330_v45, %v5208_v25  ;;  %v5332_v52 = vpop.f32.mrf.mxu1 }
 0x330   : > { %v7797_v50 = vpop.eup %7796  ;;  %6760 = vst [vmem:[%s11732_s28 + $0xe8] sm:$0xff] %v6616_v34  ;;  %v6623_v58 = vmul.f32 %v6479_v37, %v15624_v61  ;;  %v6480_v0 = vmul.f32 %v7795_v38, %v6048_v13  ;;  %7822 = vrsqrt.f32 %v13874_v7  ;;  %v5210_v8 = vadd.f32 %v5209_v36, %v13712_v12  ;;  %v5213_v54 = vpop.f32.mrf.mxu0 }
 0x331   : > { %v7799_v4 = vpop.eup %7798  ;;  %v6487_v57 = vmul.f32 %v7797_v50, %v6055_v55  ;;  %7824 = vrcp.f32 %v6224_v24  ;;  %v6231_v33 = vadd.f32 1.0, %v13883_v48  ;;  %v5214_v11 = vadd.f32 %v5213_v54, %v13717_v9  ;;  %v5336_v23 = vpop.f32.mrf.mxu1  ;;  %v15628_v50 = vld [vmem:[#allocation149_spill] sm:$0xff] }
 0x332   : > { %v7801_v51 = vpop.eup %7800  ;;  %6767 = vst [vmem:[%s11732_s28 + $0x120] sm:$0xff] %v6623_v58  ;;  %v6624_v30 = vmul.f32 %v6480_v0, %v15625_v31  ;;  %v6056_v53 = vmul.f32 %v7799_v4, %v13828_v17  ;;  %7826 = vrsqrt.f32 %v13883_v48  ;;  %v13895_v6 = vadd.f32 %v5332_v52, %v5210_v8  ;;  %v5215_v12 = vpop.f32.mrf.mxu0 }
 0x333   : > { %v7803_v43 = vpop.eup %7802  ;;  %v6631_v44 = vmul.f32 %v6487_v57, %v15626_v59  ;;  %7828 = vrcp.f32 %v6231_v33  ;;  %v13898_v5 = vadd.f32 %v5336_v23, %v5214_v11  ;;  %v5216_v9 = vadd.f32 %v5215_v12, %v13720_v39  ;;  %v5338_v27 = vpop.f32.mrf.mxu1  ;;  %v15629_v11 = vld [vmem:[#allocation142_spill] sm:$0xff] }
 0x334   : > { %v7805_v47 = vpop.eup %7804  ;;  %6768 = vst [vmem:[%s11732_s28 + $0x128] sm:$0xff] %v6624_v30  ;;  %v6488_v63 = vmul.f32 %v7801_v51, %v6056_v53  ;;  %v6063_v17 = vmul.f32 %v7803_v43, %v13834_v22  ;;  %7830 = vrsqrt.f32 %v13895_v6  ;;  %v6232_v56 = vadd.f32 1.0, %v13895_v6  ;;  %v5217_v60 = vpop.f32.mrf.mxu0 }
 0x335   : > { %v7807_v35 = vpop.eup %7806  ;;  %6775 = vst [vmem:[%s11732_s28 + $0x160] sm:$0xff] %v6631_v44  ;;  %7832 = vrsqrt.f32 %v13898_v5  ;;  %v6239_v40 = vadd.f32 1.0, %v13898_v5  ;;  %v13908_v25 = vadd.f32 %v5338_v27, %v5216_v9  ;;  %v5218_v39 = vadd.f32 %v5217_v60, %v13722_v28  ;;  %v5340_v45 = vpop.f32.mrf.mxu1  ;;  %v15630_v44 = vld [vmem:[#allocation151_spill] sm:$0xff] }
 0x336   : > { %v7809_v15 = vpop.eup %7808  ;;  %v6632_v22 = vmul.f32 %v6488_v63, %v15627_v10  ;;  %v6495_v34 = vmul.f32 %v7805_v47, %v6063_v17  ;;  %v6064_v37 = vmul.f32 %v7807_v35, %v13842_v14  ;;  %7834 = vrcp.f32 %v6232_v56  ;;  %v5219_v13 = vpop.f32.mrf.mxu0 }
 0x337   : > { %v7811_v36 = vpop.eup %7810  ;;  %7836 = vrcp.f32 %v6239_v40  ;;  %v6240_v38 = vadd.f32 1.0, %v13908_v25  ;;  %v13914_v55 = vadd.f32 %v5340_v45, %v5218_v39  ;;  %v5220_v24 = vadd.f32 %v5219_v13, %v13724_v1  ;;  %v5342_v52 = vpop.f32.mrf.mxu1  ;;  %v15631_v40 = vld [vmem:[#allocation143_spill] sm:$0xff] }
 0x338   : > { %v7813_v28 = vpop.eup %7812  ;;  %6776 = vst [vmem:[%s11732_s28 + $0x168] sm:$0xff] %v6632_v22  ;;  %v6639_v61 = vmul.f32 %v6495_v34, %v15628_v50  ;;  %v6496_v58 = vmul.f32 %v7809_v15, %v6064_v37  ;;  %v6071_v0 = vmul.f32 %v7811_v36, %v13850_v41  ;;  %7838 = vrsqrt.f32 %v13908_v25  ;;  %v5223_v14 = vpop.f32.mrf.mxu0  ;;  %v15632_v36 = vld [vmem:[#allocation160_spill] sm:$0xff] }
 0x339   : > { %v7815_v8 = vpop.eup %7814  ;;  %7840 = vrcp.f32 %v6240_v38  ;;  %v6247_v54 = vadd.f32 1.0, %v13914_v55  ;;  %v13922_v4 = vadd.f32 %v5342_v52, %v5220_v24  ;;  %v5224_v1 = vadd.f32 %v5223_v14, %v13729_v18  ;;  %v5346_v57 = vpop.f32.mrf.mxu1  ;;  %v15633_v14 = vld [vmem:[#allocation154_spill] sm:$0xff] }
 0x33a   : > { %v7817_v33 = vpop.eup %7816  ;;  %6783 = vst [vmem:[%s11732_s28 + $0x1a0] sm:$0xff] %v6639_v61  ;;  %v6640_v23 = vmul.f32 %v6496_v58, %v15629_v11  ;;  %v6503_v51 = vmul.f32 %v7813_v28, %v6071_v0  ;;  %v6072_v41 = vmul.f32 %v7815_v8, %v13858_v19  ;;  %7842 = vrsqrt.f32 %v13914_v55  ;;  %v5225_v31 = vpop.f32.mrf.mxu0 }
 0x33b   : > { %v7819_v30 = vpop.eup %7818  ;;  %7844 = vrcp.f32 %v6247_v54  ;;  %v6248_v53 = vadd.f32 1.0, %v13922_v4  ;;  %v13930_v12 = vadd.f32 %v5346_v57, %v5224_v1  ;;  %v5226_v18 = vadd.f32 %v5225_v31, %v13732_v32  ;;  %v5348_v43 = vpop.f32.mrf.mxu1 }
 0x33c   : > { %v7821_v59 = vpop.eup %7820  ;;  %6784 = vst [vmem:[%s11732_s28 + $0x1a8] sm:$0xff] %v6640_v23  ;;  %v6647_v9 = vmul.f32 %v6503_v51, %v15630_v44  ;;  %v6504_v27 = vmul.f32 %v7817_v33, %v6072_v41  ;;  %v6079_v19 = vmul.f32 %v7819_v30, %v13866_v26  ;;  %7846 = vrsqrt.f32 %v13922_v4  ;;  %v5227_v47 = vpop.f32.mrf.mxu0  ;;  %v15634_v41 = vld [vmem:[#allocation161_spill] sm:$0xff] }
 0x33d   : > { %v7823_v63 = vpop.eup %7822  ;;  %7848 = vrcp.f32 %v6248_v53  ;;  %v6255_v17 = vadd.f32 1.0, %v13930_v12  ;;  %v13938_v56 = vadd.f32 %v5348_v43, %v5226_v18  ;;  %v5228_v32 = vadd.f32 %v5227_v47, %v13734_v16  ;;  %v5350_v60 = vpop.f32.mrf.mxu1 }
 0x33e   : > { %v7825_v35 = vpop.eup %7824  ;;  %6791 = vst [vmem:[%s11732_s28 + $0x1e0] sm:$0xff] %v6647_v9  ;;  %v6648_v39 = vmul.f32 %v6504_v27, %v15631_v40  ;;  %v6511_v45 = vmul.f32 %v7821_v59, %v6079_v19  ;;  %v6080_v26 = vmul.f32 %v7823_v63, %v13874_v7  ;;  %7850 = vrsqrt.f32 %v13930_v12  ;;  %v5229_v15 = vpop.f32.mrf.mxu0  ;;  %v15635_v27 = vld [vmem:[#allocation156_spill] sm:$0xff] }
 0x33f   : > { %v7827_v10 = vpop.eup %7826  ;;  %7852 = vrcp.f32 %v6255_v17  ;;  %v6256_v22 = vadd.f32 1.0, %v13938_v56  ;;  %v13946_v34 = vadd.f32 %v5350_v60, %v5228_v32  ;;  %v5230_v16 = vadd.f32 %v5229_v15, %v13736_v21  ;;  %v5352_v37 = vpop.f32.mrf.mxu1  ;;  %v15636_v32 = vld [vmem:[#allocation173_spill] sm:$0xff] }
 0x340   : > { %v7829_v13 = vpop.eup %7828  ;;  %6792 = vst [vmem:[%s11732_s28 + $0x1e8] sm:$0xff] %v6648_v39  ;;  %v6655_v38 = vmul.f32 %v6511_v45, %v15632_v36  ;;  %v6512_v24 = vmul.f32 %v7825_v35, %v6080_v26  ;;  %v6087_v7 = vmul.f32 %v7827_v10, %v13883_v48  ;;  %7854 = vrsqrt.f32 %v13938_v56  ;;  %v5233_v52 = vpop.f32.mrf.mxu0  ;;  %v15637_v36 = vld [vmem:[#allocation165_spill] sm:$0xff] }
 0x341   : > { %v7831_v28 = vpop.eup %7830  ;;  %7856 = vrcp.f32 %v6256_v22  ;;  %v6263_v50 = vadd.f32 1.0, %v13946_v34  ;;  %v13954_v61 = vadd.f32 %v5352_v37, %v5230_v16  ;;  %v5234_v21 = vadd.f32 %v5233_v52, %v13741_v49  ;;  %v5356_v58 = vpop.f32.mrf.mxu1 }
 0x342   : > { %v7833_v0 = vpop.eup %7832  ;;  %6799 = vst [vmem:[%s11732_s28 + $0x220] sm:$0xff] %v6655_v38  ;;  %v6656_v8 = vmul.f32 %v6512_v24, %v15633_v14  ;;  %v6519_v54 = vmul.f32 %v7829_v13, %v6087_v7  ;;  %v6088_v48 = vmul.f32 %v7831_v28, %v13895_v6  ;;  %7858 = vrsqrt.f32 %v13946_v34  ;;  %v5235_v1 = vpop.f32.mrf.mxu0 }
 0x343   : > { %v7835_v57 = vpop.eup %7834  ;;  %v6095_v33 = vmul.f32 %v7833_v0, %v13898_v5  ;;  %7860 = vrcp.f32 %v6263_v50  ;;  %v6264_v11 = vadd.f32 1.0, %v13954_v61  ;;  %v13963_v23 = vadd.f32 %v5356_v58, %v5234_v21  ;;  %v5358_v49 = vpop.f32.mrf.mxu1  ;;  %v15638_v0 = vld [vmem:[#allocation175_spill] sm:$0xff] }
 0x344   : > { %v7837_v51 = vpop.eup %7836  ;;  %6800 = vst [vmem:[%s11732_s28 + $0x228] sm:$0xff] %v6656_v8  ;;  %v6663_v31 = vmul.f32 %v6519_v54, %v15634_v41  ;;  %v6520_v30 = vmul.f32 %v7835_v57, %v6088_v48  ;;  %7862 = vrsqrt.f32 %v13954_v61  ;;  %v5236_v6 = vadd.f32 %v5235_v1, %v13744_v3  ;;  %v5237_v53 = vpop.f32.mrf.mxu0 }
 0x345   : > { %v7839_v18 = vpop.eup %7838  ;;  %v6527_v43 = vmul.f32 %v7837_v51, %v6095_v33  ;;  %7864 = vrcp.f32 %v6264_v11  ;;  %v6271_v5 = vadd.f32 1.0, %v13963_v23  ;;  %v5238_v59 = vadd.f32 %v5237_v53, %v13746_v46  ;;  %v5360_v44 = vpop.f32.mrf.mxu1 }
 0x346   : > { %v7841_v9 = vpop.eup %7840  ;;  %6807 = vst [vmem:[%s11732_s28 + $0x260] sm:$0xff] %v6663_v31  ;;  %v6664_v19 = vmul.f32 %v6520_v30, %v15635_v27  ;;  %v6096_v47 = vmul.f32 %v7839_v18, %v13908_v25  ;;  %7866 = vrsqrt.f32 %v13963_v23  ;;  %v13975_v63 = vadd.f32 %v5358_v49, %v5236_v6  ;;  %v5239_v3 = vpop.f32.mrf.mxu0  ;;  %v15639_v49 = vld [vmem:[#allocation167_spill] sm:$0xff] }
 0x347   : > { %v7843_v17 = vpop.eup %7842  ;;  %v6671_v60 = vmul.f32 %v6527_v43, %v15636_v32  ;;  %7868 = vrcp.f32 %v6271_v5  ;;  %v13978_v35 = vadd.f32 %v5360_v44, %v5238_v59  ;;  %v5240_v46 = vadd.f32 %v5239_v3, %v13748_v2  ;;  %v5362_v40 = vpop.f32.mrf.mxu1  ;;  %v15640_v5 = vld [vmem:[#allocation184_spill] sm:$0xff] }
 0x348   : > { %v7845_v39 = vpop.eup %7844  ;;  %6808 = vst [vmem:[%s11732_s28 + $0x268] sm:$0xff] %v6664_v19  ;;  %v6528_v45 = vmul.f32 %v7841_v9, %v6096_v47  ;;  %v6103_v25 = vmul.f32 %v7843_v17, %v13914_v55  ;;  %7870 = vrsqrt.f32 %v13975_v63  ;;  %v6272_v26 = vadd.f32 1.0, %v13975_v63  ;;  %v5243_v15 = vpop.f32.mrf.mxu0  ;;  %v15641_v17 = vld [vmem:[#allocation180_spill] sm:$0xff] }
 0x349   : > { %v7847_v10 = vpop.eup %7846  ;;  %6815 = vst [vmem:[%s11732_s28 + $0x2a0] sm:$0xff] %v6671_v60  ;;  %7872 = vrsqrt.f32 %v13978_v35  ;;  %v6279_v22 = vadd.f32 1.0, %v13978_v35  ;;  %v13988_v16 = vadd.f32 %v5362_v40, %v5240_v46  ;;  %v5244_v2 = vadd.f32 %v5243_v15, %v13753_v62  ;;  %v5366_v37 = vpop.f32.mrf.mxu1  ;;  %v15642_v15 = vld [vmem:[#allocation185_spill] sm:$0xff] }
 0x34a   : > { %v7849_v13 = vpop.eup %7848  ;;  %v6672_v55 = vmul.f32 %v6528_v45, %v15637_v36  ;;  %v6535_v38 = vmul.f32 %v7845_v39, %v6103_v25  ;;  %v6104_v24 = vmul.f32 %v7847_v10, %v13922_v4  ;;  %7874 = vrcp.f32 %v6272_v26  ;;  %v5245_v7 = vpop.f32.mrf.mxu0 }
 0x34b   : > { %v7851_v52 = vpop.eup %7850  ;;  %7876 = vrcp.f32 %v6279_v22  ;;  %v6280_v28 = vadd.f32 1.0, %v13988_v16  ;;  %v13994_v50 = vadd.f32 %v5366_v37, %v5244_v2  ;;  %v5246_v21 = vadd.f32 %v5245_v7, %v13756_v20  ;;  %v5368_v58 = vpop.f32.mrf.mxu1 }
 0x34c   : > { %v7853_v62 = vpop.eup %7852  ;;  %6816 = vst [vmem:[%s11732_s28 + $0x2a8] sm:$0xff] %v6672_v55  ;;  %v6679_v14 = vmul.f32 %v6535_v38, %v15638_v0  ;;  %v6536_v8 = vmul.f32 %v7849_v13, %v6104_v24  ;;  %v6111_v54 = vmul.f32 %v7851_v52, %v13930_v12  ;;  %7878 = vrsqrt.f32 %v13988_v16  ;;  %v5247_v4 = vpop.f32.mrf.mxu0  ;;  %v15643_v38 = vld [vmem:[#allocation181_spill] sm:$0xff] }
 0x34d   : > { %v7855_v48 = vpop.eup %7854  ;;  %7880 = vrcp.f32 %v6280_v28  ;;  %v6287_v1 = vadd.f32 1.0, %v13994_v50  ;;  %v14002_v57 = vadd.f32 %v5368_v58, %v5246_v21  ;;  %v5248_v20 = vadd.f32 %v5247_v4, %v13758_v42  ;;  %v5370_v33 = vpop.f32.mrf.mxu1 }
 0x34e   : > { %v7857_v11 = vpop.eup %7856  ;;  %6823 = vst [vmem:[%s11732_s28 + $0x2e0] sm:$0xff] %v6679_v14  ;;  %v6680_v51 = vmul.f32 %v6536_v8, %v15639_v49  ;;  %v6543_v41 = vmul.f32 %v7853_v62, %v6111_v54  ;;  %v6112_v12 = vmul.f32 %v7855_v48, %v13938_v56  ;;  %7882 = vrsqrt.f32 %v13994_v50  ;;  %v5249_v31 = vpop.f32.mrf.mxu0  ;;  %v15644_v14 = vld [vmem:[#allocation197_spill] sm:$0xff] }
 0x34f   : > { %v7859_v30 = vpop.eup %7858  ;;  %7884 = vrcp.f32 %v6287_v1  ;;  %v6288_v6 = vadd.f32 1.0, %v14002_v57  ;;  %v14010_v53 = vadd.f32 %v5370_v33, %v5248_v20  ;;  %v5250_v42 = vadd.f32 %v5249_v31, %v13760_v29  ;;  %v5372_v18 = vpop.f32.mrf.mxu1  ;;  %v15646_v31 = vld [vmem:[#allocation199_spill] sm:$0xff] }
 0x350   : > { %v7861_v43 = vpop.eup %7860  ;;  %6824 = vst [vmem:[%s11732_s28 + $0x2e8] sm:$0xff] %v6680_v51  ;;  %v6687_v59 = vmul.f32 %v6543_v41, %v15640_v5  ;;  %v6544_v44 = vmul.f32 %v7857_v11, %v6112_v12  ;;  %v6119_v56 = vmul.f32 %v7859_v30, %v13946_v34  ;;  %7886 = vrsqrt.f32 %v14002_v57  ;;  %v5409_v9 = vpop.f32.mrf.mxu0  ;;  %v15645_v11 = vld [vmem:[#allocation190_spill] sm:$0xff] }
 0x351   : > { %v7863_v27 = vpop.eup %7862  ;;  %7888 = vrcp.f32 %v6288_v6  ;;  %v6295_v19 = vadd.f32 1.0, %v14010_v53  ;;  %v14018_v47 = vadd.f32 %v5372_v18, %v5250_v42  ;;  %v5532_v3 = vpop.f32.mrf.mxu1 }
 0x352   : > { %v7865_v29 = vpop.eup %7864  ;;  %6831 = vst [vmem:[%s11732_s28 + $0x320] sm:$0xff] %v6687_v59  ;;  %v6688_v32 = vmul.f32 %v6544_v44, %v15641_v17  ;;  %v6551_v60 = vmul.f32 %v7861_v43, %v6119_v56  ;;  %v6120_v46 = vmul.f32 %v7863_v27, %v13954_v61  ;;  %7890 = vrsqrt.f32 %v14010_v53  ;;  %v5411_v34 = vpop.f32.mrf.mxu0 }
 0x353   : > { %v7867_v40 = vpop.eup %7866  ;;  %7892 = vrcp.f32 %v6295_v19  ;;  %v6296_v39 = vadd.f32 1.0, %v14018_v47  ;;  %v14025_v45 = vadd.f32 %v5532_v3, %v5409_v9  ;;  %v5534_v25 = vpop.f32.mrf.mxu1  ;;  %v15647_v9 = vld [vmem:[#allocation191_spill] sm:$0xff] }
 0x354   : > { %v7869_v26 = vpop.eup %7868  ;;  %6832 = vst [vmem:[%s11732_s28 + $0x328] sm:$0xff] %v6688_v32  ;;  %v6695_v10 = vmul.f32 %v6551_v60, %v15642_v15  ;;  %v6552_v22 = vmul.f32 %v7865_v29, %v6120_v46  ;;  %v6127_v2 = vmul.f32 %v7867_v40, %v13963_v23  ;;  %7894 = vrsqrt.f32 %v14018_v47  ;;  %v5413_v61 = vpop.f32.mrf.mxu0 }
 0x355   : > { %v7871_v37 = vpop.eup %7870  ;;  %7896 = vrcp.f32 %v6296_v39  ;;  %v14031_v13 = vadd.f32 %v5534_v25, %v5411_v34  ;;  %v5536_v36 = vpop.f32.mrf.mxu1 }
 0x356   : > { %v7873_v55 = vpop.eup %7872  ;;  %6839 = vst [vmem:[%s11732_s28 + $0x360] sm:$0xff] %v6695_v10  ;;  %v6696_v24 = vmul.f32 %v6552_v22, %v15643_v38  ;;  %v6559_v7 = vmul.f32 %v7869_v26, %v6127_v2  ;;  %v6128_v52 = vmul.f32 %v7871_v37, %v13975_v63  ;;  %v14036_v28 = vadd.f32 %v5536_v36, %v5413_v61  ;;  %v5415_v23 = vpop.f32.mrf.mxu0  ;;  %v15649_v22 = vld [vmem:[#allocation203_spill] sm:$0xff] }
 0x357   : > { %v7875_v21 = vpop.eup %7874  ;;  %v6135_v58 = vmul.f32 %v7873_v55, %v13978_v35  ;;  %v5538_v62 = vpop.f32.mrf.mxu1 }
 0x358   : > { %v7877_v0 = vpop.eup %7876  ;;  %6840 = vst [vmem:[%s11732_s28 + $0x368] sm:$0xff] %v6696_v24  ;;  %v6703_v8 = vmul.f32 %v6559_v7, %v15644_v14  ;;  %v6560_v54 = vmul.f32 %v7875_v21, %v6128_v52  ;;  %v14041_v4 = vadd.f32 %v5538_v62, %v5415_v23  ;;  %v5419_v48 = vpop.f32.mrf.mxu0 }
 0x359   : > { %v7879_v1 = vpop.eup %7878  ;;  %v6567_v20 = vmul.f32 %v7877_v0, %v6135_v58  ;;  %v5542_v63 = vpop.f32.mrf.mxu1  ;;  %v15651_v58 = vld [vmem:[#allocation204_spill] sm:$0xff] }
 0x35a   : > { %v7881_v33 = vpop.eup %7880  ;;  %6847 = vst [vmem:[%s11732_s28 + $0x3a0] sm:$0xff] %v6703_v8  ;;  %v6704_v49 = vmul.f32 %v6560_v54, %v15645_v11  ;;  %v6136_v35 = vmul.f32 %v7879_v1, %v13988_v16  ;;  %v14046_v51 = vadd.f32 %v5542_v63, %v5419_v48  ;;  %v5421_v41 = vpop.f32.mrf.mxu0 }
 0x35b   : > { %v7883_v12 = vpop.eup %7882  ;;  %v6711_v30 = vmul.f32 %v6567_v20, %v15646_v31  ;;  %v5544_v6 = vpop.f32.mrf.mxu1 }
 0x35c   : > { %v7885_v42 = vpop.eup %7884  ;;  %6848 = vst [vmem:[%s11732_s28 + $0x3a8] sm:$0xff] %v6704_v49  ;;  %v6568_v18 = vmul.f32 %v7881_v33, %v6136_v35  ;;  %v6143_v43 = vmul.f32 %v7883_v12, %v13994_v50  ;;  %v14051_v5 = vadd.f32 %v5544_v6, %v5421_v41  ;;  %v5423_v59 = vpop.f32.mrf.mxu0  ;;  %v15648_v50 = vld [vmem:[#allocation209_spill] sm:$0xff] }
 0x35d   : > { %v7887_v44 = vpop.eup %7886  ;;  %6855 = vst [vmem:[%s11732_s28 + $0x3e0] sm:$0xff] %v6711_v30  ;;  %v5546_v56 = vpop.f32.mrf.mxu1 }
 0x35e   : > { %v7889_v16 = vpop.eup %7888  ;;  %v6712_v27 = vmul.f32 %v6568_v18, %v15647_v9  ;;  %v6575_v19 = vmul.f32 %v7885_v42, %v6143_v43  ;;  %v6144_v3 = vmul.f32 %v7887_v44, %v14002_v57  ;;  %v14056_v29 = vadd.f32 %v5546_v56, %v5423_v59  ;;  %v5425_v17 = vpop.f32.mrf.mxu0 }
 0x35f   : > { %v7891_v32 = vpop.eup %7890  ;;  %v5548_v60 = vpop.f32.mrf.mxu1 }
 0x360   : > { %v7893_v46 = vpop.eup %7892  ;;  %6856 = vst [vmem:[%s11732_s28 + $0x3e8] sm:$0xff] %v6712_v27  ;;  %v6719_v34 = vmul.f32 %v6575_v19, %v15648_v50  ;;  %v6576_v40 = vmul.f32 %v7889_v16, %v6144_v3  ;;  %v6151_v39 = vmul.f32 %v7891_v32, %v14010_v53  ;;  %v14061_v25 = vadd.f32 %v5548_v60, %v5425_v17  ;;  %v5429_v26 = vpop.f32.mrf.mxu0  ;;  %v15650_v53 = vld [vmem:[#allocation210_spill] sm:$0xff] }
 0x361   : > { %v7895_v15 = vpop.eup %7894  ;;  %v5552_v10 = vpop.f32.mrf.mxu1 }
 0x362   : > { %v7897_v57 = vpop.eup %7896  ;;  %6863 = vst [vmem:[%s11732_s28 + $0x420] sm:$0xff] %v6719_v34  ;;  %v6720_v2 = vmul.f32 %v6576_v40, %v15649_v22  ;;  %v6583_v61 = vmul.f32 %v7893_v46, %v6151_v39  ;;  %v6152_v37 = vmul.f32 %v7895_v15, %v14018_v47  ;;  %v14066_v36 = vadd.f32 %v5552_v10, %v5429_v26  ;;  %v5431_v55 = vpop.f32.mrf.mxu0 }
 0x363   : > { %v5554_v38 = vpop.f32.mrf.mxu1 }
 0x364   : > { %6864 = vst [vmem:[%s11732_s28 + $0x428] sm:$0xff] %v6720_v2  ;;  %v6727_v24 = vmul.f32 %v6583_v61, %v15650_v53  ;;  %v6584_v7 = vmul.f32 %v7897_v57, %v6152_v37  ;;  %v14070_v52 = vadd.f32 %v5554_v38, %v5431_v55  ;;  %v5433_v23 = vpop.f32.mrf.mxu0 }
 0x365   : > { %v5556_v21 = vpop.f32.mrf.mxu1 }
 0x366   : > { %6871 = vst [vmem:[%s11732_s28 + $0x460] sm:$0xff] %v6727_v24  ;;  %v6728_v62 = vmul.f32 %v6584_v7, %v15651_v58  ;;  %v14074_v0 = vadd.f32 %v5556_v21, %v5433_v23  ;;  %v5435_v14 = vpop.f32.mrf.mxu0 }
 0x367   : > { %v5558_v8 = vpop.f32.mrf.mxu1 }
 0x368   : > { %6872 = vst [vmem:[%s11732_s28 + $0x468] sm:$0xff] %v6728_v62  ;;  %v14077_v47 = vadd.f32 %v5558_v8, %v5435_v14  ;;  %v5439_v54 = vpop.f32.mrf.mxu0 }
 0x369   : > { %v5562_v48 = vpop.f32.mrf.mxu1 }
 0x36a   : > { %v14079_v1 = vadd.f32 %v5562_v48, %v5439_v54  ;;  %v5441_v20 = vpop.f32.mrf.mxu0 }
 0x36b   : > { %v5564_v63 = vpop.f32.mrf.mxu1 }
 0x36c   : > { %v14081_v33 = vadd.f32 %v5564_v63, %v5441_v20  ;;  %v5443_v11 = vpop.f32.mrf.mxu0 }
 0x36d   : > { %v5566_v49 = vpop.f32.mrf.mxu1 }
 0x36e   : > { %v14083_v35 = vadd.f32 %v5566_v49, %v5443_v11  ;;  %v5445_v41 = vpop.f32.mrf.mxu0 }
 0x36f   : > { %v5568_v12 = vpop.f32.mrf.mxu1 }
 0x370   : > { %v14085_v31 = vadd.f32 %v5568_v12, %v5445_v41  ;;  %v5449_v30 = vpop.f32.mrf.mxu0 }
 0x371   : > { %v5572_v6 = vpop.f32.mrf.mxu1 }
 0x372   : > { %v14087_v42 = vadd.f32 %v5572_v6, %v5449_v30  ;;  %v5451_v18 = vpop.f32.mrf.mxu0 }
 0x373   : > { %v5574_v43 = vpop.f32.mrf.mxu1 }
 0x374   : > { %v14089_v59 = vadd.f32 %v5574_v43, %v5451_v18  ;;  %v5453_v44 = vpop.f32.mrf.mxu0 }
 0x375   : > { %v5576_v56 = vpop.f32.mrf.mxu1 }
 0x376   : > { %v14091_v16 = vadd.f32 %v5576_v56, %v5453_v44  ;;  %v5455_v9 = vpop.f32.mrf.mxu0 }
 0x377   : > { %v5578_v27 = vpop.f32.mrf.mxu1 }
 0x378   : > { %v14093_v19 = vadd.f32 %v5578_v27, %v5455_v9  ;;  %v5459_v3 = vpop.f32.mrf.mxu0 }
 0x379   : > { %v5582_v17 = vpop.f32.mrf.mxu1 }
 0x37a   : > { %v14095_v32 = vadd.f32 %v5582_v17, %v5459_v3  ;;  %v5461_v60 = vpop.f32.mrf.mxu0 }
 0x37b   : > { %v5584_v46 = vpop.f32.mrf.mxu1 }
 0x37c   : > { %v14097_v50 = vadd.f32 %v5584_v46, %v5461_v60  ;;  %v5463_v34 = vpop.f32.mrf.mxu0 }
 0x37d   : > { %v5586_v40 = vpop.f32.mrf.mxu1 }
 0x37e   : > { %v14099_v39 = vadd.f32 %v5586_v40, %v5463_v34  ;;  %v5465_v26 = vpop.f32.mrf.mxu0 }
 0x37f   : > { %v5588_v15 = vpop.f32.mrf.mxu1 }
 0x380   : > { %v14101_v10 = vadd.f32 %v5588_v15, %v5465_v26  ;;  %v5469_v57 = vpop.f32.mrf.mxu0 }
 0x381   : > { %v5592_v22 = vpop.f32.mrf.mxu1 }
 0x382   : > { %v14103_v2 = vadd.f32 %v5592_v22, %v5469_v57  ;;  %v5471_v61 = vpop.f32.mrf.mxu0 }
 0x383   : > { %v5594_v37 = vpop.f32.mrf.mxu1 }
 0x384   : > { %v14105_v55 = vadd.f32 %v5594_v37, %v5471_v61  ;;  %v5473_v38 = vpop.f32.mrf.mxu0 }
 0x385   : > { %v5596_v53 = vpop.f32.mrf.mxu1 }
 0x386   : > { %v14107_v24 = vadd.f32 %v5596_v53, %v5473_v38  ;;  %v5475_v7 = vpop.f32.mrf.mxu0 }
 0x387   : > { %v5598_v23 = vpop.f32.mrf.mxu1 }
 0x388   : > { %v14109_v21 = vadd.f32 %v5598_v23, %v5475_v7  ;;  %v5479_v58 = vpop.f32.mrf.mxu0 }
 0x38a   : > { %v5481_v8 = vpop.f32.mrf.mxu0 }
 0x38c   : > { %v5602_v62 = vpop.f32.mrf.mxu1  ;;  %v5483_v20 = vpop.f32.mrf.mxu0 }
 0x38d   : > { %v14111_v14 = vadd.f32 %v5602_v62, %v5479_v58 }
 0x38e   : > { %v5604_v54 = vpop.f32.mrf.mxu1  ;;  %v5485_v49 = vpop.f32.mrf.mxu0 }
 0x38f   : > { %v14113_v48 = vadd.f32 %v5604_v54, %v5481_v8 }
 0x390   : > { %v5606_v63 = vpop.f32.mrf.mxu1  ;;  %v5489_v30 = vpop.f32.mrf.mxu0 }
 0x391   : > { %v14115_v11 = vadd.f32 %v5606_v63, %v5483_v20 }
 0x392   : > { %v5608_v41 = vpop.f32.mrf.mxu1  ;;  %v5491_v43 = vpop.f32.mrf.mxu0 }
 0x393   : > { %v14117_v12 = vadd.f32 %v5608_v41, %v5485_v49 }
 0x394   : > { %v5612_v6 = vpop.f32.mrf.mxu1  ;;  %v5493_v9 = vpop.f32.mrf.mxu0 }
 0x395   : > { %v14119_v18 = vadd.f32 %v5612_v6, %v5489_v30 }
 0x396   : > { %v5614_v44 = vpop.f32.mrf.mxu1  ;;  %v5495_v17 = vpop.f32.mrf.mxu0 }
 0x397   : > { %v14121_v56 = vadd.f32 %v5614_v44, %v5491_v43 }
 0x398   : > { %v5616_v27 = vpop.f32.mrf.mxu1  ;;  %v5655_v34 = vpop.f32.mrf.mxu0 }
 0x399   : > { %v14123_v3 = vadd.f32 %v5616_v27, %v5493_v9  ;;  %v5656_v40 = vadd.f32 %v5655_v34, %v14025_v45 }
 0x39a   : > { %v5618_v60 = vpop.f32.mrf.mxu1  ;;  %v5657_v15 = vpop.f32.mrf.mxu0 }
 0x39b   : > { %v14125_v46 = vadd.f32 %v5618_v60, %v5495_v17  ;;  %v5658_v22 = vadd.f32 %v5657_v15, %v14031_v13 }
 0x39c   : > { %v5778_v26 = vpop.f32.mrf.mxu1  ;;  %v5659_v37 = vpop.f32.mrf.mxu0 }
 0x39d   : > { %v5779_v57 = vadd.f32 %v5778_v26, %v5656_v40  ;;  %v5660_v7 = vadd.f32 %v5659_v37, %v14036_v28 }
 0x39e   : > { %v5780_v61 = vpop.f32.mrf.mxu1  ;;  %v5661_v58 = vpop.f32.mrf.mxu0 }
 0x39f   : > { %7898 = vrsqrt.f32 %v5779_v57  ;;  %v6161_v38 = vadd.f32 1.0, %v5779_v57  ;;  %v14129_v53 = vadd.f32 %v5780_v61, %v5658_v22  ;;  %v5662_v45 = vadd.f32 %v5661_v58, %v14041_v4 }
 0x3a0   : > { %v5782_v23 = vpop.f32.mrf.mxu1  ;;  %v5665_v13 = vpop.f32.mrf.mxu0 }
 0x3a1   : > { %7900 = vrcp.f32 %v6161_v38  ;;  %v6162_v62 = vadd.f32 1.0, %v14129_v53  ;;  %v14133_v8 = vadd.f32 %v5782_v23, %v5660_v7  ;;  %v5666_v28 = vadd.f32 %v5665_v13, %v14046_v51 }
 0x3a2   : > { %v5784_v54 = vpop.f32.mrf.mxu1  ;;  %7902 = vrsqrt.f32 %v14129_v53  ;;  %v5667_v41 = vpop.f32.mrf.mxu0 }
 0x3a3   : > { %7904 = vrcp.f32 %v6162_v62  ;;  %v6169_v20 = vadd.f32 1.0, %v14133_v8  ;;  %v14138_v63 = vadd.f32 %v5784_v54, %v5662_v45  ;;  %v5668_v4 = vadd.f32 %v5667_v41, %v14051_v5 }
 0x3a4   : > { %v5788_v49 = vpop.f32.mrf.mxu1  ;;  %7906 = vrsqrt.f32 %v14133_v8  ;;  %v5669_v44 = vpop.f32.mrf.mxu0 }
 0x3a5   : > { %7908 = vrcp.f32 %v6169_v20  ;;  %v6170_v30 = vadd.f32 1.0, %v14138_v63  ;;  %v14143_v6 = vadd.f32 %v5788_v49, %v5666_v28  ;;  %v5670_v51 = vadd.f32 %v5669_v44, %v14056_v29 }
 0x3a6   : > { %v5790_v43 = vpop.f32.mrf.mxu1  ;;  %7910 = vrsqrt.f32 %v14138_v63  ;;  %v5671_v60 = vpop.f32.mrf.mxu0 }
 0x3a7   : > { %7912 = vrcp.f32 %v6170_v30  ;;  %v6177_v9 = vadd.f32 1.0, %v14143_v6  ;;  %v14148_v27 = vadd.f32 %v5790_v43, %v5668_v4  ;;  %v5672_v5 = vadd.f32 %v5671_v60, %v14061_v25 }
 0x3a8   : > { %v5792_v17 = vpop.f32.mrf.mxu1  ;;  %7914 = vrsqrt.f32 %v14143_v6  ;;  %v5675_v15 = vpop.f32.mrf.mxu0 }
 0x3a9   : > { %7916 = vrcp.f32 %v6177_v9  ;;  %v6178_v34 = vadd.f32 1.0, %v14148_v27  ;;  %v14153_v40 = vadd.f32 %v5792_v17, %v5670_v51  ;;  %v5676_v29 = vadd.f32 %v5675_v15, %v14066_v36 }
 0x3aa   : > { %v5794_v26 = vpop.f32.mrf.mxu1  ;;  %7918 = vrsqrt.f32 %v14148_v27  ;;  %v5677_v7 = vpop.f32.mrf.mxu0 }
 0x3ab   : > { %7920 = vrcp.f32 %v6178_v34  ;;  %v6185_v22 = vadd.f32 1.0, %v14153_v40  ;;  %v14158_v61 = vadd.f32 %v5794_v26, %v5672_v5  ;;  %v5678_v54 = vadd.f32 %v5677_v7, %v14070_v52  ;;  %v15652_v52 = vld [vmem:[#allocation115_spill] sm:$0xff]  ;;  %v15653_v7 = vld [vmem:[#allocation110_spill] sm:$0xff] }
 0x3ac   : > { %v5798_v37 = vpop.f32.mrf.mxu1  ;;  %v7899_v38 = vpop.eup %7898  ;;  %7922 = vrsqrt.f32 %v14153_v40 }
 0x3ad   : > { %v6017_v23 = vmul.f32 %v7899_v38, %v5779_v57  ;;  %7924 = vrcp.f32 %v6185_v22  ;;  %v6186_v25 = vadd.f32 1.0, %v14158_v61  ;;  %v14163_v58 = vadd.f32 %v5798_v37, %v5676_v29  ;;  %v5679_v13 = vpop.f32.mrf.mxu0 }
 0x3ae   : > { %v5800_v62 = vpop.f32.mrf.mxu1  ;;  %v7901_v45 = vpop.eup %7900  ;;  %7926 = vrsqrt.f32 %v14158_v61  ;;  %v5680_v49 = vadd.f32 %v5679_v13, %v14074_v0 }
 0x3af   : > { %v7903_v20 = vpop.eup %7902  ;;  %v6449_v36 = vmul.f32 %v7901_v45, %v6017_v23  ;;  %7928 = vrcp.f32 %v6186_v25  ;;  %v6193_v28 = vadd.f32 1.0, %v14163_v58  ;;  %v14171_v4 = vadd.f32 %v5800_v62, %v5678_v54  ;;  %v5681_v43 = vpop.f32.mrf.mxu0 }
 0x3b0   : > { %v5802_v57 = vpop.f32.mrf.mxu1  ;;  %v7905_v41 = vpop.eup %7904  ;;  %v6018_v30 = vmul.f32 %v7903_v20, %v14129_v53  ;;  %7930 = vrsqrt.f32 %v14163_v58  ;;  %v5682_v17 = vadd.f32 %v5681_v43, %v14077_v47 }
 0x3b1   : > { %v7907_v44 = vpop.eup %7906  ;;  %v6593_v9 = vmul.f32 %v6449_v36, %v15652_v52  ;;  %7932 = vrcp.f32 %v6193_v28  ;;  %v14174_v51 = vadd.f32 %v5802_v57, %v5680_v49  ;;  %v6194_v53 = vadd.f32 1.0, %v14171_v4  ;;  %v5685_v26 = vpop.f32.mrf.mxu0  ;;  %v15654_v28 = vld [vmem:[#allocation116_spill] sm:$0xff] }
 0x3b2   : > { %v5804_v60 = vpop.f32.mrf.mxu1  ;;  %v7909_v0 = vpop.eup %7908  ;;  %v6450_v34 = vmul.f32 %v7905_v41, %v6018_v30  ;;  %v6025_v5 = vmul.f32 %v7907_v44, %v14133_v8  ;;  %7934 = vrsqrt.f32 %v14171_v4  ;;  %v5686_v47 = vadd.f32 %v5685_v26, %v14079_v1 }
 0x3b3   : > { %v7911_v15 = vpop.eup %7910  ;;  %6737 = vst [vmem:[%s11732_s28 + $0x30] sm:$0xff] %v6593_v9  ;;  %7936 = vrsqrt.f32 %v14174_v51  ;;  %v6201_v22 = vadd.f32 1.0, %v14174_v51  ;;  %v14183_v29 = vadd.f32 %v5804_v60, %v5682_v17  ;;  %v5687_v62 = vpop.f32.mrf.mxu0  ;;  %v15655_v17 = vld [vmem:[#allocation111_spill] sm:$0xff] }
 0x3b4   : > { %v5808_v37 = vpop.f32.mrf.mxu1  ;;  %v7913_v38 = vpop.eup %7912  ;;  %v6594_v8 = vmul.f32 %v6450_v34, %v15653_v7  ;;  %v6457_v23 = vmul.f32 %v7909_v0, %v6025_v5  ;;  %v6026_v25 = vmul.f32 %v7911_v15, %v14138_v63  ;;  %7938 = vrcp.f32 %v6194_v53 }
 0x3b5   : > { %v7915_v45 = vpop.eup %7914  ;;  %7940 = vrcp.f32 %v6201_v22  ;;  %v6202_v54 = vadd.f32 1.0, %v14183_v29  ;;  %v14189_v13 = vadd.f32 %v5808_v37, %v5686_v47  ;;  %v5688_v20 = vadd.f32 %v5687_v62, %v14081_v33  ;;  %v5689_v63 = vpop.f32.mrf.mxu0  ;;  %v15656_v47 = vld [vmem:[#allocation128_spill] sm:$0xff] }
 0x3b6   : > { %v5810_v36 = vpop.f32.mrf.mxu1  ;;  %v7917_v1 = vpop.eup %7916  ;;  %6738 = vst [vmem:[%s11732_s28 + $0x38] sm:$0xff] %v6594_v8  ;;  %v6601_v49 = vmul.f32 %v6457_v23, %v15654_v28  ;;  %v6458_v57 = vmul.f32 %v7913_v38, %v6026_v25  ;;  %v6033_v41 = vmul.f32 %v7915_v45, %v14143_v6  ;;  %7942 = vrsqrt.f32 %v14183_v29 }
 0x3b7   : > { %v7919_v30 = vpop.eup %7918  ;;  %7944 = vrcp.f32 %v6202_v54  ;;  %v6209_v43 = vadd.f32 1.0, %v14189_v13  ;;  %v14197_v44 = vadd.f32 %v5810_v36, %v5688_v20  ;;  %v5690_v33 = vadd.f32 %v5689_v63, %v14083_v35  ;;  %v5691_v34 = vpop.f32.mrf.mxu0  ;;  %v15657_v54 = vld [vmem:[#allocation122_spill] sm:$0xff] }
 0x3b8   : > { %v5812_v52 = vpop.f32.mrf.mxu1  ;;  %v7921_v9 = vpop.eup %7920  ;;  %6745 = vst [vmem:[%s11732_s28 + $0x70] sm:$0xff] %v6601_v49  ;;  %v6602_v60 = vmul.f32 %v6458_v57, %v15655_v17  ;;  %v6465_v0 = vmul.f32 %v7917_v1, %v6033_v41  ;;  %v6034_v6 = vmul.f32 %v7919_v30, %v14148_v27  ;;  %7946 = vrsqrt.f32 %v14189_v13  ;;  %v15658_v30 = vld [vmem:[#allocation129_spill] sm:$0xff] }
 0x3b9   : > { %v7923_v5 = vpop.eup %7922  ;;  %7948 = vrcp.f32 %v6209_v43  ;;  %v6210_v53 = vadd.f32 1.0, %v14197_v44  ;;  %v14205_v26 = vadd.f32 %v5812_v52, %v5690_v33  ;;  %v5692_v35 = vadd.f32 %v5691_v34, %v14085_v31  ;;  %v5695_v7 = vpop.f32.mrf.mxu0  ;;  %v15659_v34 = vld [vmem:[#allocation123_spill] sm:$0xff] }
 0x3ba   : > { %v5814_v15 = vpop.f32.mrf.mxu1  ;;  %v7925_v22 = vpop.eup %7924  ;;  %6746 = vst [vmem:[%s11732_s28 + $0x78] sm:$0xff] %v6602_v60  ;;  %v6609_v37 = vmul.f32 %v6465_v0, %v15656_v47  ;;  %v6466_v38 = vmul.f32 %v7921_v9, %v6034_v6  ;;  %v6041_v27 = vmul.f32 %v7923_v5, %v14153_v40  ;;  %7950 = vrsqrt.f32 %v14197_v44 }
 0x3bb   : > { %v7927_v8 = vpop.eup %7926  ;;  %7952 = vrcp.f32 %v6210_v53  ;;  %v6217_v23 = vadd.f32 1.0, %v14205_v26  ;;  %v14213_v25 = vadd.f32 %v5814_v15, %v5692_v35  ;;  %v5696_v31 = vadd.f32 %v5695_v7, %v14087_v42  ;;  %v5697_v1 = vpop.f32.mrf.mxu0 }
 0x3bc   : > { %v5818_v62 = vpop.f32.mrf.mxu1  ;;  %v7929_v45 = vpop.eup %7928  ;;  %6753 = vst [vmem:[%s11732_s28 + $0xb0] sm:$0xff] %v6609_v37  ;;  %v6610_v20 = vmul.f32 %v6466_v38, %v15657_v54  ;;  %v6473_v36 = vmul.f32 %v7925_v22, %v6041_v27  ;;  %v6042_v40 = vmul.f32 %v7927_v8, %v14158_v61  ;;  %7954 = vrsqrt.f32 %v14205_v26  ;;  %v15660_v27 = vld [vmem:[#allocation139_spill] sm:$0xff] }
 0x3bd   : > { %v7931_v28 = vpop.eup %7930  ;;  %7956 = vrcp.f32 %v6217_v23  ;;  %v6218_v49 = vadd.f32 1.0, %v14213_v25  ;;  %v14221_v57 = vadd.f32 %v5818_v62, %v5696_v31  ;;  %v5698_v42 = vadd.f32 %v5697_v1, %v14089_v59  ;;  %v5699_v52 = vpop.f32.mrf.mxu0 }
 0x3be   : > { %v5820_v41 = vpop.f32.mrf.mxu1  ;;  %v7933_v63 = vpop.eup %7932  ;;  %6754 = vst [vmem:[%s11732_s28 + $0xb8] sm:$0xff] %v6610_v20  ;;  %v6617_v43 = vmul.f32 %v6473_v36, %v15658_v30  ;;  %v6474_v33 = vmul.f32 %v7929_v45, %v6042_v40  ;;  %v6049_v61 = vmul.f32 %v7931_v28, %v14163_v58  ;;  %7958 = vrsqrt.f32 %v14213_v25  ;;  %v15661_v36 = vld [vmem:[#allocation134_spill] sm:$0xff] }
 0x3bf   : > { %v7935_v9 = vpop.eup %7934  ;;  %7960 = vrcp.f32 %v6218_v49  ;;  %v6225_v17 = vadd.f32 1.0, %v14221_v57  ;;  %v14229_v60 = vadd.f32 %v5820_v41, %v5698_v42  ;;  %v5700_v59 = vadd.f32 %v5699_v52, %v14091_v16  ;;  %v5701_v35 = vpop.f32.mrf.mxu0  ;;  %v15662_v42 = vld [vmem:[#allocation140_spill] sm:$0xff] }
 0x3c0   : > { %v5822_v0 = vpop.f32.mrf.mxu1  ;;  %v7937_v6 = vpop.eup %7936  ;;  %6761 = vst [vmem:[%s11732_s28 + $0xf0] sm:$0xff] %v6617_v43  ;;  %v6618_v5 = vmul.f32 %v6474_v33, %v15659_v34  ;;  %v6481_v53 = vmul.f32 %v7933_v63, %v6049_v61  ;;  %v6050_v58 = vmul.f32 %v7935_v9, %v14171_v4  ;;  %7962 = vrsqrt.f32 %v14221_v57  ;;  %v15663_v34 = vld [vmem:[#allocation135_spill] sm:$0xff] }
 0x3c1   : > { %v7939_v15 = vpop.eup %7938  ;;  %v6057_v22 = vmul.f32 %v7937_v6, %v14174_v51  ;;  %7964 = vrcp.f32 %v6225_v17  ;;  %v6226_v47 = vadd.f32 1.0, %v14229_v60  ;;  %v14238_v37 = vadd.f32 %v5822_v0, %v5700_v59  ;;  %v5705_v23 = vpop.f32.mrf.mxu0 }
 0x3c2   : > { %v5824_v16 = vpop.f32.mrf.mxu1  ;;  %v7941_v38 = vpop.eup %7940  ;;  %6762 = vst [vmem:[%s11732_s28 + $0xf8] sm:$0xff] %v6618_v5  ;;  %v6625_v7 = vmul.f32 %v6481_v53, %v15660_v27  ;;  %v6482_v8 = vmul.f32 %v7939_v15, %v6050_v58  ;;  %7966 = vrsqrt.f32 %v14229_v60  ;;  %v5702_v4 = vadd.f32 %v5701_v35, %v14093_v19 }
 0x3c3   : > { %v7943_v31 = vpop.eup %7942  ;;  %v6489_v62 = vmul.f32 %v7941_v38, %v6057_v22  ;;  %7968 = vrcp.f32 %v6226_v47  ;;  %v6233_v51 = vadd.f32 1.0, %v14238_v37  ;;  %v5706_v45 = vadd.f32 %v5705_v23, %v14095_v32  ;;  %v5707_v19 = vpop.f32.mrf.mxu0  ;;  %v15664_v38 = vld [vmem:[#allocation152_spill] sm:$0xff] }
 0x3c4   : > { %v5828_v54 = vpop.f32.mrf.mxu1  ;;  %v7945_v20 = vpop.eup %7944  ;;  %6769 = vst [vmem:[%s11732_s28 + $0x130] sm:$0xff] %v6625_v7  ;;  %v6626_v40 = vmul.f32 %v6482_v8, %v15661_v36  ;;  %v6058_v1 = vmul.f32 %v7943_v31, %v14183_v29  ;;  %7970 = vrsqrt.f32 %v14238_v37  ;;  %v14250_v28 = vadd.f32 %v5824_v16, %v5702_v4 }
 0x3c5   : > { %v7947_v49 = vpop.eup %7946  ;;  %v6633_v41 = vmul.f32 %v6489_v62, %v15662_v42  ;;  %7972 = vrcp.f32 %v6233_v51  ;;  %v14253_v63 = vadd.f32 %v5828_v54, %v5706_v45  ;;  %v5708_v32 = vadd.f32 %v5707_v19, %v14097_v50  ;;  %v5709_v52 = vpop.f32.mrf.mxu0  ;;  %v15665_v45 = vld [vmem:[#allocation146_spill] sm:$0xff] }
 0x3c6   : > { %v5830_v30 = vpop.f32.mrf.mxu1  ;;  %v7949_v43 = vpop.eup %7948  ;;  %6770 = vst [vmem:[%s11732_s28 + $0x138] sm:$0xff] %v6626_v40  ;;  %v6490_v33 = vmul.f32 %v7945_v20, %v6058_v1  ;;  %v6065_v29 = vmul.f32 %v7947_v49, %v14189_v13  ;;  %7974 = vrsqrt.f32 %v14250_v28  ;;  %v6234_v61 = vadd.f32 1.0, %v14250_v28 }
 0x3c7   : > { %v7951_v9 = vpop.eup %7950  ;;  %6777 = vst [vmem:[%s11732_s28 + $0x170] sm:$0xff] %v6633_v41  ;;  %7976 = vrsqrt.f32 %v14253_v63  ;;  %v6241_v17 = vadd.f32 1.0, %v14253_v63  ;;  %v14263_v59 = vadd.f32 %v5830_v30, %v5708_v32  ;;  %v5710_v50 = vadd.f32 %v5709_v52, %v14099_v39  ;;  %v5711_v58 = vpop.f32.mrf.mxu0  ;;  %v15666_v41 = vld [vmem:[#allocation153_spill] sm:$0xff] }
 0x3c8   : > { %v5832_v0 = vpop.f32.mrf.mxu1  ;;  %v7953_v6 = vpop.eup %7952  ;;  %v6634_v13 = vmul.f32 %v6490_v33, %v15663_v34  ;;  %v6497_v5 = vmul.f32 %v7949_v43, %v6065_v29  ;;  %v6066_v53 = vmul.f32 %v7951_v9, %v14197_v44  ;;  %7978 = vrcp.f32 %v6234_v61 }
 0x3c9   : > { %v7955_v35 = vpop.eup %7954  ;;  %7980 = vrcp.f32 %v6241_v17  ;;  %v6242_v15 = vadd.f32 1.0, %v14263_v59  ;;  %v14269_v22 = vadd.f32 %v5832_v0, %v5710_v50  ;;  %v5712_v47 = vadd.f32 %v5711_v58, %v14101_v10  ;;  %v5715_v44 = vpop.f32.mrf.mxu0  ;;  %v15667_v17 = vld [vmem:[#allocation147_spill] sm:$0xff] }
 0x3ca   : > { %v5834_v16 = vpop.f32.mrf.mxu1  ;;  %v7957_v39 = vpop.eup %7956  ;;  %6778 = vst [vmem:[%s11732_s28 + $0x178] sm:$0xff] %v6634_v13  ;;  %v6641_v27 = vmul.f32 %v6497_v5, %v15664_v38  ;;  %v6498_v7 = vmul.f32 %v7953_v6, %v6066_v53  ;;  %v6073_v8 = vmul.f32 %v7955_v35, %v14205_v26  ;;  %7982 = vrsqrt.f32 %v14263_v59  ;;  %v15668_v35 = vld [vmem:[#allocation162_spill] sm:$0xff] }
 0x3cb   : > { %v7959_v4 = vpop.eup %7958  ;;  %7984 = vrcp.f32 %v6242_v15  ;;  %v6249_v23 = vadd.f32 1.0, %v14269_v22  ;;  %v14277_v31 = vadd.f32 %v5834_v16, %v5712_v47  ;;  %v5716_v10 = vadd.f32 %v5715_v44, %v14103_v2  ;;  %v5717_v36 = vpop.f32.mrf.mxu0  ;;  %v15669_v44 = vld [vmem:[#allocation158_spill] sm:$0xff] }
 0x3cc   : > { %v5838_v62 = vpop.f32.mrf.mxu1  ;;  %v7961_v51 = vpop.eup %7960  ;;  %6785 = vst [vmem:[%s11732_s28 + $0x1b0] sm:$0xff] %v6641_v27  ;;  %v6642_v54 = vmul.f32 %v6498_v7, %v15665_v45  ;;  %v6505_v20 = vmul.f32 %v7957_v39, %v6073_v8  ;;  %v6074_v26 = vmul.f32 %v7959_v4, %v14213_v25  ;;  %7986 = vrsqrt.f32 %v14269_v22 }
 0x3cd   : > { %v7963_v40 = vpop.eup %7962  ;;  %7988 = vrcp.f32 %v6249_v23  ;;  %v6250_v1 = vadd.f32 1.0, %v14277_v31  ;;  %v14285_v19 = vadd.f32 %v5838_v62, %v5716_v10  ;;  %v5718_v2 = vadd.f32 %v5717_v36, %v14105_v55  ;;  %v5719_v43 = vpop.f32.mrf.mxu0 }
 0x3ce   : > { %v5840_v49 = vpop.f32.mrf.mxu1  ;;  %v7965_v42 = vpop.eup %7964  ;;  %6786 = vst [vmem:[%s11732_s28 + $0x1b8] sm:$0xff] %v6642_v54  ;;  %v6649_v32 = vmul.f32 %v6505_v20, %v15666_v41  ;;  %v6506_v30 = vmul.f32 %v7961_v51, %v6074_v26  ;;  %v6081_v25 = vmul.f32 %v7963_v40, %v14221_v57  ;;  %7990 = vrsqrt.f32 %v14277_v31  ;;  %v15670_v26 = vld [vmem:[#allocation164_spill] sm:$0xff] }
 0x3cf   : > { %v7967_v33 = vpop.eup %7966  ;;  %7992 = vrcp.f32 %v6250_v1  ;;  %v6257_v29 = vadd.f32 1.0, %v14285_v19  ;;  %v14293_v61 = vadd.f32 %v5840_v49, %v5718_v2  ;;  %v5720_v55 = vadd.f32 %v5719_v43, %v14107_v24  ;;  %v5721_v6 = vpop.f32.mrf.mxu0 }
 0x3d0   : > { %v5842_v52 = vpop.f32.mrf.mxu1  ;;  %v7969_v9 = vpop.eup %7968  ;;  %6793 = vst [vmem:[%s11732_s28 + $0x1f0] sm:$0xff] %v6649_v32  ;;  %v6650_v50 = vmul.f32 %v6506_v30, %v15667_v17  ;;  %v6513_v0 = vmul.f32 %v7965_v42, %v6081_v25  ;;  %v6082_v57 = vmul.f32 %v7967_v33, %v14229_v60  ;;  %7994 = vrsqrt.f32 %v14285_v19  ;;  %v15671_v30 = vld [vmem:[#allocation159_spill] sm:$0xff] }
 0x3d1   : > { %v7971_v34 = vpop.eup %7970  ;;  %7996 = vrcp.f32 %v6257_v29  ;;  %v6258_v13 = vadd.f32 1.0, %v14293_v61  ;;  %v14301_v5 = vadd.f32 %v5842_v52, %v5720_v55  ;;  %v5722_v24 = vadd.f32 %v5721_v6, %v14109_v21  ;;  %v5725_v16 = vpop.f32.mrf.mxu0  ;;  %v15672_v55 = vld [vmem:[#allocation176_spill] sm:$0xff] }
 0x3d2   : > { %v5844_v53 = vpop.f32.mrf.mxu1  ;;  %v7973_v58 = vpop.eup %7972  ;;  %6794 = vst [vmem:[%s11732_s28 + $0x1f8] sm:$0xff] %v6650_v50  ;;  %v6657_v15 = vmul.f32 %v6513_v0, %v15668_v35  ;;  %v6514_v47 = vmul.f32 %v7969_v9, %v6082_v57  ;;  %v6089_v60 = vmul.f32 %v7971_v34, %v14238_v37  ;;  %7998 = vrsqrt.f32 %v14293_v61  ;;  %v15673_v35 = vld [vmem:[#allocation168_spill] sm:$0xff] }
 0x3d3   : > { %v7975_v39 = vpop.eup %7974  ;;  %8000 = vrcp.f32 %v6258_v13  ;;  %v6265_v38 = vadd.f32 1.0, %v14301_v5  ;;  %v14309_v27 = vadd.f32 %v5844_v53, %v5722_v24  ;;  %v5726_v21 = vadd.f32 %v5725_v16, %v14111_v14  ;;  %v5727_v10 = vpop.f32.mrf.mxu0 }
 0x3d4   : > { %v5848_v7 = vpop.f32.mrf.mxu1  ;;  %v7977_v8 = vpop.eup %7976  ;;  %6801 = vst [vmem:[%s11732_s28 + $0x230] sm:$0xff] %v6657_v15  ;;  %v6658_v4 = vmul.f32 %v6514_v47, %v15669_v44  ;;  %v6521_v23 = vmul.f32 %v7973_v58, %v6089_v60  ;;  %v6090_v37 = vmul.f32 %v7975_v39, %v14250_v28  ;;  %8002 = vrsqrt.f32 %v14301_v5 }
 0x3d5   : > { %v7979_v62 = vpop.eup %7978  ;;  %v6097_v51 = vmul.f32 %v7977_v8, %v14253_v63  ;;  %8004 = vrcp.f32 %v6265_v38  ;;  %v6266_v45 = vadd.f32 1.0, %v14309_v27  ;;  %v14318_v54 = vadd.f32 %v5848_v7, %v5726_v21  ;;  %v5729_v1 = vpop.f32.mrf.mxu0  ;;  %v15674_v8 = vld [vmem:[#allocation177_spill] sm:$0xff] }
 0x3d6   : > { %v5850_v14 = vpop.f32.mrf.mxu1  ;;  %v7981_v20 = vpop.eup %7980  ;;  %6802 = vst [vmem:[%s11732_s28 + $0x238] sm:$0xff] %v6658_v4  ;;  %v6665_v36 = vmul.f32 %v6521_v23, %v15670_v26  ;;  %v6522_v40 = vmul.f32 %v7979_v62, %v6090_v37  ;;  %8006 = vrsqrt.f32 %v14309_v27  ;;  %v5728_v28 = vadd.f32 %v5727_v10, %v14113_v48 }
 0x3d7   : > { %v7983_v2 = vpop.eup %7982  ;;  %v6529_v49 = vmul.f32 %v7981_v20, %v6097_v51  ;;  %8008 = vrcp.f32 %v6266_v45  ;;  %v6273_v63 = vadd.f32 1.0, %v14318_v54  ;;  %v5730_v42 = vadd.f32 %v5729_v1, %v14115_v11  ;;  %v5731_v48 = vpop.f32.mrf.mxu0 }
 0x3d8   : > { %v5852_v41 = vpop.f32.mrf.mxu1  ;;  %v7985_v32 = vpop.eup %7984  ;;  %6809 = vst [vmem:[%s11732_s28 + $0x270] sm:$0xff] %v6665_v36  ;;  %v6666_v25 = vmul.f32 %v6522_v40, %v15671_v30  ;;  %v6098_v43 = vmul.f32 %v7983_v2, %v14263_v59  ;;  %8010 = vrsqrt.f32 %v14318_v54  ;;  %v14330_v33 = vadd.f32 %v5850_v14, %v5728_v28  ;;  %v15675_v14 = vld [vmem:[#allocation169_spill] sm:$0xff] }
 0x3d9   : > { %v7987_v29 = vpop.eup %7986  ;;  %v6673_v52 = vmul.f32 %v6529_v49, %v15672_v55  ;;  %8012 = vrcp.f32 %v6273_v63  ;;  %v14333_v9 = vadd.f32 %v5852_v41, %v5730_v42  ;;  %v5732_v11 = vadd.f32 %v5731_v48, %v14117_v12  ;;  %v5735_v6 = vpop.f32.mrf.mxu0  ;;  %v15676_v49 = vld [vmem:[#allocation187_spill] sm:$0xff]  ;;  %v15677_v48 = vld [vmem:[#allocation182_spill] sm:$0xff] }
 0x3da   : > { %v5854_v17 = vpop.f32.mrf.mxu1  ;;  %v7989_v50 = vpop.eup %7988  ;;  %6810 = vst [vmem:[%s11732_s28 + $0x278] sm:$0xff] %v6666_v25  ;;  %v6530_v0 = vmul.f32 %v7985_v32, %v6098_v43  ;;  %v6105_v59 = vmul.f32 %v7987_v29, %v14269_v22  ;;  %8014 = vrsqrt.f32 %v14330_v33  ;;  %v6274_v57 = vadd.f32 1.0, %v14330_v33 }
 0x3db   : > { %v7991_v34 = vpop.eup %7990  ;;  %6817 = vst [vmem:[%s11732_s28 + $0x2b0] sm:$0xff] %v6673_v52  ;;  %8016 = vrsqrt.f32 %v14333_v9  ;;  %v6281_v13 = vadd.f32 1.0, %v14333_v9  ;;  %v14343_v24 = vadd.f32 %v5854_v17, %v5732_v11  ;;  %v5736_v12 = vadd.f32 %v5735_v6, %v14119_v18  ;;  %v5737_v60 = vpop.f32.mrf.mxu0  ;;  %v15678_v17 = vld [vmem:[#allocation188_spill] sm:$0xff] }
 0x3dc   : > { %v5858_v53 = vpop.f32.mrf.mxu1  ;;  %v7993_v58 = vpop.eup %7992  ;;  %v6674_v22 = vmul.f32 %v6530_v0, %v15673_v35  ;;  %v6537_v15 = vmul.f32 %v7989_v50, %v6105_v59  ;;  %v6106_v47 = vmul.f32 %v7991_v34, %v14277_v31  ;;  %8018 = vrcp.f32 %v6274_v57 }
 0x3dd   : > { %v7995_v16 = vpop.eup %7994  ;;  %8020 = vrcp.f32 %v6281_v13  ;;  %v6282_v39 = vadd.f32 1.0, %v14343_v24  ;;  %v14349_v38 = vadd.f32 %v5858_v53, %v5736_v12  ;;  %v5738_v21 = vadd.f32 %v5737_v60, %v14121_v56  ;;  %v5739_v31 = vpop.f32.mrf.mxu0 }
 0x3de   : > { %v5860_v7 = vpop.f32.mrf.mxu1  ;;  %v7997_v18 = vpop.eup %7996  ;;  %6818 = vst [vmem:[%s11732_s28 + $0x2b8] sm:$0xff] %v6674_v22  ;;  %v6681_v44 = vmul.f32 %v6537_v15, %v15674_v8  ;;  %v6538_v4 = vmul.f32 %v7993_v58, %v6106_v47  ;;  %v6113_v23 = vmul.f32 %v7995_v16, %v14285_v19  ;;  %8022 = vrsqrt.f32 %v14343_v24  ;;  %v15680_v22 = vld [vmem:[#allocation200_spill] sm:$0xff] }
 0x3df   : > { %v7999_v37 = vpop.eup %7998  ;;  %8024 = vrcp.f32 %v6282_v39  ;;  %v6289_v10 = vadd.f32 1.0, %v14349_v38  ;;  %v14357_v62 = vadd.f32 %v5860_v7, %v5738_v21  ;;  %v5740_v56 = vadd.f32 %v5739_v31, %v14123_v3  ;;  %v5741_v36 = vpop.f32.mrf.mxu0  ;;  %v15681_v39 = vld [vmem:[#allocation194_spill] sm:$0xff] }
 0x3e0   : > { %v5862_v51 = vpop.f32.mrf.mxu1  ;;  %v8001_v45 = vpop.eup %8000  ;;  %6825 = vst [vmem:[%s11732_s28 + $0x2f0] sm:$0xff] %v6681_v44  ;;  %v6682_v20 = vmul.f32 %v6538_v4, %v15675_v14  ;;  %v6545_v26 = vmul.f32 %v7997_v18, %v6113_v23  ;;  %v6114_v19 = vmul.f32 %v7999_v37, %v14293_v61  ;;  %8026 = vrsqrt.f32 %v14349_v38  ;;  %v15682_v18 = vld [vmem:[#allocation202_spill] sm:$0xff]  ;;  %v15683_v37 = vld [vmem:[#allocation195_spill] sm:$0xff]  ;;  %v15684_v14 = vld [vmem:[#allocation213_spill] sm:$0xff] }
 0x3e1   : > { %v8003_v40 = vpop.eup %8002  ;;  %8028 = vrcp.f32 %v6289_v10  ;;  %v6290_v28 = vadd.f32 1.0, %v14357_v62  ;;  %v14365_v1 = vadd.f32 %v5862_v51, %v5740_v56  ;;  %v5742_v3 = vadd.f32 %v5741_v36, %v14125_v46 }
 0x3e2   : > { %v8005_v2 = vpop.eup %8004  ;;  %6826 = vst [vmem:[%s11732_s28 + $0x2f8] sm:$0xff] %v6682_v20  ;;  %v6689_v63 = vmul.f32 %v6545_v26, %v15676_v49  ;;  %v6546_v42 = vmul.f32 %v8001_v45, %v6114_v19  ;;  %v6121_v41 = vmul.f32 %v8003_v40, %v14301_v5  ;;  %8030 = vrsqrt.f32 %v14357_v62  ;;  %v5864_v61 = vpop.f32.mrf.mxu1  ;;  %v15685_v40 = vld [vmem:[#allocation206_spill] sm:$0xff] }
 0x3e3   : > { %v8007_v32 = vpop.eup %8006  ;;  %8032 = vrcp.f32 %v6290_v28  ;;  %v6297_v30 = vadd.f32 1.0, %v14365_v1  ;;  %v5865_v25 = vadd.f32 %v5864_v61, %v5742_v3  ;;  %v15686_v49 = vld [vmem:[#allocation214_spill] sm:$0xff] }
 0x3e4   : > { %v8009_v43 = vpop.eup %8008  ;;  %6833 = vst [vmem:[%s11732_s28 + $0x330] sm:$0xff] %v6689_v63  ;;  %v6690_v46 = vmul.f32 %v6546_v42, %v15677_v48  ;;  %v6553_v29 = vmul.f32 %v8005_v2, %v6121_v41  ;;  %v6122_v55 = vmul.f32 %v8007_v32, %v14309_v27  ;;  %8034 = vrsqrt.f32 %v14365_v1  ;;  %v15679_v27 = vld [vmem:[#allocation183_spill] sm:$0xff] }
 0x3e5   : > { %v8011_v5 = vpop.eup %8010  ;;  %8036 = vrcp.f32 %v6297_v30  ;;  %v6298_v52 = vadd.f32 1.0, %v5865_v25  ;;  %v15687_v42 = vld [vmem:[#allocation207_spill] sm:$0xff] }
 0x3e6   : > { %v8013_v11 = vpop.eup %8012  ;;  %6834 = vst [vmem:[%s11732_s28 + $0x338] sm:$0xff] %v6690_v46  ;;  %v6697_v50 = vmul.f32 %v6553_v29, %v15678_v17  ;;  %v6554_v0 = vmul.f32 %v8009_v43, %v6122_v55  ;;  %v6129_v59 = vmul.f32 %v8011_v5, %v14318_v54  ;;  %8038 = vrsqrt.f32 %v5865_v25 }
 0x3e7   : > { %v8015_v57 = vpop.eup %8014  ;;  %8040 = vrcp.f32 %v6298_v52 }
 0x3e8   : > { %v8017_v6 = vpop.eup %8016  ;;  %6841 = vst [vmem:[%s11732_s28 + $0x370] sm:$0xff] %v6697_v50  ;;  %v6698_v34 = vmul.f32 %v6554_v0, %v15679_v27  ;;  %v6561_v13 = vmul.f32 %v8013_v11, %v6129_v59  ;;  %v6130_v12 = vmul.f32 %v8015_v57, %v14330_v33 }
 0x3e9   : > { %v8019_v53 = vpop.eup %8018  ;;  %v6137_v58 = vmul.f32 %v8017_v6, %v14333_v9 }
 0x3ea   : > { %v8021_v35 = vpop.eup %8020  ;;  %6842 = vst [vmem:[%s11732_s28 + $0x378] sm:$0xff] %v6698_v34  ;;  %v6705_v54 = vmul.f32 %v6561_v13, %v15680_v22  ;;  %v6562_v15 = vmul.f32 %v8019_v53, %v6130_v12 }
 0x3eb   : > { %v8023_v47 = vpop.eup %8022  ;;  %v6569_v60 = vmul.f32 %v8021_v35, %v6137_v58 }
 0x3ec   : > { %v8025_v16 = vpop.eup %8024  ;;  %6849 = vst [vmem:[%s11732_s28 + $0x3b0] sm:$0xff] %v6705_v54  ;;  %v6706_v21 = vmul.f32 %v6562_v15, %v15681_v39  ;;  %v6138_v7 = vmul.f32 %v8023_v47, %v14343_v24 }
 0x3ed   : > { %v8027_v33 = vpop.eup %8026  ;;  %v6713_v8 = vmul.f32 %v6569_v60, %v15682_v18 }
 0x3ee   : > { %v8029_v44 = vpop.eup %8028  ;;  %6850 = vst [vmem:[%s11732_s28 + $0x3b8] sm:$0xff] %v6706_v21  ;;  %v6570_v9 = vmul.f32 %v8025_v16, %v6138_v7  ;;  %v6145_v4 = vmul.f32 %v8027_v33, %v14349_v38 }
 0x3ef   : > { %v8031_v23 = vpop.eup %8030  ;;  %6857 = vst [vmem:[%s11732_s28 + $0x3f0] sm:$0xff] %v6713_v8 }
 0x3f0   : > { %v8033_v31 = vpop.eup %8032  ;;  %v6714_v10 = vmul.f32 %v6570_v9, %v15683_v37  ;;  %v6577_v56 = vmul.f32 %v8029_v44, %v6145_v4  ;;  %v6146_v51 = vmul.f32 %v8031_v23, %v14357_v62 }
 0x3f1   : > { %v8035_v24 = vpop.eup %8034 }
 0x3f2   : > { %v8037_v45 = vpop.eup %8036  ;;  %6858 = vst [vmem:[%s11732_s28 + $0x3f8] sm:$0xff] %v6714_v10  ;;  %v6721_v20 = vmul.f32 %v6577_v56, %v15684_v14  ;;  %v6578_v26 = vmul.f32 %v8033_v31, %v6146_v51  ;;  %v6153_v19 = vmul.f32 %v8035_v24, %v14365_v1 }
 0x3f3   : > { %v8039_v38 = vpop.eup %8038 }
 0x3f4   : > { %v8041_v36 = vpop.eup %8040  ;;  %6865 = vst [vmem:[%s11732_s28 + $0x430] sm:$0xff] %v6721_v20  ;;  %v6722_v28 = vmul.f32 %v6578_v26, %v15685_v40  ;;  %v6585_v3 = vmul.f32 %v8037_v45, %v6153_v19  ;;  %v6154_v2 = vmul.f32 %v8039_v38, %v5865_v25 }
 0x3f6   : > { %6866 = vst [vmem:[%s11732_s28 + $0x438] sm:$0xff] %v6722_v28  ;;  %v6729_v62 = vmul.f32 %v6585_v3, %v15686_v49  ;;  %v6586_v63 = vmul.f32 %v8041_v36, %v6154_v2 }
 0x3f8   : > { %6873 = vst [vmem:[%s11732_s28 + $0x470] sm:$0xff] %v6729_v62  ;;  %v6730_v41 = vmul.f32 %v6586_v63, %v15687_v42 }
 0x3fa   : > { %6874 = vst [vmem:[%s11732_s28 + $0x478] sm:$0xff] %v6730_v41 }
 0x3fb PF: > { %s13_s12 = sadd.s32 1, %s8048_s12  }
 0x3fc   : > { %p10_p4 = scmp.ge.s32.totalorder %s13_s12, 4  }
 0x3fe   :  { %12 = sbr.rel (!%p10_p4) target bundleno = 1 (0x1), region = 62 }

</bundles_post_ra>
